<compile_context>
chip_gen: v7x
topology: tpu7x:2x2x1
jax: 0.10.0
libtpu: 0.0.40
codegen_flags: <defaults>
</compile_context>

<pallas_src>
import functools
import operator

import jax
import jax.numpy as jnp
from jax.experimental import pallas as pl
from jax.experimental.pallas import tpu as pltpu


def round_(filter_size):
    return round(filter_size / 3)


# ----------------------------------------------------------------------------
# Pallas kernels
# ----------------------------------------------------------------------------

@functools.lru_cache(maxsize=None)
def _make_fused_kernel(pre_relu, with_bn, with_add, post_relu, n_groups,
                       out_dtype_name):
    """out = post_relu?( sum_groups?( BN?( w @ relu?(a) ) ) + add? )

    Shapes: w (Ct, K) bf16, a (K, rows) bf16, gamma/beta (Ct, 1) f32,
            add (Ct/n_groups, rows) or (Ct/n_groups, 1) f32,
            out (Ct/n_groups, rows) out_dtype.
    All epilogue math in f32; only the MXU operands are bf16.
    """
    out_dtype = jnp.dtype(out_dtype_name)

    def kernel(*refs):
        it = iter(refs)
        w_ref = next(it)
        a_ref = next(it)
        g_ref = next(it) if with_bn else None
        b_ref = next(it) if with_bn else None
        add_ref = next(it) if with_add else None
        o_ref = next(it)

        a = a_ref[...]
        if pre_relu:
            a = jnp.maximum(a, 0.0)
        y = jnp.dot(w_ref[...], a, preferred_element_type=jnp.float32)
        if with_bn:
            # Training-mode BatchNorm2d: per-channel batch stats over rows (=N*H*W),
            # biased variance, eps=1e-5.
            mean = jnp.mean(y, axis=1, keepdims=True)
            cen = y - mean
            var = jnp.mean(cen * cen, axis=1, keepdims=True)
            y = cen * jax.lax.rsqrt(var + 1e-5) * g_ref[...] + b_ref[...]
        if n_groups > 1:
            cg = y.shape[0] // n_groups
            acc = y[0:cg, :]
            for g in range(1, n_groups):
                acc = acc + y[g * cg:(g + 1) * cg, :]
            y = acc
        if with_add:
            y = y + add_ref[...]
        if post_relu:
            y = jnp.maximum(y, 0.0)
        o_ref[...] = y.astype(out_dtype)

    return kernel


def fused_conv_bn(w2d, a, *, gamma=None, beta=None, add=None,
                  pre_relu=False, post_relu=False, n_groups=1,
                  out_dtype=jnp.float32):
    """Fused GEMM + epilogue. bf16 MXU operands, f32 accumulate/epilogue.

    Full-array blocks, single grid step, everything VMEM-resident at these sizes.
    """
    c_tot, k = w2d.shape
    k2, rows = a.shape
    assert k == k2
    c_out = c_tot // n_groups
    with_bn = gamma is not None
    with_add = add is not None

    inputs = [w2d.astype(jnp.bfloat16), a.astype(jnp.bfloat16)]
    if with_bn:
        inputs.append(gamma.reshape(c_tot, 1).astype(jnp.float32))
        inputs.append(beta.reshape(c_tot, 1).astype(jnp.float32))
    if with_add:
        inputs.append(add.astype(jnp.float32))

    kern = _make_fused_kernel(pre_relu, with_bn, with_add, post_relu, n_groups,
                              jnp.dtype(out_dtype).name)
    return pl.pallas_call(
        kern,
        out_shape=jax.ShapeDtypeStruct((c_out, rows), out_dtype),
        grid=(1,),
        in_specs=[pl.BlockSpec(x.shape, lambda i: (0, 0)) for x in inputs],
        out_specs=pl.BlockSpec((c_out, rows), lambda i: (0, 0)),
        compiler_params=pltpu.CompilerParams(dimension_semantics=("arbitrary",)),
    )(*inputs)


@functools.lru_cache(maxsize=None)
def _make_skip_kernel(c1):
    """SkipConnection: BN(concat([w1 @ relu(x), w2 @ shift_pad(x)])) in one kernel.
    BN per-channel stats -> computing the two halves independently is exact."""

    def kernel(w1_ref, w2_ref, a1_ref, a2_ref, g_ref, b_ref, o_ref):
        g = g_ref[...]
        b = b_ref[...]

        def bn(y, gg, bb):
            mean = jnp.mean(y, axis=1, keepdims=True)
            cen = y - mean
            var = jnp.mean(cen * cen, axis=1, keepdims=True)
            return cen * jax.lax.rsqrt(var + 1e-5) * gg + bb

        y1 = jnp.dot(w1_ref[...], a1_ref[...], preferred_element_type=jnp.float32)
        y2 = jnp.dot(w2_ref[...], a2_ref[...], preferred_element_type=jnp.float32)
        o_ref[0:c1, :] = bn(y1, g[0:c1, :], b[0:c1, :])
        o_ref[c1:, :] = bn(y2, g[c1:, :], b[c1:, :])

    return kernel


# ----------------------------------------------------------------------------
# JAX glue: im2col on a CNHW layout (K index order = (c, kh, kw), matching
# PyTorch's (Cout, Cin, kh, kw) weight flatten). Kept in bf16.
# ----------------------------------------------------------------------------

def im2col_cnhw(x4d, kh, kw, pad):
    C, N, H, W = x4d.shape
    xp = jnp.pad(x4d, ((0, 0), (0, 0), (pad, pad), (pad, pad))) if pad else x4d
    Ho = H + 2 * pad - kh + 1
    Wo = W + 2 * pad - kw + 1
    if kh == 1 and kw == 1:
        return xp.reshape(C, N * Ho * Wo), Ho, Wo
    cols = [xp[:, :, i:i + Ho, j:j + Wo] for i in range(kh) for j in range(kw)]
    col = jnp.stack(cols, axis=1).reshape(C * kh * kw, N * Ho * Wo)
    return col, Ho, Wo


# ----------------------------------------------------------------------------
# Network construction (mirrors the PyTorch __init__ logic)
# ----------------------------------------------------------------------------

class KeyGen:
    def __init__(self, key):
        self.key = key

    def __call__(self):
        self.key, sub = jax.random.split(self.key)
        return sub


def _conv_w(kg, c_out, c_in, k):
    return jax.random.normal(kg(), (c_out, c_in, k, k), jnp.float32) * 0.05


def _bn_p(c):
    return jnp.ones((c,), jnp.float32), jnp.zeros((c,), jnp.float32)


def _make_branch(kg, c_in, c_out, f):
    g1, b1 = _bn_p(c_out)
    g2, b2 = _bn_p(c_out)
    return dict(w1=_conv_w(kg, c_out, c_in, f), g1=g1, b1=b1,
                w2=_conv_w(kg, c_out, c_out, f), g2=g2, b2=b2)


def _make_skip(kg, c_in, c_out):
    half1 = int(c_out / 2)
    half2 = int(c_out / 2) if c_out % 2 == 0 else int(c_out / 2) + 1
    g, b = _bn_p(c_out)
    return dict(w1=_conv_w(kg, half1, c_in, 1),
                w2=_conv_w(kg, half2, c_in, 1),
                bn_g=g, bn_b=b)


def _make_block(kg, c_in, c_out, f, branches, stride):
    params = dict(
        branches=[_make_branch(kg, c_in, c_out, f) for _ in range(branches)],
        skip=(_make_skip(kg, c_in, c_out)
              if (c_in != c_out or stride != 1) else None),
    )
    meta = dict(stride=stride, f=f)
    return params, meta


def build_network(config, key, input_dim=(3, 16, 16), classes=10):
    kg = KeyGen(key)
    filters_size = {f'Group_{i}': 3 for i in range(1, 6)}
    widen = {f'Group_{i}': config[f'widenfact{i}'] for i in range(1, 6)}
    res_blocks = {f'Group_{i}': config[f'R{i}'] for i in range(1, 6)}
    res_branches = {f'Group_{i}': config[f'B{i}'] for i in range(1, 6)}
    M = config['M']
    oc0 = config['out_channel0']

    params = {'conv0': _conv_w(kg, oc0, 3, 7)}
    params['bn0_g'], params['bn0_b'] = _bn_p(oc0)

    groups, metas = [], []

    def add_group(c_in, c_out, n_blocks, f, branches):
        blks, ms = [], []
        p, m = _make_block(kg, c_in, c_out, f, branches, stride=1)  # ResidualGroup forces stride=1
        blks.append(p); ms.append(m)
        for _ in range(2, n_blocks + 1):
            p, m = _make_block(kg, c_out, c_out, f, branches, stride=1)
            blks.append(p); ms.append(m)
        groups.append(blks)
        metas.append(ms)

    fm_in = int(round(oc0 // widen['Group_1']))
    add_group(oc0, fm_in, res_blocks['Group_1'], filters_size['Group_1'],
              res_branches['Group_1'])
    fm_out = fm_in
    for m in range(2, M + 1):
        g = f'Group_{m}'
        fm_out = int(round(fm_in // widen[g]))
        add_group(fm_in, fm_out, res_blocks[g], filters_size[g], res_branches[g])
        fm_in = fm_out

    params['groups'] = groups

    # fc_len: analytic shape trace of Main_blocks on (1, *input_dim)
    # (Conv_0 uses padding=1 exactly as the PyTorch reference hard-codes it.)
    H = input_dim[1] + 2 * 1 - 7 + 1
    W = input_dim[2] + 2 * 1 - 7 + 1
    Hp, Wp = H - 8 + 1, W - 8 + 1         # AvgPool2d(8, stride=1)
    fc_len = functools.reduce(operator.mul, (1, fm_out, Hp, Wp))
    params['fc_w'] = jax.random.normal(kg(), (classes, fc_len), jnp.float32) * 0.02
    params['fc_b'] = jnp.zeros((classes,), jnp.float32)

    return params, metas


# ----------------------------------------------------------------------------
# Forward pass (activations in CNHW / (C, rows) layout throughout)
# ----------------------------------------------------------------------------

def skip_forward(x4d, relu_x_bf, p):
    """SkipConnection (stride forced to 1 -> AvgPool2d(1,1) is identity)."""
    C, N, H, W = x4d.shape
    rows = N * H * W
    c1 = p['w1'].shape[0]
    c2 = p['w2'].shape[0]
    c_out = c1 + c2
    a1 = relu_x_bf.reshape(C, rows)                                   # relu(x)
    x_sh = jnp.pad(x4d[:, :, 1:, 1:],                                 # pad(x[:,:,1:,1:])
                   ((0, 0), (0, 0), (0, 1), (0, 1))).astype(jnp.bfloat16)
    a2 = x_sh.reshape(C, rows)
    w1 = p['w1'].reshape(c1, C).astype(jnp.bfloat16)
    w2 = p['w2'].reshape(c2, C).astype(jnp.bfloat16)
    gamma = p['bn_g'].reshape(c_out, 1)
    beta = p['bn_b'].reshape(c_out, 1)

    if c1 % 8 == 0:
        inputs = [w1, w2, a1, a2, gamma, beta]
        return pl.pallas_call(
            _make_skip_kernel(c1),
            out_shape=jax.ShapeDtypeStruct((c_out, rows), jnp.float32),
            grid=(1,),
            in_specs=[pl.BlockSpec(x.shape, lambda i: (0, 0)) for x in inputs],
            out_specs=pl.BlockSpec((c_out, rows), lambda i: (0, 0)),
            compiler_params=pltpu.CompilerParams(dimension_semantics=("arbitrary",)),
        )(*inputs)

    # Fallback (sublane-unaligned split): two calls; per-channel BN split is exact.
    s1 = fused_conv_bn(w1, a1, gamma=p['bn_g'][:c1], beta=p['bn_b'][:c1])
    s2 = fused_conv_bn(w2, a2, gamma=p['bn_g'][c1:], beta=p['bn_b'][c1:])
    return jnp.concatenate([s1, s2], axis=0)


def block_forward(x4d, p, meta):
    """BasicBlock: sum_b BN2(conv2(relu(BN1(conv1(relu(x)))))) + skip(x)."""
    f = meta['f']
    pad = round_(f)
    C, N, H, W = x4d.shape
    rows = N * H * W

    x_bf = x4d.astype(jnp.bfloat16)
    relu_x = jnp.maximum(x_bf, 0)          # ReLU applied ONCE on the base activation

    if p['skip'] is not None:
        acc = skip_forward(x4d, relu_x, p['skip'])        # (Cout, rows) f32
    else:
        acc = x4d.reshape(C, rows)                        # identity skip, f32

    branches = p['branches']
    B = len(branches)
    co = branches[0]['w1'].shape[0]

    # --- Conv_1 of all branches as one stacked GEMM (shared im2col(relu(x))) ---
    w1_all = jnp.concatenate([bp['w1'].reshape(co, -1) for bp in branches], axis=0)
    g1_all = jnp.concatenate([bp['g1'] for bp in branches])
    b1_all = jnp.concatenate([bp['b1'] for bp in branches])
    col1, Ho, Wo = im2col_cnhw(relu_x, f, f, pad)
    # post-ReLU (= ReLU_2) fused; bf16 output feeds conv2's im2col directly.
    y1_all = fused_conv_bn(w1_all, col1, gamma=g1_all, beta=b1_all,
                           post_relu=True, out_dtype=jnp.bfloat16)    # (B*co, rows)

    # --- Conv_2 of all branches as one block-diagonal GEMM + fused BN/sum/add ---
    y1_4d = y1_all.reshape(B * co, N, Ho, Wo)
    col2, Ho2, Wo2 = im2col_cnhw(y1_4d, f, f, pad)
    if B == 1:
        w2_all = branches[0]['w2'].reshape(co, -1)
    else:
        zero = jnp.zeros((co, co * f * f), jnp.float32)
        rows_w = []
        for bi, bp in enumerate(branches):
            chunks = [zero] * B
            chunks[bi] = bp['w2'].reshape(co, -1)
            rows_w.append(jnp.concatenate(chunks, axis=1))
        w2_all = jnp.concatenate(rows_w, axis=0)          # (B*co, B*co*f*f)
    g2_all = jnp.concatenate([bp['g2'] for bp in branches])
    b2_all = jnp.concatenate([bp['b2'] for bp in branches])
    out = fused_conv_bn(w2_all, col2, gamma=g2_all, beta=b2_all,
                        add=acc, n_groups=B)              # (co, rows) f32
    return out.reshape(co, N, Ho2, Wo2)


def network_forward(params, metas, x_nchw):
    x = jnp.transpose(x_nchw, (1, 0, 2, 3)).astype(jnp.bfloat16)   # NCHW -> CNHW
    C, N, H, W = x.shape

    # Conv_0 (k=7, padding=1 exactly as in the reference) + BN_0
    col0, Ho, Wo = im2col_cnhw(x, 7, 7, 1)
    y = fused_conv_bn(params['conv0'].reshape(params['conv0'].shape[0], -1),
                      col0, gamma=params['bn0_g'], beta=params['bn0_b'])
    y = y.reshape(-1, N, Ho, Wo)

    for gp, gm in zip(params['groups'], metas):
        for bp, bm in zip(gp, gm):
            y = block_forward(y, bp, bm)

    # --- ReLU_0 + AvgPool2d(8,1) + flatten + Linear, fused into ONE kernel ---
    # AvgPool is linear, so fold it into the FC weight analytically:
    #   A[k,c,h,w] = (1/64) * sum_{ho,wo} [ho<=h<ho+8][wo<=w<wo+8] fc_w[k,c,ho,wo]
    Cf, Nf, Hf, Wf = y.shape
    Hp, Wp = Hf - 8 + 1, Wf - 8 + 1
    classes = params['fc_w'].shape[0]
    fc_w4 = params['fc_w'].reshape(classes, Cf, Hp, Wp)
    hh = jnp.arange(Hf)[:, None]
    ho = jnp.arange(Hp)[None, :]
    ww = jnp.arange(Wf)[:, None]
    wo = jnp.arange(Wp)[None, :]
    qh = ((hh >= ho) & (hh < ho + 8)).astype(jnp.float32)            # (Hf, Hp)
    qw = ((ww >= wo) & (ww < wo + 8)).astype(jnp.float32)            # (Wf, Wp)
    A = jnp.einsum('kcij,hi,wj->kchw', fc_w4, qh, qw) / 64.0
    A2 = A.reshape(classes, Cf * Hf * Wf)

    # x.view(B, -1) flatten order is (c, h, w) per image -> features on sublanes.
    a_fc = y.transpose(0, 2, 3, 1).reshape(Cf * Hf * Wf, Nf)
    # ReLU_0 fused as pre_relu (applied on the un-duplicated base activation);
    # fc bias broadcast-added inside the kernel.
    logits_t = fused_conv_bn(A2, a_fc, add=params['fc_b'].reshape(classes, 1),
                             pre_relu=True)                          # (classes, N)
    return logits_t.T                                                # (N, classes)


# ----------------------------------------------------------------------------

if __name__ == "__main__":
    CONFIG = dict(
        M=2,
        R1=1, R2=2, R3=1, R4=1, R5=1,
        widenfact1=0.5, widenfact2=0.5, widenfact3=0.5, widenfact4=0.5, widenfact5=0.5,
        B1=1, B2=2, B3=1, B4=1, B5=1,
        convblock1=1, convblock2=1, convblock3=1, convblock4=1, convblock5=1,
        out_channel0=8,
    )

    key = jax.random.PRNGKey(0)
    k_params, k_data = jax.random.split(key)

    params, metas = build_network(CONFIG, k_params, input_dim=(3, 16, 16), classes=10)

    x = jax.random.normal(k_data, (2, 3, 16, 16), jnp.float32)   # NCHW input

    fwd = jax.jit(lambda p, xx: network_forward(p, metas, xx))
    out = fwd(params, x)
    out = jax.block_until_ready(out)

    assert out.shape == (2, 10), out.shape
    assert jnp.all(jnp.isfinite(out))
    print("KERNEL_OK")
</pallas_src>

<mosaic_0001>
module attributes {stable_mosaic.version = 11 : i64} {
  func.func @kernel(%arg0: i32, %arg1: memref<8x147xbf16, #tpu.memory_space<vmem>>, %arg2: memref<147x288xbf16, #tpu.memory_space<vmem>>, %arg3: memref<8x1xf32, #tpu.memory_space<vmem>>, %arg4: memref<8x1xf32, #tpu.memory_space<vmem>>, %arg5: memref<8x288xf32, #tpu.memory_space<vmem>>) attributes {dimension_semantics = [#tpu.dimension_semantics<arbitrary>], iteration_bounds = array<i64: 1>, scalar_prefetch = 0 : i64, scratch_operands = 0 : i64, tpu.core_type = #tpu.core_type<tc>, window_params = [{pipeline_mode = #tpu.pipeline_mode<synchronous>, transform_indices = @transform_0, window_bounds = array<i64: 8, 147>}, {pipeline_mode = #tpu.pipeline_mode<synchronous>, transform_indices = @transform_1, window_bounds = array<i64: 147, 288>}, {pipeline_mode = #tpu.pipeline_mode<synchronous>, transform_indices = @transform_2, window_bounds = array<i64: 8, 1>}, {pipeline_mode = #tpu.pipeline_mode<synchronous>, transform_indices = @transform_3, window_bounds = array<i64: 8, 1>}, {pipeline_mode = #tpu.pipeline_mode<synchronous>, transform_indices = @transform_4, window_bounds = array<i64: 8, 288>}]} {
    %c0 = arith.constant 0 : index
    %c0_0 = arith.constant 0 : index
    %0 = vector.load %arg2[%c0, %c0_0] : memref<147x288xbf16, #tpu.memory_space<vmem>>, vector<147x288xbf16>
    %c0_1 = arith.constant 0 : index
    %c0_2 = arith.constant 0 : index
    %1 = vector.load %arg1[%c0_1, %c0_2] : memref<8x147xbf16, #tpu.memory_space<vmem>>, vector<8x147xbf16>
    %cst = arith.constant dense<0.000000e+00> : vector<8x288xf32>
    %2 = tpu.matmul %1, %0, %cst {dimension_numbers = #tpu.dot_dimension_numbers<[1], [0], [0], [1], [0, 0, 1, 1], [], []>} : vector<8x147xbf16>, vector<147x288xbf16>, vector<8x288xf32> -> vector<8x288xf32>
    %cst_3 = arith.constant dense<0.000000e+00> : vector<8xf32>
    %3 = vector.multi_reduction <add>, %2, %cst_3 [1] : vector<8x288xf32> to vector<8xf32>
    %4 = vector.shape_cast %3 : vector<8xf32> to vector<8x1xf32>
    %cst_4 = arith.constant 2.880000e+02 : f32
    %5 = vector.broadcast %cst_4 : f32 to vector<8x1xf32>
    %6 = arith.divf %4, %5 : vector<8x1xf32>
    %7 = vector.broadcast %6 : vector<8x1xf32> to vector<8x288xf32>
    %8 = arith.subf %2, %7 : vector<8x288xf32>
    %9 = arith.mulf %8, %8 : vector<8x288xf32>
    %cst_5 = arith.constant dense<0.000000e+00> : vector<8xf32>
    %10 = vector.multi_reduction <add>, %9, %cst_5 [1] : vector<8x288xf32> to vector<8xf32>
    %11 = vector.shape_cast %10 : vector<8xf32> to vector<8x1xf32>
    %cst_6 = arith.constant 2.880000e+02 : f32
    %12 = vector.broadcast %cst_6 : f32 to vector<8x1xf32>
    %13 = arith.divf %11, %12 : vector<8x1xf32>
    %cst_7 = arith.constant 9.99999974E-6 : f32
    %14 = vector.broadcast %cst_7 : f32 to vector<8x1xf32>
    %15 = arith.addf %13, %14 : vector<8x1xf32>
    %16 = math.rsqrt %15 : vector<8x1xf32>
    %17 = vector.broadcast %16 : vector<8x1xf32> to vector<8x288xf32>
    %18 = arith.mulf %8, %17 : vector<8x288xf32>
    %c0_8 = arith.constant 0 : index
    %c0_9 = arith.constant 0 : index
    %19 = vector.load %arg3[%c0_8, %c0_9] : memref<8x1xf32, #tpu.memory_space<vmem>>, vector<8x1xf32>
    %20 = vector.broadcast %19 : vector<8x1xf32> to vector<8x288xf32>
    %21 = arith.mulf %18, %20 : vector<8x288xf32>
    %c0_10 = arith.constant 0 : index
    %c0_11 = arith.constant 0 : index
    %22 = vector.load %arg4[%c0_10, %c0_11] : memref<8x1xf32, #tpu.memory_space<vmem>>, vector<8x1xf32>
    %23 = vector.broadcast %22 : vector<8x1xf32> to vector<8x288xf32>
    %24 = arith.addf %21, %23 : vector<8x288xf32>
    %c0_12 = arith.constant 0 : index
    %c0_13 = arith.constant 0 : index
    %25 = vector.load %arg5[%c0_12, %c0_13] : memref<8x288xf32, #tpu.memory_space<vmem>>, vector<8x288xf32>
    tpu.vector_store %arg5[%c0_12, %c0_13], %24 {strides = array<i32>} : memref<8x288xf32, #tpu.memory_space<vmem>>, vector<8x288xf32>,
    return
  }
  func.func @transform_0(%arg0: i32) -> (i32, i32) {
    %c0_i32 = arith.constant 0 : i32
    %c0_i32_0 = arith.constant 0 : i32
    %c0_i32_1 = arith.constant 0 : i32
    return %c0_i32, %c0_i32_0 : i32, i32
  }
  func.func @transform_1(%arg0: i32) -> (i32, i32) {
    %c0_i32 = arith.constant 0 : i32
    %c0_i32_0 = arith.constant 0 : i32
    %c0_i32_1 = arith.constant 0 : i32
    return %c0_i32, %c0_i32_0 : i32, i32
  }
  func.func @transform_2(%arg0: i32) -> (i32, i32) {
    %c0_i32 = arith.constant 0 : i32
    %c0_i32_0 = arith.constant 0 : i32
    %c0_i32_1 = arith.constant 0 : i32
    return %c0_i32, %c0_i32_0 : i32, i32
  }
  func.func @transform_3(%arg0: i32) -> (i32, i32) {
    %c0_i32 = arith.constant 0 : i32
    %c0_i32_0 = arith.constant 0 : i32
    %c0_i32_1 = arith.constant 0 : i32
    return %c0_i32, %c0_i32_0 : i32, i32
  }
  func.func @transform_4(%arg0: i32) -> (i32, i32) {
    %c0_i32 = arith.constant 0 : i32
    %c0_i32_0 = arith.constant 0 : i32
    %c0_i32_1 = arith.constant 0 : i32
    return %c0_i32, %c0_i32_0 : i32, i32
  }
}

module attributes {stable_mosaic.version = 11 : i64} {
  func.func @kernel(%arg0: i32, %arg1: memref<8x8xbf16, #tpu.memory_space<vmem>>, %arg2: memref<8x8xbf16, #tpu.memory_space<vmem>>, %arg3: memref<8x288xbf16, #tpu.memory_space<vmem>>, %arg4: memref<8x288xbf16, #tpu.memory_space<vmem>>, %arg5: memref<16x1xf32, #tpu.memory_space<vmem>>, %arg6: memref<16x1xf32, #tpu.memory_space<vmem>>, %arg7: memref<16x288xf32, #tpu.memory_space<vmem>>) attributes {dimension_semantics = [#tpu.dimension_semantics<arbitrary>], iteration_bounds = array<i64: 1>, scalar_prefetch = 0 : i64, scratch_operands = 0 : i64, tpu.core_type = #tpu.core_type<tc>, window_params = [{pipeline_mode = #tpu.pipeline_mode<synchronous>, transform_indices = @transform_0, window_bounds = array<i64: 8, 8>}, {pipeline_mode = #tpu.pipeline_mode<synchronous>, transform_indices = @transform_1, window_bounds = array<i64: 8, 8>}, {pipeline_mode = #tpu.pipeline_mode<synchronous>, transform_indices = @transform_2, window_bounds = array<i64: 8, 288>}, {pipeline_mode = #tpu.pipeline_mode<synchronous>, transform_indices = @transform_3, window_bounds = array<i64: 8, 288>}, {pipeline_mode = #tpu.pipeline_mode<synchronous>, transform_indices = @transform_4, window_bounds = array<i64: 16, 1>}, {pipeline_mode = #tpu.pipeline_mode<synchronous>, transform_indices = @transform_5, window_bounds = array<i64: 16, 1>}, {pipeline_mode = #tpu.pipeline_mode<synchronous>, transform_indices = @transform_6, window_bounds = array<i64: 16, 288>}]} {
    %c0 = arith.constant 0 : index
    %c0_0 = arith.constant 0 : index
    %0 = vector.load %arg5[%c0, %c0_0] : memref<16x1xf32, #tpu.memory_space<vmem>>, vector<16x1xf32>
    %c0_1 = arith.constant 0 : index
    %c0_2 = arith.constant 0 : index
    %1 = vector.load %arg6[%c0_1, %c0_2] : memref<16x1xf32, #tpu.memory_space<vmem>>, vector<16x1xf32>
    %c0_3 = arith.constant 0 : index
    %c0_4 = arith.constant 0 : index
    %2 = vector.load %arg1[%c0_3, %c0_4] : memref<8x8xbf16, #tpu.memory_space<vmem>>, vector<8x8xbf16>
    %c0_5 = arith.constant 0 : index
    %c0_6 = arith.constant 0 : index
    %3 = vector.load %arg3[%c0_5, %c0_6] : memref<8x288xbf16, #tpu.memory_space<vmem>>, vector<8x288xbf16>
    %cst = arith.constant dense<0.000000e+00> : vector<8x288xf32>
    %4 = tpu.matmul %2, %3, %cst {dimension_numbers = #tpu.dot_dimension_numbers<[1], [0], [0], [1], [0, 0, 1, 1], [], []>} : vector<8x8xbf16>, vector<8x288xbf16>, vector<8x288xf32> -> vector<8x288xf32>
    %c0_7 = arith.constant 0 : index
    %c0_8 = arith.constant 0 : index
    %5 = vector.load %arg2[%c0_7, %c0_8] : memref<8x8xbf16, #tpu.memory_space<vmem>>, vector<8x8xbf16>
    %c0_9 = arith.constant 0 : index
    %c0_10 = arith.constant 0 : index
    %6 = vector.load %arg4[%c0_9, %c0_10] : memref<8x288xbf16, #tpu.memory_space<vmem>>, vector<8x288xbf16>
    %cst_11 = arith.constant dense<0.000000e+00> : vector<8x288xf32>
    %7 = tpu.matmul %5, %6, %cst_11 {dimension_numbers = #tpu.dot_dimension_numbers<[1], [0], [0], [1], [0, 0, 1, 1], [], []>} : vector<8x8xbf16>, vector<8x288xbf16>, vector<8x288xf32> -> vector<8x288xf32>
    %8 = vector.extract_strided_slice %0 {offsets = [0, 0], sizes = [8, 1], strides = [1, 1]} : vector<16x1xf32> to vector<8x1xf32>
    %9 = vector.extract_strided_slice %1 {offsets = [0, 0], sizes = [8, 1], strides = [1, 1]} : vector<16x1xf32> to vector<8x1xf32>
    %cst_12 = arith.constant dense<0.000000e+00> : vector<8xf32>
    %10 = vector.multi_reduction <add>, %4, %cst_12 [1] : vector<8x288xf32> to vector<8xf32>
    %11 = vector.shape_cast %10 : vector<8xf32> to vector<8x1xf32>
    %cst_13 = arith.constant 2.880000e+02 : f32
    %12 = vector.broadcast %cst_13 : f32 to vector<8x1xf32>
    %13 = arith.divf %11, %12 : vector<8x1xf32>
    %14 = vector.broadcast %13 : vector<8x1xf32> to vector<8x288xf32>
    %15 = arith.subf %4, %14 : vector<8x288xf32>
    %16 = arith.mulf %15, %15 : vector<8x288xf32>
    %cst_14 = arith.constant dense<0.000000e+00> : vector<8xf32>
    %17 = vector.multi_reduction <add>, %16, %cst_14 [1] : vector<8x288xf32> to vector<8xf32>
    %18 = vector.shape_cast %17 : vector<8xf32> to vector<8x1xf32>
    %cst_15 = arith.constant 2.880000e+02 : f32
    %19 = vector.broadcast %cst_15 : f32 to vector<8x1xf32>
    %20 = arith.divf %18, %19 : vector<8x1xf32>
    %cst_16 = arith.constant 9.99999974E-6 : f32
    %21 = vector.broadcast %cst_16 : f32 to vector<8x1xf32>
    %22 = arith.addf %20, %21 : vector<8x1xf32>
    %23 = math.rsqrt %22 : vector<8x1xf32>
    %24 = vector.broadcast %23 : vector<8x1xf32> to vector<8x288xf32>
    %25 = arith.mulf %15, %24 : vector<8x288xf32>
    %26 = vector.broadcast %8 : vector<8x1xf32> to vector<8x288xf32>
    %27 = arith.mulf %25, %26 : vector<8x288xf32>
    %28 = vector.broadcast %9 : vector<8x1xf32> to vector<8x288xf32>
    %29 = arith.addf %27, %28 : vector<8x288xf32>
    %c0_17 = arith.constant 0 : index
    %c0_18 = arith.constant 0 : index
    %30 = vector.load %arg7[%c0_17, %c0_18] : memref<16x288xf32, #tpu.memory_space<vmem>>, vector<8x288xf32>
    tpu.vector_store %arg7[%c0_17, %c0_18], %29 {strides = array<i32>} : memref<16x288xf32, #tpu.memory_space<vmem>>, vector<8x288xf32>,
    %31 = vector.extract_strided_slice %0 {offsets = [8, 0], sizes = [8, 1], strides = [1, 1]} : vector<16x1xf32> to vector<8x1xf32>
    %32 = vector.extract_strided_slice %1 {offsets = [8, 0], sizes = [8, 1], strides = [1, 1]} : vector<16x1xf32> to vector<8x1xf32>
    %cst_19 = arith.constant dense<0.000000e+00> : vector<8xf32>
    %33 = vector.multi_reduction <add>, %7, %cst_19 [1] : vector<8x288xf32> to vector<8xf32>
    %34 = vector.shape_cast %33 : vector<8xf32> to vector<8x1xf32>
    %cst_20 = arith.constant 2.880000e+02 : f32
    %35 = vector.broadcast %cst_20 : f32 to vector<8x1xf32>
    %36 = arith.divf %34, %35 : vector<8x1xf32>
    %37 = vector.broadcast %36 : vector<8x1xf32> to vector<8x288xf32>
    %38 = arith.subf %7, %37 : vector<8x288xf32>
    %39 = arith.mulf %38, %38 : vector<8x288xf32>
    %cst_21 = arith.constant dense<0.000000e+00> : vector<8xf32>
    %40 = vector.multi_reduction <add>, %39, %cst_21 [1] : vector<8x288xf32> to vector<8xf32>
    %41 = vector.shape_cast %40 : vector<8xf32> to vector<8x1xf32>
    %cst_22 = arith.constant 2.880000e+02 : f32
    %42 = vector.broadcast %cst_22 : f32 to vector<8x1xf32>
    %43 = arith.divf %41, %42 : vector<8x1xf32>
    %cst_23 = arith.constant 9.99999974E-6 : f32
    %44 = vector.broadcast %cst_23 : f32 to vector<8x1xf32>
    %45 = arith.addf %43, %44 : vector<8x1xf32>
    %46 = math.rsqrt %45 : vector<8x1xf32>
    %47 = vector.broadcast %46 : vector<8x1xf32> to vector<8x288xf32>
    %48 = arith.mulf %38, %47 : vector<8x288xf32>
    %49 = vector.broadcast %31 : vector<8x1xf32> to vector<8x288xf32>
    %50 = arith.mulf %48, %49 : vector<8x288xf32>
    %51 = vector.broadcast %32 : vector<8x1xf32> to vector<8x288xf32>
    %52 = arith.addf %50, %51 : vector<8x288xf32>
    %c8 = arith.constant 8 : index
    %c0_24 = arith.constant 0 : index
    %53 = vector.load %arg7[%c8, %c0_24] : memref<16x288xf32, #tpu.memory_space<vmem>>, vector<8x288xf32>
    tpu.vector_store %arg7[%c8, %c0_24], %52 {strides = array<i32>} : memref<16x288xf32, #tpu.memory_space<vmem>>, vector<8x288xf32>,
    return
  }
  func.func @transform_0(%arg0: i32) -> (i32, i32) {
    %c0_i32 = arith.constant 0 : i32
    %c0_i32_0 = arith.constant 0 : i32
    %c0_i32_1 = arith.constant 0 : i32
    return %c0_i32, %c0_i32_0 : i32, i32
  }
  func.func @transform_1(%arg0: i32) -> (i32, i32) {
    %c0_i32 = arith.constant 0 : i32
    %c0_i32_0 = arith.constant 0 : i32
    %c0_i32_1 = arith.constant 0 : i32
    return %c0_i32, %c0_i32_0 : i32, i32
  }
  func.func @transform_2(%arg0: i32) -> (i32, i32) {
    %c0_i32 = arith.constant 0 : i32
    %c0_i32_0 = arith.constant 0 : i32
    %c0_i32_1 = arith.constant 0 : i32
    return %c0_i32, %c0_i32_0 : i32, i32
  }
  func.func @transform_3(%arg0: i32) -> (i32, i32) {
    %c0_i32 = arith.constant 0 : i32
    %c0_i32_0 = arith.constant 0 : i32
    %c0_i32_1 = arith.constant 0 : i32
    return %c0_i32, %c0_i32_0 : i32, i32
  }
  func.func @transform_4(%arg0: i32) -> (i32, i32) {
    %c0_i32 = arith.constant 0 : i32
    %c0_i32_0 = arith.constant 0 : i32
    %c0_i32_1 = arith.constant 0 : i32
    return %c0_i32, %c0_i32_0 : i32, i32
  }
  func.func @transform_5(%arg0: i32) -> (i32, i32) {
    %c0_i32 = arith.constant 0 : i32
    %c0_i32_0 = arith.constant 0 : i32
    %c0_i32_1 = arith.constant 0 : i32
    return %c0_i32, %c0_i32_0 : i32, i32
  }
  func.func @transform_6(%arg0: i32) -> (i32, i32) {
    %c0_i32 = arith.constant 0 : i32
    %c0_i32_0 = arith.constant 0 : i32
    %c0_i32_1 = arith.constant 0 : i32
    return %c0_i32, %c0_i32_0 : i32, i32
  }
}

module attributes {stable_mosaic.version = 11 : i64} {
  func.func @kernel(%arg0: i32, %arg1: memref<16x72xbf16, #tpu.memory_space<vmem>>, %arg2: memref<72x288xbf16, #tpu.memory_space<vmem>>, %arg3: memref<16x1xf32, #tpu.memory_space<vmem>>, %arg4: memref<16x1xf32, #tpu.memory_space<vmem>>, %arg5: memref<16x288xbf16, #tpu.memory_space<vmem>>) attributes {dimension_semantics = [#tpu.dimension_semantics<arbitrary>], iteration_bounds = array<i64: 1>, scalar_prefetch = 0 : i64, scratch_operands = 0 : i64, tpu.core_type = #tpu.core_type<tc>, window_params = [{pipeline_mode = #tpu.pipeline_mode<synchronous>, transform_indices = @transform_0, window_bounds = array<i64: 16, 72>}, {pipeline_mode = #tpu.pipeline_mode<synchronous>, transform_indices = @transform_1, window_bounds = array<i64: 72, 288>}, {pipeline_mode = #tpu.pipeline_mode<synchronous>, transform_indices = @transform_2, window_bounds = array<i64: 16, 1>}, {pipeline_mode = #tpu.pipeline_mode<synchronous>, transform_indices = @transform_3, window_bounds = array<i64: 16, 1>}, {pipeline_mode = #tpu.pipeline_mode<synchronous>, transform_indices = @transform_4, window_bounds = array<i64: 16, 288>}]} {
    %c0 = arith.constant 0 : index
    %c0_0 = arith.constant 0 : index
    %0 = vector.load %arg2[%c0, %c0_0] : memref<72x288xbf16, #tpu.memory_space<vmem>>, vector<72x288xbf16>
    %c0_1 = arith.constant 0 : index
    %c0_2 = arith.constant 0 : index
    %1 = vector.load %arg1[%c0_1, %c0_2] : memref<16x72xbf16, #tpu.memory_space<vmem>>, vector<16x72xbf16>
    %cst = arith.constant dense<0.000000e+00> : vector<16x288xf32>
    %2 = tpu.matmul %1, %0, %cst {dimension_numbers = #tpu.dot_dimension_numbers<[1], [0], [0], [1], [0, 0, 1, 1], [], []>} : vector<16x72xbf16>, vector<72x288xbf16>, vector<16x288xf32> -> vector<16x288xf32>
    %cst_3 = arith.constant dense<0.000000e+00> : vector<16xf32>
    %3 = vector.multi_reduction <add>, %2, %cst_3 [1] : vector<16x288xf32> to vector<16xf32>
    %4 = vector.shape_cast %3 : vector<16xf32> to vector<16x1xf32>
    %cst_4 = arith.constant 2.880000e+02 : f32
    %5 = vector.broadcast %cst_4 : f32 to vector<16x1xf32>
    %6 = arith.divf %4, %5 : vector<16x1xf32>
    %7 = vector.broadcast %6 : vector<16x1xf32> to vector<16x288xf32>
    %8 = arith.subf %2, %7 : vector<16x288xf32>
    %9 = arith.mulf %8, %8 : vector<16x288xf32>
    %cst_5 = arith.constant dense<0.000000e+00> : vector<16xf32>
    %10 = vector.multi_reduction <add>, %9, %cst_5 [1] : vector<16x288xf32> to vector<16xf32>
    %11 = vector.shape_cast %10 : vector<16xf32> to vector<16x1xf32>
    %cst_6 = arith.constant 2.880000e+02 : f32
    %12 = vector.broadcast %cst_6 : f32 to vector<16x1xf32>
    %13 = arith.divf %11, %12 : vector<16x1xf32>
    %cst_7 = arith.constant 9.99999974E-6 : f32
    %14 = vector.broadcast %cst_7 : f32 to vector<16x1xf32>
    %15 = arith.addf %13, %14 : vector<16x1xf32>
    %16 = math.rsqrt %15 : vector<16x1xf32>
    %17 = vector.broadcast %16 : vector<16x1xf32> to vector<16x288xf32>
    %18 = arith.mulf %8, %17 : vector<16x288xf32>
    %c0_8 = arith.constant 0 : index
    %c0_9 = arith.constant 0 : index
    %19 = vector.load %arg3[%c0_8, %c0_9] : memref<16x1xf32, #tpu.memory_space<vmem>>, vector<16x1xf32>
    %20 = vector.broadcast %19 : vector<16x1xf32> to vector<16x288xf32>
    %21 = arith.mulf %18, %20 : vector<16x288xf32>
    %c0_10 = arith.constant 0 : index
    %c0_11 = arith.constant 0 : index
    %22 = vector.load %arg4[%c0_10, %c0_11] : memref<16x1xf32, #tpu.memory_space<vmem>>, vector<16x1xf32>
    %23 = vector.broadcast %22 : vector<16x1xf32> to vector<16x288xf32>
    %24 = arith.addf %21, %23 : vector<16x288xf32>
    %cst_12 = arith.constant 0.000000e+00 : f32
    %25 = vector.broadcast %cst_12 : f32 to vector<16x288xf32>
    %26 = arith.maximumf %24, %25 : vector<16x288xf32>
    %27 = arith.truncf %26 : vector<16x288xf32> to vector<16x288xbf16>
    %c0_13 = arith.constant 0 : index
    %c0_14 = arith.constant 0 : index
    %28 = vector.load %arg5[%c0_13, %c0_14] : memref<16x288xbf16, #tpu.memory_space<vmem>>, vector<16x288xbf16>
    tpu.vector_store %arg5[%c0_13, %c0_14], %27 {strides = array<i32>} : memref<16x288xbf16, #tpu.memory_space<vmem>>, vector<16x288xbf16>,
    return
  }
  func.func @transform_0(%arg0: i32) -> (i32, i32) {
    %c0_i32 = arith.constant 0 : i32
    %c0_i32_0 = arith.constant 0 : i32
    %c0_i32_1 = arith.constant 0 : i32
    return %c0_i32, %c0_i32_0 : i32, i32
  }
  func.func @transform_1(%arg0: i32) -> (i32, i32) {
    %c0_i32 = arith.constant 0 : i32
    %c0_i32_0 = arith.constant 0 : i32
    %c0_i32_1 = arith.constant 0 : i32
    return %c0_i32, %c0_i32_0 : i32, i32
  }
  func.func @transform_2(%arg0: i32) -> (i32, i32) {
    %c0_i32 = arith.constant 0 : i32
    %c0_i32_0 = arith.constant 0 : i32
    %c0_i32_1 = arith.constant 0 : i32
    return %c0_i32, %c0_i32_0 : i32, i32
  }
  func.func @transform_3(%arg0: i32) -> (i32, i32) {
    %c0_i32 = arith.constant 0 : i32
    %c0_i32_0 = arith.constant 0 : i32
    %c0_i32_1 = arith.constant 0 : i32
    return %c0_i32, %c0_i32_0 : i32, i32
  }
  func.func @transform_4(%arg0: i32) -> (i32, i32) {
    %c0_i32 = arith.constant 0 : i32
    %c0_i32_0 = arith.constant 0 : i32
    %c0_i32_1 = arith.constant 0 : i32
    return %c0_i32, %c0_i32_0 : i32, i32
  }
}

module attributes {stable_mosaic.version = 11 : i64} {
  func.func @kernel(%arg0: i32, %arg1: memref<16x144xbf16, #tpu.memory_space<vmem>>, %arg2: memref<144x288xbf16, #tpu.memory_space<vmem>>, %arg3: memref<16x1xf32, #tpu.memory_space<vmem>>, %arg4: memref<16x1xf32, #tpu.memory_space<vmem>>, %arg5: memref<16x288xf32, #tpu.memory_space<vmem>>, %arg6: memref<16x288xf32, #tpu.memory_space<vmem>>) attributes {dimension_semantics = [#tpu.dimension_semantics<arbitrary>], iteration_bounds = array<i64: 1>, scalar_prefetch = 0 : i64, scratch_operands = 0 : i64, tpu.core_type = #tpu.core_type<tc>, window_params = [{pipeline_mode = #tpu.pipeline_mode<synchronous>, transform_indices = @transform_0, window_bounds = array<i64: 16, 144>}, {pipeline_mode = #tpu.pipeline_mode<synchronous>, transform_indices = @transform_1, window_bounds = array<i64: 144, 288>}, {pipeline_mode = #tpu.pipeline_mode<synchronous>, transform_indices = @transform_2, window_bounds = array<i64: 16, 1>}, {pipeline_mode = #tpu.pipeline_mode<synchronous>, transform_indices = @transform_3, window_bounds = array<i64: 16, 1>}, {pipeline_mode = #tpu.pipeline_mode<synchronous>, transform_indices = @transform_4, window_bounds = array<i64: 16, 288>}, {pipeline_mode = #tpu.pipeline_mode<synchronous>, transform_indices = @transform_5, window_bounds = array<i64: 16, 288>}]} {
    %c0 = arith.constant 0 : index
    %c0_0 = arith.constant 0 : index
    %0 = vector.load %arg2[%c0, %c0_0] : memref<144x288xbf16, #tpu.memory_space<vmem>>, vector<144x288xbf16>
    %c0_1 = arith.constant 0 : index
    %c0_2 = arith.constant 0 : index
    %1 = vector.load %arg1[%c0_1, %c0_2] : memref<16x144xbf16, #tpu.memory_space<vmem>>, vector<16x144xbf16>
    %cst = arith.constant dense<0.000000e+00> : vector<16x288xf32>
    %2 = tpu.matmul %1, %0, %cst {dimension_numbers = #tpu.dot_dimension_numbers<[1], [0], [0], [1], [0, 0, 1, 1], [], []>} : vector<16x144xbf16>, vector<144x288xbf16>, vector<16x288xf32> -> vector<16x288xf32>
    %cst_3 = arith.constant dense<0.000000e+00> : vector<16xf32>
    %3 = vector.multi_reduction <add>, %2, %cst_3 [1] : vector<16x288xf32> to vector<16xf32>
    %4 = vector.shape_cast %3 : vector<16xf32> to vector<16x1xf32>
    %cst_4 = arith.constant 2.880000e+02 : f32
    %5 = vector.broadcast %cst_4 : f32 to vector<16x1xf32>
    %6 = arith.divf %4, %5 : vector<16x1xf32>
    %7 = vector.broadcast %6 : vector<16x1xf32> to vector<16x288xf32>
    %8 = arith.subf %2, %7 : vector<16x288xf32>
    %9 = arith.mulf %8, %8 : vector<16x288xf32>
    %cst_5 = arith.constant dense<0.000000e+00> : vector<16xf32>
    %10 = vector.multi_reduction <add>, %9, %cst_5 [1] : vector<16x288xf32> to vector<16xf32>
    %11 = vector.shape_cast %10 : vector<16xf32> to vector<16x1xf32>
    %cst_6 = arith.constant 2.880000e+02 : f32
    %12 = vector.broadcast %cst_6 : f32 to vector<16x1xf32>
    %13 = arith.divf %11, %12 : vector<16x1xf32>
    %cst_7 = arith.constant 9.99999974E-6 : f32
    %14 = vector.broadcast %cst_7 : f32 to vector<16x1xf32>
    %15 = arith.addf %13, %14 : vector<16x1xf32>
    %16 = math.rsqrt %15 : vector<16x1xf32>
    %17 = vector.broadcast %16 : vector<16x1xf32> to vector<16x288xf32>
    %18 = arith.mulf %8, %17 : vector<16x288xf32>
    %c0_8 = arith.constant 0 : index
    %c0_9 = arith.constant 0 : index
    %19 = vector.load %arg3[%c0_8, %c0_9] : memref<16x1xf32, #tpu.memory_space<vmem>>, vector<16x1xf32>
    %20 = vector.broadcast %19 : vector<16x1xf32> to vector<16x288xf32>
    %21 = arith.mulf %18, %20 : vector<16x288xf32>
    %c0_10 = arith.constant 0 : index
    %c0_11 = arith.constant 0 : index
    %22 = vector.load %arg4[%c0_10, %c0_11] : memref<16x1xf32, #tpu.memory_space<vmem>>, vector<16x1xf32>
    %23 = vector.broadcast %22 : vector<16x1xf32> to vector<16x288xf32>
    %24 = arith.addf %21, %23 : vector<16x288xf32>
    %c0_12 = arith.constant 0 : index
    %c0_13 = arith.constant 0 : index
    %25 = vector.load %arg5[%c0_12, %c0_13] : memref<16x288xf32, #tpu.memory_space<vmem>>, vector<16x288xf32>
    %26 = arith.addf %24, %25 : vector<16x288xf32>
    %c0_14 = arith.constant 0 : index
    %c0_15 = arith.constant 0 : index
    %27 = vector.load %arg6[%c0_14, %c0_15] : memref<16x288xf32, #tpu.memory_space<vmem>>, vector<16x288xf32>
    tpu.vector_store %arg6[%c0_14, %c0_15], %26 {strides = array<i32>} : memref<16x288xf32, #tpu.memory_space<vmem>>, vector<16x288xf32>,
    return
  }
  func.func @transform_0(%arg0: i32) -> (i32, i32) {
    %c0_i32 = arith.constant 0 : i32
    %c0_i32_0 = arith.constant 0 : i32
    %c0_i32_1 = arith.constant 0 : i32
    return %c0_i32, %c0_i32_0 : i32, i32
  }
  func.func @transform_1(%arg0: i32) -> (i32, i32) {
    %c0_i32 = arith.constant 0 : i32
    %c0_i32_0 = arith.constant 0 : i32
    %c0_i32_1 = arith.constant 0 : i32
    return %c0_i32, %c0_i32_0 : i32, i32
  }
  func.func @transform_2(%arg0: i32) -> (i32, i32) {
    %c0_i32 = arith.constant 0 : i32
    %c0_i32_0 = arith.constant 0 : i32
    %c0_i32_1 = arith.constant 0 : i32
    return %c0_i32, %c0_i32_0 : i32, i32
  }
  func.func @transform_3(%arg0: i32) -> (i32, i32) {
    %c0_i32 = arith.constant 0 : i32
    %c0_i32_0 = arith.constant 0 : i32
    %c0_i32_1 = arith.constant 0 : i32
    return %c0_i32, %c0_i32_0 : i32, i32
  }
  func.func @transform_4(%arg0: i32) -> (i32, i32) {
    %c0_i32 = arith.constant 0 : i32
    %c0_i32_0 = arith.constant 0 : i32
    %c0_i32_1 = arith.constant 0 : i32
    return %c0_i32, %c0_i32_0 : i32, i32
  }
  func.func @transform_5(%arg0: i32) -> (i32, i32) {
    %c0_i32 = arith.constant 0 : i32
    %c0_i32_0 = arith.constant 0 : i32
    %c0_i32_1 = arith.constant 0 : i32
    return %c0_i32, %c0_i32_0 : i32, i32
  }
}

module attributes {stable_mosaic.version = 11 : i64} {
  func.func @kernel(%arg0: i32, %arg1: memref<16x16xbf16, #tpu.memory_space<vmem>>, %arg2: memref<16x16xbf16, #tpu.memory_space<vmem>>, %arg3: memref<16x288xbf16, #tpu.memory_space<vmem>>, %arg4: memref<16x288xbf16, #tpu.memory_space<vmem>>, %arg5: memref<32x1xf32, #tpu.memory_space<vmem>>, %arg6: memref<32x1xf32, #tpu.memory_space<vmem>>, %arg7: memref<32x288xf32, #tpu.memory_space<vmem>>) attributes {dimension_semantics = [#tpu.dimension_semantics<arbitrary>], iteration_bounds = array<i64: 1>, scalar_prefetch = 0 : i64, scratch_operands = 0 : i64, tpu.core_type = #tpu.core_type<tc>, window_params = [{pipeline_mode = #tpu.pipeline_mode<synchronous>, transform_indices = @transform_0, window_bounds = array<i64: 16, 16>}, {pipeline_mode = #tpu.pipeline_mode<synchronous>, transform_indices = @transform_1, window_bounds = array<i64: 16, 16>}, {pipeline_mode = #tpu.pipeline_mode<synchronous>, transform_indices = @transform_2, window_bounds = array<i64: 16, 288>}, {pipeline_mode = #tpu.pipeline_mode<synchronous>, transform_indices = @transform_3, window_bounds = array<i64: 16, 288>}, {pipeline_mode = #tpu.pipeline_mode<synchronous>, transform_indices = @transform_4, window_bounds = array<i64: 32, 1>}, {pipeline_mode = #tpu.pipeline_mode<synchronous>, transform_indices = @transform_5, window_bounds = array<i64: 32, 1>}, {pipeline_mode = #tpu.pipeline_mode<synchronous>, transform_indices = @transform_6, window_bounds = array<i64: 32, 288>}]} {
    %c0 = arith.constant 0 : index
    %c0_0 = arith.constant 0 : index
    %0 = vector.load %arg5[%c0, %c0_0] : memref<32x1xf32, #tpu.memory_space<vmem>>, vector<32x1xf32>
    %c0_1 = arith.constant 0 : index
    %c0_2 = arith.constant 0 : index
    %1 = vector.load %arg6[%c0_1, %c0_2] : memref<32x1xf32, #tpu.memory_space<vmem>>, vector<32x1xf32>
    %c0_3 = arith.constant 0 : index
    %c0_4 = arith.constant 0 : index
    %2 = vector.load %arg1[%c0_3, %c0_4] : memref<16x16xbf16, #tpu.memory_space<vmem>>, vector<16x16xbf16>
    %c0_5 = arith.constant 0 : index
    %c0_6 = arith.constant 0 : index
    %3 = vector.load %arg3[%c0_5, %c0_6] : memref<16x288xbf16, #tpu.memory_space<vmem>>, vector<16x288xbf16>
    %cst = arith.constant dense<0.000000e+00> : vector<16x288xf32>
    %4 = tpu.matmul %2, %3, %cst {dimension_numbers = #tpu.dot_dimension_numbers<[1], [0], [0], [1], [0, 0, 1, 1], [], []>} : vector<16x16xbf16>, vector<16x288xbf16>, vector<16x288xf32> -> vector<16x288xf32>
    %c0_7 = arith.constant 0 : index
    %c0_8 = arith.constant 0 : index
    %5 = vector.load %arg2[%c0_7, %c0_8] : memref<16x16xbf16, #tpu.memory_space<vmem>>, vector<16x16xbf16>
    %c0_9 = arith.constant 0 : index
    %c0_10 = arith.constant 0 : index
    %6 = vector.load %arg4[%c0_9, %c0_10] : memref<16x288xbf16, #tpu.memory_space<vmem>>, vector<16x288xbf16>
    %cst_11 = arith.constant dense<0.000000e+00> : vector<16x288xf32>
    %7 = tpu.matmul %5, %6, %cst_11 {dimension_numbers = #tpu.dot_dimension_numbers<[1], [0], [0], [1], [0, 0, 1, 1], [], []>} : vector<16x16xbf16>, vector<16x288xbf16>, vector<16x288xf32> -> vector<16x288xf32>
    %8 = vector.extract_strided_slice %0 {offsets = [0, 0], sizes = [16, 1], strides = [1, 1]} : vector<32x1xf32> to vector<16x1xf32>
    %9 = vector.extract_strided_slice %1 {offsets = [0, 0], sizes = [16, 1], strides = [1, 1]} : vector<32x1xf32> to vector<16x1xf32>
    %cst_12 = arith.constant dense<0.000000e+00> : vector<16xf32>
    %10 = vector.multi_reduction <add>, %4, %cst_12 [1] : vector<16x288xf32> to vector<16xf32>
    %11 = vector.shape_cast %10 : vector<16xf32> to vector<16x1xf32>
    %cst_13 = arith.constant 2.880000e+02 : f32
    %12 = vector.broadcast %cst_13 : f32 to vector<16x1xf32>
    %13 = arith.divf %11, %12 : vector<16x1xf32>
    %14 = vector.broadcast %13 : vector<16x1xf32> to vector<16x288xf32>
    %15 = arith.subf %4, %14 : vector<16x288xf32>
    %16 = arith.mulf %15, %15 : vector<16x288xf32>
    %cst_14 = arith.constant dense<0.000000e+00> : vector<16xf32>
    %17 = vector.multi_reduction <add>, %16, %cst_14 [1] : vector<16x288xf32> to vector<16xf32>
    %18 = vector.shape_cast %17 : vector<16xf32> to vector<16x1xf32>
    %cst_15 = arith.constant 2.880000e+02 : f32
    %19 = vector.broadcast %cst_15 : f32 to vector<16x1xf32>
    %20 = arith.divf %18, %19 : vector<16x1xf32>
    %cst_16 = arith.constant 9.99999974E-6 : f32
    %21 = vector.broadcast %cst_16 : f32 to vector<16x1xf32>
    %22 = arith.addf %20, %21 : vector<16x1xf32>
    %23 = math.rsqrt %22 : vector<16x1xf32>
    %24 = vector.broadcast %23 : vector<16x1xf32> to vector<16x288xf32>
    %25 = arith.mulf %15, %24 : vector<16x288xf32>
    %26 = vector.broadcast %8 : vector<16x1xf32> to vector<16x288xf32>
    %27 = arith.mulf %25, %26 : vector<16x288xf32>
    %28 = vector.broadcast %9 : vector<16x1xf32> to vector<16x288xf32>
    %29 = arith.addf %27, %28 : vector<16x288xf32>
    %c0_17 = arith.constant 0 : index
    %c0_18 = arith.constant 0 : index
    %30 = vector.load %arg7[%c0_17, %c0_18] : memref<32x288xf32, #tpu.memory_space<vmem>>, vector<16x288xf32>
    tpu.vector_store %arg7[%c0_17, %c0_18], %29 {strides = array<i32>} : memref<32x288xf32, #tpu.memory_space<vmem>>, vector<16x288xf32>,
    %31 = vector.extract_strided_slice %0 {offsets = [16, 0], sizes = [16, 1], strides = [1, 1]} : vector<32x1xf32> to vector<16x1xf32>
    %32 = vector.extract_strided_slice %1 {offsets = [16, 0], sizes = [16, 1], strides = [1, 1]} : vector<32x1xf32> to vector<16x1xf32>
    %cst_19 = arith.constant dense<0.000000e+00> : vector<16xf32>
    %33 = vector.multi_reduction <add>, %7, %cst_19 [1] : vector<16x288xf32> to vector<16xf32>
    %34 = vector.shape_cast %33 : vector<16xf32> to vector<16x1xf32>
    %cst_20 = arith.constant 2.880000e+02 : f32
    %35 = vector.broadcast %cst_20 : f32 to vector<16x1xf32>
    %36 = arith.divf %34, %35 : vector<16x1xf32>
    %37 = vector.broadcast %36 : vector<16x1xf32> to vector<16x288xf32>
    %38 = arith.subf %7, %37 : vector<16x288xf32>
    %39 = arith.mulf %38, %38 : vector<16x288xf32>
    %cst_21 = arith.constant dense<0.000000e+00> : vector<16xf32>
    %40 = vector.multi_reduction <add>, %39, %cst_21 [1] : vector<16x288xf32> to vector<16xf32>
    %41 = vector.shape_cast %40 : vector<16xf32> to vector<16x1xf32>
    %cst_22 = arith.constant 2.880000e+02 : f32
    %42 = vector.broadcast %cst_22 : f32 to vector<16x1xf32>
    %43 = arith.divf %41, %42 : vector<16x1xf32>
    %cst_23 = arith.constant 9.99999974E-6 : f32
    %44 = vector.broadcast %cst_23 : f32 to vector<16x1xf32>
    %45 = arith.addf %43, %44 : vector<16x1xf32>
    %46 = math.rsqrt %45 : vector<16x1xf32>
    %47 = vector.broadcast %46 : vector<16x1xf32> to vector<16x288xf32>
    %48 = arith.mulf %38, %47 : vector<16x288xf32>
    %49 = vector.broadcast %31 : vector<16x1xf32> to vector<16x288xf32>
    %50 = arith.mulf %48, %49 : vector<16x288xf32>
    %51 = vector.broadcast %32 : vector<16x1xf32> to vector<16x288xf32>
    %52 = arith.addf %50, %51 : vector<16x288xf32>
    %c16 = arith.constant 16 : index
    %c0_24 = arith.constant 0 : index
    %53 = vector.load %arg7[%c16, %c0_24] : memref<32x288xf32, #tpu.memory_space<vmem>>, vector<16x288xf32>
    tpu.vector_store %arg7[%c16, %c0_24], %52 {strides = array<i32>} : memref<32x288xf32, #tpu.memory_space<vmem>>, vector<16x288xf32>,
    return
  }
  func.func @transform_0(%arg0: i32) -> (i32, i32) {
    %c0_i32 = arith.constant 0 : i32
    %c0_i32_0 = arith.constant 0 : i32
    %c0_i32_1 = arith.constant 0 : i32
    return %c0_i32, %c0_i32_0 : i32, i32
  }
  func.func @transform_1(%arg0: i32) -> (i32, i32) {
    %c0_i32 = arith.constant 0 : i32
    %c0_i32_0 = arith.constant 0 : i32
    %c0_i32_1 = arith.constant 0 : i32
    return %c0_i32, %c0_i32_0 : i32, i32
  }
  func.func @transform_2(%arg0: i32) -> (i32, i32) {
    %c0_i32 = arith.constant 0 : i32
    %c0_i32_0 = arith.constant 0 : i32
    %c0_i32_1 = arith.constant 0 : i32
    return %c0_i32, %c0_i32_0 : i32, i32
  }
  func.func @transform_3(%arg0: i32) -> (i32, i32) {
    %c0_i32 = arith.constant 0 : i32
    %c0_i32_0 = arith.constant 0 : i32
    %c0_i32_1 = arith.constant 0 : i32
    return %c0_i32, %c0_i32_0 : i32, i32
  }
  func.func @transform_4(%arg0: i32) -> (i32, i32) {
    %c0_i32 = arith.constant 0 : i32
    %c0_i32_0 = arith.constant 0 : i32
    %c0_i32_1 = arith.constant 0 : i32
    return %c0_i32, %c0_i32_0 : i32, i32
  }
  func.func @transform_5(%arg0: i32) -> (i32, i32) {
    %c0_i32 = arith.constant 0 : i32
    %c0_i32_0 = arith.constant 0 : i32
    %c0_i32_1 = arith.constant 0 : i32
    return %c0_i32, %c0_i32_0 : i32, i32
  }
  func.func @transform_6(%arg0: i32) -> (i32, i32) {
    %c0_i32 = arith.constant 0 : i32
    %c0_i32_0 = arith.constant 0 : i32
    %c0_i32_1 = arith.constant 0 : i32
    return %c0_i32, %c0_i32_0 : i32, i32
  }
}

module attributes {stable_mosaic.version = 11 : i64} {
  func.func @kernel(%arg0: i32, %arg1: memref<64x144xbf16, #tpu.memory_space<vmem>>, %arg2: memref<144x288xbf16, #tpu.memory_space<vmem>>, %arg3: memref<64x1xf32, #tpu.memory_space<vmem>>, %arg4: memref<64x1xf32, #tpu.memory_space<vmem>>, %arg5: memref<64x288xbf16, #tpu.memory_space<vmem>>) attributes {dimension_semantics = [#tpu.dimension_semantics<arbitrary>], iteration_bounds = array<i64: 1>, scalar_prefetch = 0 : i64, scratch_operands = 0 : i64, tpu.core_type = #tpu.core_type<tc>, window_params = [{pipeline_mode = #tpu.pipeline_mode<synchronous>, transform_indices = @transform_0, window_bounds = array<i64: 64, 144>}, {pipeline_mode = #tpu.pipeline_mode<synchronous>, transform_indices = @transform_1, window_bounds = array<i64: 144, 288>}, {pipeline_mode = #tpu.pipeline_mode<synchronous>, transform_indices = @transform_2, window_bounds = array<i64: 64, 1>}, {pipeline_mode = #tpu.pipeline_mode<synchronous>, transform_indices = @transform_3, window_bounds = array<i64: 64, 1>}, {pipeline_mode = #tpu.pipeline_mode<synchronous>, transform_indices = @transform_4, window_bounds = array<i64: 64, 288>}]} {
    %c0 = arith.constant 0 : index
    %c0_0 = arith.constant 0 : index
    %0 = vector.load %arg2[%c0, %c0_0] : memref<144x288xbf16, #tpu.memory_space<vmem>>, vector<144x288xbf16>
    %c0_1 = arith.constant 0 : index
    %c0_2 = arith.constant 0 : index
    %1 = vector.load %arg1[%c0_1, %c0_2] : memref<64x144xbf16, #tpu.memory_space<vmem>>, vector<64x144xbf16>
    %cst = arith.constant dense<0.000000e+00> : vector<64x288xf32>
    %2 = tpu.matmul %1, %0, %cst {dimension_numbers = #tpu.dot_dimension_numbers<[1], [0], [0], [1], [0, 0, 1, 1], [], []>} : vector<64x144xbf16>, vector<144x288xbf16>, vector<64x288xf32> -> vector<64x288xf32>
    %cst_3 = arith.constant dense<0.000000e+00> : vector<64xf32>
    %3 = vector.multi_reduction <add>, %2, %cst_3 [1] : vector<64x288xf32> to vector<64xf32>
    %4 = vector.shape_cast %3 : vector<64xf32> to vector<64x1xf32>
    %cst_4 = arith.constant 2.880000e+02 : f32
    %5 = vector.broadcast %cst_4 : f32 to vector<64x1xf32>
    %6 = arith.divf %4, %5 : vector<64x1xf32>
    %7 = vector.broadcast %6 : vector<64x1xf32> to vector<64x288xf32>
    %8 = arith.subf %2, %7 : vector<64x288xf32>
    %9 = arith.mulf %8, %8 : vector<64x288xf32>
    %cst_5 = arith.constant dense<0.000000e+00> : vector<64xf32>
    %10 = vector.multi_reduction <add>, %9, %cst_5 [1] : vector<64x288xf32> to vector<64xf32>
    %11 = vector.shape_cast %10 : vector<64xf32> to vector<64x1xf32>
    %cst_6 = arith.constant 2.880000e+02 : f32
    %12 = vector.broadcast %cst_6 : f32 to vector<64x1xf32>
    %13 = arith.divf %11, %12 : vector<64x1xf32>
    %cst_7 = arith.constant 9.99999974E-6 : f32
    %14 = vector.broadcast %cst_7 : f32 to vector<64x1xf32>
    %15 = arith.addf %13, %14 : vector<64x1xf32>
    %16 = math.rsqrt %15 : vector<64x1xf32>
    %17 = vector.broadcast %16 : vector<64x1xf32> to vector<64x288xf32>
    %18 = arith.mulf %8, %17 : vector<64x288xf32>
    %c0_8 = arith.constant 0 : index
    %c0_9 = arith.constant 0 : index
    %19 = vector.load %arg3[%c0_8, %c0_9] : memref<64x1xf32, #tpu.memory_space<vmem>>, vector<64x1xf32>
    %20 = vector.broadcast %19 : vector<64x1xf32> to vector<64x288xf32>
    %21 = arith.mulf %18, %20 : vector<64x288xf32>
    %c0_10 = arith.constant 0 : index
    %c0_11 = arith.constant 0 : index
    %22 = vector.load %arg4[%c0_10, %c0_11] : memref<64x1xf32, #tpu.memory_space<vmem>>, vector<64x1xf32>
    %23 = vector.broadcast %22 : vector<64x1xf32> to vector<64x288xf32>
    %24 = arith.addf %21, %23 : vector<64x288xf32>
    %cst_12 = arith.constant 0.000000e+00 : f32
    %25 = vector.broadcast %cst_12 : f32 to vector<64x288xf32>
    %26 = arith.maximumf %24, %25 : vector<64x288xf32>
    %27 = arith.truncf %26 : vector<64x288xf32> to vector<64x288xbf16>
    %c0_13 = arith.constant 0 : index
    %c0_14 = arith.constant 0 : index
    %28 = vector.load %arg5[%c0_13, %c0_14] : memref<64x288xbf16, #tpu.memory_space<vmem>>, vector<64x288xbf16>
    tpu.vector_store %arg5[%c0_13, %c0_14], %27 {strides = array<i32>} : memref<64x288xbf16, #tpu.memory_space<vmem>>, vector<64x288xbf16>,
    return
  }
  func.func @transform_0(%arg0: i32) -> (i32, i32) {
    %c0_i32 = arith.constant 0 : i32
    %c0_i32_0 = arith.constant 0 : i32
    %c0_i32_1 = arith.constant 0 : i32
    return %c0_i32, %c0_i32_0 : i32, i32
  }
  func.func @transform_1(%arg0: i32) -> (i32, i32) {
    %c0_i32 = arith.constant 0 : i32
    %c0_i32_0 = arith.constant 0 : i32
    %c0_i32_1 = arith.constant 0 : i32
    return %c0_i32, %c0_i32_0 : i32, i32
  }
  func.func @transform_2(%arg0: i32) -> (i32, i32) {
    %c0_i32 = arith.constant 0 : i32
    %c0_i32_0 = arith.constant 0 : i32
    %c0_i32_1 = arith.constant 0 : i32
    return %c0_i32, %c0_i32_0 : i32, i32
  }
  func.func @transform_3(%arg0: i32) -> (i32, i32) {
    %c0_i32 = arith.constant 0 : i32
    %c0_i32_0 = arith.constant 0 : i32
    %c0_i32_1 = arith.constant 0 : i32
    return %c0_i32, %c0_i32_0 : i32, i32
  }
  func.func @transform_4(%arg0: i32) -> (i32, i32) {
    %c0_i32 = arith.constant 0 : i32
    %c0_i32_0 = arith.constant 0 : i32
    %c0_i32_1 = arith.constant 0 : i32
    return %c0_i32, %c0_i32_0 : i32, i32
  }
}

module attributes {stable_mosaic.version = 11 : i64} {
  func.func @kernel(%arg0: i32, %arg1: memref<64x576xbf16, #tpu.memory_space<vmem>>, %arg2: memref<576x288xbf16, #tpu.memory_space<vmem>>, %arg3: memref<64x1xf32, #tpu.memory_space<vmem>>, %arg4: memref<64x1xf32, #tpu.memory_space<vmem>>, %arg5: memref<32x288xf32, #tpu.memory_space<vmem>>, %arg6: memref<32x288xf32, #tpu.memory_space<vmem>>) attributes {dimension_semantics = [#tpu.dimension_semantics<arbitrary>], iteration_bounds = array<i64: 1>, scalar_prefetch = 0 : i64, scratch_operands = 0 : i64, tpu.core_type = #tpu.core_type<tc>, window_params = [{pipeline_mode = #tpu.pipeline_mode<synchronous>, transform_indices = @transform_0, window_bounds = array<i64: 64, 576>}, {pipeline_mode = #tpu.pipeline_mode<synchronous>, transform_indices = @transform_1, window_bounds = array<i64: 576, 288>}, {pipeline_mode = #tpu.pipeline_mode<synchronous>, transform_indices = @transform_2, window_bounds = array<i64: 64, 1>}, {pipeline_mode = #tpu.pipeline_mode<synchronous>, transform_indices = @transform_3, window_bounds = array<i64: 64, 1>}, {pipeline_mode = #tpu.pipeline_mode<synchronous>, transform_indices = @transform_4, window_bounds = array<i64: 32, 288>}, {pipeline_mode = #tpu.pipeline_mode<synchronous>, transform_indices = @transform_5, window_bounds = array<i64: 32, 288>}]} {
    %c0 = arith.constant 0 : index
    %c0_0 = arith.constant 0 : index
    %0 = vector.load %arg2[%c0, %c0_0] : memref<576x288xbf16, #tpu.memory_space<vmem>>, vector<576x288xbf16>
    %c0_1 = arith.constant 0 : index
    %c0_2 = arith.constant 0 : index
    %1 = vector.load %arg1[%c0_1, %c0_2] : memref<64x576xbf16, #tpu.memory_space<vmem>>, vector<64x576xbf16>
    %cst = arith.constant dense<0.000000e+00> : vector<64x288xf32>
    %2 = tpu.matmul %1, %0, %cst {dimension_numbers = #tpu.dot_dimension_numbers<[1], [0], [0], [1], [0, 0, 1, 1], [], []>} : vector<64x576xbf16>, vector<576x288xbf16>, vector<64x288xf32> -> vector<64x288xf32>
    %cst_3 = arith.constant dense<0.000000e+00> : vector<64xf32>
    %3 = vector.multi_reduction <add>, %2, %cst_3 [1] : vector<64x288xf32> to vector<64xf32>
    %4 = vector.shape_cast %3 : vector<64xf32> to vector<64x1xf32>
    %cst_4 = arith.constant 2.880000e+02 : f32
    %5 = vector.broadcast %cst_4 : f32 to vector<64x1xf32>
    %6 = arith.divf %4, %5 : vector<64x1xf32>
    %7 = vector.broadcast %6 : vector<64x1xf32> to vector<64x288xf32>
    %8 = arith.subf %2, %7 : vector<64x288xf32>
    %9 = arith.mulf %8, %8 : vector<64x288xf32>
    %cst_5 = arith.constant dense<0.000000e+00> : vector<64xf32>
    %10 = vector.multi_reduction <add>, %9, %cst_5 [1] : vector<64x288xf32> to vector<64xf32>
    %11 = vector.shape_cast %10 : vector<64xf32> to vector<64x1xf32>
    %cst_6 = arith.constant 2.880000e+02 : f32
    %12 = vector.broadcast %cst_6 : f32 to vector<64x1xf32>
    %13 = arith.divf %11, %12 : vector<64x1xf32>
    %cst_7 = arith.constant 9.99999974E-6 : f32
    %14 = vector.broadcast %cst_7 : f32 to vector<64x1xf32>
    %15 = arith.addf %13, %14 : vector<64x1xf32>
    %16 = math.rsqrt %15 : vector<64x1xf32>
    %17 = vector.broadcast %16 : vector<64x1xf32> to vector<64x288xf32>
    %18 = arith.mulf %8, %17 : vector<64x288xf32>
    %c0_8 = arith.constant 0 : index
    %c0_9 = arith.constant 0 : index
    %19 = vector.load %arg3[%c0_8, %c0_9] : memref<64x1xf32, #tpu.memory_space<vmem>>, vector<64x1xf32>
    %20 = vector.broadcast %19 : vector<64x1xf32> to vector<64x288xf32>
    %21 = arith.mulf %18, %20 : vector<64x288xf32>
    %c0_10 = arith.constant 0 : index
    %c0_11 = arith.constant 0 : index
    %22 = vector.load %arg4[%c0_10, %c0_11] : memref<64x1xf32, #tpu.memory_space<vmem>>, vector<64x1xf32>
    %23 = vector.broadcast %22 : vector<64x1xf32> to vector<64x288xf32>
    %24 = arith.addf %21, %23 : vector<64x288xf32>
    %25 = vector.extract_strided_slice %24 {offsets = [0, 0], sizes = [32, 288], strides = [1, 1]} : vector<64x288xf32> to vector<32x288xf32>
    %26 = vector.extract_strided_slice %24 {offsets = [32, 0], sizes = [32, 288], strides = [1, 1]} : vector<64x288xf32> to vector<32x288xf32>
    %27 = arith.addf %25, %26 : vector<32x288xf32>
    %c0_12 = arith.constant 0 : index
    %c0_13 = arith.constant 0 : index
    %28 = vector.load %arg5[%c0_12, %c0_13] : memref<32x288xf32, #tpu.memory_space<vmem>>, vector<32x288xf32>
    %29 = arith.addf %27, %28 : vector<32x288xf32>
    %c0_14 = arith.constant 0 : index
    %c0_15 = arith.constant 0 : index
    %30 = vector.load %arg6[%c0_14, %c0_15] : memref<32x288xf32, #tpu.memory_space<vmem>>, vector<32x288xf32>
    tpu.vector_store %arg6[%c0_14, %c0_15], %29 {strides = array<i32>} : memref<32x288xf32, #tpu.memory_space<vmem>>, vector<32x288xf32>,
    return
  }
  func.func @transform_0(%arg0: i32) -> (i32, i32) {
    %c0_i32 = arith.constant 0 : i32
    %c0_i32_0 = arith.constant 0 : i32
    %c0_i32_1 = arith.constant 0 : i32
    return %c0_i32, %c0_i32_0 : i32, i32
  }
  func.func @transform_1(%arg0: i32) -> (i32, i32) {
    %c0_i32 = arith.constant 0 : i32
    %c0_i32_0 = arith.constant 0 : i32
    %c0_i32_1 = arith.constant 0 : i32
    return %c0_i32, %c0_i32_0 : i32, i32
  }
  func.func @transform_2(%arg0: i32) -> (i32, i32) {
    %c0_i32 = arith.constant 0 : i32
    %c0_i32_0 = arith.constant 0 : i32
    %c0_i32_1 = arith.constant 0 : i32
    return %c0_i32, %c0_i32_0 : i32, i32
  }
  func.func @transform_3(%arg0: i32) -> (i32, i32) {
    %c0_i32 = arith.constant 0 : i32
    %c0_i32_0 = arith.constant 0 : i32
    %c0_i32_1 = arith.constant 0 : i32
    return %c0_i32, %c0_i32_0 : i32, i32
  }
  func.func @transform_4(%arg0: i32) -> (i32, i32) {
    %c0_i32 = arith.constant 0 : i32
    %c0_i32_0 = arith.constant 0 : i32
    %c0_i32_1 = arith.constant 0 : i32
    return %c0_i32, %c0_i32_0 : i32, i32
  }
  func.func @transform_5(%arg0: i32) -> (i32, i32) {
    %c0_i32 = arith.constant 0 : i32
    %c0_i32_0 = arith.constant 0 : i32
    %c0_i32_1 = arith.constant 0 : i32
    return %c0_i32, %c0_i32_0 : i32, i32
  }
}

module attributes {stable_mosaic.version = 11 : i64} {
  func.func @kernel(%arg0: i32, %arg1: memref<64x288xbf16, #tpu.memory_space<vmem>>, %arg2: memref<288x288xbf16, #tpu.memory_space<vmem>>, %arg3: memref<64x1xf32, #tpu.memory_space<vmem>>, %arg4: memref<64x1xf32, #tpu.memory_space<vmem>>, %arg5: memref<64x288xbf16, #tpu.memory_space<vmem>>) attributes {dimension_semantics = [#tpu.dimension_semantics<arbitrary>], iteration_bounds = array<i64: 1>, scalar_prefetch = 0 : i64, scratch_operands = 0 : i64, tpu.core_type = #tpu.core_type<tc>, window_params = [{pipeline_mode = #tpu.pipeline_mode<synchronous>, transform_indices = @transform_0, window_bounds = array<i64: 64, 288>}, {pipeline_mode = #tpu.pipeline_mode<synchronous>, transform_indices = @transform_1, window_bounds = array<i64: 288, 288>}, {pipeline_mode = #tpu.pipeline_mode<synchronous>, transform_indices = @transform_2, window_bounds = array<i64: 64, 1>}, {pipeline_mode = #tpu.pipeline_mode<synchronous>, transform_indices = @transform_3, window_bounds = array<i64: 64, 1>}, {pipeline_mode = #tpu.pipeline_mode<synchronous>, transform_indices = @transform_4, window_bounds = array<i64: 64, 288>}]} {
    %c0 = arith.constant 0 : index
    %c0_0 = arith.constant 0 : index
    %0 = vector.load %arg2[%c0, %c0_0] : memref<288x288xbf16, #tpu.memory_space<vmem>>, vector<288x288xbf16>
    %c0_1 = arith.constant 0 : index
    %c0_2 = arith.constant 0 : index
    %1 = vector.load %arg1[%c0_1, %c0_2] : memref<64x288xbf16, #tpu.memory_space<vmem>>, vector<64x288xbf16>
    %cst = arith.constant dense<0.000000e+00> : vector<64x288xf32>
    %2 = tpu.matmul %1, %0, %cst {dimension_numbers = #tpu.dot_dimension_numbers<[1], [0], [0], [1], [0, 0, 1, 1], [], []>} : vector<64x288xbf16>, vector<288x288xbf16>, vector<64x288xf32> -> vector<64x288xf32>
    %cst_3 = arith.constant dense<0.000000e+00> : vector<64xf32>
    %3 = vector.multi_reduction <add>, %2, %cst_3 [1] : vector<64x288xf32> to vector<64xf32>
    %4 = vector.shape_cast %3 : vector<64xf32> to vector<64x1xf32>
    %cst_4 = arith.constant 2.880000e+02 : f32
    %5 = vector.broadcast %cst_4 : f32 to vector<64x1xf32>
    %6 = arith.divf %4, %5 : vector<64x1xf32>
    %7 = vector.broadcast %6 : vector<64x1xf32> to vector<64x288xf32>
    %8 = arith.subf %2, %7 : vector<64x288xf32>
    %9 = arith.mulf %8, %8 : vector<64x288xf32>
    %cst_5 = arith.constant dense<0.000000e+00> : vector<64xf32>
    %10 = vector.multi_reduction <add>, %9, %cst_5 [1] : vector<64x288xf32> to vector<64xf32>
    %11 = vector.shape_cast %10 : vector<64xf32> to vector<64x1xf32>
    %cst_6 = arith.constant 2.880000e+02 : f32
    %12 = vector.broadcast %cst_6 : f32 to vector<64x1xf32>
    %13 = arith.divf %11, %12 : vector<64x1xf32>
    %cst_7 = arith.constant 9.99999974E-6 : f32
    %14 = vector.broadcast %cst_7 : f32 to vector<64x1xf32>
    %15 = arith.addf %13, %14 : vector<64x1xf32>
    %16 = math.rsqrt %15 : vector<64x1xf32>
    %17 = vector.broadcast %16 : vector<64x1xf32> to vector<64x288xf32>
    %18 = arith.mulf %8, %17 : vector<64x288xf32>
    %c0_8 = arith.constant 0 : index
    %c0_9 = arith.constant 0 : index
    %19 = vector.load %arg3[%c0_8, %c0_9] : memref<64x1xf32, #tpu.memory_space<vmem>>, vector<64x1xf32>
    %20 = vector.broadcast %19 : vector<64x1xf32> to vector<64x288xf32>
    %21 = arith.mulf %18, %20 : vector<64x288xf32>
    %c0_10 = arith.constant 0 : index
    %c0_11 = arith.constant 0 : index
    %22 = vector.load %arg4[%c0_10, %c0_11] : memref<64x1xf32, #tpu.memory_space<vmem>>, vector<64x1xf32>
    %23 = vector.broadcast %22 : vector<64x1xf32> to vector<64x288xf32>
    %24 = arith.addf %21, %23 : vector<64x288xf32>
    %cst_12 = arith.constant 0.000000e+00 : f32
    %25 = vector.broadcast %cst_12 : f32 to vector<64x288xf32>
    %26 = arith.maximumf %24, %25 : vector<64x288xf32>
    %27 = arith.truncf %26 : vector<64x288xf32> to vector<64x288xbf16>
    %c0_13 = arith.constant 0 : index
    %c0_14 = arith.constant 0 : index
    %28 = vector.load %arg5[%c0_13, %c0_14] : memref<64x288xbf16, #tpu.memory_space<vmem>>, vector<64x288xbf16>
    tpu.vector_store %arg5[%c0_13, %c0_14], %27 {strides = array<i32>} : memref<64x288xbf16, #tpu.memory_space<vmem>>, vector<64x288xbf16>,
    return
  }
  func.func @transform_0(%arg0: i32) -> (i32, i32) {
    %c0_i32 = arith.constant 0 : i32
    %c0_i32_0 = arith.constant 0 : i32
    %c0_i32_1 = arith.constant 0 : i32
    return %c0_i32, %c0_i32_0 : i32, i32
  }
  func.func @transform_1(%arg0: i32) -> (i32, i32) {
    %c0_i32 = arith.constant 0 : i32
    %c0_i32_0 = arith.constant 0 : i32
    %c0_i32_1 = arith.constant 0 : i32
    return %c0_i32, %c0_i32_0 : i32, i32
  }
  func.func @transform_2(%arg0: i32) -> (i32, i32) {
    %c0_i32 = arith.constant 0 : i32
    %c0_i32_0 = arith.constant 0 : i32
    %c0_i32_1 = arith.constant 0 : i32
    return %c0_i32, %c0_i32_0 : i32, i32
  }
  func.func @transform_3(%arg0: i32) -> (i32, i32) {
    %c0_i32 = arith.constant 0 : i32
    %c0_i32_0 = arith.constant 0 : i32
    %c0_i32_1 = arith.constant 0 : i32
    return %c0_i32, %c0_i32_0 : i32, i32
  }
  func.func @transform_4(%arg0: i32) -> (i32, i32) {
    %c0_i32 = arith.constant 0 : i32
    %c0_i32_0 = arith.constant 0 : i32
    %c0_i32_1 = arith.constant 0 : i32
    return %c0_i32, %c0_i32_0 : i32, i32
  }
}

module attributes {stable_mosaic.version = 11 : i64} {
  func.func @kernel(%arg0: i32, %arg1: memref<10x4608xbf16, #tpu.memory_space<vmem>>, %arg2: memref<4608x2xbf16, #tpu.memory_space<vmem>>, %arg3: memref<10x1xf32, #tpu.memory_space<vmem>>, %arg4: memref<10x2xf32, #tpu.memory_space<vmem>>) attributes {dimension_semantics = [#tpu.dimension_semantics<arbitrary>], iteration_bounds = array<i64: 1>, scalar_prefetch = 0 : i64, scratch_operands = 0 : i64, tpu.core_type = #tpu.core_type<tc>, window_params = [{pipeline_mode = #tpu.pipeline_mode<synchronous>, transform_indices = @transform_0, window_bounds = array<i64: 10, 4608>}, {pipeline_mode = #tpu.pipeline_mode<synchronous>, transform_indices = @transform_1, window_bounds = array<i64: 4608, 2>}, {pipeline_mode = #tpu.pipeline_mode<synchronous>, transform_indices = @transform_2, window_bounds = array<i64: 10, 1>}, {pipeline_mode = #tpu.pipeline_mode<synchronous>, transform_indices = @transform_3, window_bounds = array<i64: 10, 2>}]} {
    %c0 = arith.constant 0 : index
    %c0_0 = arith.constant 0 : index
    %0 = vector.load %arg2[%c0, %c0_0] : memref<4608x2xbf16, #tpu.memory_space<vmem>>, vector<4608x2xbf16>
    %cst = arith.constant 0.000000e+00 : bf16
    %1 = vector.broadcast %cst : bf16 to vector<4608x2xbf16>
    %2 = arith.maximumf %0, %1 : vector<4608x2xbf16>
    %c0_1 = arith.constant 0 : index
    %c0_2 = arith.constant 0 : index
    %3 = vector.load %arg1[%c0_1, %c0_2] : memref<10x4608xbf16, #tpu.memory_space<vmem>>, vector<10x4608xbf16>
    %cst_3 = arith.constant dense<0.000000e+00> : vector<10x2xf32>
    %4 = tpu.matmul %3, %2, %cst_3 {dimension_numbers = #tpu.dot_dimension_numbers<[1], [0], [0], [1], [0, 0, 1, 1], [], []>} : vector<10x4608xbf16>, vector<4608x2xbf16>, vector<10x2xf32> -> vector<10x2xf32>
    %c0_4 = arith.constant 0 : index
    %c0_5 = arith.constant 0 : index
    %5 = vector.load %arg3[%c0_4, %c0_5] : memref<10x1xf32, #tpu.memory_space<vmem>>, vector<10x1xf32>
    %6 = vector.broadcast %5 : vector<10x1xf32> to vector<10x2xf32>
    %7 = arith.addf %4, %6 : vector<10x2xf32>
    %c0_6 = arith.constant 0 : index
    %c0_7 = arith.constant 0 : index
    %8 = vector.load %arg4[%c0_6, %c0_7] : memref<10x2xf32, #tpu.memory_space<vmem>>, vector<10x2xf32>
    tpu.vector_store %arg4[%c0_6, %c0_7], %7 {strides = array<i32>} : memref<10x2xf32, #tpu.memory_space<vmem>>, vector<10x2xf32>,
    return
  }
  func.func @transform_0(%arg0: i32) -> (i32, i32) {
    %c0_i32 = arith.constant 0 : i32
    %c0_i32_0 = arith.constant 0 : i32
    %c0_i32_1 = arith.constant 0 : i32
    return %c0_i32, %c0_i32_0 : i32, i32
  }
  func.func @transform_1(%arg0: i32) -> (i32, i32) {
    %c0_i32 = arith.constant 0 : i32
    %c0_i32_0 = arith.constant 0 : i32
    %c0_i32_1 = arith.constant 0 : i32
    return %c0_i32, %c0_i32_0 : i32, i32
  }
  func.func @transform_2(%arg0: i32) -> (i32, i32) {
    %c0_i32 = arith.constant 0 : i32
    %c0_i32_0 = arith.constant 0 : i32
    %c0_i32_1 = arith.constant 0 : i32
    return %c0_i32, %c0_i32_0 : i32, i32
  }
  func.func @transform_3(%arg0: i32) -> (i32, i32) {
    %c0_i32 = arith.constant 0 : i32
    %c0_i32_0 = arith.constant 0 : i32
    %c0_i32_1 = arith.constant 0 : i32
    return %c0_i32, %c0_i32_0 : i32, i32
  }
}

</mosaic_0001>

<bundles_post_ra>
// kernel: _lambda_.10
= control target key start
LH: loop header
LB: loop body
LE: loop exit
PB: predicated region body
PF: predicated region fallthrough
CT: control target
= control target key end

     0   :  { %v444_v0 = vmov 0   ;;  %vm215_vm0 = vcmask 154624   ;;  %vm219_vm1 = vcmask 1040384   ;;  %vm220_vm2 = vcmask 1041408   ;;  %s591_s1 = inlined_call_operand.vmem [shape: bf16[147,288], index: 1, kind: input, shape index: {}]   ;;  %s592_s0 = inlined_call_operand.vmem [shape: bf16[8,147], index: 0, kind: input, shape index: {}]   ;;  %s593_s2 = inlined_call_operand.vmem [shape: f32[8,1], index: 2, kind: input, shape index: {}]   ;;  %s594_s3 = inlined_call_operand.vmem [shape: f32[8,1], index: 3, kind: input, shape index: {}]   ;;  %s595_s4 = inlined_call_operand.vmem [shape: f32[8,288], index: 4, kind: output, shape index: {}]  }
   0x1   :  { %273 = vmatprep.subr.bf16.mxu1 %v444_v0  ;;  %v401_v1 = vld [vmem:[%s591_s1 + $0x4] ss:$12 sps:$4 sm:$0xff]   ;;  %399 = vset.pattern.permute.xlu1 %v444_v0  ;;  %v403_v2 = vld [vmem:[%s591_s1 + $0x8] ss:$12 sps:$4 sm:$0xff]   ;;  %v404_v3 = vld [vmem:[%s591_s1] ss:$12 sps:$4 sm:$0xff]  }
   0x2   :  { %400 = vset.pattern.permute.xlu0 %v444_v0  ;;  %232 = vmatprep.subr.bf16.mxu0 %v401_v1  ;;  %v405_v4 = vld [vmem:[%s591_s1 + $0x1c] ss:$12 sps:$4 sm:$0xff]   ;;  %v407_v5 = vld [vmem:[%s591_s1 + $0x20] ss:$12 sps:$4 sm:$0xff]   ;;  %v408_v6 = vld [vmem:[%s591_s1 + $0x18] ss:$12 sps:$4 sm:$0xff]  }
   0x3   :  { %274 = vmatpush1.bf16.msra.mxu1 %v403_v2  ;;  %233 = vmatpush1.bf16.msra.mxu0 %v404_v3  ;;  %v409_v7 = vld [vmem:[%s591_s1 + $0x34] ss:$12 sps:$4 sm:$0xff]   ;;  %v411_v8 = vld [vmem:[%s591_s1 + $0x38] ss:$12 sps:$4 sm:$0xff]   ;;  %v412_v9 = vld [vmem:[%s591_s1 + $0x30] ss:$12 sps:$4 sm:$0xff]  }
   0x4   :  { %275 = vmatprep.subr.bf16.mxu1 %v444_v0  ;;  %234 = vmatprep.subr.bf16.mxu0 %v405_v4  ;;  %v413_v10 = vld [vmem:[%s591_s1 + $0x4c] ss:$12 sps:$4 sm:$0xff]   ;;  %v415_v11 = vld [vmem:[%s591_s1 + $0x50] ss:$12 sps:$4 sm:$0xff]   ;;  %v416_v12 = vld [vmem:[%s591_s1 + $0x48] ss:$12 sps:$4 sm:$0xff]  }
   0x5   :  { %v417_v13 = vld [vmem:[%s591_s1 + $0x64] ss:$12 sps:$4 sm:$0xff]   ;;  %v419_v14 = vld [vmem:[%s591_s1 + $0x68] ss:$12 sps:$4 sm:$0xff]   ;;  %v420_v15 = vld [vmem:[%s591_s1 + $0x60] ss:$12 sps:$4 sm:$0xff]  }
   0x6   :  { %v421_v16 = vld [vmem:[%s591_s1 + $0x7c] ss:$12 sps:$4 sm:$0xff]   ;;  %v423_v17 = vld [vmem:[%s591_s1 + $0x80] ss:$12 sps:$4 sm:$0xff]   ;;  %v424_v18 = vld [vmem:[%s591_s1 + $0x78] ss:$12 sps:$4 sm:$0xff]  }
   0x7   :  { %276 = vmatpush1.bf16.msra.mxu1 %v407_v5  ;;  %235 = vmatpush1.bf16.msra.mxu0 %v408_v6  ;;  %v425_v19 = vld [vmem:[%s591_s1 + $0x94] ss:$12 sps:$4 sm:$0xff]   ;;  %v427_v22 = vld [vmem:[%s591_s1 + $0x98] ss:$12 sps:$4 sm:$0xff]   ;;  %v428_v23 = vld [vmem:[%s591_s1 + $0x90] ss:$12 sps:$4 sm:$0xff]  }
   0x8   :  { %277 = vmatprep.subr.bf16.mxu1 %v444_v0  ;;  %236 = vmatprep.subr.bf16.mxu0 %v409_v7  ;;  %v56_v20 = vld [vmem:[%s592_s0] sm:$0xff]  ;;  %v429_v24 = vld [vmem:[%s591_s1 + $0xac] ss:$12 sps:$4 sm:$0xff]   ;;  %v431_v26 = vld [vmem:[%s591_s1 + $0xb0] ss:$12 sps:$4 sm:$0xff]   ;;  %v445_v27 = vmov 65535  }
   0x9   :  { %v364_v21 = vcombine.high %v56_v20, %v56_v20  ;;  %v54_v25 = vld [vmem:[%s591_s1 + $0xd8] sm:$0x33]  ;;  %v221_v28 = vsel %vm219_vm1, 4294967295, %v445_v27  ;;  %v432_v29 = vld [vmem:[%s591_s1 + $0xa8] ss:$12 sps:$4 sm:$0xff]   ;;  %v363_v40 = vcombine.low %v56_v20, %v56_v20  ;;  %vm314_vm3 = vcmask 261120  }
   0xa   :  { %v433_v30 = vld [vmem:[%s591_s1 + $0xc4] ss:$12 sps:$4 sm:$0xff]   ;;  %v393_v31 = vcombine.high %v54_v25, %v54_v25  ;;  %v222_v32 = vsel %vm220_vm2, %v221_v28, 0  ;;  %v435_v33 = vld [vmem:[%s591_s1 + $0xc8] ss:$12 sps:$4 sm:$0xff]   ;;  %v392_v36 = vcombine.low %v54_v25, %v54_v25 }
   0xb   :  { %278 = vmatpush1.bf16.msra.mxu1 %v411_v8  ;;  %237 = vmatpush1.bf16.msra.mxu0 %v412_v9  ;;  %v438_v34 = vld [vmem:[%s591_s1 + $0xe0] ss:$0 sps:$4 sm:$0x33]  }
   0xc   :  { %279 = vmatprep.subr.bf16.mxu1 %v444_v0  ;;  %238 = vmatprep.subr.bf16.mxu0 %v413_v10  ;;  %v436_v35 = vld [vmem:[%s591_s1 + $0xc0] ss:$12 sps:$4 sm:$0xff]   ;;  %v227_v37 = vand.u32 %v393_v31, %v222_v32  ;;  %v230_v38 = vand.u32 %v438_v34, %v222_v32  ;;  %v224_v39 = vand.u32 %v392_v36, %v222_v32 }
   0xd   :  { %396 = vmatprep.mubr.msk.bf16.mxu1 %vm215_vm0, %v364_v21  ;;  %395 = vmatprep.mubr.msk.bf16.mxu0 %vm215_vm0, %v364_v21  ;;  %v338_v52 = vld [vmem:[%s593_s2] sm:$0xff] }
   0xe   :  { %341 = vperm.xlu1 %399, %v338_v52   ;;  %v347_v53 = vld [vmem:[%s594_s3] sm:$0xff] }
   0xf   :  { %280 = vmatpush1.bf16.msra.mxu1 %v415_v11  ;;  %239 = vmatpush1.bf16.msra.mxu0 %v416_v12 }
  0x10   :  { %281 = vmatprep.subr.bf16.mxu1 %v444_v0  ;;  %240 = vmatprep.subr.bf16.mxu0 %v417_v13 }
  0x12   :  { %350 = vperm.xlu1 %399, %v347_v53  }
  0x13   :  { %282 = vmatpush1.bf16.msra.mxu1 %v419_v14  ;;  %241 = vmatpush1.bf16.msra.mxu0 %v420_v15 }
  0x14   :  { %283 = vmatprep.subr.bf16.mxu1 %v444_v0  ;;  %242 = vmatprep.subr.bf16.mxu0 %v421_v16 }
  0x17   :  { %284 = vmatpush1.bf16.msra.mxu1 %v423_v17  ;;  %243 = vmatpush1.bf16.msra.mxu0 %v424_v18 }
  0x18   :  { %285 = vmatprep.subr.bf16.mxu1 %v444_v0  ;;  %244 = vmatprep.subr.bf16.mxu0 %v425_v19 }
  0x1b   :  { %286 = vmatpush1.bf16.msra.mxu1 %v427_v22  ;;  %245 = vmatpush1.bf16.msra.mxu0 %v428_v23 }
  0x1c   :  { %287 = vmatprep.subr.bf16.mxu1 %v444_v0  ;;  %246 = vmatprep.subr.bf16.mxu0 %v429_v24 }
  0x1f   :  { %288 = vmatpush1.bf16.msra.mxu1 %v431_v26  ;;  %247 = vmatpush1.bf16.msra.mxu0 %v432_v29 }
  0x20   :  { %289 = vmatprep.subr.bf16.mxu1 %v444_v0  ;;  %248 = vmatprep.subr.bf16.mxu0 %v433_v30 }
  0x23   :  { %290 = vmatpush1.bf16.msra.mxu1 %v435_v33  ;;  %249 = vmatpush1.bf16.msra.mxu0 %v436_v35 }
  0x24   :  { %291 = vmatprep.subr.bf16.mxu1 %v444_v0  ;;  %250 = vmatprep.subr.bf16.mxu0 %v227_v37 }
  0x27   :  { %292 = vmatpush1.bf16.msra.mxu1 %v230_v38  ;;  %251 = vmatpush1.bf16.msra.mxu0 %v224_v39 }
  0x2a   :  { %306 = vmatmul.mubr.bf16.vlgmr.msra.gmra.mrb[0].mxu1 %v363_v40  ;;  %265 = vmatmul.mubr.bf16.vlgmr.msra.gmra.mrb[0].mxu0 %v363_v40 }
  0x8d   :  { %v342_v4 = vpop.permute.xlu1 %341 }
  0x91   :  { %v351_v12 = vpop.permute.xlu1 %350 }
  0xfd   :  { %v307_v41 = vpop.f32.mrb[0].mxu1  ;;  %v266_v42 = vpop.f32.mrb[0].mxu0 }
  0xfe   :  { %v309_v43 = vpop.f32.mrb[1].mxu1  ;;  %v268_v44 = vpop.f32.mrb[1].mxu0  ;;  %v315_v46 = vsel %vm314_vm3, %v307_v41, 0.0 }
  0xff   :  { %v310_v45 = vpop.f32.mrb[2].mxu1  ;;  %v313_v47 = vadd.f32 %v268_v44, %v266_v42  ;;  %v270_v48 = vpop.f32.mrb[2].mxu0 }
 0x100   :  { %v311_v49 = vpop.f32.mrb[3].mxu1  ;;  %v271_v50 = vpop.f32.mrb[3].mxu0 }
 0x101   :  { %v316_v51 = vadd.f32 %v315_v46, %v313_v47 }
 0x103   :  { %317 = vadd.xlane.f32.xlu0 %v316_v51 }
 0x190   :  { %v318_v54 = vpop.xlane.xlu0 %317 }
 0x191   :  { %v320_v55 = vmul.f32 0.0034722222, %v318_v54 }
 0x193   :  { %v321_v56 = vsub.f32 %v266_v42, %v320_v55  ;;  %v322_v57 = vsub.f32 %v268_v44, %v320_v55  ;;  %v323_v58 = vsub.f32 %v307_v41, %v320_v55 }
 0x195   :  { %v324_v59 = vmul.f32 %v321_v56, %v321_v56  ;;  %v325_v60 = vmul.f32 %v322_v57, %v322_v57  ;;  %v326_v61 = vmul.f32 %v323_v58, %v323_v58 }
 0x197   :  { %v327_v62 = vadd.f32 %v325_v60, %v324_v59  ;;  %v328_v63 = vsel %vm314_vm3, %v326_v61, 0.0 }
 0x199   :  { %v329_v0 = vadd.f32 %v328_v63, %v327_v62 }
 0x19b   :  { %330 = vadd.xlane.f32.xlu0 %v329_v0 }
 0x228   :  { %v331_v1 = vpop.xlane.xlu0 %330 }
 0x229   :  { %v332_v2 = vmul.f32 0.0034722222, %v331_v1 }
 0x22b   :  { %v333_v3 = vadd.f32 1e-05, %v332_v2 }
 0x22d   :  { %442 = vrsqrt.f32 %v333_v3 }
 0x237   :  { %v443_v5 = vpop.eup %442 }
 0x238   :  { %v335_v6 = vmul.f32 %v443_v5, %v321_v56  ;;  %v336_v7 = vmul.f32 %v443_v5, %v322_v57  ;;  %v337_v8 = vmul.f32 %v443_v5, %v323_v58 }
 0x23a   :  { %v344_v9 = vmul.f32 %v342_v4, %v335_v6  ;;  %v345_v10 = vmul.f32 %v342_v4, %v336_v7  ;;  %v346_v11 = vmul.f32 %v342_v4, %v337_v8 }
 0x23c   :  { %v353_v13 = vadd.f32 %v351_v12, %v344_v9  ;;  %v354_v14 = vadd.f32 %v351_v12, %v345_v10  ;;  %v355_v15 = vadd.f32 %v351_v12, %v346_v11 }
 0x23e   :  { %356 = vst [vmem:[%s595_s4] sm:$0xff] %v353_v13  ;;  %357 = vst [vmem:[%s595_s4 + $0x8] sm:$0xff] %v354_v14 }
 0x23f   :  { %358 = vst.msk [vmem:[%s595_s4 + $0x10] sm:$0xff] %vm314_vm3, %v355_v15 }

// kernel: _lambda_.11
= control target key start
LH: loop header
LB: loop body
LE: loop exit
PB: predicated region body
PF: predicated region fallthrough
CT: control target
= control target key end

     0   :  { %vm43_vm0 = vcmask 1043456   ;;  %v371_v1 = vmov 0.0   ;;  %v372_v3 = vmov 0   ;;  %vm373_vm1 = vmmov 0   ;;  %s471_s2 = inlined_call_operand.vmem [shape: bf16[8,288], index: 2, kind: input, shape index: {}]   ;;  %s472_s3 = inlined_call_operand.vmem [shape: bf16[8,288], index: 3, kind: input, shape index: {}]   ;;  %s473_s0 = inlined_call_operand.vmem [shape: bf16[8,8], index: 0, kind: input, shape index: {}]   ;;  %s474_s1 = inlined_call_operand.vmem [shape: bf16[8,8], index: 1, kind: input, shape index: {}]   ;;  %s475_s4 = inlined_call_operand.vmem [shape: f32[16,1], index: 4, kind: input, shape index: {}]   ;;  %s476_s5 = inlined_call_operand.vmem [shape: f32[16,1], index: 5, kind: input, shape index: {}]   ;;  %s477_s6 = inlined_call_operand.vmem [shape: f32[16,288], index: 6, kind: output, shape index: {}]  }
   0x1   :  { %v29_v0 = vld [vmem:[%s471_s2] sm:$0xff]  ;;  %344 = vmatprep.subr.bf16.mxu1 %v371_v1  ;;  %v363_v2 = vld [vmem:[%s471_s2 + $0x8] ss:$0 sps:$4 sm:$0xff]   ;;  %85 = vmatprep.mubr.bf16.mxu0 %v372_v3  ;;  %vm39_vm2 = vcmask 64512   ;;  %vm239_vm3 = vcmask 261120  }
   0x2   :  { %v329_v4 = vcombine.high %v29_v0, %v29_v0  ;;  %v328_v5 = vcombine.low %v29_v0, %v29_v0  ;;  %346 = vmatprep.mubr.msk.bf16.mxu1 %vm373_vm1, %v371_v1  ;;  %v135_v6 = vld [vmem:[%s472_s3] sm:$0xff]  ;;  %360 = vset.pattern.permute.xlu1 %v372_v3  ;;  %v51_v7 = vsel %vm43_vm0, %v363_v2, 0  ;;  %v366_v10 = vld [vmem:[%s472_s3 + $0x8] ss:$0 sps:$4 sm:$0xff]  }
   0x3   :  { %v335_v8 = vcombine.high %v135_v6, %v135_v6  ;;  %v334_v9 = vcombine.low %v135_v6, %v135_v6  ;;  %359 = vset.pattern.permute.xlu0 %v372_v3  ;;  %345 = vmatpush3.bf16.msra.mxu1 %v51_v7  ;;  %v28_v12 = vld [vmem:[%s473_s0] sm:$0xf]  ;;  %v155_v13 = vsel %vm43_vm0, %v366_v10, 0  ;;  %v25_v16 = vld [vmem:[%s475_s4 + $0x8] sm:$0xff] }
   0x4   :  { %331 = vmatprep.subr.msk.bf16.mxu0 %vm43_vm0, %v329_v4  ;;  %v45_v11 = vsel %vm43_vm0, %v328_v5, 0  ;;  %350 = vmatprep.subr.bf16.mxu1 %v371_v1  ;;  %v134_v15 = vld [vmem:[%s474_s1] sm:$0xf]  ;;  %v27_v63 = vld [vmem:[%s476_s5 + $0x8] sm:$0xff] }
   0x5   :  { %54 = vmatpush1.bf16.msra.mxu0 %v45_v11  ;;  %v149_v14 = vsel %vm43_vm0, %v334_v9, 0  ;;  %307 = vperm.xlu1 %360, %v25_v16   ;;  %v26_v17 = vld [vmem:[%s476_s5] sm:$0xff] }
   0x6   :  { %337 = vmatprep.subr.msk.bf16.mxu0 %vm43_vm0, %v335_v8  ;;  %347 = vmatmul.mubr.msk.bf16.vlgmr.msra.gmra.mrb[0].mxu1 %vm39_vm2, %v28_v12  ;;  %v24_v40 = vld [vmem:[%s475_s4] sm:$0xff] }
   0x7   :  { %351 = vmatpush3.bf16.msra.mxu1 %v155_v13  ;;  %352 = vmatprep.mubr.msk.bf16.mxu1 %vm373_vm1, %v371_v1 }
   0x8   :  { %332 = vmatmul.mubr.msk.bf16.vlgmr.msra.gmra.mrb[0].mxu0 %vm39_vm2, %v28_v12 }
   0x9   :  { %158 = vmatpush1.bf16.msra.mxu0 %v149_v14  ;;  %189 = vmatprep.mubr.bf16.mxu0 %v372_v3 }
   0xa   :  { %273 = vperm.xlu1 %360, %v26_v17  }
   0xe   :  { %353 = vmatmul.mubr.msk.bf16.vlgmr.msra.gmra.mrb[4].mxu1 %vm39_vm2, %v134_v15 }
  0x10   :  { %338 = vmatmul.mubr.msk.bf16.vlgmr.msra.gmra.mrb[4].mxu0 %vm39_vm2, %v134_v15 }
  0x84   :  { %v308_v0 = vpop.permute.xlu1 %307 }
  0x89   :  { %v274_v1 = vpop.permute.xlu1 %273 }
  0xd9   :  { %v128_v18 = vpop.f32.mrb[0].mxu1 }
  0xda   :  { %v348_v20 = vpop.f32.mrb[1].mxu1  ;;  %v240_v23 = vsel %vm239_vm3, %v128_v18, 0.0 }
  0xdb   :  { %v87_v19 = vpop.f32.mrb[0].mxu0  ;;  %v131_v22 = vpop.f32.mrb[2].mxu1 }
  0xdc   :  { %v89_v21 = vpop.f32.mrb[1].mxu0  ;;  %v349_v26 = vpop.f32.mrb[3].mxu1 }
  0xdd   :  { %v238_v24 = vadd.f32 %v89_v21, %v87_v19  ;;  %v91_v25 = vpop.f32.mrb[2].mxu0 }
  0xde   :  { %v92_v27 = vpop.f32.mrb[3].mxu0 }
  0xdf   :  { %v241_v28 = vadd.f32 %v240_v23, %v238_v24 }
  0xe1   :  { %242 = vadd.xlane.f32.xlu0 %v241_v28  ;;  %v232_v29 = vpop.f32.mrb[4].mxu1 }
  0xe2   :  { %v354_v31 = vpop.f32.mrb[5].mxu1  ;;  %v283_v32 = vsel %vm239_vm3, %v232_v29, 0.0 }
  0xe3   :  { %v191_v30 = vpop.f32.mrb[4].mxu0  ;;  %v235_v34 = vpop.f32.mrb[6].mxu1 }
  0xe4   :  { %v193_v33 = vpop.f32.mrb[5].mxu0  ;;  %v355_v37 = vpop.f32.mrb[7].mxu1 }
  0xe5   :  { %v282_v35 = vadd.f32 %v193_v33, %v191_v30  ;;  %v195_v36 = vpop.f32.mrb[6].mxu0 }
  0xe6   :  { %v196_v38 = vpop.f32.mrb[7].mxu0 }
  0xe7   :  { %v284_v39 = vadd.f32 %v283_v32, %v282_v35 }
  0xe9   :  { %285 = vadd.xlane.f32.xlu0 %v284_v39 }
  0xff   :  { %265 = vperm.xlu0 %359, %v24_v40  }
 0x16e   :  { %v243_v41 = vpop.xlane.xlu0 %242 }
 0x16f   :  { %v245_v42 = vmul.f32 0.0034722222, %v243_v41 }
 0x171   :  { %v246_v43 = vsub.f32 %v87_v19, %v245_v42  ;;  %v247_v44 = vsub.f32 %v89_v21, %v245_v42  ;;  %v248_v45 = vsub.f32 %v128_v18, %v245_v42 }
 0x173   :  { %v249_v46 = vmul.f32 %v246_v43, %v246_v43  ;;  %v250_v47 = vmul.f32 %v247_v44, %v247_v44  ;;  %v251_v48 = vmul.f32 %v248_v45, %v248_v45 }
 0x175   :  { %v252_v49 = vadd.f32 %v250_v47, %v249_v46  ;;  %v253_v50 = vsel %vm239_vm3, %v251_v48, 0.0 }
 0x176   :  { %v286_v51 = vpop.xlane.xlu0 %285 }
 0x177   :  { %v287_v52 = vmul.f32 0.0034722222, %v286_v51  ;;  %v254_v53 = vadd.f32 %v253_v50, %v252_v49 }
 0x179   :  { %v288_v54 = vsub.f32 %v191_v30, %v287_v52  ;;  %v289_v55 = vsub.f32 %v193_v33, %v287_v52  ;;  %v290_v56 = vsub.f32 %v232_v29, %v287_v52  ;;  %255 = vadd.xlane.f32.xlu1 %v254_v53 }
 0x17b   :  { %v291_v57 = vmul.f32 %v288_v54, %v288_v54  ;;  %v292_v58 = vmul.f32 %v289_v55, %v289_v55  ;;  %v293_v59 = vmul.f32 %v290_v56, %v290_v56 }
 0x17d   :  { %v294_v60 = vadd.f32 %v292_v58, %v291_v57  ;;  %v295_v61 = vsel %vm239_vm3, %v293_v59, 0.0 }
 0x17e   :  { %v266_v9 = vpop.permute.xlu0 %265 }
 0x17f   :  { %v296_v62 = vadd.f32 %v295_v61, %v294_v60 }
 0x181   :  { %297 = vadd.xlane.f32.xlu1 %v296_v62 }
 0x192   :  { %315 = vperm.xlu1 %360, %v27_v63  }
 0x206   :  { %v256_v2 = vpop.xlane.xlu1 %255 }
 0x207   :  { %v257_v3 = vmul.f32 0.0034722222, %v256_v2 }
 0x209   :  { %v258_v4 = vadd.f32 1e-05, %v257_v3 }
 0x20b   :  { %367 = vrsqrt.f32 %v258_v4 }
 0x20e   :  { %v298_v5 = vpop.xlane.xlu1 %297 }
 0x20f   :  { %v299_v6 = vmul.f32 0.0034722222, %v298_v5 }
 0x211   :  { %v300_v7 = vadd.f32 1e-05, %v299_v6 }
 0x212   :  { %v316_v26 = vpop.permute.xlu1 %315 }
 0x213   :  { %369 = vrsqrt.f32 %v300_v7 }
 0x215   :  { %v368_v8 = vpop.eup %367 }
 0x216   :  { %v260_v10 = vmul.f32 %v368_v8, %v246_v43  ;;  %v261_v11 = vmul.f32 %v368_v8, %v247_v44  ;;  %v262_v12 = vmul.f32 %v368_v8, %v248_v45 }
 0x218   :  { %v268_v13 = vmul.f32 %v266_v9, %v260_v10  ;;  %v269_v14 = vmul.f32 %v266_v9, %v261_v11  ;;  %v270_v15 = vmul.f32 %v266_v9, %v262_v12 }
 0x21a   :  { %v276_v16 = vadd.f32 %v274_v1, %v268_v13  ;;  %v277_v17 = vadd.f32 %v274_v1, %v269_v14  ;;  %v278_v18 = vadd.f32 %v274_v1, %v270_v15 }
 0x21c   :  { %279 = vst [vmem:[%s477_s6] sm:$0xff] %v276_v16  ;;  %280 = vst [vmem:[%s477_s6 + $0x8] sm:$0xff] %v277_v17 }
 0x21d   :  { %281 = vst.msk [vmem:[%s477_s6 + $0x10] sm:$0xff] %vm239_vm3, %v278_v18  ;;  %v370_v19 = vpop.eup %369 }
 0x21e   :  { %v302_v20 = vmul.f32 %v370_v19, %v288_v54  ;;  %v303_v21 = vmul.f32 %v370_v19, %v289_v55  ;;  %v304_v22 = vmul.f32 %v370_v19, %v290_v56 }
 0x220   :  { %v310_v23 = vmul.f32 %v308_v0, %v302_v20  ;;  %v311_v24 = vmul.f32 %v308_v0, %v303_v21  ;;  %v312_v25 = vmul.f32 %v308_v0, %v304_v22 }
 0x222   :  { %v318_v27 = vadd.f32 %v316_v26, %v310_v23  ;;  %v319_v28 = vadd.f32 %v316_v26, %v311_v24  ;;  %v320_v29 = vadd.f32 %v316_v26, %v312_v25 }
 0x224   :  { %321 = vst [vmem:[%s477_s6 + $0x18] sm:$0xff] %v318_v27  ;;  %322 = vst [vmem:[%s477_s6 + $0x20] sm:$0xff] %v319_v28 }
 0x225   :  { %323 = vst.msk [vmem:[%s477_s6 + $0x28] sm:$0xff] %vm239_vm3, %v320_v29 }

// kernel: _lambda_.12
= control target key start
LH: loop header
LB: loop body
LE: loop exit
PB: predicated region body
PF: predicated region fallthrough
CT: control target
= control target key end

     0   :  { %v408_v0 = vmov 0.0   ;;  %vm409_vm0 = vmmov 0   ;;  %v410_v3 = vmov 0   ;;  %vm119_vm1 = vcmask 1043456   ;;  %s509_s1 = inlined_call_operand.vmem [shape: bf16[72,288], index: 1, kind: input, shape index: {}]   ;;  %s510_s0 = inlined_call_operand.vmem [shape: bf16[16,72], index: 0, kind: input, shape index: {}]   ;;  %s511_s2 = inlined_call_operand.vmem [shape: f32[16,1], index: 2, kind: input, shape index: {}]   ;;  %s512_s3 = inlined_call_operand.vmem [shape: f32[16,1], index: 3, kind: input, shape index: {}]   ;;  %s513_s4 = inlined_call_operand.vmem [shape: bf16[16,288], index: 4, kind: output, shape index: {}]  }
   0x1   :  { %365 = vmatprep.subr.bf16.mxu1 %v408_v0  ;;  %v384_v1 = vld [vmem:[%s509_s1 + $0x4] ss:$12 sps:$4 sm:$0xff]   ;;  %375 = vmatprep.mubr.msk.bf16.mxu1 %vm409_vm0, %v408_v0  ;;  %v386_v2 = vld [vmem:[%s509_s1 + $0x8] ss:$12 sps:$4 sm:$0xff]   ;;  %v387_v4 = vld [vmem:[%s509_s1] ss:$12 sps:$4 sm:$0xff]  }
   0x2   :  { %161 = vmatprep.mubr.bf16.mxu0 %v410_v3  ;;  %383 = vset.pattern.permute.xlu1 %v410_v3  ;;  %v388_v5 = vld [vmem:[%s509_s1 + $0x1c] ss:$12 sps:$4 sm:$0xff]   ;;  %v390_v6 = vld [vmem:[%s509_s1 + $0x20] ss:$12 sps:$4 sm:$0xff]   ;;  %v391_v7 = vld [vmem:[%s509_s1 + $0x18] ss:$12 sps:$4 sm:$0xff]  }
   0x3   :  { %129 = vmatprep.subr.bf16.mxu0 %v384_v1  ;;  %382 = vset.pattern.permute.xlu0 %v410_v3  ;;  %v392_v8 = vld [vmem:[%s509_s1 + $0x34] ss:$12 sps:$4 sm:$0xff]   ;;  %v394_v9 = vld [vmem:[%s509_s1 + $0x38] ss:$12 sps:$4 sm:$0xff]   ;;  %v395_v10 = vld [vmem:[%s509_s1 + $0x30] ss:$12 sps:$4 sm:$0xff]  }
   0x4   :  { %366 = vmatpush3.bf16.msra.mxu1 %v386_v2  ;;  %130 = vmatpush1.bf16.msra.mxu0 %v387_v4  ;;  %v396_v11 = vld [vmem:[%s509_s1 + $0x4c] ss:$12 sps:$4 sm:$0xff]   ;;  %v34_v12 = vld [vmem:[%s509_s1 + $0x60] sm:$0xff]  ;;  %v398_v13 = vld [vmem:[%s509_s1 + $0x50] ss:$12 sps:$4 sm:$0xff]   ;;  %vm115_vm2 = vcmask 588800  }
   0x5   :  { %367 = vmatprep.subr.bf16.mxu1 %v408_v0  ;;  %131 = vmatprep.subr.bf16.mxu0 %v388_v5  ;;  %v399_v14 = vld [vmem:[%s509_s1 + $0x48] ss:$12 sps:$4 sm:$0xff]   ;;  %v346_v16 = vcombine.high %v34_v12, %v34_v12  ;;  %v345_v17 = vcombine.low %v34_v12, %v34_v12  ;;  %v403_v20 = vld [vmem:[%s510_s0] sm:$0xff]   ;;  %vm214_vm3 = vcmask 261120   ;;  %vm324_vm4 = vcmask 257024  }
   0x6   :  { %v401_v15 = vld [vmem:[%s509_s1 + $0x68] ss:$0 sps:$4 sm:$0xff]   ;;  %v279_v22 = vld [vmem:[%s512_s3] sm:$0xff] }
   0x7   :  { %v127_v18 = vsel %vm119_vm1, %v401_v15, 0  ;;  %v121_v19 = vsel %vm119_vm1, %v345_v17, 0  ;;  %v262_v21 = vld [vmem:[%s511_s2 + $0x8] sm:$0xff]  ;;  %v261_v37 = vld [vmem:[%s511_s2] sm:$0xff] }
   0x8   :  { %368 = vmatpush3.bf16.msra.mxu1 %v390_v6  ;;  %132 = vmatpush1.bf16.msra.mxu0 %v391_v7  ;;  %v280_v60 = vld [vmem:[%s512_s3 + $0x8] sm:$0xff] }
   0x9   :  { %369 = vmatprep.subr.bf16.mxu1 %v408_v0  ;;  %133 = vmatprep.subr.bf16.mxu0 %v392_v8 }
   0xa   :  { %270 = vperm.xlu1 %383, %v262_v21  }
   0xc   :  { %370 = vmatpush3.bf16.msra.mxu1 %v394_v9  ;;  %134 = vmatpush1.bf16.msra.mxu0 %v395_v10 }
   0xd   :  { %371 = vmatprep.subr.bf16.mxu1 %v408_v0  ;;  %135 = vmatprep.subr.bf16.mxu0 %v396_v11 }
   0xe   :  { %283 = vperm.xlu1 %383, %v279_v22  }
  0x10   :  { %372 = vmatpush3.bf16.msra.mxu1 %v398_v13  ;;  %136 = vmatpush1.bf16.msra.mxu0 %v399_v14 }
  0x11   :  { %373 = vmatprep.subr.bf16.mxu1 %v408_v0  ;;  %348 = vmatprep.subr.msk.bf16.mxu0 %vm119_vm1, %v346_v16 }
  0x14   :  { %374 = vmatpush3.bf16.msra.mxu1 %v127_v18  ;;  %138 = vmatpush1.bf16.msra.mxu0 %v121_v19 }
  0x17   :  { %376 = vmatmul.mubr.msk.bf16.vlgmr.msra.gmra.mrb[0].mxu1 %vm115_vm2, %v403_v20  ;;  %349 = vmatmul.mubr.msk.bf16.vlgmr.msra.gmra.mrb[0].mxu0 %vm115_vm2, %v403_v20 }
  0x89   :  { %v271_v61 = vpop.permute.xlu1 %270 }
  0x8d   :  { %v284_v62 = vpop.permute.xlu1 %283 }
  0xea   :  { %v206_v23 = vpop.f32.mrb[0].mxu1  ;;  %v163_v24 = vpop.f32.mrb[0].mxu0 }
  0xeb   :  { %v377_v25 = vpop.f32.mrb[1].mxu1  ;;  %v165_v26 = vpop.f32.mrb[1].mxu0  ;;  %v215_v28 = vsel %vm214_vm3, %v206_v23, 0.0 }
  0xec   :  { %v209_v27 = vpop.f32.mrb[2].mxu1  ;;  %v213_v29 = vadd.f32 %v165_v26, %v163_v24  ;;  %v167_v30 = vpop.f32.mrb[2].mxu0 }
  0xed   :  { %v378_v31 = vpop.f32.mrb[3].mxu1  ;;  %v169_v32 = vpop.f32.mrb[3].mxu0  ;;  %v220_v35 = vsel %vm214_vm3, %v209_v27, 0.0 }
  0xee   :  { %v219_v33 = vadd.f32 %v169_v32, %v167_v30  ;;  %v216_v34 = vadd.f32 %v215_v28, %v213_v29 }
  0xf0   :  { %217 = vadd.xlane.f32.xlu0 %v216_v34  ;;  %v221_v36 = vadd.f32 %v220_v35, %v219_v33 }
  0xf4   :  { %222 = vadd.xlane.f32.xlu0 %v221_v36 }
 0x10a   :  { %265 = vperm.xlu0 %382, %v261_v37  }
 0x17d   :  { %v218_v38 = vpop.xlane.xlu0 %217 }
 0x17e   :  { %v225_v39 = vmul.f32 0.0034722222, %v218_v38 }
 0x180   :  { %v227_v40 = vsub.f32 %v163_v24, %v225_v39  ;;  %v228_v41 = vsub.f32 %v165_v26, %v225_v39  ;;  %v229_v42 = vsub.f32 %v206_v23, %v225_v39 }
 0x181   :  { %v223_v43 = vpop.xlane.xlu0 %222 }
 0x182   :  { %v226_v44 = vmul.f32 0.0034722222, %v223_v43  ;;  %v233_v45 = vmul.f32 %v227_v40, %v227_v40  ;;  %v234_v46 = vmul.f32 %v228_v41, %v228_v41  ;;  %v235_v47 = vmul.f32 %v229_v42, %v229_v42 }
 0x184   :  { %v230_v48 = vsub.f32 %v167_v30, %v226_v44  ;;  %v231_v49 = vsub.f32 %v169_v32, %v226_v44  ;;  %v232_v50 = vsub.f32 %v209_v27, %v226_v44  ;;  %v239_v51 = vadd.f32 %v234_v46, %v233_v45 }
 0x185   :  { %v240_v52 = vsel %vm214_vm3, %v235_v47, 0.0 }
 0x186   :  { %v241_v53 = vadd.f32 %v240_v52, %v239_v51  ;;  %v236_v54 = vmul.f32 %v230_v48, %v230_v48  ;;  %v237_v55 = vmul.f32 %v231_v49, %v231_v49  ;;  %v238_v56 = vmul.f32 %v232_v50, %v232_v50 }
 0x188   :  { %242 = vadd.xlane.f32.xlu1 %v241_v53  ;;  %v244_v57 = vadd.f32 %v237_v55, %v236_v54  ;;  %v245_v58 = vsel %vm214_vm3, %v238_v56, 0.0 }
 0x189   :  { %v266_v6 = vpop.permute.xlu0 %265 }
 0x18a   :  { %v246_v59 = vadd.f32 %v245_v58, %v244_v57 }
 0x18c   :  { %247 = vadd.xlane.f32.xlu1 %v246_v59 }
 0x19d   :  { %288 = vperm.xlu1 %383, %v280_v60  }
 0x215   :  { %v243_v63 = vpop.xlane.xlu1 %242 }
 0x216   :  { %v249_v0 = vmul.f32 0.0034722222, %v243_v63 }
 0x218   :  { %v251_v1 = vadd.f32 1e-05, %v249_v0 }
 0x219   :  { %v248_v2 = vpop.xlane.xlu1 %247 }
 0x21a   :  { %404 = vrsqrt.f32 %v251_v1  ;;  %v250_v3 = vmul.f32 0.0034722222, %v248_v2 }
 0x21c   :  { %v252_v4 = vadd.f32 1e-05, %v250_v3 }
 0x21d   :  { %v289_v24 = vpop.permute.xlu1 %288 }
 0x21e   :  { %406 = vrsqrt.f32 %v252_v4 }
 0x224   :  { %v405_v5 = vpop.eup %404 }
 0x225   :  { %v255_v7 = vmul.f32 %v405_v5, %v227_v40  ;;  %v256_v8 = vmul.f32 %v405_v5, %v228_v41  ;;  %v257_v9 = vmul.f32 %v405_v5, %v229_v42 }
 0x227   :  { %v273_v10 = vmul.f32 %v266_v6, %v255_v7  ;;  %v274_v11 = vmul.f32 %v266_v6, %v256_v8  ;;  %v275_v12 = vmul.f32 %v266_v6, %v257_v9 }
 0x228   :  { %v407_v13 = vpop.eup %406 }
 0x229   :  { %v258_v14 = vmul.f32 %v407_v13, %v230_v48  ;;  %v259_v15 = vmul.f32 %v407_v13, %v231_v49  ;;  %v260_v16 = vmul.f32 %v407_v13, %v232_v50  ;;  %v291_v17 = vadd.f32 %v284_v62, %v273_v10 }
 0x22a   :  { %v292_v18 = vadd.f32 %v284_v62, %v274_v11  ;;  %v293_v19 = vadd.f32 %v284_v62, %v275_v12 }
 0x22b   :  { %v276_v20 = vmul.f32 %v271_v61, %v258_v14  ;;  %v277_v21 = vmul.f32 %v271_v61, %v259_v15  ;;  %v278_v22 = vmul.f32 %v271_v61, %v260_v16  ;;  %v297_v23 = vmax.f32 %v291_v17, 0.0 }
 0x22c   :  { %v298_v25 = vmax.f32 %v292_v18, 0.0  ;;  %v299_v26 = vmax.f32 %v293_v19, 0.0 }
 0x22d   :  { %v294_v27 = vadd.f32 %v289_v24, %v276_v20  ;;  %v295_v28 = vadd.f32 %v289_v24, %v277_v21  ;;  %v296_v29 = vadd.f32 %v289_v24, %v278_v22 }
 0x22e   :  { %v355_v30 = vpack.c.bf16 %v298_v25, %v297_v23  ;;  %v356_v31 = vpack.c.bf16 %v299_v26, %v299_v26 }
 0x22f   :  { %v300_v32 = vmax.f32 %v294_v27, 0.0  ;;  %v301_v33 = vmax.f32 %v295_v28, 0.0  ;;  %v302_v34 = vmax.f32 %v296_v29, 0.0 }
 0x230   :  { %323 = vst [vmem:[%s513_s4] sm:$0xff] %v355_v30  ;;  %325 = vst.msk [vmem:[%s513_s4 + $0x8] sm:$0xf] %vm324_vm4, %v356_v31 }
 0x231   :  { %v357_v35 = vpack.c.bf16 %v301_v33, %v300_v32  ;;  %v358_v36 = vpack.c.bf16 %v302_v34, %v302_v34 }
 0x233   :  { %326 = vst [vmem:[%s513_s4 + $0xc] sm:$0xff] %v357_v35  ;;  %327 = vst.msk [vmem:[%s513_s4 + $0x14] sm:$0xf] %vm324_vm4, %v358_v36 }

// kernel: _lambda_.13
= control target key start
LH: loop header
LB: loop body
LE: loop exit
PB: predicated region body
PF: predicated region fallthrough
CT: control target
= control target key end

     0   :  { %v483_v0 = vmov 0   ;;  %vm212_vm0 = vcmask 130048   ;;  %vm301_vm1 = vcmask 261120   ;;  %s666_s1 = inlined_call_operand.vmem [shape: bf16[144,288], index: 1, kind: input, shape index: {}]   ;;  %s667_s0 = inlined_call_operand.vmem [shape: bf16[16,144], index: 0, kind: input, shape index: {}]   ;;  %s668_s2 = inlined_call_operand.vmem [shape: f32[16,1], index: 2, kind: input, shape index: {}]   ;;  %s669_s3 = inlined_call_operand.vmem [shape: f32[16,1], index: 3, kind: input, shape index: {}]   ;;  %s670_s4 = inlined_call_operand.vmem [shape: f32[16,288], index: 4, kind: input, shape index: {}]   ;;  %s671_s5 = inlined_call_operand.vmem [shape: f32[16,288], index: 5, kind: output, shape index: {}]  }
   0x1   :  { %259 = vmatprep.subr.bf16.mxu1 %v483_v0  ;;  %v440_v1 = vld [vmem:[%s666_s1 + $0x4] ss:$12 sps:$4 sm:$0xff]   ;;  %439 = vset.pattern.permute.xlu1 %v483_v0  ;;  %v442_v2 = vld [vmem:[%s666_s1 + $0x8] ss:$12 sps:$4 sm:$0xff]   ;;  %v443_v3 = vld [vmem:[%s666_s1] ss:$12 sps:$4 sm:$0xff]  }
   0x2   :  { %438 = vset.pattern.permute.xlu0 %v483_v0  ;;  %216 = vmatprep.subr.bf16.mxu0 %v440_v1  ;;  %v444_v4 = vld [vmem:[%s666_s1 + $0x1c] ss:$12 sps:$4 sm:$0xff]   ;;  %v446_v5 = vld [vmem:[%s666_s1 + $0x20] ss:$12 sps:$4 sm:$0xff]   ;;  %v447_v6 = vld [vmem:[%s666_s1 + $0x18] ss:$12 sps:$4 sm:$0xff]  }
   0x3   :  { %260 = vmatpush1.bf16.msra.mxu1 %v442_v2  ;;  %217 = vmatpush1.bf16.msra.mxu0 %v443_v3  ;;  %v448_v7 = vld [vmem:[%s666_s1 + $0x34] ss:$12 sps:$4 sm:$0xff]   ;;  %v450_v8 = vld [vmem:[%s666_s1 + $0x38] ss:$12 sps:$4 sm:$0xff]   ;;  %v451_v9 = vld [vmem:[%s666_s1 + $0x30] ss:$12 sps:$4 sm:$0xff]  }
   0x4   :  { %261 = vmatprep.subr.bf16.mxu1 %v483_v0  ;;  %218 = vmatprep.subr.bf16.mxu0 %v444_v4  ;;  %v452_v10 = vld [vmem:[%s666_s1 + $0x4c] ss:$12 sps:$4 sm:$0xff]   ;;  %v454_v11 = vld [vmem:[%s666_s1 + $0x50] ss:$12 sps:$4 sm:$0xff]   ;;  %v455_v12 = vld [vmem:[%s666_s1 + $0x48] ss:$12 sps:$4 sm:$0xff]  }
   0x5   :  { %v456_v13 = vld [vmem:[%s666_s1 + $0x64] ss:$12 sps:$4 sm:$0xff]   ;;  %v458_v14 = vld [vmem:[%s666_s1 + $0x68] ss:$12 sps:$4 sm:$0xff]   ;;  %v459_v15 = vld [vmem:[%s666_s1 + $0x60] ss:$12 sps:$4 sm:$0xff]  }
   0x6   :  { %v460_v16 = vld [vmem:[%s666_s1 + $0x7c] ss:$12 sps:$4 sm:$0xff]   ;;  %v462_v17 = vld [vmem:[%s666_s1 + $0x80] ss:$12 sps:$4 sm:$0xff]   ;;  %v463_v18 = vld [vmem:[%s666_s1 + $0x78] ss:$12 sps:$4 sm:$0xff]  }
   0x7   :  { %262 = vmatpush1.bf16.msra.mxu1 %v446_v5  ;;  %219 = vmatpush1.bf16.msra.mxu0 %v447_v6  ;;  %v464_v19 = vld [vmem:[%s666_s1 + $0x94] ss:$12 sps:$4 sm:$0xff]   ;;  %v478_v20 = vld [vmem:[%s667_s0 + $0x4] ss:$8 sps:$4 sm:$0xff]   ;;  %v467_v22 = vld [vmem:[%s666_s1 + $0x90] ss:$12 sps:$4 sm:$0xff]  }
   0x8   :  { %263 = vmatprep.subr.bf16.mxu1 %v483_v0  ;;  %220 = vmatprep.subr.bf16.mxu0 %v448_v7  ;;  %v466_v21 = vld [vmem:[%s666_s1 + $0x98] ss:$12 sps:$4 sm:$0xff]   ;;  %v470_v24 = vld [vmem:[%s666_s1 + $0xb0] ss:$12 sps:$4 sm:$0xff]   ;;  %v471_v25 = vld [vmem:[%s666_s1 + $0xa8] ss:$12 sps:$4 sm:$0xff]  }
   0x9   :  { %v468_v23 = vld [vmem:[%s666_s1 + $0xac] ss:$12 sps:$4 sm:$0xff]   ;;  %436 = vmatprep.mubr.msk.bf16.mxu1 %vm212_vm0, %v478_v20  ;;  %435 = vmatprep.mubr.msk.bf16.mxu0 %vm212_vm0, %v478_v20  ;;  %v472_v26 = vld [vmem:[%s666_s1 + $0xc4] ss:$12 sps:$4 sm:$0xff]   ;;  %v474_v27 = vld [vmem:[%s666_s1 + $0xc8] ss:$12 sps:$4 sm:$0xff]  }
   0xa   :  { %v475_v28 = vld [vmem:[%s666_s1 + $0xc0] ss:$12 sps:$4 sm:$0xff]  }
   0xb   :  { %264 = vmatpush1.bf16.msra.mxu1 %v450_v8  ;;  %221 = vmatpush1.bf16.msra.mxu0 %v451_v9  ;;  %v476_v29 = vld [vmem:[%s667_s0] ss:$8 sps:$4 sm:$0xff]  }
   0xc   :  { %265 = vmatprep.subr.bf16.mxu1 %v483_v0  ;;  %222 = vmatprep.subr.bf16.mxu0 %v452_v10  ;;  %v349_v30 = vld [vmem:[%s668_s2 + $0x8] sm:$0xff]  ;;  %v366_v31 = vld [vmem:[%s669_s3] sm:$0xff] }
   0xd   :  { %357 = vperm.xlu1 %439, %v349_v30   ;;  %v348_v46 = vld [vmem:[%s668_s2] sm:$0xff]  ;;  %v367_v5 = vld [vmem:[%s669_s3 + $0x8] sm:$0xff] }
   0xf   :  { %266 = vmatpush1.bf16.msra.mxu1 %v454_v11  ;;  %223 = vmatpush1.bf16.msra.mxu0 %v455_v12 }
  0x10   :  { %267 = vmatprep.subr.bf16.mxu1 %v483_v0  ;;  %224 = vmatprep.subr.bf16.mxu0 %v456_v13 }
  0x11   :  { %370 = vperm.xlu1 %439, %v366_v31  }
  0x13   :  { %268 = vmatpush1.bf16.msra.mxu1 %v458_v14  ;;  %225 = vmatpush1.bf16.msra.mxu0 %v459_v15 }
  0x14   :  { %269 = vmatprep.subr.bf16.mxu1 %v483_v0  ;;  %226 = vmatprep.subr.bf16.mxu0 %v460_v16 }
  0x17   :  { %270 = vmatpush1.bf16.msra.mxu1 %v462_v17  ;;  %227 = vmatpush1.bf16.msra.mxu0 %v463_v18 }
  0x18   :  { %271 = vmatprep.subr.bf16.mxu1 %v483_v0  ;;  %228 = vmatprep.subr.bf16.mxu0 %v464_v19 }
  0x1b   :  { %272 = vmatpush1.bf16.msra.mxu1 %v466_v21  ;;  %229 = vmatpush1.bf16.msra.mxu0 %v467_v22 }
  0x1c   :  { %273 = vmatprep.subr.bf16.mxu1 %v483_v0  ;;  %230 = vmatprep.subr.bf16.mxu0 %v468_v23  ;;  %v384_v23 = vld [vmem:[%s670_s4] sm:$0xff] }
  0x1f   :  { %274 = vmatpush1.bf16.msra.mxu1 %v470_v24  ;;  %231 = vmatpush1.bf16.msra.mxu0 %v471_v25 }
  0x20   :  { %275 = vmatprep.subr.bf16.mxu1 %v483_v0  ;;  %232 = vmatprep.subr.bf16.mxu0 %v472_v26 }
  0x23   :  { %276 = vmatpush1.bf16.msra.mxu1 %v474_v27  ;;  %233 = vmatpush1.bf16.msra.mxu0 %v475_v28  ;;  %v385_v27 = vld [vmem:[%s670_s4 + $0x8] sm:$0xff]  ;;  %v386_v28 = vld [vmem:[%s670_s4 + $0x10] sm:$0xff] }
  0x26   :  { %292 = vmatmul.mubr.bf16.vlgmr.msra.gmra.mrb[0].mxu1 %v476_v29  ;;  %249 = vmatmul.mubr.bf16.vlgmr.msra.gmra.mrb[0].mxu0 %v476_v29 }
  0x8c   :  { %v358_v6 = vpop.permute.xlu1 %357 }
  0x90   :  { %v371_v7 = vpop.permute.xlu1 %370 }
  0xf9   :  { %v293_v32 = vpop.f32.mrb[0].mxu1  ;;  %v250_v33 = vpop.f32.mrb[0].mxu0 }
  0xfa   :  { %v295_v34 = vpop.f32.mrb[1].mxu1  ;;  %v252_v35 = vpop.f32.mrb[1].mxu0  ;;  %v302_v37 = vsel %vm301_vm1, %v293_v32, 0.0 }
  0xfb   :  { %v296_v36 = vpop.f32.mrb[2].mxu1  ;;  %v300_v38 = vadd.f32 %v252_v35, %v250_v33  ;;  %v254_v39 = vpop.f32.mrb[2].mxu0 }
  0xfc   :  { %v298_v40 = vpop.f32.mrb[3].mxu1  ;;  %v256_v41 = vpop.f32.mrb[3].mxu0  ;;  %v307_v44 = vsel %vm301_vm1, %v296_v36, 0.0 }
  0xfd   :  { %v306_v42 = vadd.f32 %v256_v41, %v254_v39  ;;  %v303_v43 = vadd.f32 %v302_v37, %v300_v38  ;;  %v388_v37 = vld [vmem:[%s670_s4 + $0x20] sm:$0xff]  ;;  %v389_v38 = vld [vmem:[%s670_s4 + $0x28] sm:$0xff] }
  0xff   :  { %304 = vadd.xlane.f32.xlu0 %v303_v43  ;;  %v308_v45 = vadd.f32 %v307_v44, %v306_v42 }
 0x103   :  { %309 = vadd.xlane.f32.xlu0 %v308_v45 }
 0x119   :  { %352 = vperm.xlu0 %438, %v348_v46  }
 0x18c   :  { %v305_v47 = vpop.xlane.xlu0 %304 }
 0x18d   :  { %v312_v48 = vmul.f32 0.0034722222, %v305_v47 }
 0x18f   :  { %v314_v49 = vsub.f32 %v250_v33, %v312_v48  ;;  %v315_v50 = vsub.f32 %v252_v35, %v312_v48  ;;  %v316_v51 = vsub.f32 %v293_v32, %v312_v48 }
 0x190   :  { %v310_v52 = vpop.xlane.xlu0 %309 }
 0x191   :  { %v313_v53 = vmul.f32 0.0034722222, %v310_v52  ;;  %v320_v54 = vmul.f32 %v314_v49, %v314_v49  ;;  %v321_v55 = vmul.f32 %v315_v50, %v315_v50  ;;  %v322_v56 = vmul.f32 %v316_v51, %v316_v51 }
 0x193   :  { %v317_v57 = vsub.f32 %v254_v39, %v313_v53  ;;  %v318_v58 = vsub.f32 %v256_v41, %v313_v53  ;;  %v319_v59 = vsub.f32 %v296_v36, %v313_v53  ;;  %v326_v60 = vadd.f32 %v321_v55, %v320_v54  ;;  %v387_v36 = vld [vmem:[%s670_s4 + $0x18] sm:$0xff] }
 0x194   :  { %v327_v61 = vsel %vm301_vm1, %v322_v56, 0.0 }
 0x195   :  { %v328_v62 = vadd.f32 %v327_v61, %v326_v60  ;;  %v323_v63 = vmul.f32 %v317_v57, %v317_v57  ;;  %v324_v0 = vmul.f32 %v318_v58, %v318_v58  ;;  %v325_v1 = vmul.f32 %v319_v59, %v319_v59 }
 0x197   :  { %329 = vadd.xlane.f32.xlu1 %v328_v62  ;;  %v331_v2 = vadd.f32 %v324_v0, %v323_v63  ;;  %v332_v3 = vsel %vm301_vm1, %v325_v1, 0.0 }
 0x198   :  { %v353_v15 = vpop.permute.xlu0 %352 }
 0x199   :  { %v333_v4 = vadd.f32 %v332_v3, %v331_v2 }
 0x19b   :  { %334 = vadd.xlane.f32.xlu1 %v333_v4 }
 0x1ac   :  { %375 = vperm.xlu1 %439, %v367_v5  }
 0x224   :  { %v330_v8 = vpop.xlane.xlu1 %329 }
 0x225   :  { %v336_v9 = vmul.f32 0.0034722222, %v330_v8 }
 0x227   :  { %v338_v10 = vadd.f32 1e-05, %v336_v9 }
 0x228   :  { %v335_v11 = vpop.xlane.xlu1 %334 }
 0x229   :  { %479 = vrsqrt.f32 %v338_v10  ;;  %v337_v12 = vmul.f32 0.0034722222, %v335_v11 }
 0x22b   :  { %v339_v13 = vadd.f32 1e-05, %v337_v12 }
 0x22c   :  { %v376_v39 = vpop.permute.xlu1 %375 }
 0x22d   :  { %481 = vrsqrt.f32 %v339_v13 }
 0x233   :  { %v480_v14 = vpop.eup %479 }
 0x234   :  { %v342_v16 = vmul.f32 %v480_v14, %v314_v49  ;;  %v343_v17 = vmul.f32 %v480_v14, %v315_v50  ;;  %v344_v18 = vmul.f32 %v480_v14, %v316_v51 }
 0x236   :  { %v360_v19 = vmul.f32 %v353_v15, %v342_v16  ;;  %v361_v20 = vmul.f32 %v353_v15, %v343_v17  ;;  %v362_v21 = vmul.f32 %v353_v15, %v344_v18 }
 0x237   :  { %v482_v22 = vpop.eup %481 }
 0x238   :  { %v345_v24 = vmul.f32 %v482_v22, %v317_v57  ;;  %v346_v25 = vmul.f32 %v482_v22, %v318_v58  ;;  %v347_v26 = vmul.f32 %v482_v22, %v319_v59  ;;  %v378_v29 = vadd.f32 %v371_v7, %v360_v19 }
 0x239   :  { %v379_v30 = vadd.f32 %v371_v7, %v361_v20  ;;  %v380_v31 = vadd.f32 %v371_v7, %v362_v21 }
 0x23a   :  { %v363_v32 = vmul.f32 %v358_v6, %v345_v24  ;;  %v364_v33 = vmul.f32 %v358_v6, %v346_v25  ;;  %v365_v34 = vmul.f32 %v358_v6, %v347_v26  ;;  %v390_v35 = vadd.f32 %v384_v23, %v378_v29 }
 0x23b   :  { %v391_v40 = vadd.f32 %v385_v27, %v379_v30  ;;  %v392_v41 = vadd.f32 %v386_v28, %v380_v31 }
 0x23c   :  { %v381_v42 = vadd.f32 %v376_v39, %v363_v32  ;;  %v382_v43 = vadd.f32 %v376_v39, %v364_v33  ;;  %v383_v44 = vadd.f32 %v376_v39, %v365_v34  ;;  %396 = vst [vmem:[%s671_s5] sm:$0xff] %v390_v35 }
 0x23d   :  { %397 = vst [vmem:[%s671_s5 + $0x8] sm:$0xff] %v391_v40  ;;  %398 = vst.msk [vmem:[%s671_s5 + $0x10] sm:$0xff] %vm301_vm1, %v392_v41 }
 0x23e   :  { %v393_v45 = vadd.f32 %v387_v36, %v381_v42  ;;  %v394_v46 = vadd.f32 %v388_v37, %v382_v43  ;;  %v395_v47 = vadd.f32 %v389_v38, %v383_v44 }
 0x240   :  { %399 = vst [vmem:[%s671_s5 + $0x18] sm:$0xff] %v393_v45  ;;  %400 = vst [vmem:[%s671_s5 + $0x20] sm:$0xff] %v394_v46 }
 0x241   :  { %401 = vst.msk [vmem:[%s671_s5 + $0x28] sm:$0xff] %vm301_vm1, %v395_v47 }

// kernel: _lambda_.14
= control target key start
LH: loop header
LB: loop body
LE: loop exit
PB: predicated region body
PF: predicated region fallthrough
CT: control target
= control target key end

     0   :  { %v486_v0 = vmov 0.0   ;;  %vm487_vm0 = vmmov 0   ;;  %v488_v3 = vmov 0   ;;  %vm59_vm1 = vcmask 130048   ;;  %s694_s2 = inlined_call_operand.vmem [shape: bf16[16,288], index: 2, kind: input, shape index: {}]   ;;  %s695_s0 = inlined_call_operand.vmem [shape: bf16[16,16], index: 0, kind: input, shape index: {}]   ;;  %s696_s3 = inlined_call_operand.vmem [shape: bf16[16,288], index: 3, kind: input, shape index: {}]   ;;  %s697_s1 = inlined_call_operand.vmem [shape: bf16[16,16], index: 1, kind: input, shape index: {}]   ;;  %s698_s4 = inlined_call_operand.vmem [shape: f32[32,1], index: 4, kind: input, shape index: {}]   ;;  %s699_s5 = inlined_call_operand.vmem [shape: f32[32,1], index: 5, kind: input, shape index: {}]   ;;  %s700_s6 = inlined_call_operand.vmem [shape: f32[32,288], index: 6, kind: output, shape index: {}]  }
   0x1   :  { %451 = vmatprep.subr.bf16.mxu1 %v486_v0  ;;  %v468_v1 = vld [vmem:[%s694_s2 + $0x4] ss:$12 sps:$4 sm:$0xff]   ;;  %453 = vmatprep.mubr.msk.bf16.mxu1 %vm487_vm0, %v486_v0  ;;  %v470_v2 = vld [vmem:[%s694_s2 + $0x8] ss:$12 sps:$4 sm:$0xff]   ;;  %v471_v4 = vld [vmem:[%s694_s2] ss:$12 sps:$4 sm:$0xff]  }
   0x2   :  { %95 = vmatprep.mubr.bf16.mxu0 %v488_v3  ;;  %467 = vset.pattern.permute.xlu1 %v488_v3  ;;  %v472_v5 = vld [vmem:[%s695_s0] sm:$0xff]   ;;  %v476_v8 = vld [vmem:[%s696_s3 + $0x8] ss:$12 sps:$4 sm:$0xff]   ;;  %vm262_vm2 = vcmask 261120  }
   0x3   :  { %63 = vmatprep.subr.bf16.mxu0 %v468_v1  ;;  %466 = vset.pattern.permute.xlu0 %v488_v3  ;;  %v473_v6 = vld [vmem:[%s696_s3] ss:$12 sps:$4 sm:$0xff]   ;;  %v475_v7 = vld [vmem:[%s696_s3 + $0x4] ss:$12 sps:$4 sm:$0xff]  }
   0x4   :  { %452 = vmatpush3.bf16.msra.mxu1 %v470_v2  ;;  %64 = vmatpush1.bf16.msra.mxu0 %v471_v4  ;;  %v477_v9 = vld [vmem:[%s697_s1] sm:$0xff]  }
   0x5   :  { %457 = vmatprep.subr.bf16.mxu1 %v486_v0  ;;  %177 = vmatprep.subr.bf16.mxu0 %v475_v7  ;;  %v25_v7 = vld [vmem:[%s698_s4 + $0x8] sm:$0xff] }
   0x7   :  { %454 = vmatmul.mubr.msk.bf16.vlgmr.msra.gmra.mrb[0].mxu1 %vm59_vm1, %v472_v5  ;;  %439 = vmatmul.mubr.msk.bf16.vlgmr.msra.gmra.mrb[0].mxu0 %vm59_vm1, %v472_v5 }
   0x8   :  { %458 = vmatpush3.bf16.msra.mxu1 %v476_v8  ;;  %178 = vmatpush1.bf16.msra.mxu0 %v473_v6  ;;  %v26_v8 = vld [vmem:[%s698_s4 + $0x10] sm:$0xff] }
   0x9   :  { %209 = vmatprep.mubr.bf16.mxu0 %v488_v3  ;;  %459 = vmatprep.mubr.msk.bf16.mxu1 %vm487_vm0, %v486_v0 }
   0xf   :  { %460 = vmatmul.mubr.msk.bf16.vlgmr.msra.gmra.mrb[4].mxu1 %vm59_vm1, %v477_v9  ;;  %445 = vmatmul.mubr.msk.bf16.vlgmr.msra.gmra.mrb[4].mxu0 %vm59_vm1, %v477_v9  ;;  %v27_v9 = vld [vmem:[%s698_s4 + $0x18] sm:$0xff] }
  0xda   :  { %v140_v10 = vpop.f32.mrb[0].mxu1  ;;  %v97_v11 = vpop.f32.mrb[0].mxu0 }
  0xdb   :  { %v455_v12 = vpop.f32.mrb[1].mxu1  ;;  %v99_v13 = vpop.f32.mrb[1].mxu0  ;;  %v263_v15 = vsel %vm262_vm2, %v140_v10, 0.0 }
  0xdc   :  { %v143_v14 = vpop.f32.mrb[2].mxu1  ;;  %v261_v16 = vadd.f32 %v99_v13, %v97_v11  ;;  %v101_v17 = vpop.f32.mrb[2].mxu0  ;;  %v29_v12 = vld [vmem:[%s699_s5 + $0x8] sm:$0xff] }
  0xdd   :  { %v456_v18 = vpop.f32.mrb[3].mxu1  ;;  %v103_v19 = vpop.f32.mrb[3].mxu0  ;;  %v268_v22 = vsel %vm262_vm2, %v143_v14, 0.0 }
  0xde   :  { %v267_v20 = vadd.f32 %v103_v19, %v101_v17  ;;  %v264_v21 = vadd.f32 %v263_v15, %v261_v16 }
  0xe0   :  { %265 = vadd.xlane.f32.xlu0 %v264_v21  ;;  %v269_v23 = vadd.f32 %v268_v22, %v267_v20 }
  0xe2   :  { %v254_v24 = vpop.f32.mrb[4].mxu1  ;;  %v211_v25 = vpop.f32.mrb[4].mxu0 }
  0xe3   :  { %v461_v26 = vpop.f32.mrb[5].mxu1  ;;  %v213_v27 = vpop.f32.mrb[5].mxu0  ;;  %v348_v29 = vsel %vm262_vm2, %v254_v24, 0.0 }
  0xe4   :  { %v556_v28 = vpop.f32.mrb[6].mxu1  ;;  %v347_v30 = vadd.f32 %v213_v27, %v211_v25  ;;  %270 = vadd.xlane.f32.xlu0 %v269_v23  ;;  %v559_v31 = vpop.f32.mrb[6].mxu0 }
  0xe5   :  { %v462_v32 = vpop.f32.mrb[7].mxu1  ;;  %v217_v33 = vpop.f32.mrb[7].mxu0  ;;  %v353_v34 = vsel %vm262_vm2, %v556_v28, 0.0 }
  0xe6   :  { %v352_v35 = vadd.f32 %v217_v33, %v559_v31  ;;  %v349_v36 = vadd.f32 %v348_v29, %v347_v30 }
  0xe8   :  { %350 = vadd.xlane.f32.xlu1 %v349_v36  ;;  %v354_v37 = vadd.f32 %v353_v34, %v352_v35 }
  0xec   :  { %355 = vadd.xlane.f32.xlu1 %v354_v37 }
 0x16d   :  { %v266_v38 = vpop.xlane.xlu0 %265 }
 0x16e   :  { %v273_v39 = vmul.f32 0.0034722222, %v266_v38 }
 0x170   :  { %v564_v40 = vsub.f32 %v97_v11, %v273_v39  ;;  %v566_v41 = vsub.f32 %v99_v13, %v273_v39  ;;  %v568_v42 = vsub.f32 %v140_v10, %v273_v39  ;;  %v24_v10 = vld [vmem:[%s698_s4] sm:$0xff]  ;;  %v30_v13 = vld [vmem:[%s699_s5 + $0x10] sm:$0xff] }
 0x171   :  { %v271_v43 = vpop.xlane.xlu0 %270  ;;  %v28_v11 = vld [vmem:[%s699_s5] sm:$0xff] }
 0x172   :  { %v274_v44 = vmul.f32 0.0034722222, %v271_v43  ;;  %v281_v45 = vmul.f32 %v564_v40, %v564_v40  ;;  %v282_v46 = vmul.f32 %v566_v41, %v566_v41  ;;  %v283_v47 = vmul.f32 %v568_v42, %v568_v42 }
 0x174   :  { %v576_v48 = vsub.f32 %v101_v17, %v274_v44  ;;  %v578_v49 = vsub.f32 %v103_v19, %v274_v44  ;;  %v580_v50 = vsub.f32 %v143_v14, %v274_v44  ;;  %v287_v51 = vadd.f32 %v282_v46, %v281_v45 }
 0x175   :  { %v351_v52 = vpop.xlane.xlu1 %350  ;;  %v288_v53 = vsel %vm262_vm2, %v283_v47, 0.0 }
 0x176   :  { %v357_v54 = vmul.f32 0.0034722222, %v351_v52  ;;  %v289_v55 = vadd.f32 %v288_v53, %v287_v51  ;;  %v284_v56 = vmul.f32 %v576_v48, %v576_v48  ;;  %v285_v57 = vmul.f32 %v578_v49, %v578_v49 }
 0x177   :  { %v286_v58 = vmul.f32 %v580_v50, %v580_v50 }
 0x178   :  { %v589_v59 = vsub.f32 %v211_v25, %v357_v54  ;;  %v591_v60 = vsub.f32 %v213_v27, %v357_v54  ;;  %v593_v61 = vsub.f32 %v254_v24, %v357_v54  ;;  %290 = vadd.xlane.f32.xlu0 %v289_v55  ;;  %v292_v62 = vadd.f32 %v285_v57, %v284_v56  ;;  %v31_v25 = vld [vmem:[%s699_s5 + $0x18] sm:$0xff] }
 0x179   :  { %v293_v63 = vsel %vm262_vm2, %v286_v58, 0.0  ;;  %v356_v14 = vpop.xlane.xlu1 %355 }
 0x17a   :  { %v294_v0 = vadd.f32 %v293_v63, %v292_v62  ;;  %v365_v1 = vmul.f32 %v589_v59, %v589_v59  ;;  %v366_v2 = vmul.f32 %v591_v60, %v591_v60  ;;  %v367_v3 = vmul.f32 %v593_v61, %v593_v61 }
 0x17b   :  { %v358_v15 = vmul.f32 0.0034722222, %v356_v14 }
 0x17c   :  { %295 = vadd.xlane.f32.xlu1 %v294_v0  ;;  %v371_v4 = vadd.f32 %v366_v2, %v365_v1  ;;  %v372_v5 = vsel %vm262_vm2, %v367_v3, 0.0 }
 0x17d   :  { %v625_v16 = vsub.f32 %v559_v31, %v358_v15  ;;  %v627_v17 = vsub.f32 %v217_v33, %v358_v15  ;;  %v630_v18 = vsub.f32 %v556_v28, %v358_v15 }
 0x17e   :  { %v373_v6 = vadd.f32 %v372_v5, %v371_v4 }
 0x17f   :  { %v368_v19 = vmul.f32 %v625_v16, %v625_v16  ;;  %v369_v20 = vmul.f32 %v627_v17, %v627_v17  ;;  %v370_v21 = vmul.f32 %v630_v18, %v630_v18 }
 0x180   :  { %374 = vadd.xlane.f32.xlu0 %v373_v6 }
 0x181   :  { %v376_v22 = vadd.f32 %v369_v20, %v368_v19  ;;  %v377_v23 = vsel %vm262_vm2, %v370_v21, 0.0 }
 0x183   :  { %v378_v24 = vadd.f32 %v377_v23, %v376_v22 }
 0x18d   :  { %316 = vperm.xlu1 %467, %v25_v7  }
 0x191   :  { %395 = vperm.xlu1 %467, %v26_v8  }
 0x195   :  { %400 = vperm.xlu1 %467, %v27_v9  }
 0x196   :  { %311 = vperm.xlu0 %466, %v24_v10  }
 0x199   :  { %327 = vperm.xlu1 %467, %v28_v11  }
 0x19d   :  { %332 = vperm.xlu1 %467, %v29_v12  }
 0x1a1   :  { %411 = vperm.xlu1 %467, %v30_v13  }
 0x1c5   :  { %379 = vadd.xlane.f32.xlu1 %v378_v24 }
 0x1d6   :  { %416 = vperm.xlu1 %467, %v31_v25  }
 0x205   :  { %v291_v26 = vpop.xlane.xlu0 %290 }
 0x206   :  { %v297_v27 = vmul.f32 0.0034722222, %v291_v26 }
 0x208   :  { %v299_v28 = vadd.f32 1e-05, %v297_v27 }
 0x209   :  { %v296_v29 = vpop.xlane.xlu1 %295 }
 0x20a   :  { %478 = vrsqrt.f32 %v299_v28  ;;  %v298_v30 = vmul.f32 0.0034722222, %v296_v29 }
 0x20c   :  { %v300_v31 = vadd.f32 1e-05, %v298_v30 }
 0x20d   :  { %v375_v32 = vpop.xlane.xlu0 %374  ;;  %v317_v33 = vpop.permute.xlu1 %316 }
 0x20e   :  { %480 = vrsqrt.f32 %v300_v31  ;;  %v381_v34 = vmul.f32 0.0034722222, %v375_v32 }
 0x210   :  { %v383_v35 = vadd.f32 1e-05, %v381_v34 }
 0x211   :  { %v396_v36 = vpop.permute.xlu1 %395 }
 0x212   :  { %482 = vrsqrt.f32 %v383_v35 }
 0x214   :  { %v479_v37 = vpop.eup %478 }
 0x215   :  { %v401_v38 = vpop.permute.xlu1 %400  ;;  %v303_v39 = vmul.f32 %v479_v37, %v564_v40  ;;  %v304_v43 = vmul.f32 %v479_v37, %v566_v41  ;;  %v305_v44 = vmul.f32 %v479_v37, %v568_v42  ;;  %v312_v45 = vpop.permute.xlu0 %311 }
 0x217   :  { %v319_v46 = vmul.f32 %v312_v45, %v303_v39  ;;  %v320_v47 = vmul.f32 %v312_v45, %v304_v43  ;;  %v321_v51 = vmul.f32 %v312_v45, %v305_v44 }
 0x218   :  { %v481_v52 = vpop.eup %480 }
 0x219   :  { %v306_v53 = vmul.f32 %v481_v52, %v576_v48  ;;  %v307_v54 = vmul.f32 %v481_v52, %v578_v49  ;;  %v308_v55 = vmul.f32 %v481_v52, %v580_v50  ;;  %v328_v56 = vpop.permute.xlu1 %327 }
 0x21a   :  { %v335_v57 = vadd.f32 %v328_v56, %v319_v46  ;;  %v336_v58 = vadd.f32 %v328_v56, %v320_v47  ;;  %v337_v62 = vadd.f32 %v328_v56, %v321_v51 }
 0x21b   :  { %v322_v40 = vmul.f32 %v317_v33, %v306_v53  ;;  %v323_v63 = vmul.f32 %v317_v33, %v307_v54  ;;  %v324_v41 = vmul.f32 %v317_v33, %v308_v55 }
 0x21c   :  { %v483_v0 = vpop.eup %482  ;;  %341 = vst [vmem:[%s700_s6] sm:$0xff] %v335_v57  ;;  %342 = vst [vmem:[%s700_s6 + $0x8] sm:$0xff] %v336_v58 }
 0x21d   :  { %343 = vst.msk [vmem:[%s700_s6 + $0x10] sm:$0xff] %vm262_vm2, %v337_v62  ;;  %v387_v42 = vmul.f32 %v483_v0, %v589_v59  ;;  %v388_v48 = vmul.f32 %v483_v0, %v591_v60  ;;  %v389_v49 = vmul.f32 %v483_v0, %v593_v61  ;;  %v333_v50 = vpop.permute.xlu1 %332 }
 0x21e   :  { %v338_v1 = vadd.f32 %v333_v50, %v322_v40  ;;  %v339_v2 = vadd.f32 %v333_v50, %v323_v63  ;;  %v340_v3 = vadd.f32 %v333_v50, %v324_v41 }
 0x21f   :  { %v403_v4 = vmul.f32 %v396_v36, %v387_v42  ;;  %v404_v5 = vmul.f32 %v396_v36, %v388_v48  ;;  %v405_v6 = vmul.f32 %v396_v36, %v389_v49 }
 0x220   :  { %344 = vst [vmem:[%s700_s6 + $0x18] sm:$0xff] %v338_v1  ;;  %345 = vst [vmem:[%s700_s6 + $0x20] sm:$0xff] %v339_v2 }
 0x221   :  { %346 = vst.msk [vmem:[%s700_s6 + $0x28] sm:$0xff] %vm262_vm2, %v340_v3  ;;  %v412_v59 = vpop.permute.xlu1 %411 }
 0x222   :  { %v419_v60 = vadd.f32 %v412_v59, %v403_v4  ;;  %v420_v61 = vadd.f32 %v412_v59, %v404_v5  ;;  %v421_v7 = vadd.f32 %v412_v59, %v405_v6 }
 0x224   :  { %425 = vst [vmem:[%s700_s6 + $0x30] sm:$0xff] %v419_v60  ;;  %426 = vst [vmem:[%s700_s6 + $0x38] sm:$0xff] %v420_v61 }
 0x225   :  { %427 = vst.msk [vmem:[%s700_s6 + $0x40] sm:$0xff] %vm262_vm2, %v421_v7 }
 0x252   :  { %v380_v8 = vpop.xlane.xlu1 %379 }
 0x253   :  { %v382_v9 = vmul.f32 0.0034722222, %v380_v8 }
 0x255   :  { %v384_v10 = vadd.f32 1e-05, %v382_v9 }
 0x256   :  { %v417_v21 = vpop.permute.xlu1 %416 }
 0x257   :  { %484 = vrsqrt.f32 %v384_v10 }
 0x261   :  { %v485_v11 = vpop.eup %484 }
 0x262   :  { %v390_v12 = vmul.f32 %v485_v11, %v625_v16  ;;  %v391_v13 = vmul.f32 %v485_v11, %v627_v17  ;;  %v392_v14 = vmul.f32 %v485_v11, %v630_v18 }
 0x264   :  { %v406_v15 = vmul.f32 %v401_v38, %v390_v12  ;;  %v407_v19 = vmul.f32 %v401_v38, %v391_v13  ;;  %v408_v20 = vmul.f32 %v401_v38, %v392_v14 }
 0x266   :  { %v422_v22 = vadd.f32 %v417_v21, %v406_v15  ;;  %v423_v23 = vadd.f32 %v417_v21, %v407_v19  ;;  %v424_v24 = vadd.f32 %v417_v21, %v408_v20 }
 0x268   :  { %428 = vst [vmem:[%s700_s6 + $0x48] sm:$0xff] %v422_v22  ;;  %429 = vst [vmem:[%s700_s6 + $0x50] sm:$0xff] %v423_v23 }
 0x269   :  { %430 = vst.msk [vmem:[%s700_s6 + $0x58] sm:$0xff] %vm262_vm2, %v424_v24 }

// kernel: _lambda_.15
= control target key start
LH: loop header
LB: loop body
LE: loop exit
PB: predicated region body
PF: predicated region fallthrough
CT: control target
= control target key end

     0   :  { %v990_v0 = vmov 0   ;;  %vm242_vm0 = vcmask 130048   ;;  %vm394_vm1 = vcmask 261120   ;;  %vm828_vm2 = vcmask 257024   ;;  %s1531_s1 = inlined_call_operand.vmem [shape: bf16[144,288], index: 1, kind: input, shape index: {}]   ;;  %s1532_s0 = inlined_call_operand.vmem [shape: bf16[64,144], index: 0, kind: input, shape index: {}]   ;;  %s1533_s2 = inlined_call_operand.vmem [shape: f32[64,1], index: 2, kind: input, shape index: {}]   ;;  %s1534_s3 = inlined_call_operand.vmem [shape: f32[64,1], index: 3, kind: input, shape index: {}]   ;;  %s1535_s4 = inlined_call_operand.vmem [shape: bf16[64,288], index: 4, kind: output, shape index: {}]  }
   0x1   :  { %328 = vmatprep.subr.bf16.mxu1 %v990_v0  ;;  %v926_v1 = vld [vmem:[%s1531_s1 + $0x4] ss:$12 sps:$4 sm:$0xff]   ;;  %925 = vset.pattern.permute.xlu1 %v990_v0  ;;  %v928_v2 = vld [vmem:[%s1531_s1 + $0x8] ss:$12 sps:$4 sm:$0xff]   ;;  %v929_v3 = vld [vmem:[%s1531_s1] ss:$12 sps:$4 sm:$0xff]  }
   0x2   :  { %924 = vset.pattern.permute.xlu0 %v990_v0  ;;  %255 = vmatprep.subr.bf16.mxu0 %v926_v1  ;;  %v930_v4 = vld [vmem:[%s1531_s1 + $0x1c] ss:$12 sps:$4 sm:$0xff]   ;;  %v932_v5 = vld [vmem:[%s1531_s1 + $0x20] ss:$12 sps:$4 sm:$0xff]   ;;  %v933_v6 = vld [vmem:[%s1531_s1 + $0x18] ss:$12 sps:$4 sm:$0xff]  }
   0x3   :  { %329 = vmatpush1.bf16.msra.mxu1 %v928_v2  ;;  %256 = vmatpush1.bf16.msra.mxu0 %v929_v3  ;;  %v934_v7 = vld [vmem:[%s1531_s1 + $0x34] ss:$12 sps:$4 sm:$0xff]   ;;  %v936_v8 = vld [vmem:[%s1531_s1 + $0x38] ss:$12 sps:$4 sm:$0xff]   ;;  %v937_v9 = vld [vmem:[%s1531_s1 + $0x30] ss:$12 sps:$4 sm:$0xff]  }
   0x4   :  { %330 = vmatprep.subr.bf16.mxu1 %v990_v0  ;;  %257 = vmatprep.subr.bf16.mxu0 %v930_v4  ;;  %v938_v10 = vld [vmem:[%s1531_s1 + $0x4c] ss:$12 sps:$4 sm:$0xff]   ;;  %v940_v11 = vld [vmem:[%s1531_s1 + $0x50] ss:$12 sps:$4 sm:$0xff]   ;;  %v941_v12 = vld [vmem:[%s1531_s1 + $0x48] ss:$12 sps:$4 sm:$0xff]  }
   0x5   :  { %v942_v13 = vld [vmem:[%s1531_s1 + $0x64] ss:$12 sps:$4 sm:$0xff]   ;;  %v944_v14 = vld [vmem:[%s1531_s1 + $0x68] ss:$12 sps:$4 sm:$0xff]   ;;  %v945_v15 = vld [vmem:[%s1531_s1 + $0x60] ss:$12 sps:$4 sm:$0xff]  }
   0x6   :  { %v946_v16 = vld [vmem:[%s1531_s1 + $0x7c] ss:$12 sps:$4 sm:$0xff]   ;;  %v948_v17 = vld [vmem:[%s1531_s1 + $0x80] ss:$12 sps:$4 sm:$0xff]   ;;  %v949_v18 = vld [vmem:[%s1531_s1 + $0x78] ss:$12 sps:$4 sm:$0xff]  }
   0x7   :  { %331 = vmatpush1.bf16.msra.mxu1 %v932_v5  ;;  %258 = vmatpush1.bf16.msra.mxu0 %v933_v6  ;;  %v950_v19 = vld [vmem:[%s1531_s1 + $0x94] ss:$12 sps:$4 sm:$0xff]   ;;  %v964_v20 = vld [vmem:[%s1532_s0 + $0x4] ss:$8 sps:$4 sm:$0xff]   ;;  %v953_v22 = vld [vmem:[%s1531_s1 + $0x90] ss:$12 sps:$4 sm:$0xff]  }
   0x8   :  { %332 = vmatprep.subr.bf16.mxu1 %v990_v0  ;;  %259 = vmatprep.subr.bf16.mxu0 %v934_v7  ;;  %v952_v21 = vld [vmem:[%s1531_s1 + $0x98] ss:$12 sps:$4 sm:$0xff]   ;;  %v956_v24 = vld [vmem:[%s1531_s1 + $0xb0] ss:$12 sps:$4 sm:$0xff]   ;;  %v957_v25 = vld [vmem:[%s1531_s1 + $0xa8] ss:$12 sps:$4 sm:$0xff]  }
   0x9   :  { %v954_v23 = vld [vmem:[%s1531_s1 + $0xac] ss:$12 sps:$4 sm:$0xff]   ;;  %887 = vmatprep.mubr.msk.bf16.mxu1 %vm242_vm0, %v964_v20  ;;  %883 = vmatprep.mubr.msk.bf16.mxu0 %vm242_vm0, %v964_v20  ;;  %v958_v26 = vld [vmem:[%s1531_s1 + $0xc4] ss:$12 sps:$4 sm:$0xff]   ;;  %v960_v27 = vld [vmem:[%s1531_s1 + $0xc8] ss:$12 sps:$4 sm:$0xff]  }
   0xa   :  { %v961_v28 = vld [vmem:[%s1531_s1 + $0xc0] ss:$12 sps:$4 sm:$0xff]   ;;  %v965_v30 = vld [vmem:[%s1532_s0 + $0x14] ss:$8 sps:$4 sm:$0xff]   ;;  %v967_v31 = vld [vmem:[%s1532_s0 + $0x10] ss:$8 sps:$4 sm:$0xff]  }
   0xb   :  { %333 = vmatpush1.bf16.msra.mxu1 %v936_v8  ;;  %260 = vmatpush1.bf16.msra.mxu0 %v937_v9  ;;  %v962_v29 = vld [vmem:[%s1532_s0] ss:$8 sps:$4 sm:$0xff]   ;;  %v968_v32 = vld [vmem:[%s1532_s0 + $0x24] ss:$8 sps:$4 sm:$0xff]   ;;  %v971_v34 = vld [vmem:[%s1532_s0 + $0x34] ss:$8 sps:$4 sm:$0xff]  }
   0xc   :  { %334 = vmatprep.subr.bf16.mxu1 %v990_v0  ;;  %261 = vmatprep.subr.bf16.mxu0 %v938_v10  ;;  %v970_v33 = vld [vmem:[%s1532_s0 + $0x20] ss:$8 sps:$4 sm:$0xff]   ;;  %v973_v35 = vld [vmem:[%s1532_s0 + $0x30] ss:$8 sps:$4 sm:$0xff]  }
   0xf   :  { %335 = vmatpush1.bf16.msra.mxu1 %v940_v11  ;;  %262 = vmatpush1.bf16.msra.mxu0 %v941_v12 }
  0x10   :  { %336 = vmatprep.subr.bf16.mxu1 %v990_v0  ;;  %263 = vmatprep.subr.bf16.mxu0 %v942_v13 }
  0x13   :  { %337 = vmatpush1.bf16.msra.mxu1 %v944_v14  ;;  %264 = vmatpush1.bf16.msra.mxu0 %v945_v15 }
  0x14   :  { %338 = vmatprep.subr.bf16.mxu1 %v990_v0  ;;  %265 = vmatprep.subr.bf16.mxu0 %v946_v16 }
  0x17   :  { %339 = vmatpush1.bf16.msra.mxu1 %v948_v17  ;;  %266 = vmatpush1.bf16.msra.mxu0 %v949_v18 }
  0x18   :  { %340 = vmatprep.subr.bf16.mxu1 %v990_v0  ;;  %267 = vmatprep.subr.bf16.mxu0 %v950_v19 }
  0x1b   :  { %341 = vmatpush1.bf16.msra.mxu1 %v952_v21  ;;  %268 = vmatpush1.bf16.msra.mxu0 %v953_v22 }
  0x1c   :  { %342 = vmatprep.subr.bf16.mxu1 %v990_v0  ;;  %269 = vmatprep.subr.bf16.mxu0 %v954_v23 }
  0x1f   :  { %343 = vmatpush1.bf16.msra.mxu1 %v956_v24  ;;  %270 = vmatpush1.bf16.msra.mxu0 %v957_v25 }
  0x20   :  { %344 = vmatprep.subr.bf16.mxu1 %v990_v0  ;;  %271 = vmatprep.subr.bf16.mxu0 %v958_v26 }
  0x23   :  { %345 = vmatpush1.bf16.msra.mxu1 %v960_v27  ;;  %272 = vmatpush1.bf16.msra.mxu0 %v961_v28  ;;  %v580_v28 = vld [vmem:[%s1533_s2 + $0x8] sm:$0xff] }
  0x26   :  { %361 = vmatmul.mubr.bf16.vlgmr.msra.gmra.mrb[0].mxu1 %v962_v29  ;;  %288 = vmatmul.mubr.bf16.vlgmr.msra.gmra.mrb[0].mxu0 %v962_v29  ;;  %v581_v29 = vld [vmem:[%s1533_s2 + $0x10] sm:$0xff] }
  0x27   :  { %888 = vmatprep.mubr.msk.bf16.mxu1 %vm242_vm0, %v965_v30  ;;  %884 = vmatprep.mubr.msk.bf16.mxu0 %vm242_vm0, %v965_v30  ;;  %v582_v30 = vld [vmem:[%s1533_s2 + $0x18] sm:$0xff] }
  0x2e   :  { %369 = vmatmul.mubr.bf16.gmra.mrb[4].mxu1 %v967_v31  ;;  %298 = vmatmul.mubr.bf16.gmra.mrb[4].mxu0 %v967_v31  ;;  %v579_v31 = vld [vmem:[%s1533_s2] sm:$0xff] }
  0x2f   :  { %889 = vmatprep.mubr.msk.bf16.mxu1 %vm242_vm0, %v968_v32  ;;  %885 = vmatprep.mubr.msk.bf16.mxu0 %vm242_vm0, %v968_v32  ;;  %v583_v32 = vld [vmem:[%s1533_s2 + $0x20] sm:$0xff] }
  0x36   :  { %377 = vmatmul.mubr.bf16.gmra.mrb[8].mxu1 %v970_v33  ;;  %308 = vmatmul.mubr.bf16.gmra.mrb[8].mxu0 %v970_v33  ;;  %v652_v33 = vld [vmem:[%s1534_s3 + $0x8] sm:$0xff] }
  0x37   :  { %890 = vmatprep.mubr.msk.bf16.mxu1 %vm242_vm0, %v971_v34  ;;  %886 = vmatprep.mubr.msk.bf16.mxu0 %vm242_vm0, %v971_v34  ;;  %v584_v34 = vld [vmem:[%s1533_s2 + $0x28] sm:$0xff] }
  0x3e   :  { %385 = vmatmul.mubr.bf16.gmra.mrb[12].mxu1 %v973_v35  ;;  %318 = vmatmul.mubr.bf16.gmra.mrb[12].mxu0 %v973_v35  ;;  %v654_v35 = vld [vmem:[%s1534_s3 + $0x18] sm:$0xff] }
  0xf9   :  { %v1140_v36 = vpop.f32.mrb[0].mxu1  ;;  %v1142_v37 = vpop.f32.mrb[0].mxu0 }
  0xfa   :  { %v364_v38 = vpop.f32.mrb[1].mxu1  ;;  %v1144_v39 = vpop.f32.mrb[1].mxu0  ;;  %v395_v41 = vsel %vm394_vm1, %v1140_v36, 0.0 }
  0xfb   :  { %v1146_v40 = vpop.f32.mrb[2].mxu1  ;;  %v393_v42 = vadd.f32 %v1144_v39, %v1142_v37  ;;  %v1152_v43 = vpop.f32.mrb[2].mxu0  ;;  %v585_v38 = vld [vmem:[%s1533_s2 + $0x30] sm:$0xff] }
  0xfc   :  { %v367_v44 = vpop.f32.mrb[3].mxu1  ;;  %v1154_v45 = vpop.f32.mrb[3].mxu0  ;;  %v400_v48 = vsel %vm394_vm1, %v1146_v40, 0.0 }
  0xfd   :  { %v399_v46 = vadd.f32 %v1154_v45, %v1152_v43  ;;  %v396_v47 = vadd.f32 %v395_v41, %v393_v42  ;;  %v656_v41 = vld [vmem:[%s1534_s3 + $0x28] sm:$0xff]  ;;  %v586_v42 = vld [vmem:[%s1533_s2 + $0x38] sm:$0xff]  ;;  %v651_v44 = vld [vmem:[%s1534_s3] sm:$0xff] }
  0xff   :  { %397 = vadd.xlane.f32.xlu0 %v396_v47  ;;  %v401_v49 = vadd.f32 %v400_v48, %v399_v46  ;;  %v653_v46 = vld [vmem:[%s1534_s3 + $0x10] sm:$0xff]  ;;  %v655_v47 = vld [vmem:[%s1534_s3 + $0x20] sm:$0xff] }
 0x101   :  { %v1160_v50 = vpop.f32.mrb[4].mxu1  ;;  %v1162_v51 = vpop.f32.mrb[4].mxu0 }
 0x102   :  { %v372_v52 = vpop.f32.mrb[5].mxu1  ;;  %v1164_v53 = vpop.f32.mrb[5].mxu0  ;;  %v405_v55 = vsel %vm394_vm1, %v1160_v50, 0.0 }
 0x103   :  { %v1166_v54 = vpop.f32.mrb[6].mxu1  ;;  %v404_v56 = vadd.f32 %v1164_v53, %v1162_v51  ;;  %402 = vadd.xlane.f32.xlu0 %v401_v49  ;;  %v1172_v58 = vpop.f32.mrb[6].mxu0 }
 0x104   :  { %v375_v57 = vpop.f32.mrb[7].mxu1  ;;  %v1174_v59 = vpop.f32.mrb[7].mxu0  ;;  %v410_v62 = vsel %vm394_vm1, %v1166_v54, 0.0 }
 0x105   :  { %v409_v60 = vadd.f32 %v1174_v59, %v1172_v58  ;;  %v406_v61 = vadd.f32 %v405_v55, %v404_v56 }
 0x107   :  { %407 = vadd.xlane.f32.xlu1 %v406_v61  ;;  %v411_v63 = vadd.f32 %v410_v62, %v409_v60 }
 0x109   :  { %v1180_v0 = vpop.f32.mrb[8].mxu1  ;;  %v1182_v1 = vpop.f32.mrb[8].mxu0 }
 0x10a   :  { %v380_v2 = vpop.f32.mrb[9].mxu1  ;;  %v415_v3 = vsel %vm394_vm1, %v1180_v0, 0.0  ;;  %v1186_v4 = vpop.f32.mrb[9].mxu0 }
 0x10b   :  { %v1188_v5 = vpop.f32.mrb[10].mxu1  ;;  %v414_v6 = vadd.f32 %v1186_v4, %v1182_v1  ;;  %412 = vadd.xlane.f32.xlu1 %v411_v63  ;;  %v1192_v8 = vpop.f32.mrb[10].mxu0 }
 0x10c   :  { %v383_v7 = vpop.f32.mrb[11].mxu1  ;;  %v1194_v9 = vpop.f32.mrb[11].mxu0  ;;  %v420_v12 = vsel %vm394_vm1, %v1188_v5, 0.0 }
 0x10d   :  { %v419_v10 = vadd.f32 %v1194_v9, %v1192_v8  ;;  %v416_v11 = vadd.f32 %v415_v3, %v414_v6 }
 0x10f   :  { %417 = vadd.xlane.f32.xlu0 %v416_v11  ;;  %v421_v13 = vadd.f32 %v420_v12, %v419_v10 }
 0x111   :  { %v1200_v14 = vpop.f32.mrb[12].mxu1  ;;  %422 = vadd.xlane.f32.xlu1 %v421_v13  ;;  %v1202_v15 = vpop.f32.mrb[12].mxu0 }
 0x112   :  { %v388_v16 = vpop.f32.mrb[13].mxu1  ;;  %v1204_v17 = vpop.f32.mrb[13].mxu0  ;;  %v425_v18 = vsel %vm394_vm1, %v1200_v14, 0.0 }
 0x113   :  { %v1208_v19 = vpop.f32.mrb[14].mxu1  ;;  %v424_v20 = vadd.f32 %v1204_v17, %v1202_v15  ;;  %v1212_v21 = vpop.f32.mrb[14].mxu0 }
 0x114   :  { %v391_v22 = vpop.f32.mrb[15].mxu1  ;;  %v1214_v23 = vpop.f32.mrb[15].mxu0  ;;  %v430_v24 = vsel %vm394_vm1, %v1208_v19, 0.0 }
 0x115   :  { %v426_v25 = vadd.f32 %v425_v18, %v424_v20  ;;  %v429_v26 = vadd.f32 %v1214_v23, %v1212_v21 }
 0x117   :  { %427 = vadd.xlane.f32.xlu0 %v426_v25  ;;  %v431_v27 = vadd.f32 %v430_v24, %v429_v26 }
 0x122   :  { %594 = vperm.xlu1 %925, %v580_v28  }
 0x126   :  { %599 = vperm.xlu1 %925, %v581_v29  }
 0x12a   :  { %604 = vperm.xlu1 %925, %v582_v30  }
 0x12d   :  { %589 = vperm.xlu0 %924, %v579_v31  }
 0x12e   :  { %609 = vperm.xlu1 %925, %v583_v32  }
 0x131   :  { %666 = vperm.xlu0 %924, %v652_v33  }
 0x132   :  { %614 = vperm.xlu1 %925, %v584_v34  }
 0x135   :  { %676 = vperm.xlu0 %924, %v654_v35  }
 0x136   :  { %619 = vperm.xlu1 %925, %v585_v38  }
 0x139   :  { %686 = vperm.xlu0 %924, %v656_v41  }
 0x13a   :  { %624 = vperm.xlu1 %925, %v586_v42  }
 0x15e   :  { %432 = vadd.xlane.f32.xlu1 %v431_v27 }
 0x16f   :  { %661 = vperm.xlu1 %925, %v651_v44  }
 0x173   :  { %671 = vperm.xlu1 %925, %v653_v46  }
 0x177   :  { %681 = vperm.xlu1 %925, %v655_v47  }
 0x18c   :  { %v398_v48 = vpop.xlane.xlu0 %397 }
 0x18d   :  { %v435_v49 = vmul.f32 0.0034722222, %v398_v48 }
 0x18f   :  { %v1263_v52 = vsub.f32 %v1142_v37, %v435_v49  ;;  %v1266_v55 = vsub.f32 %v1144_v39, %v435_v49  ;;  %v1269_v56 = vsub.f32 %v1140_v36, %v435_v49 }
 0x190   :  { %v403_v57 = vpop.xlane.xlu0 %402 }
 0x191   :  { %v436_v60 = vmul.f32 0.0034722222, %v403_v57  ;;  %v467_v61 = vmul.f32 %v1263_v52, %v1263_v52  ;;  %v468_v62 = vmul.f32 %v1266_v55, %v1266_v55  ;;  %v469_v63 = vmul.f32 %v1269_v56, %v1269_v56 }
 0x193   :  { %v1278_v37 = vsub.f32 %v1152_v43, %v436_v60  ;;  %v1281_v39 = vsub.f32 %v1154_v45, %v436_v60  ;;  %v1284_v36 = vsub.f32 %v1146_v40, %v436_v60  ;;  %v491_v2 = vadd.f32 %v468_v62, %v467_v61 }
 0x194   :  { %v408_v3 = vpop.xlane.xlu1 %407  ;;  %v492_v6 = vsel %vm394_vm1, %v469_v63, 0.0 }
 0x195   :  { %v437_v7 = vmul.f32 0.0034722222, %v408_v3  ;;  %v493_v10 = vadd.f32 %v492_v6, %v491_v2  ;;  %v470_v11 = vmul.f32 %v1278_v37, %v1278_v37  ;;  %v471_v12 = vmul.f32 %v1281_v39, %v1281_v39 }
 0x196   :  { %v472_v43 = vmul.f32 %v1284_v36, %v1284_v36 }
 0x197   :  { %v1294_v45 = vsub.f32 %v1162_v51, %v437_v7  ;;  %v1297_v40 = vsub.f32 %v1164_v53, %v437_v7  ;;  %v1300_v13 = vsub.f32 %v1160_v50, %v437_v7  ;;  %494 = vadd.xlane.f32.xlu0 %v493_v10  ;;  %v496_v16 = vadd.f32 %v471_v12, %v470_v11 }
 0x198   :  { %v413_v18 = vpop.xlane.xlu1 %412  ;;  %v497_v20 = vsel %vm394_vm1, %v472_v43, 0.0 }
 0x199   :  { %v438_v22 = vmul.f32 0.0034722222, %v413_v18  ;;  %v498_v24 = vadd.f32 %v497_v20, %v496_v16  ;;  %v473_v25 = vmul.f32 %v1294_v45, %v1294_v45  ;;  %v474_v51 = vmul.f32 %v1297_v40, %v1297_v40 }
 0x19a   :  { %v475_v53 = vmul.f32 %v1300_v13, %v1300_v13 }
 0x19b   :  { %v1310_v26 = vsub.f32 %v1172_v58, %v438_v22  ;;  %v1313_v50 = vsub.f32 %v1174_v59, %v438_v22  ;;  %v1316_v27 = vsub.f32 %v1166_v54, %v438_v22  ;;  %499 = vadd.xlane.f32.xlu1 %v498_v24  ;;  %v501_v28 = vadd.f32 %v474_v51, %v473_v25 }
 0x19c   :  { %v418_v29 = vpop.xlane.xlu0 %417  ;;  %v502_v30 = vsel %vm394_vm1, %v475_v53, 0.0 }
 0x19d   :  { %v439_v31 = vmul.f32 0.0034722222, %v418_v29  ;;  %v503_v32 = vadd.f32 %v502_v30, %v501_v28  ;;  %v476_v33 = vmul.f32 %v1310_v26, %v1310_v26  ;;  %v477_v58 = vmul.f32 %v1313_v50, %v1313_v50 }
 0x19e   :  { %v423_v34 = vpop.xlane.xlu1 %422  ;;  %v478_v59 = vmul.f32 %v1316_v27, %v1316_v27 }
 0x19f   :  { %v1326_v54 = vsub.f32 %v1182_v1, %v439_v31  ;;  %v1329_v35 = vsub.f32 %v1186_v4, %v439_v31  ;;  %v1332_v38 = vsub.f32 %v1180_v0, %v439_v31  ;;  %v440_v41 = vmul.f32 0.0034722222, %v423_v34  ;;  %504 = vadd.xlane.f32.xlu0 %v503_v32 }
 0x1a0   :  { %v506_v42 = vadd.f32 %v477_v58, %v476_v33  ;;  %v507_v44 = vsel %vm394_vm1, %v478_v59, 0.0 }
 0x1a1   :  { %v1336_v46 = vsub.f32 %v1192_v8, %v440_v41  ;;  %v1339_v47 = vsub.f32 %v1194_v9, %v440_v41  ;;  %v1342_v1 = vsub.f32 %v1188_v5, %v440_v41  ;;  %v479_v4 = vmul.f32 %v1326_v54, %v1326_v54 }
 0x1a2   :  { %v508_v48 = vadd.f32 %v507_v44, %v506_v42  ;;  %v480_v0 = vmul.f32 %v1329_v35, %v1329_v35  ;;  %v481_v49 = vmul.f32 %v1332_v38, %v1332_v38  ;;  %v1377_v20 = vpop.permute.xlu1 %594 }
 0x1a3   :  { %v482_v8 = vmul.f32 %v1336_v46, %v1336_v46  ;;  %v483_v9 = vmul.f32 %v1339_v47, %v1339_v47  ;;  %v484_v5 = vmul.f32 %v1342_v1, %v1342_v1 }
 0x1a4   :  { %509 = vadd.xlane.f32.xlu1 %v508_v48  ;;  %v428_v57 = vpop.xlane.xlu0 %427  ;;  %v511_v60 = vadd.f32 %v480_v0, %v479_v4  ;;  %v512_v61 = vsel %vm394_vm1, %v481_v49, 0.0 }
 0x1a5   :  { %v441_v62 = vmul.f32 0.0034722222, %v428_v57  ;;  %v516_v63 = vadd.f32 %v483_v9, %v482_v8  ;;  %v517_v2 = vsel %vm394_vm1, %v484_v5, 0.0 }
 0x1a6   :  { %v513_v3 = vadd.f32 %v512_v61, %v511_v60  ;;  %v1379_v22 = vpop.permute.xlu1 %599 }
 0x1a7   :  { %v1359_v6 = vsub.f32 %v1202_v15, %v441_v62  ;;  %v1362_v7 = vsub.f32 %v1204_v17, %v441_v62  ;;  %v1365_v10 = vsub.f32 %v1200_v14, %v441_v62  ;;  %v518_v11 = vadd.f32 %v517_v2, %v516_v63  ;;  %v658_v14 = vld [vmem:[%s1534_s3 + $0x38] sm:$0xff] }
 0x1a8   :  { %514 = vadd.xlane.f32.xlu0 %v513_v3 }
 0x1a9   :  { %519 = vadd.xlane.f32.xlu1 %v518_v11  ;;  %v485_v12 = vmul.f32 %v1359_v6, %v1359_v6  ;;  %v486_v43 = vmul.f32 %v1362_v7, %v1362_v7  ;;  %v487_v16 = vmul.f32 %v1365_v10, %v1365_v10 }
 0x1aa   :  { %v1381_v24 = vpop.permute.xlu1 %604 }
 0x1ab   :  { %v521_v15 = vadd.f32 %v486_v43, %v485_v12  ;;  %v522_v18 = vsel %vm394_vm1, %v487_v16, 0.0 }
 0x1ad   :  { %v523_v17 = vadd.f32 %v522_v18, %v521_v15 }
 0x1ae   :  { %v1383_v25 = vpop.permute.xlu1 %609 }
 0x1af   :  { %524 = vadd.xlane.f32.xlu0 %v523_v17 }
 0x1b2   :  { %v1385_v51 = vpop.permute.xlu1 %614 }
 0x1b6   :  { %v1387_v53 = vpop.permute.xlu1 %619 }
 0x1ba   :  { %v1389_v28 = vpop.permute.xlu1 %624 }
 0x1c5   :  { %696 = vperm.xlu0 %924, %v658_v14  }
 0x1eb   :  { %v433_v29 = vpop.xlane.xlu1 %432 }
 0x1ec   :  { %v442_v30 = vmul.f32 0.0034722222, %v433_v29 }
 0x1ee   :  { %v1392_v31 = vsub.f32 %v1212_v21, %v442_v30  ;;  %v1395_v32 = vsub.f32 %v1214_v23, %v442_v30  ;;  %v1398_v33 = vsub.f32 %v1208_v19, %v442_v30  ;;  %v657_v23 = vld [vmem:[%s1534_s3 + $0x30] sm:$0xff]  ;;  %v590_v19 = vpop.permute.xlu0 %589 }
 0x1ef   :  { %v662_v4 = vpop.permute.xlu1 %661 }
 0x1f0   :  { %v488_v58 = vmul.f32 %v1392_v31, %v1392_v31  ;;  %v489_v34 = vmul.f32 %v1395_v32, %v1395_v32  ;;  %v490_v59 = vmul.f32 %v1398_v33, %v1398_v33 }
 0x1f2   :  { %v526_v41 = vadd.f32 %v489_v34, %v488_v58  ;;  %v527_v42 = vsel %vm394_vm1, %v490_v59, 0.0  ;;  %v667_v44 = vpop.permute.xlu0 %666 }
 0x1f3   :  { %v1412_v0 = vpop.permute.xlu1 %671 }
 0x1f4   :  { %v528_v21 = vadd.f32 %v527_v42, %v526_v41 }
 0x1f6   :  { %529 = vadd.xlane.f32.xlu1 %v528_v21  ;;  %v1410_v48 = vpop.permute.xlu0 %676 }
 0x1f7   :  { %v1416_v8 = vpop.permute.xlu1 %681 }
 0x1fa   :  { %v1414_v49 = vpop.permute.xlu0 %686 }
 0x207   :  { %691 = vperm.xlu1 %925, %v657_v23  }
 0x224   :  { %v495_v9 = vpop.xlane.xlu0 %494 }
 0x225   :  { %v531_v5 = vmul.f32 0.0034722222, %v495_v9 }
 0x227   :  { %v539_v57 = vadd.f32 1e-05, %v531_v5 }
 0x228   :  { %v500_v60 = vpop.xlane.xlu1 %499 }
 0x229   :  { %974 = vrsqrt.f32 %v539_v57  ;;  %v532_v61 = vmul.f32 0.0034722222, %v500_v60 }
 0x22b   :  { %v540_v62 = vadd.f32 1e-05, %v532_v61 }
 0x22c   :  { %v505_v63 = vpop.xlane.xlu0 %504 }
 0x22d   :  { %976 = vrsqrt.f32 %v540_v62  ;;  %v533_v2 = vmul.f32 0.0034722222, %v505_v63 }
 0x22f   :  { %v541_v3 = vadd.f32 1e-05, %v533_v2 }
 0x231   :  { %978 = vrsqrt.f32 %v541_v3  ;;  %v510_v11 = vpop.xlane.xlu1 %509 }
 0x232   :  { %v534_v12 = vmul.f32 0.0034722222, %v510_v11 }
 0x233   :  { %v975_v43 = vpop.eup %974 }
 0x234   :  { %v555_v16 = vmul.f32 %v975_v43, %v1263_v52  ;;  %v556_v15 = vmul.f32 %v975_v43, %v1266_v55  ;;  %v557_v18 = vmul.f32 %v975_v43, %v1269_v56  ;;  %v542_v17 = vadd.f32 1e-05, %v534_v12 }
 0x235   :  { %v515_v14 = vpop.xlane.xlu0 %514 }
 0x236   :  { %v627_v29 = vmul.f32 %v590_v19, %v555_v16  ;;  %v628_v30 = vmul.f32 %v590_v19, %v556_v15  ;;  %v629_v58 = vmul.f32 %v590_v19, %v557_v18  ;;  %980 = vrsqrt.f32 %v542_v17  ;;  %v520_v34 = vpop.xlane.xlu1 %519 }
 0x237   :  { %v977_v59 = vpop.eup %976  ;;  %v535_v41 = vmul.f32 0.0034722222, %v515_v14  ;;  %v536_v42 = vmul.f32 0.0034722222, %v520_v34 }
 0x238   :  { %v699_v21 = vadd.f32 %v662_v4, %v627_v29  ;;  %v700_v23 = vadd.f32 %v662_v4, %v628_v30  ;;  %v701_v9 = vadd.f32 %v662_v4, %v629_v58  ;;  %v558_v5 = vmul.f32 %v977_v59, %v1278_v37 }
 0x239   :  { %v559_v52 = vmul.f32 %v977_v59, %v1281_v39  ;;  %v560_v55 = vmul.f32 %v977_v59, %v1284_v36  ;;  %v543_v56 = vadd.f32 1e-05, %v535_v41  ;;  %v544_v57 = vadd.f32 1e-05, %v536_v42 }
 0x23a   :  { %v723_v60 = vmax.f32 %v699_v21, 0.0  ;;  %v724_v61 = vmax.f32 %v700_v23, 0.0  ;;  %v725_v62 = vmax.f32 %v701_v9, 0.0  ;;  %v630_v19 = vmul.f32 %v1377_v20, %v558_v5 }
 0x23b   :  { %v979_v63 = vpop.eup %978  ;;  %v631_v2 = vmul.f32 %v1377_v20, %v559_v52  ;;  %v632_v3 = vmul.f32 %v1377_v20, %v560_v55  ;;  %982 = vrsqrt.f32 %v543_v56 }
 0x23c   :  { %v907_v4 = vpack.c.bf16 %v724_v61, %v723_v60  ;;  %v908_v37 = vpack.c.bf16 %v725_v62, %v725_v62  ;;  %v702_v11 = vadd.f32 %v667_v44, %v630_v19  ;;  %v561_v39 = vmul.f32 %v979_v63, %v1294_v45 }
 0x23d   :  { %v703_v36 = vadd.f32 %v667_v44, %v631_v2  ;;  %v704_v12 = vadd.f32 %v667_v44, %v632_v3  ;;  %v562_v43 = vmul.f32 %v979_v63, %v1297_v40  ;;  %v563_v16 = vmul.f32 %v979_v63, %v1300_v13 }
 0x23e   :  { %827 = vst [vmem:[%s1535_s4] sm:$0xff] %v907_v4  ;;  %v726_v15 = vmax.f32 %v702_v11, 0.0  ;;  %v633_v20 = vmul.f32 %v1379_v22, %v561_v39  ;;  %984 = vrsqrt.f32 %v544_v57  ;;  %829 = vst.msk [vmem:[%s1535_s4 + $0x8] sm:$0xf] %vm828_vm2, %v908_v37 }
 0x23f   :  { %v727_v45 = vmax.f32 %v703_v36, 0.0  ;;  %v728_v18 = vmax.f32 %v704_v12, 0.0  ;;  %v634_v44 = vmul.f32 %v1379_v22, %v562_v43  ;;  %v635_v40 = vmul.f32 %v1379_v22, %v563_v16 }
 0x240   :  { %v981_v13 = vpop.eup %980  ;;  %v705_v17 = vadd.f32 %v1412_v0, %v633_v20 }
 0x241   :  { %v909_v14 = vpack.c.bf16 %v727_v45, %v726_v15  ;;  %v910_v29 = vpack.c.bf16 %v728_v18, %v728_v18  ;;  %v706_v30 = vadd.f32 %v1412_v0, %v634_v44  ;;  %v707_v58 = vadd.f32 %v1412_v0, %v635_v40 }
 0x242   :  { %v729_v34 = vmax.f32 %v705_v17, 0.0  ;;  %v564_v59 = vmul.f32 %v981_v13, %v1310_v26  ;;  %v565_v41 = vmul.f32 %v981_v13, %v1313_v50  ;;  %v566_v42 = vmul.f32 %v981_v13, %v1316_v27 }
 0x243   :  { %830 = vst [vmem:[%s1535_s4 + $0xc] sm:$0xff] %v909_v14  ;;  %v730_v22 = vmax.f32 %v706_v30, 0.0  ;;  %v731_v21 = vmax.f32 %v707_v58, 0.0  ;;  %831 = vst.msk [vmem:[%s1535_s4 + $0x14] sm:$0xf] %vm828_vm2, %v910_v29 }
 0x244   :  { %v636_v0 = vmul.f32 %v1381_v24, %v564_v59  ;;  %v637_v23 = vmul.f32 %v1381_v24, %v565_v41  ;;  %v638_v26 = vmul.f32 %v1381_v24, %v566_v42 }
 0x245   :  { %v983_v50 = vpop.eup %982  ;;  %v911_v9 = vpack.c.bf16 %v730_v22, %v729_v34  ;;  %v912_v27 = vpack.c.bf16 %v731_v21, %v731_v21 }
 0x246   :  { %v708_v5 = vadd.f32 %v1410_v48, %v636_v0  ;;  %v709_v52 = vadd.f32 %v1410_v48, %v637_v23  ;;  %v710_v55 = vadd.f32 %v1410_v48, %v638_v26  ;;  %v567_v56 = vmul.f32 %v983_v50, %v1326_v54 }
 0x247   :  { %832 = vst [vmem:[%s1535_s4 + $0x18] sm:$0xff] %v911_v9  ;;  %v568_v57 = vmul.f32 %v983_v50, %v1329_v35  ;;  %v569_v60 = vmul.f32 %v983_v50, %v1332_v38  ;;  %833 = vst.msk [vmem:[%s1535_s4 + $0x20] sm:$0xf] %vm828_vm2, %v912_v27 }
 0x248   :  { %v985_v24 = vpop.eup %984  ;;  %v732_v61 = vmax.f32 %v708_v5, 0.0  ;;  %v733_v62 = vmax.f32 %v709_v52, 0.0  ;;  %v734_v19 = vmax.f32 %v710_v55, 0.0  ;;  %v639_v48 = vmul.f32 %v1383_v25, %v567_v56 }
 0x249   :  { %v640_v54 = vmul.f32 %v1383_v25, %v568_v57  ;;  %v641_v63 = vmul.f32 %v1383_v25, %v569_v60  ;;  %v570_v2 = vmul.f32 %v985_v24, %v1336_v46  ;;  %v571_v35 = vmul.f32 %v985_v24, %v1339_v47 }
 0x24a   :  { %v913_v38 = vpack.c.bf16 %v733_v62, %v732_v61  ;;  %v914_v3 = vpack.c.bf16 %v734_v19, %v734_v19  ;;  %v711_v4 = vadd.f32 %v1416_v8, %v639_v48  ;;  %v572_v37 = vmul.f32 %v985_v24, %v1342_v1 }
 0x24b   :  { %v712_v11 = vadd.f32 %v1416_v8, %v640_v54  ;;  %v713_v39 = vadd.f32 %v1416_v8, %v641_v63  ;;  %v642_v36 = vmul.f32 %v1385_v51, %v570_v2  ;;  %v643_v12 = vmul.f32 %v1385_v51, %v571_v35 }
 0x24c   :  { %834 = vst [vmem:[%s1535_s4 + $0x24] sm:$0xff] %v913_v38  ;;  %v735_v46 = vmax.f32 %v711_v4, 0.0  ;;  %v644_v47 = vmul.f32 %v1385_v51, %v572_v37  ;;  %835 = vst.msk [vmem:[%s1535_s4 + $0x2c] sm:$0xf] %vm828_vm2, %v914_v3 }
 0x24d   :  { %v736_v1 = vmax.f32 %v712_v11, 0.0  ;;  %v737_v25 = vmax.f32 %v713_v39, 0.0  ;;  %v714_v8 = vadd.f32 %v1414_v49, %v642_v36  ;;  %v715_v43 = vadd.f32 %v1414_v49, %v643_v12 }
 0x24e   :  { %v716_v16 = vadd.f32 %v1414_v49, %v644_v47  ;;  %v525_v49 = vpop.xlane.xlu0 %524 }
 0x24f   :  { %v915_v15 = vpack.c.bf16 %v736_v1, %v735_v46  ;;  %v916_v20 = vpack.c.bf16 %v737_v25, %v737_v25  ;;  %v738_v45 = vmax.f32 %v714_v8, 0.0  ;;  %v739_v18 = vmax.f32 %v715_v43, 0.0 }
 0x250   :  { %v740_v44 = vmax.f32 %v716_v16, 0.0  ;;  %v537_v13 = vmul.f32 0.0034722222, %v525_v49 }
 0x251   :  { %836 = vst [vmem:[%s1535_s4 + $0x30] sm:$0xff] %v915_v15  ;;  %v917_v51 = vpack.c.bf16 %v739_v18, %v738_v45  ;;  %837 = vst.msk [vmem:[%s1535_s4 + $0x38] sm:$0xf] %vm828_vm2, %v916_v20 }
 0x252   :  { %v918_v40 = vpack.c.bf16 %v740_v44, %v740_v44  ;;  %v545_v17 = vadd.f32 1e-05, %v537_v13  ;;  %v697_v24 = vpop.permute.xlu0 %696 }
 0x253   :  { %838 = vst [vmem:[%s1535_s4 + $0x3c] sm:$0xff] %v917_v51 }
 0x254   :  { %839 = vst.msk [vmem:[%s1535_s4 + $0x44] sm:$0xf] %vm828_vm2, %v918_v40  ;;  %986 = vrsqrt.f32 %v545_v17 }
 0x25e   :  { %v987_v14 = vpop.eup %986 }
 0x25f   :  { %v573_v29 = vmul.f32 %v987_v14, %v1359_v6  ;;  %v574_v30 = vmul.f32 %v987_v14, %v1362_v7  ;;  %v575_v58 = vmul.f32 %v987_v14, %v1365_v10 }
 0x261   :  { %v645_v42 = vmul.f32 %v1387_v53, %v573_v29  ;;  %v646_v22 = vmul.f32 %v1387_v53, %v574_v30  ;;  %v647_v21 = vmul.f32 %v1387_v53, %v575_v58 }
 0x283   :  { %v530_v34 = vpop.xlane.xlu1 %529 }
 0x284   :  { %v538_v59 = vmul.f32 0.0034722222, %v530_v34 }
 0x286   :  { %v546_v41 = vadd.f32 1e-05, %v538_v59 }
 0x287   :  { %v692_v0 = vpop.permute.xlu1 %691 }
 0x288   :  { %988 = vrsqrt.f32 %v546_v41  ;;  %v717_v23 = vadd.f32 %v692_v0, %v645_v42  ;;  %v718_v26 = vadd.f32 %v692_v0, %v646_v22  ;;  %v719_v50 = vadd.f32 %v692_v0, %v647_v21 }
 0x28a   :  { %v741_v9 = vmax.f32 %v717_v23, 0.0  ;;  %v742_v6 = vmax.f32 %v718_v26, 0.0  ;;  %v743_v27 = vmax.f32 %v719_v50, 0.0 }
 0x28c   :  { %v919_v7 = vpack.c.bf16 %v742_v6, %v741_v9  ;;  %v920_v5 = vpack.c.bf16 %v743_v27, %v743_v27 }
 0x28e   :  { %840 = vst [vmem:[%s1535_s4 + $0x48] sm:$0xff] %v919_v7  ;;  %841 = vst.msk [vmem:[%s1535_s4 + $0x50] sm:$0xf] %vm828_vm2, %v920_v5 }
 0x292   :  { %v989_v10 = vpop.eup %988 }
 0x293   :  { %v576_v53 = vmul.f32 %v989_v10, %v1392_v31  ;;  %v577_v52 = vmul.f32 %v989_v10, %v1395_v32  ;;  %v578_v55 = vmul.f32 %v989_v10, %v1398_v33 }
 0x295   :  { %v648_v56 = vmul.f32 %v1389_v28, %v576_v53  ;;  %v649_v57 = vmul.f32 %v1389_v28, %v577_v52  ;;  %v650_v60 = vmul.f32 %v1389_v28, %v578_v55 }
 0x297   :  { %v720_v61 = vadd.f32 %v697_v24, %v648_v56  ;;  %v721_v62 = vadd.f32 %v697_v24, %v649_v57  ;;  %v722_v19 = vadd.f32 %v697_v24, %v650_v60 }
 0x299   :  { %v744_v48 = vmax.f32 %v720_v61, 0.0  ;;  %v745_v54 = vmax.f32 %v721_v62, 0.0  ;;  %v746_v63 = vmax.f32 %v722_v19, 0.0 }
 0x29b   :  { %v921_v2 = vpack.c.bf16 %v745_v54, %v744_v48  ;;  %v922_v35 = vpack.c.bf16 %v746_v63, %v746_v63 }
 0x29d   :  { %842 = vst [vmem:[%s1535_s4 + $0x54] sm:$0xff] %v921_v2  ;;  %843 = vst.msk [vmem:[%s1535_s4 + $0x5c] sm:$0xf] %vm828_vm2, %v922_v35 }

// kernel: _lambda_.16
= control target key start
LH: loop header
LB: loop body
LE: loop exit
PB: predicated region body
PF: predicated region fallthrough
CT: control target
= control target key end

     0   :  { %v2137_v1 = vmov 0   ;;  %vm865_vm0 = vcmask 523264   ;;  %vm1293_vm1 = vcmask 261120   ;;  %s3058_s1 = inlined_call_operand.vmem [shape: bf16[576,288], index: 1, kind: input, shape index: {}]   ;;  %s3059_s0 = inlined_call_operand.vmem [shape: bf16[64,576], index: 0, kind: input, shape index: {}]   ;;  %s3060_s2 = inlined_call_operand.vmem [shape: f32[64,1], index: 2, kind: input, shape index: {}]   ;;  %s3061_s3 = inlined_call_operand.vmem [shape: f32[64,1], index: 3, kind: input, shape index: {}]   ;;  %s3062_s4 = inlined_call_operand.vmem [shape: f32[32,288], index: 4, kind: input, shape index: {}]   ;;  %s3063_s5 = inlined_call_operand.vmem [shape: f32[32,288], index: 5, kind: output, shape index: {}]  }
   0x1   :  { %v1949_v0 = vld [vmem:[%s3058_s1 + $0x4] ss:$12 sps:$4 sm:$0xff]   ;;  %1056 = vmatprep.mubr.bf16.mxu1 %v2137_v1  ;;  %1948 = vset.pattern.permute.xlu1 %v2137_v1  ;;  %v1953_v3 = vld [vmem:[%s3058_s1] ss:$12 sps:$4 sm:$0xff]   ;;  %v1955_v5 = vld [vmem:[%s3058_s1 + $0x1c] ss:$12 sps:$4 sm:$0xff]  }
   0x2   :  { %v1951_v2 = vld [vmem:[%s3058_s1 + $0x304] ss:$12 sps:$4 sm:$0xff]   ;;  %1947 = vset.pattern.permute.xlu0 %v2137_v1  ;;  %878 = vmatprep.subr.bf16.mxu0 %v1949_v0  ;;  %v1954_v4 = vld [vmem:[%s3058_s1 + $0x300] ss:$12 sps:$4 sm:$0xff]   ;;  %v1957_v6 = vld [vmem:[%s3058_s1 + $0x31c] ss:$12 sps:$4 sm:$0xff]  }
   0x3   :  { %1024 = vmatprep.subr.bf16.mxu1 %v1951_v2  ;;  %879 = vmatpush1.bf16.msra.mxu0 %v1953_v3  ;;  %v1959_v7 = vld [vmem:[%s3058_s1 + $0x18] ss:$12 sps:$4 sm:$0xff]   ;;  %v1961_v9 = vld [vmem:[%s3058_s1 + $0x34] ss:$12 sps:$4 sm:$0xff]   ;;  %v1965_v11 = vld [vmem:[%s3058_s1 + $0x30] ss:$12 sps:$4 sm:$0xff]  }
   0x4   :  { %1025 = vmatpush1.bf16.msra.mxu1 %v1954_v4  ;;  %880 = vmatprep.subr.bf16.mxu0 %v1955_v5  ;;  %v1960_v8 = vld [vmem:[%s3058_s1 + $0x318] ss:$12 sps:$4 sm:$0xff]   ;;  %v1963_v10 = vld [vmem:[%s3058_s1 + $0x334] ss:$12 sps:$4 sm:$0xff]   ;;  %v1966_v12 = vld [vmem:[%s3058_s1 + $0x330] ss:$12 sps:$4 sm:$0xff]  }
   0x5   :  { %1026 = vmatprep.subr.bf16.mxu1 %v1957_v6  ;;  %v1967_v13 = vld [vmem:[%s3058_s1 + $0x4c] ss:$12 sps:$4 sm:$0xff]   ;;  %v1971_v15 = vld [vmem:[%s3058_s1 + $0x48] ss:$12 sps:$4 sm:$0xff]   ;;  %v1973_v17 = vld [vmem:[%s3058_s1 + $0x64] ss:$12 sps:$4 sm:$0xff]  }
   0x6   :  { %v1969_v14 = vld [vmem:[%s3058_s1 + $0x34c] ss:$12 sps:$4 sm:$0xff]   ;;  %v1972_v16 = vld [vmem:[%s3058_s1 + $0x348] ss:$12 sps:$4 sm:$0xff]   ;;  %v2225_v18 = vld [vmem:[%s3059_s0 + $0x10] ss:$20 sps:$4 sm:$0xff]  }
   0x7   :  { %881 = vmatpush1.bf16.msra.mxu0 %v1959_v7  ;;  %v1976_v19 = vld [vmem:[%s3058_s1 + $0xc8] ss:$12 sps:$4 sm:$0xff]   ;;  %v1977_v20 = vld [vmem:[%s3058_s1 + $0x60] ss:$12 sps:$4 sm:$0xff]   ;;  %v1982_v24 = vld [vmem:[%s3058_s1 + $0x78] ss:$12 sps:$4 sm:$0xff]  }
   0x8   :  { %1027 = vmatpush1.bf16.msra.mxu1 %v1960_v8  ;;  %882 = vmatprep.subr.bf16.mxu0 %v1961_v9  ;;  %v1978_v21 = vld [vmem:[%s3058_s1 + $0x8] ss:$12 sps:$4 sm:$0xff]   ;;  %v1981_v23 = vld [vmem:[%s3058_s1 + $0xe0] ss:$12 sps:$4 sm:$0xff]   ;;  %v1987_v27 = vld [vmem:[%s3058_s1 + $0xf8] ss:$12 sps:$4 sm:$0xff]  }
   0x9   :  { %1028 = vmatprep.subr.bf16.mxu1 %v1963_v10  ;;  %v1979_v22 = vld [vmem:[%s3058_s1 + $0x7c] ss:$12 sps:$4 sm:$0xff]   ;;  %v1983_v25 = vld [vmem:[%s3058_s1 + $0x20] ss:$12 sps:$4 sm:$0xff]   ;;  %v1989_v30 = vld [vmem:[%s3058_s1 + $0x38] ss:$12 sps:$4 sm:$0xff]  }
   0xa   :  { %v1984_v26 = vld [vmem:[%s3058_s1 + $0x94] ss:$12 sps:$4 sm:$0xff]   ;;  %v2260_v28 = vld [vmem:[%s3059_s0 + $0x38] ss:$20 sps:$4 sm:$0xff]   ;;  %v1988_v29 = vld [vmem:[%s3058_s1 + $0x90] ss:$12 sps:$4 sm:$0xff]  }
   0xb   :  { %883 = vmatpush1.bf16.msra.mxu0 %v1965_v11  ;;  %v1990_v31 = vld [vmem:[%s3058_s1 + $0xac] ss:$12 sps:$4 sm:$0xff]   ;;  %v1992_v32 = vld [vmem:[%s3058_s1 + $0x110] ss:$12 sps:$4 sm:$0xff]   ;;  %v1993_v33 = vld [vmem:[%s3058_s1 + $0xa8] ss:$12 sps:$4 sm:$0xff]  }
   0xc   :  { %1029 = vmatpush1.bf16.msra.mxu1 %v1966_v12  ;;  %884 = vmatprep.subr.bf16.mxu0 %v1967_v13  ;;  %v1994_v34 = vld [vmem:[%s3058_s1 + $0x50] ss:$12 sps:$4 sm:$0xff]   ;;  %v1998_v36 = vld [vmem:[%s3058_s1 + $0x128] ss:$12 sps:$4 sm:$0xff]   ;;  %v1999_v38 = vld [vmem:[%s3058_s1 + $0xc0] ss:$12 sps:$4 sm:$0xff]  }
   0xd   :  { %1030 = vmatprep.subr.bf16.mxu1 %v1969_v14  ;;  %v1995_v35 = vld [vmem:[%s3058_s1 + $0xc4] ss:$12 sps:$4 sm:$0xff]   ;;  %v2292_v37 = vld [vmem:[%s3059_s0 + $0x60] ss:$20 sps:$4 sm:$0xff]   ;;  %v2001_v40 = vld [vmem:[%s3058_s1 + $0xdc] ss:$12 sps:$4 sm:$0xff]  }
   0xe   :  { %v2000_v39 = vld [vmem:[%s3058_s1 + $0x68] ss:$12 sps:$4 sm:$0xff]   ;;  %v2003_v41 = vld [vmem:[%s3058_s1 + $0x140] ss:$12 sps:$4 sm:$0xff]   ;;  %v2004_v42 = vld [vmem:[%s3058_s1 + $0xd8] ss:$12 sps:$4 sm:$0xff]  }
   0xf   :  { %885 = vmatpush1.bf16.msra.mxu0 %v1971_v15  ;;  %v2005_v43 = vld [vmem:[%s3058_s1 + $0x80] ss:$12 sps:$4 sm:$0xff]   ;;  %v2320_v45 = vld [vmem:[%s3059_s0 + $0x88] ss:$20 sps:$4 sm:$0xff]   ;;  %v2009_v46 = vld [vmem:[%s3058_s1 + $0x158] ss:$12 sps:$4 sm:$0xff]  }
  0x10   :  { %1031 = vmatpush1.bf16.msra.mxu1 %v1972_v16  ;;  %886 = vmatprep.subr.bf16.mxu0 %v1973_v17  ;;  %v2006_v44 = vld [vmem:[%s3058_s1 + $0xf4] ss:$12 sps:$4 sm:$0xff]   ;;  %v2010_v47 = vld [vmem:[%s3058_s1 + $0xf0] ss:$12 sps:$4 sm:$0xff]   ;;  %v2011_v48 = vld [vmem:[%s3058_s1 + $0x98] ss:$12 sps:$4 sm:$0xff]  }
  0x11   :  { %1810 = vmatprep.subr.bf16.mxu1 %v1976_v19  ;;  %v2012_v49 = vld [vmem:[%s3058_s1 + $0x10c] ss:$12 sps:$4 sm:$0xff]   ;;  %v2014_v50 = vld [vmem:[%s3058_s1 + $0x170] ss:$12 sps:$4 sm:$0xff]   ;;  %v2015_v52 = vld [vmem:[%s3058_s1 + $0x108] ss:$12 sps:$4 sm:$0xff]  }
  0x12   :  { %v2019_v51 = vld [vmem:[%s3059_s0 + $0x4] ss:$20 sps:$4 sm:$0xff]   ;;  %v2016_v53 = vld [vmem:[%s3058_s1 + $0xb0] ss:$12 sps:$4 sm:$0xff]   ;;  %v2017_v55 = vld [vmem:[%s3059_s0] ss:$20 sps:$4 sm:$0xff]  }
  0x13   :  { %1802 = vmatmul.mubr.msk.bf16.vlgmr.msra.gmra.mrb[0].mxu1 %vm865_vm0, %v2225_v18  ;;  %887 = vmatpush1.bf16.msra.mxu0 %v1977_v20  ;;  %v2020_v54 = vld [vmem:[%s3058_s1 + $0x124] ss:$12 sps:$4 sm:$0xff]   ;;  %v2022_v56 = vld [vmem:[%s3058_s1 + $0x248] ss:$12 sps:$4 sm:$0xff]   ;;  %v2023_v57 = vld [vmem:[%s3058_s1 + $0x120] ss:$12 sps:$4 sm:$0xff]  }
  0x14   :  { %1811 = vmatpush3.bf16.msra.mxu1 %v1978_v21  ;;  %888 = vmatprep.subr.bf16.mxu0 %v1979_v22  ;;  %v2024_v58 = vld [vmem:[%s3058_s1 + $0x188] ss:$12 sps:$4 sm:$0xff]   ;;  %v2027_v60 = vld [vmem:[%s3058_s1 + $0x260] ss:$12 sps:$4 sm:$0xff]   ;;  %v2028_v62 = vld [vmem:[%s3058_s1 + $0x138] ss:$12 sps:$4 sm:$0xff]  }
  0x15   :  { %1812 = vmatprep.subr.bf16.mxu1 %v1981_v23  ;;  %1066 = vmatprep.mubr.bf16.mxu1 %v2137_v1  ;;  %v2025_v59 = vld [vmem:[%s3058_s1 + $0x13c] ss:$12 sps:$4 sm:$0xff]   ;;  %v2030_v61 = vld [vmem:[%s3059_s0 + $0x2c] ss:$20 sps:$4 sm:$0xff]   ;;  %v2035_v2 = vld [vmem:[%s3058_s1 + $0x278] ss:$12 sps:$4 sm:$0xff]  }
  0x16   :  { %910 = vmatprep.mubr.bf16.mxu0 %v2019_v51  ;;  %v2029_v63 = vld [vmem:[%s3058_s1 + $0x1a0] ss:$12 sps:$4 sm:$0xff]   ;;  %v2036_v3 = vld [vmem:[%s3058_s1 + $0x150] ss:$12 sps:$4 sm:$0xff]   ;;  %v2037_v4 = vld [vmem:[%s3058_s1 + $0x1b8] ss:$12 sps:$4 sm:$0xff]  }
  0x17   :  { %889 = vmatpush1.bf16.msra.mxu0 %v1982_v24  ;;  %v2032_v0 = vld [vmem:[%s3058_s1 + $0x154] ss:$12 sps:$4 sm:$0xff]   ;;  %v2038_v5 = vld [vmem:[%s3058_s1 + $0x16c] ss:$12 sps:$4 sm:$0xff]   ;;  %v2040_v6 = vld [vmem:[%s3058_s1 + $0x290] ss:$12 sps:$4 sm:$0xff]  }
  0x18   :  { %1813 = vmatpush3.bf16.msra.mxu1 %v1983_v25  ;;  %890 = vmatprep.subr.bf16.mxu0 %v1984_v26  ;;  %v2043_v7 = vld [vmem:[%s3059_s0 + $0x54] ss:$20 sps:$4 sm:$0xff]   ;;  %v2042_v9 = vld [vmem:[%s3058_s1 + $0x1d0] ss:$12 sps:$4 sm:$0xff]   ;;  %v2045_v12 = vld [vmem:[%s3058_s1 + $0x180] ss:$12 sps:$4 sm:$0xff]  }
  0x19   :  { %1814 = vmatprep.subr.bf16.mxu1 %v1987_v27  ;;  %v2041_v8 = vld [vmem:[%s3058_s1 + $0x168] ss:$12 sps:$4 sm:$0xff]   ;;  %v2047_v10 = vld [vmem:[%s3058_s1 + $0x184] ss:$12 sps:$4 sm:$0xff]   ;;  %v2054_v16 = vld [vmem:[%s3058_s1 + $0x2c0] ss:$12 sps:$4 sm:$0xff]  }
  0x1a   :  { %v2049_v11 = vld [vmem:[%s3058_s1 + $0x2a8] ss:$12 sps:$4 sm:$0xff]   ;;  %v2048_v13 = vld [vmem:[%s3059_s0 + $0x50] ss:$20 sps:$4 sm:$0xff]   ;;  %v2055_v20 = vld [vmem:[%s3058_s1 + $0x200] ss:$12 sps:$4 sm:$0xff]  }
  0x1b   :  { %1803 = vmatmul.mubr.msk.bf16.gmra.mrb[4].mxu1 %vm865_vm0, %v2260_v28  ;;  %891 = vmatpush1.bf16.msra.mxu0 %v1988_v29  ;;  %v2050_v14 = vld [vmem:[%s3058_s1 + $0x1e8] ss:$12 sps:$4 sm:$0xff]   ;;  %v2056_v17 = vld [vmem:[%s3059_s0 + $0x7c] ss:$20 sps:$4 sm:$0xff]   ;;  %v2051_v19 = vld [vmem:[%s3058_s1 + $0x198] ss:$12 sps:$4 sm:$0xff]  }
  0x1c   :  { %1815 = vmatpush3.bf16.msra.mxu1 %v1989_v30  ;;  %892 = vmatprep.subr.bf16.mxu0 %v1990_v31  ;;  %v2053_v15 = vld [vmem:[%s3058_s1 + $0x19c] ss:$12 sps:$4 sm:$0xff]   ;;  %v2060_v21 = vld [vmem:[%s3058_s1 + $0x1b4] ss:$12 sps:$4 sm:$0xff]   ;;  %v2062_v22 = vld [vmem:[%s3058_s1 + $0x2d8] ss:$12 sps:$4 sm:$0xff]  }
  0x1d   :  { %1816 = vmatprep.subr.bf16.mxu1 %v1992_v32  ;;  %1076 = vmatprep.mubr.bf16.mxu1 %v2137_v1  ;;  %v2058_v23 = vld [vmem:[%s3058_s1 + $0x1b0] ss:$12 sps:$4 sm:$0xff]   ;;  %v2061_v24 = vld [vmem:[%s3059_s0 + $0x78] ss:$20 sps:$4 sm:$0xff]   ;;  %v2064_v30 = vld [vmem:[%s3058_s1 + $0x1c8] ss:$12 sps:$4 sm:$0xff]  }
  0x1e   :  { %v2063_v25 = vld [vmem:[%s3058_s1 + $0x218] ss:$12 sps:$4 sm:$0xff]   ;;  %v2067_v27 = vld [vmem:[%s3058_s1 + $0x2f0] ss:$12 sps:$4 sm:$0xff]   ;;  %v2071_v29 = vld [vmem:[%s3059_s0 + $0xc] ss:$20 sps:$4 sm:$0xff]  }
  0x1f   :  { %893 = vmatpush1.bf16.msra.mxu0 %v1993_v33  ;;  %v2066_v26 = vld [vmem:[%s3058_s1 + $0x1cc] ss:$12 sps:$4 sm:$0xff]   ;;  %v2068_v31 = vld [vmem:[%s3058_s1 + $0x230] ss:$12 sps:$4 sm:$0xff]  }
  0x20   :  { %1817 = vmatpush3.bf16.msra.mxu1 %v1994_v34  ;;  %894 = vmatprep.subr.bf16.mxu0 %v1995_v35  ;;  %v2074_v32 = vld [vmem:[%s3058_s1 + $0x1e4] ss:$12 sps:$4 sm:$0xff]   ;;  %v2475_v33 = vld [vmem:[%s3059_s0 + $0x8] ss:$20 sps:$4 sm:$0xff]   ;;  %v2072_v34 = vld [vmem:[%s3058_s1 + $0x1e0] ss:$12 sps:$4 sm:$0xff]  }
  0x21   :  { %1818 = vmatprep.subr.bf16.mxu1 %v1998_v36  ;;  %v2483_v35 = vld [vmem:[%s3059_s0 + $0x34] ss:$20 sps:$4 sm:$0xff]  }
  0x22   :  { %v2077_v36 = vld [vmem:[%s3058_s1 + $0x1fc] ss:$12 sps:$4 sm:$0xff]  }
  0x23   :  { %1804 = vmatmul.mubr.msk.bf16.gmra.mrb[8].mxu1 %vm865_vm0, %v2292_v37  ;;  %895 = vmatpush1.bf16.msra.mxu0 %v1999_v38  ;;  %v2075_v38 = vld [vmem:[%s3058_s1 + $0x1f8] ss:$12 sps:$4 sm:$0xff]  }
  0x24   :  { %1819 = vmatpush3.bf16.msra.mxu1 %v2000_v39  ;;  %896 = vmatprep.subr.bf16.mxu0 %v2001_v40  ;;  %v2093_v39 = vld [vmem:[%s3058_s1 + $0x308] ss:$12 sps:$4 sm:$0xff]  }
  0x25   :  { %1820 = vmatprep.subr.bf16.mxu1 %v2003_v41  ;;  %1086 = vmatprep.mubr.bf16.mxu1 %v2137_v1  ;;  %v2034_v1 = vld [vmem:[%s3059_s0 + $0x28] ss:$20 sps:$4 sm:$0xff]   ;;  %v2082_v40 = vld [vmem:[%s3058_s1 + $0x214] ss:$12 sps:$4 sm:$0xff]  }
  0x26   :  { %v2080_v41 = vld [vmem:[%s3058_s1 + $0x210] ss:$12 sps:$4 sm:$0xff]  }
  0x27   :  { %897 = vmatpush1.bf16.msra.mxu0 %v2004_v42  ;;  %v2505_v42 = vld [vmem:[%s3059_s0 + $0x30] ss:$20 sps:$4 sm:$0xff]  }
  0x28   :  { %1821 = vmatpush3.bf16.msra.mxu1 %v2005_v43  ;;  %898 = vmatprep.subr.bf16.mxu0 %v2006_v44  ;;  %v2097_v43 = vld [vmem:[%s3058_s1 + $0x320] ss:$12 sps:$4 sm:$0xff]   ;;  %v2513_v44 = vld [vmem:[%s3059_s0 + $0x5c] ss:$20 sps:$4 sm:$0xff]  }
  0x29   :  { %1822 = vmatprep.subr.bf16.mxu1 %v2009_v46  ;;  %v2086_v46 = vld [vmem:[%s3058_s1 + $0x22c] ss:$12 sps:$4 sm:$0xff]  }
  0x2b   :  { %1805 = vmatmul.mubr.msk.bf16.gmra.mrb[12].mxu1 %vm865_vm0, %v2320_v45  ;;  %899 = vmatpush1.bf16.msra.mxu0 %v2010_v47  ;;  %v2104_v47 = vld [vmem:[%s3058_s1 + $0x338] ss:$12 sps:$4 sm:$0xff]  }
  0x2c   :  { %1823 = vmatpush3.bf16.msra.mxu1 %v2011_v48  ;;  %900 = vmatprep.subr.bf16.mxu0 %v2012_v49  ;;  %v2084_v48 = vld [vmem:[%s3058_s1 + $0x228] ss:$12 sps:$4 sm:$0xff]   ;;  %v2091_v49 = vld [vmem:[%s3058_s1 + $0x244] ss:$12 sps:$4 sm:$0xff]  }
  0x2d   :  { %1824 = vmatprep.subr.bf16.mxu1 %v2014_v50  ;;  %1129 = vmatprep.mubr.bf16.mxu1 %v2019_v51  ;;  %v2108_v50 = vld [vmem:[%s3058_s1 + $0x350] ss:$12 sps:$4 sm:$0xff]   ;;  %v2089_v51 = vld [vmem:[%s3058_s1 + $0x240] ss:$12 sps:$4 sm:$0xff]  }
  0x2f   :  { %901 = vmatpush1.bf16.msra.mxu0 %v2015_v52  ;;  %v2092_v52 = vld [vmem:[%s3059_s0 + $0x58] ss:$20 sps:$4 sm:$0xff]  }
  0x30   :  { %1825 = vmatpush3.bf16.msra.mxu1 %v2016_v53  ;;  %902 = vmatprep.subr.bf16.mxu0 %v2020_v54  ;;  %v2098_v53 = vld [vmem:[%s3059_s0 + $0x84] ss:$20 sps:$4 sm:$0xff]   ;;  %v2096_v54 = vld [vmem:[%s3058_s1 + $0x25c] ss:$12 sps:$4 sm:$0xff]  }
  0x31   :  { %1850 = vmatprep.subr.bf16.mxu1 %v2022_v56  ;;  %v2102_v56 = vld [vmem:[%s3058_s1 + $0x274] ss:$12 sps:$4 sm:$0xff]  }
  0x33   :  { %1130 = vmatmul.mubr.bf16.vlgmr.msra.gmra.mrb[16].mxu1 %v2017_v55  ;;  %903 = vmatpush1.bf16.msra.mxu0 %v2023_v57  ;;  %v2103_v57 = vld [vmem:[%s3059_s0 + $0x80] ss:$20 sps:$4 sm:$0xff]  }
  0x34   :  { %1851 = vmatpush3.bf16.msra.mxu1 %v2024_v58  ;;  %904 = vmatprep.subr.bf16.mxu0 %v2025_v59  ;;  %v2100_v58 = vld [vmem:[%s3058_s1 + $0x270] ss:$12 sps:$4 sm:$0xff]   ;;  %v2107_v59 = vld [vmem:[%s3058_s1 + $0x28c] ss:$12 sps:$4 sm:$0xff]  }
  0x35   :  { %1852 = vmatprep.subr.bf16.mxu1 %v2027_v60  ;;  %1137 = vmatprep.mubr.bf16.mxu1 %v2030_v61  ;;  %v2105_v60 = vld [vmem:[%s3058_s1 + $0x288] ss:$12 sps:$4 sm:$0xff]  }
  0x37   :  { %905 = vmatpush1.bf16.msra.mxu0 %v2028_v62  ;;  %v2109_v62 = vld [vmem:[%s3058_s1 + $0x2a0] ss:$12 sps:$4 sm:$0xff]  }
  0x38   :  { %1853 = vmatpush3.bf16.msra.mxu1 %v2029_v63  ;;  %906 = vmatprep.subr.bf16.mxu0 %v2032_v0  ;;  %v2114_v63 = vld [vmem:[%s3058_s1 + $0x2bc] ss:$12 sps:$4 sm:$0xff]   ;;  %v2117_v0 = vld [vmem:[%s3058_s1 + $0x2d4] ss:$12 sps:$4 sm:$0xff]  }
  0x39   :  { %1854 = vmatprep.subr.bf16.mxu1 %v2035_v2 }
  0x3b   :  { %1138 = vmatmul.mubr.bf16.gmra.mrb[20].mxu1 %v2034_v1  ;;  %907 = vmatpush1.bf16.msra.mxu0 %v2036_v3 }
  0x3c   :  { %1855 = vmatpush3.bf16.msra.mxu1 %v2037_v4  ;;  %908 = vmatprep.subr.bf16.mxu0 %v2038_v5 }
  0x3d   :  { %1856 = vmatprep.subr.bf16.mxu1 %v2040_v6  ;;  %1145 = vmatprep.mubr.bf16.mxu1 %v2043_v7 }
  0x3f   :  { %909 = vmatpush1.bf16.msra.mxu0 %v2041_v8 }
  0x40   :  { %1857 = vmatpush3.bf16.msra.mxu1 %v2042_v9  ;;  %951 = vmatprep.subr.bf16.mxu0 %v2047_v10 }
  0x41   :  { %1858 = vmatprep.subr.bf16.mxu1 %v2049_v11 }
  0x42   :  { %911 = vmatmul.mubr.bf16.vlgmr.msra.gmra.mrb[0].mxu0 %v2017_v55  ;;  %v2094_v55 = vld [vmem:[%s3058_s1 + $0x258] ss:$12 sps:$4 sm:$0xff]  }
  0x43   :  { %1146 = vmatmul.mubr.bf16.gmra.mrb[24].mxu1 %v2048_v13  ;;  %952 = vmatpush1.bf16.msra.mxu0 %v2045_v12 }
  0x44   :  { %1859 = vmatpush3.bf16.msra.mxu1 %v2050_v14  ;;  %953 = vmatprep.subr.bf16.mxu0 %v2053_v15 }
  0x45   :  { %1860 = vmatprep.subr.bf16.mxu1 %v2054_v16  ;;  %1153 = vmatprep.mubr.bf16.mxu1 %v2056_v17 }
  0x46   :  { %920 = vmatprep.mubr.bf16.mxu0 %v2030_v61  ;;  %v2111_v61 = vld [vmem:[%s3058_s1 + $0x2a4] ss:$12 sps:$4 sm:$0xff]  }
  0x47   :  { %954 = vmatpush1.bf16.msra.mxu0 %v2051_v19 }
  0x48   :  { %1861 = vmatpush3.bf16.msra.mxu1 %v2055_v20  ;;  %955 = vmatprep.subr.bf16.mxu0 %v2060_v21 }
  0x49   :  { %1862 = vmatprep.subr.bf16.mxu1 %v2062_v22 }
  0x4a   :  { %921 = vmatmul.mubr.bf16.gmra.mrb[4].mxu0 %v2034_v1  ;;  %v2115_v1 = vld [vmem:[%s3058_s1 + $0x2d0] ss:$12 sps:$4 sm:$0xff]  }
  0x4b   :  { %1154 = vmatmul.mubr.bf16.gmra.mrb[28].mxu1 %v2061_v24  ;;  %956 = vmatpush1.bf16.msra.mxu0 %v2058_v23 }
  0x4c   :  { %1863 = vmatpush3.bf16.msra.mxu1 %v2063_v25  ;;  %957 = vmatprep.subr.bf16.mxu0 %v2066_v26 }
  0x4d   :  { %1864 = vmatprep.subr.bf16.mxu1 %v2067_v27  ;;  %1194 = vmatprep.mubr.bf16.mxu1 %v2071_v29 }
  0x4e   :  { %930 = vmatprep.mubr.bf16.mxu0 %v2043_v7 }
  0x4f   :  { %958 = vmatpush1.bf16.msra.mxu0 %v2064_v30 }
  0x50   :  { %1865 = vmatpush3.bf16.msra.mxu1 %v2068_v31  ;;  %959 = vmatprep.subr.bf16.mxu0 %v2074_v32 }
  0x51   :  { %1898 = vmatprep.subr.bf16.mxu1 %v2093_v39 }
  0x52   :  { %931 = vmatmul.mubr.bf16.gmra.mrb[8].mxu0 %v2048_v13 }
  0x53   :  { %1195 = vmatmul.mubr.bf16.vlgmr.msra.gmra.mrb[32].mxu1 %v2475_v33  ;;  %960 = vmatpush1.bf16.msra.mxu0 %v2072_v34 }
  0x54   :  { %1202 = vmatprep.mubr.bf16.mxu1 %v2483_v35  ;;  %961 = vmatprep.subr.bf16.mxu0 %v2077_v36 }
  0x55   :  { %940 = vmatprep.mubr.bf16.mxu0 %v2056_v17  ;;  %1899 = vmatpush3.bf16.msra.mxu1 %v2093_v39 }
  0x56   :  { %1900 = vmatprep.subr.bf16.mxu1 %v2097_v43 }
  0x57   :  { %962 = vmatpush1.bf16.msra.mxu0 %v2075_v38 }
  0x58   :  { %963 = vmatprep.subr.bf16.mxu0 %v2082_v40 }
  0x59   :  { %1901 = vmatpush3.bf16.msra.mxu1 %v2097_v43 }
  0x5a   :  { %941 = vmatmul.mubr.bf16.gmra.mrb[12].mxu0 %v2061_v24  ;;  %1902 = vmatprep.subr.bf16.mxu1 %v2104_v47 }
  0x5b   :  { %1203 = vmatmul.mubr.bf16.gmra.mrb[36].mxu1 %v2505_v42  ;;  %964 = vmatpush1.bf16.msra.mxu0 %v2080_v41 }
  0x5c   :  { %1210 = vmatprep.mubr.bf16.mxu1 %v2513_v44  ;;  %965 = vmatprep.subr.bf16.mxu0 %v2086_v46 }
  0x5d   :  { %983 = vmatprep.mubr.bf16.mxu0 %v2071_v29  ;;  %1903 = vmatpush3.bf16.msra.mxu1 %v2104_v47 }
  0x5e   :  { %1904 = vmatprep.subr.bf16.mxu1 %v2108_v50 }
  0x5f   :  { %966 = vmatpush1.bf16.msra.mxu0 %v2084_v48 }
  0x60   :  { %967 = vmatprep.subr.bf16.mxu0 %v2091_v49 }
  0x61   :  { %1905 = vmatpush3.bf16.msra.mxu1 %v2108_v50 }
  0x63   :  { %1211 = vmatmul.mubr.bf16.gmra.mrb[40].mxu1 %v2092_v52  ;;  %968 = vmatpush1.bf16.msra.mxu0 %v2089_v51 }
  0x64   :  { %1218 = vmatprep.mubr.bf16.mxu1 %v2098_v53  ;;  %969 = vmatprep.subr.bf16.mxu0 %v2096_v54 }
  0x67   :  { %970 = vmatpush1.bf16.msra.mxu0 %v2094_v55 }
  0x68   :  { %971 = vmatprep.subr.bf16.mxu0 %v2102_v56 }
  0x6b   :  { %1219 = vmatmul.mubr.bf16.gmra.mrb[44].mxu1 %v2103_v57  ;;  %972 = vmatpush1.bf16.msra.mxu0 %v2100_v58 }
  0x6c   :  { %1906 = vmatprep.mubr.msk.bf16.mxu1 %vm865_vm0, %v2225_v18  ;;  %973 = vmatprep.subr.bf16.mxu0 %v2107_v59  ;;  %v2112_v18 = vld [vmem:[%s3058_s1 + $0x2b8] ss:$12 sps:$4 sm:$0xff]  }
  0x6f   :  { %974 = vmatpush1.bf16.msra.mxu0 %v2105_v60 }
  0x70   :  { %975 = vmatprep.subr.bf16.mxu0 %v2111_v61 }
  0x73   :  { %1907 = vmatmul.mubr.msk.bf16.vlgmr.msra.gmra.mrb[48].mxu1 %vm865_vm0, %v2260_v28  ;;  %976 = vmatpush1.bf16.msra.mxu0 %v2109_v62  ;;  %v2120_v28 = vld [vmem:[%s3058_s1 + $0x2ec] ss:$12 sps:$4 sm:$0xff]  }
  0x74   :  { %1910 = vmatprep.mubr.msk.bf16.mxu1 %vm865_vm0, %v2292_v37  ;;  %977 = vmatprep.subr.bf16.mxu0 %v2114_v63  ;;  %v2118_v37 = vld [vmem:[%s3058_s1 + $0x2e8] ss:$12 sps:$4 sm:$0xff]  }
  0x77   :  { %978 = vmatpush1.bf16.msra.mxu0 %v2112_v18 }
  0x78   :  { %979 = vmatprep.subr.bf16.mxu0 %v2117_v0 }
  0x7b   :  { %1911 = vmatmul.mubr.msk.bf16.gmra.mrb[52].mxu1 %vm865_vm0, %v2320_v45  ;;  %980 = vmatpush1.bf16.msra.mxu0 %v2115_v1 }
  0x7c   :  { %981 = vmatprep.subr.bf16.mxu0 %v2120_v28 }
  0x7f   :  { %982 = vmatpush1.bf16.msra.mxu0 %v2118_v37 }
  0x82   :  { %984 = vmatmul.mubr.bf16.vlgmr.msra.gmra.mrb[0].mxu0 %v2475_v33 }
  0x83   :  { %993 = vmatprep.mubr.bf16.mxu0 %v2483_v35 }
  0x8a   :  { %994 = vmatmul.mubr.bf16.gmra.mrb[4].mxu0 %v2505_v42 }
  0x8b   :  { %1003 = vmatprep.mubr.bf16.mxu0 %v2513_v44 }
  0x92   :  { %1004 = vmatmul.mubr.bf16.gmra.mrb[8].mxu0 %v2092_v52 }
  0x93   :  { %1013 = vmatprep.mubr.bf16.mxu0 %v2098_v53 }
  0x9a   :  { %1014 = vmatmul.mubr.bf16.gmra.mrb[12].mxu0 %v2103_v57 }
  0xe6   :  { %v2598_v2 = vpop.f32.mrb[0].mxu1 }
  0xe7   :  { %v2600_v45 = vpop.f32.mrb[1].mxu1 }
  0xe8   :  { %v2602_v3 = vpop.f32.mrb[2].mxu1 }
  0xe9   :  { %v2604_v4 = vpop.f32.mrb[3].mxu1 }
  0xee   :  { %v2606_v5 = vpop.f32.mrb[4].mxu1 }
  0xef   :  { %v2608_v6 = vpop.f32.mrb[5].mxu1 }
  0xf0   :  { %v2610_v7 = vpop.f32.mrb[6].mxu1 }
  0xf1   :  { %v2612_v8 = vpop.f32.mrb[7].mxu1 }
  0xf6   :  { %v2614_v9 = vpop.f32.mrb[8].mxu1 }
  0xf7   :  { %v2616_v10 = vpop.f32.mrb[9].mxu1 }
  0xf8   :  { %v2618_v11 = vpop.f32.mrb[10].mxu1 }
  0xf9   :  { %v2620_v12 = vpop.f32.mrb[11].mxu1 }
  0xfe   :  { %v2622_v13 = vpop.f32.mrb[12].mxu1 }
  0xff   :  { %v2624_v14 = vpop.f32.mrb[13].mxu1 }
 0x100   :  { %v2626_v15 = vpop.f32.mrb[14].mxu1 }
 0x101   :  { %v2628_v16 = vpop.f32.mrb[15].mxu1 }
 0x106   :  { %v1826_v17 = vpop.f32.mrb[16].mxu1 }
 0x107   :  { %v1827_v19 = vpop.f32.mrb[17].mxu1 }
 0x108   :  { %v1828_v20 = vadd.f32 %v1827_v19, %v1826_v17  ;;  %v1829_v21 = vpop.f32.mrb[18].mxu1 }
 0x109   :  { %v1830_v22 = vpop.f32.mrb[19].mxu1 }
 0x10a   :  { %v1831_v23 = vadd.f32 %v1830_v22, %v1829_v21 }
 0x10e   :  { %v1832_v24 = vpop.f32.mrb[20].mxu1 }
 0x10f   :  { %v1833_v25 = vpop.f32.mrb[21].mxu1 }
 0x110   :  { %v1834_v26 = vadd.f32 %v1833_v25, %v1832_v24  ;;  %v1835_v27 = vpop.f32.mrb[22].mxu1 }
 0x111   :  { %v1836_v29 = vpop.f32.mrb[23].mxu1 }
 0x112   :  { %v1837_v30 = vadd.f32 %v1836_v29, %v1835_v27 }
 0x116   :  { %v1838_v31 = vpop.f32.mrb[24].mxu1 }
 0x117   :  { %v1839_v32 = vpop.f32.mrb[25].mxu1 }
 0x118   :  { %v1840_v33 = vadd.f32 %v1839_v32, %v1838_v31  ;;  %v1841_v34 = vpop.f32.mrb[26].mxu1 }
 0x119   :  { %v1842_v35 = vpop.f32.mrb[27].mxu1 }
 0x11a   :  { %v1843_v36 = vadd.f32 %v1842_v35, %v1841_v34 }
 0x11e   :  { %v1844_v38 = vpop.f32.mrb[28].mxu1 }
 0x11f   :  { %v1845_v39 = vpop.f32.mrb[29].mxu1 }
 0x120   :  { %v1846_v40 = vadd.f32 %v1845_v39, %v1844_v38  ;;  %v1847_v41 = vpop.f32.mrb[30].mxu1 }
 0x121   :  { %v1848_v42 = vpop.f32.mrb[31].mxu1 }
 0x122   :  { %v1849_v43 = vadd.f32 %v1848_v42, %v1847_v41 }
 0x126   :  { %v1866_v44 = vpop.f32.mrb[32].mxu1 }
 0x127   :  { %v1867_v46 = vpop.f32.mrb[33].mxu1 }
 0x128   :  { %v1868_v47 = vadd.f32 %v1867_v46, %v1866_v44  ;;  %v1869_v48 = vpop.f32.mrb[34].mxu1 }
 0x129   :  { %v1870_v49 = vpop.f32.mrb[35].mxu1 }
 0x12a   :  { %v1871_v50 = vadd.f32 %v1870_v49, %v1869_v48  ;;  %v1197_v51 = vadd.f32 %v1868_v47, %v1828_v20 }
 0x12c   :  { %v1200_v52 = vadd.f32 %v1871_v50, %v1831_v23 }
 0x12e   :  { %v1872_v53 = vpop.f32.mrb[36].mxu1 }
 0x12f   :  { %v1873_v54 = vpop.f32.mrb[37].mxu1 }
 0x130   :  { %v1874_v55 = vadd.f32 %v1873_v54, %v1872_v53  ;;  %v1875_v56 = vpop.f32.mrb[38].mxu1 }
 0x131   :  { %v1876_v57 = vpop.f32.mrb[39].mxu1 }
 0x132   :  { %v1877_v58 = vadd.f32 %v1876_v57, %v1875_v56  ;;  %v1205_v59 = vadd.f32 %v1874_v55, %v1834_v26 }
 0x134   :  { %v1208_v60 = vadd.f32 %v1877_v58, %v1837_v30 }
 0x136   :  { %v1878_v61 = vpop.f32.mrb[40].mxu1 }
 0x137   :  { %v1879_v62 = vpop.f32.mrb[41].mxu1 }
 0x138   :  { %v1880_v63 = vadd.f32 %v1879_v62, %v1878_v61  ;;  %v1881_v18 = vpop.f32.mrb[42].mxu1 }
 0x139   :  { %v1882_v0 = vpop.f32.mrb[43].mxu1 }
 0x13a   :  { %v1883_v1 = vadd.f32 %v1882_v0, %v1881_v18  ;;  %v1213_v28 = vadd.f32 %v1880_v63, %v1840_v33 }
 0x13c   :  { %v1216_v37 = vadd.f32 %v1883_v1, %v1843_v36 }
 0x13e   :  { %v1884_v17 = vpop.f32.mrb[44].mxu1 }
 0x13f   :  { %v1885_v19 = vpop.f32.mrb[45].mxu1 }
 0x140   :  { %v1886_v20 = vadd.f32 %v1885_v19, %v1884_v17  ;;  %v1887_v21 = vpop.f32.mrb[46].mxu1 }
 0x141   :  { %v1888_v22 = vpop.f32.mrb[47].mxu1 }
 0x142   :  { %v1889_v23 = vadd.f32 %v1888_v22, %v1887_v21  ;;  %v1221_v24 = vadd.f32 %v1886_v20, %v1846_v40 }
 0x144   :  { %v1224_v25 = vadd.f32 %v1889_v23, %v1849_v43 }
 0x146   :  { %v1908_v27 = vpop.f32.mrb[48].mxu1 }
 0x147   :  { %v2630_v29 = vadd.f32 %v1908_v27, %v1205_v59  ;;  %v1261_v26 = vpop.f32.mrb[49].mxu1 }
 0x148   :  { %v2632_v30 = vadd.f32 %v1261_v26, %v1197_v51  ;;  %v1909_v31 = vpop.f32.mrb[50].mxu1 }
 0x149   :  { %v2634_v32 = vadd.f32 %v1909_v31, %v1208_v60  ;;  %v1264_v34 = vpop.f32.mrb[51].mxu1  ;;  %v1304_v63 = vsel %vm1293_vm1, %v2630_v29, 0.0 }
 0x14a   :  { %v2636_v33 = vadd.f32 %v1264_v34, %v1200_v52 }
 0x14e   :  { %v1912_v35 = vpop.f32.mrb[52].mxu1 }
 0x14f   :  { %v2638_v36 = vadd.f32 %v1912_v35, %v1221_v24  ;;  %v1277_v38 = vpop.f32.mrb[53].mxu1 }
 0x150   :  { %v2640_v39 = vadd.f32 %v1277_v38, %v1213_v28  ;;  %v1913_v40 = vpop.f32.mrb[54].mxu1 }
 0x151   :  { %v2642_v41 = vadd.f32 %v1913_v40, %v1224_v25  ;;  %v1280_v42 = vpop.f32.mrb[55].mxu1 }
 0x152   :  { %v2644_v43 = vadd.f32 %v1280_v42, %v1216_v37 }
 0x154   :  { %v1319_v24 = vsel %vm1293_vm1, %v2644_v43, 0.0 }
 0x155   :  { %v985_v44 = vpop.f32.mrb[0].mxu0 }
 0x156   :  { %v2647_v46 = vadd.f32 %v2598_v2, %v985_v44  ;;  %v987_v47 = vpop.f32.mrb[1].mxu0  ;;  %v1294_v2 = vsel %vm1293_vm1, %v2632_v30, 0.0  ;;  %v1478_v44 = vld [vmem:[%s3060_s2] sm:$0xff] }
 0x157   :  { %v2650_v48 = vadd.f32 %v2600_v45, %v987_v47  ;;  %v989_v49 = vpop.f32.mrb[2].mxu0  ;;  %v1482_v47 = vld [vmem:[%s3060_s2 + $0x20] sm:$0xff] }
 0x158   :  { %v2653_v50 = vadd.f32 %v2602_v3, %v989_v49  ;;  %v991_v51 = vpop.f32.mrb[3].mxu0  ;;  %v1551_v49 = vld [vmem:[%s3061_s3 + $0x8] sm:$0xff] }
 0x159   :  { %v2656_v52 = vadd.f32 %v2604_v4, %v991_v51  ;;  %v1292_v53 = vadd.f32 %v2650_v48, %v2647_v46  ;;  %v1299_v4 = vsel %vm1293_vm1, %v2636_v33, 0.0  ;;  %v1483_v51 = vld [vmem:[%s3060_s2 + $0x28] sm:$0xff] }
 0x15b   :  { %v1298_v54 = vadd.f32 %v2656_v52, %v2653_v50  ;;  %v1295_v45 = vadd.f32 %v1294_v2, %v1292_v53  ;;  %v1553_v53 = vld [vmem:[%s3061_s3 + $0x18] sm:$0xff]  ;;  %v1484_v2 = vld [vmem:[%s3060_s2 + $0x30] sm:$0xff] }
 0x15d   :  { %1296 = vadd.xlane.f32.xlu0 %v1295_v45  ;;  %v995_v55 = vpop.f32.mrb[4].mxu0  ;;  %v1300_v59 = vadd.f32 %v1299_v4, %v1298_v54  ;;  %v1555_v54 = vld [vmem:[%s3061_s3 + $0x28] sm:$0xff]  ;;  %v1485_v45 = vld [vmem:[%s3060_s2 + $0x38] sm:$0xff] }
 0x15e   :  { %v2665_v56 = vadd.f32 %v2606_v5, %v995_v55  ;;  %v997_v3 = vpop.f32.mrb[5].mxu0 }
 0x15f   :  { %v2670_v57 = vadd.f32 %v2608_v6, %v997_v3  ;;  %v999_v58 = vpop.f32.mrb[6].mxu0  ;;  %v1329_v3 = vsel %vm1293_vm1, %v2642_v41, 0.0 }
 0x160   :  { %v2673_v60 = vadd.f32 %v2610_v7, %v999_v58  ;;  %v1001_v61 = vpop.f32.mrb[7].mxu0  ;;  %v1550_v58 = vld [vmem:[%s3061_s3] sm:$0xff] }
 0x161   :  { %v2676_v62 = vadd.f32 %v2612_v8, %v1001_v61  ;;  %1301 = vadd.xlane.f32.xlu0 %v1300_v59  ;;  %v1303_v5 = vadd.f32 %v2670_v57, %v2665_v56  ;;  %v1309_v8 = vsel %vm1293_vm1, %v2634_v32, 0.0  ;;  %v1552_v59 = vld [vmem:[%s3061_s3 + $0x10] sm:$0xff]  ;;  %v1554_v61 = vld [vmem:[%s3061_s3 + $0x20] sm:$0xff] }
 0x163   :  { %v1308_v6 = vadd.f32 %v2676_v62, %v2673_v60  ;;  %v1305_v18 = vadd.f32 %v1304_v63, %v1303_v5 }
 0x165   :  { %1306 = vadd.xlane.f32.xlu1 %v1305_v18  ;;  %v1005_v0 = vpop.f32.mrb[8].mxu0  ;;  %v1310_v17 = vadd.f32 %v1309_v8, %v1308_v6 }
 0x166   :  { %v2685_v7 = vadd.f32 %v2614_v9, %v1005_v0  ;;  %v1007_v1 = vpop.f32.mrb[9].mxu0  ;;  %v1314_v9 = vsel %vm1293_vm1, %v2640_v39, 0.0 }
 0x167   :  { %v2690_v28 = vadd.f32 %v2616_v10, %v1007_v1  ;;  %v1009_v37 = vpop.f32.mrb[10].mxu0 }
 0x168   :  { %v2693_v19 = vadd.f32 %v2618_v11, %v1009_v37  ;;  %v1011_v20 = vpop.f32.mrb[11].mxu0 }
 0x169   :  { %v1313_v21 = vadd.f32 %v2690_v28, %v2685_v7  ;;  %v2698_v22 = vadd.f32 %v2620_v12, %v1011_v20  ;;  %1311 = vadd.xlane.f32.xlu1 %v1310_v17 }
 0x16b   :  { %v1318_v10 = vadd.f32 %v2698_v22, %v2693_v19  ;;  %v1315_v23 = vadd.f32 %v1314_v9, %v1313_v21 }
 0x16d   :  { %1316 = vadd.xlane.f32.xlu0 %v1315_v23  ;;  %v1015_v11 = vpop.f32.mrb[12].mxu0  ;;  %v1320_v25 = vadd.f32 %v1319_v24, %v1318_v10 }
 0x16e   :  { %v2707_v27 = vadd.f32 %v2622_v13, %v1015_v11  ;;  %v1017_v26 = vpop.f32.mrb[13].mxu0  ;;  %v1324_v13 = vsel %vm1293_vm1, %v2638_v36, 0.0 }
 0x16f   :  { %v2710_v12 = vadd.f32 %v2624_v14, %v1017_v26  ;;  %1321 = vadd.xlane.f32.xlu1 %v1320_v25  ;;  %v1019_v31 = vpop.f32.mrb[14].mxu0  ;;  %v1479_v14 = vld [vmem:[%s3060_s2 + $0x8] sm:$0xff] }
 0x170   :  { %v2713_v34 = vadd.f32 %v2626_v15, %v1019_v31  ;;  %v1021_v35 = vpop.f32.mrb[15].mxu0  ;;  %v1480_v15 = vld [vmem:[%s3060_s2 + $0x10] sm:$0xff] }
 0x171   :  { %v1323_v38 = vadd.f32 %v2710_v12, %v2707_v27  ;;  %v2718_v40 = vadd.f32 %v2628_v16, %v1021_v35  ;;  %v1481_v16 = vld [vmem:[%s3060_s2 + $0x18] sm:$0xff] }
 0x173   :  { %v1325_v42 = vadd.f32 %v1324_v13, %v1323_v38  ;;  %v1328_v55 = vadd.f32 %v2718_v40, %v2713_v34 }
 0x175   :  { %1326 = vadd.xlane.f32.xlu0 %v1325_v42  ;;  %v1330_v4 = vadd.f32 %v1329_v3, %v1328_v55 }
 0x180   :  { %1493 = vperm.xlu1 %1948, %v1479_v14  }
 0x184   :  { %1498 = vperm.xlu1 %1948, %v1480_v15  }
 0x188   :  { %1503 = vperm.xlu1 %1948, %v1481_v16  }
 0x18b   :  { %1488 = vperm.xlu0 %1947, %v1478_v44  }
 0x18c   :  { %1508 = vperm.xlu1 %1948, %v1482_v47  }
 0x18f   :  { %1565 = vperm.xlu0 %1947, %v1551_v49  }
 0x190   :  { %1513 = vperm.xlu1 %1948, %v1483_v51  }
 0x193   :  { %1575 = vperm.xlu0 %1947, %v1553_v53  }
 0x194   :  { %1518 = vperm.xlu1 %1948, %v1484_v2  }
 0x197   :  { %1585 = vperm.xlu0 %1947, %v1555_v54  }
 0x198   :  { %1523 = vperm.xlu1 %1948, %v1485_v45  }
 0x1bc   :  { %1331 = vadd.xlane.f32.xlu1 %v1330_v4 }
 0x1cd   :  { %1560 = vperm.xlu1 %1948, %v1550_v58  }
 0x1d1   :  { %1570 = vperm.xlu1 %1948, %v1552_v59  }
 0x1d5   :  { %1580 = vperm.xlu1 %1948, %v1554_v61  }
 0x1ea   :  { %v1297_v5 = vpop.xlane.xlu0 %1296 }
 0x1eb   :  { %v1334_v63 = vmul.f32 0.0034722222, %v1297_v5 }
 0x1ed   :  { %v2769_v6 = vsub.f32 %v2647_v46, %v1334_v63  ;;  %v2772_v18 = vsub.f32 %v2650_v48, %v1334_v63  ;;  %v2775_v0 = vsub.f32 %v2632_v30, %v1334_v63 }
 0x1ee   :  { %v1302_v1 = vpop.xlane.xlu0 %1301 }
 0x1ef   :  { %v1335_v8 = vmul.f32 0.0034722222, %v1302_v1  ;;  %v1366_v37 = vmul.f32 %v2769_v6, %v2769_v6  ;;  %v1367_v17 = vmul.f32 %v2772_v18, %v2772_v18  ;;  %v1368_v20 = vmul.f32 %v2775_v0, %v2775_v0 }
 0x1f1   :  { %v2784_v46 = vsub.f32 %v2653_v50, %v1335_v8  ;;  %v2787_v48 = vsub.f32 %v2656_v52, %v1335_v8  ;;  %v2790_v30 = vsub.f32 %v2636_v33, %v1335_v8  ;;  %v1390_v21 = vadd.f32 %v1367_v17, %v1366_v37 }
 0x1f2   :  { %v1307_v9 = vpop.xlane.xlu1 %1306  ;;  %v1391_v10 = vsel %vm1293_vm1, %v1368_v20, 0.0 }
 0x1f3   :  { %v1336_v23 = vmul.f32 0.0034722222, %v1307_v9  ;;  %v1392_v24 = vadd.f32 %v1391_v10, %v1390_v21  ;;  %v1369_v11 = vmul.f32 %v2784_v46, %v2784_v46  ;;  %v1370_v25 = vmul.f32 %v2787_v48, %v2787_v48 }
 0x1f4   :  { %v1371_v50 = vmul.f32 %v2790_v30, %v2790_v30 }
 0x1f5   :  { %v2800_v52 = vsub.f32 %v2665_v56, %v1336_v23  ;;  %v2803_v33 = vsub.f32 %v2670_v57, %v1336_v23  ;;  %v2806_v26 = vsub.f32 %v2630_v29, %v1336_v23  ;;  %1393 = vadd.xlane.f32.xlu0 %v1392_v24  ;;  %v1395_v31 = vadd.f32 %v1370_v25, %v1369_v11 }
 0x1f6   :  { %v1312_v35 = vpop.xlane.xlu1 %1311  ;;  %v1396_v38 = vsel %vm1293_vm1, %v1371_v50, 0.0 }
 0x1f7   :  { %v1337_v13 = vmul.f32 0.0034722222, %v1312_v35  ;;  %v1397_v42 = vadd.f32 %v1396_v38, %v1395_v31  ;;  %v1372_v14 = vmul.f32 %v2800_v52, %v2800_v52  ;;  %v1373_v56 = vmul.f32 %v2803_v33, %v2803_v33 }
 0x1f8   :  { %v1374_v57 = vmul.f32 %v2806_v26, %v2806_v26 }
 0x1f9   :  { %v2816_v15 = vsub.f32 %v2673_v60, %v1337_v13  ;;  %v2819_v29 = vsub.f32 %v2676_v62, %v1337_v13  ;;  %v2822_v16 = vsub.f32 %v2634_v32, %v1337_v13  ;;  %1398 = vadd.xlane.f32.xlu1 %v1397_v42  ;;  %v1400_v44 = vadd.f32 %v1373_v56, %v1372_v14 }
 0x1fa   :  { %v1317_v47 = vpop.xlane.xlu0 %1316  ;;  %v1401_v49 = vsel %vm1293_vm1, %v1374_v57, 0.0 }
 0x1fb   :  { %v1338_v51 = vmul.f32 0.0034722222, %v1317_v47  ;;  %v1402_v53 = vadd.f32 %v1401_v49, %v1400_v44  ;;  %v1375_v2 = vmul.f32 %v2816_v15, %v2816_v15  ;;  %v1376_v60 = vmul.f32 %v2819_v29, %v2819_v29 }
 0x1fc   :  { %v1322_v54 = vpop.xlane.xlu1 %1321  ;;  %v1377_v62 = vmul.f32 %v2822_v16, %v2822_v16 }
 0x1fd   :  { %v2832_v32 = vsub.f32 %v2685_v7, %v1338_v51  ;;  %v2835_v45 = vsub.f32 %v2690_v28, %v1338_v51  ;;  %v2838_v55 = vsub.f32 %v2640_v39, %v1338_v51  ;;  %v1339_v3 = vmul.f32 0.0034722222, %v1322_v54  ;;  %1403 = vadd.xlane.f32.xlu0 %v1402_v53 }
 0x1fe   :  { %v1405_v4 = vadd.f32 %v1376_v60, %v1375_v2  ;;  %v1406_v58 = vsel %vm1293_vm1, %v1377_v62, 0.0 }
 0x1ff   :  { %v2842_v59 = vsub.f32 %v2693_v19, %v1339_v3  ;;  %v2845_v61 = vsub.f32 %v2698_v22, %v1339_v3  ;;  %v2848_v7 = vsub.f32 %v2644_v43, %v1339_v3  ;;  %v1378_v28 = vmul.f32 %v2832_v32, %v2832_v32 }
 0x200   :  { %v1407_v5 = vadd.f32 %v1406_v58, %v1405_v4  ;;  %v1379_v39 = vmul.f32 %v2835_v45, %v2835_v45  ;;  %v1380_v63 = vmul.f32 %v2838_v55, %v2838_v55  ;;  %v2883_v38 = vpop.permute.xlu1 %1493 }
 0x201   :  { %v1381_v19 = vmul.f32 %v2842_v59, %v2842_v59  ;;  %v1382_v22 = vmul.f32 %v2845_v61, %v2845_v61  ;;  %v1383_v43 = vmul.f32 %v2848_v7, %v2848_v7 }
 0x202   :  { %1408 = vadd.xlane.f32.xlu1 %v1407_v5  ;;  %v1327_v1 = vpop.xlane.xlu0 %1326  ;;  %v1410_v8 = vadd.f32 %v1379_v39, %v1378_v28  ;;  %v1411_v37 = vsel %vm1293_vm1, %v1380_v63, 0.0 }
 0x203   :  { %v1340_v17 = vmul.f32 0.0034722222, %v1327_v1  ;;  %v1415_v20 = vadd.f32 %v1382_v22, %v1381_v19  ;;  %v1416_v21 = vsel %vm1293_vm1, %v1383_v43, 0.0 }
 0x204   :  { %v1412_v9 = vadd.f32 %v1411_v37, %v1410_v8  ;;  %v2885_v13 = vpop.permute.xlu1 %1498 }
 0x205   :  { %v2865_v10 = vsub.f32 %v2707_v27, %v1340_v17  ;;  %v2868_v23 = vsub.f32 %v2710_v12, %v1340_v17  ;;  %v2871_v24 = vsub.f32 %v2638_v36, %v1340_v17  ;;  %v1417_v11 = vadd.f32 %v1416_v21, %v1415_v20  ;;  %v1557_v36 = vld [vmem:[%s3061_s3 + $0x38] sm:$0xff] }
 0x206   :  { %1413 = vadd.xlane.f32.xlu0 %v1412_v9 }
 0x207   :  { %1418 = vadd.xlane.f32.xlu1 %v1417_v11  ;;  %v1384_v25 = vmul.f32 %v2865_v10, %v2865_v10  ;;  %v1385_v50 = vmul.f32 %v2868_v23, %v2868_v23  ;;  %v1386_v31 = vmul.f32 %v2871_v24, %v2871_v24 }
 0x208   :  { %v2887_v42 = vpop.permute.xlu1 %1503 }
 0x209   :  { %v1420_v27 = vadd.f32 %v1385_v50, %v1384_v25  ;;  %v1421_v35 = vsel %vm1293_vm1, %v1386_v31, 0.0 }
 0x20b   :  { %v1422_v12 = vadd.f32 %v1421_v35, %v1420_v27 }
 0x20c   :  { %v2889_v14 = vpop.permute.xlu1 %1508 }
 0x20d   :  { %1423 = vadd.xlane.f32.xlu0 %v1422_v12 }
 0x210   :  { %v2891_v56 = vpop.permute.xlu1 %1513 }
 0x214   :  { %v2893_v57 = vpop.permute.xlu1 %1518 }
 0x218   :  { %v2895_v44 = vpop.permute.xlu1 %1523 }
 0x223   :  { %1595 = vperm.xlu0 %1947, %v1557_v36  }
 0x249   :  { %v1332_v47 = vpop.xlane.xlu1 %1331 }
 0x24a   :  { %v1341_v49 = vmul.f32 0.0034722222, %v1332_v47 }
 0x24c   :  { %v2898_v51 = vsub.f32 %v2713_v34, %v1341_v49  ;;  %v2901_v53 = vsub.f32 %v2718_v40, %v1341_v49  ;;  %v2904_v2 = vsub.f32 %v2642_v41, %v1341_v49  ;;  %v1556_v40 = vld [vmem:[%s3061_s3 + $0x30] sm:$0xff]  ;;  %v1489_v41 = vpop.permute.xlu0 %1488 }
 0x24d   :  { %v1561_v28 = vpop.permute.xlu1 %1560 }
 0x24e   :  { %v1387_v60 = vmul.f32 %v2898_v51, %v2898_v51  ;;  %v1388_v54 = vmul.f32 %v2901_v53, %v2901_v53  ;;  %v1389_v62 = vmul.f32 %v2904_v2, %v2904_v2 }
 0x250   :  { %v1425_v3 = vadd.f32 %v1388_v54, %v1387_v60  ;;  %v1426_v4 = vsel %vm1293_vm1, %v1389_v62, 0.0  ;;  %v1566_v58 = vpop.permute.xlu0 %1565 }
 0x251   :  { %v2918_v39 = vpop.permute.xlu1 %1570 }
 0x252   :  { %v1427_v34 = vadd.f32 %v1426_v4, %v1425_v3 }
 0x254   :  { %1428 = vadd.xlane.f32.xlu1 %v1427_v34  ;;  %v2916_v5 = vpop.permute.xlu0 %1575 }
 0x255   :  { %v1581_v19 = vpop.permute.xlu1 %1580 }
 0x258   :  { %v2920_v63 = vpop.permute.xlu0 %1585 }
 0x265   :  { %1590 = vperm.xlu1 %1948, %v1556_v40  }
 0x282   :  { %v1394_v22 = vpop.xlane.xlu0 %1393 }
 0x283   :  { %v1430_v43 = vmul.f32 0.0034722222, %v1394_v22 }
 0x285   :  { %v1438_v8 = vadd.f32 1e-05, %v1430_v43 }
 0x286   :  { %v1399_v1 = vpop.xlane.xlu1 %1398 }
 0x287   :  { %v1431_v37 = vmul.f32 0.0034722222, %v1399_v1  ;;  %2121 = vrsqrt.f32 %v1438_v8 }
 0x289   :  { %v1439_v17 = vadd.f32 1e-05, %v1431_v37 }
 0x28a   :  { %v2922_v20 = vpop.xlane.xlu0 %1403 }
 0x28b   :  { %2123 = vrsqrt.f32 %v1439_v17 }
 0x28f   :  { %v2924_v21 = vpop.xlane.xlu1 %1408 }
 0x291   :  { %v2122_v35 = vpop.eup %2121 }
 0x292   :  { %v1454_v12 = vmul.f32 %v2122_v35, %v2769_v6  ;;  %v1455_v36 = vmul.f32 %v2122_v35, %v2772_v18  ;;  %v1456_v49 = vmul.f32 %v2122_v35, %v2775_v0 }
 0x293   :  { %v1414_v9 = vpop.xlane.xlu0 %1413 }
 0x294   :  { %v1419_v11 = vpop.xlane.xlu1 %1418  ;;  %v1434_v25 = vmul.f32 0.0034722222, %v1414_v9  ;;  %v1526_v60 = vmul.f32 %v1489_v41, %v1454_v12  ;;  %v1527_v54 = vmul.f32 %v1489_v41, %v1455_v36  ;;  %v1528_v34 = vmul.f32 %v1489_v41, %v1456_v49  ;;  %v1638_v49 = vld [vmem:[%s3062_s4 + $0x20] sm:$0xff] }
 0x295   :  { %v1435_v50 = vmul.f32 0.0034722222, %v1419_v11  ;;  %v2124_v47 = vpop.eup %2123 }
 0x296   :  { %v1442_v31 = vadd.f32 1e-05, %v1434_v25  ;;  %v1457_v62 = vmul.f32 %v2124_v47, %v2784_v46  ;;  %v1458_v3 = vmul.f32 %v2124_v47, %v2787_v48  ;;  %v1459_v4 = vmul.f32 %v2124_v47, %v2790_v30  ;;  %v1637_v47 = vld [vmem:[%s3062_s4 + $0x18] sm:$0xff] }
 0x297   :  { %v1443_v27 = vadd.f32 1e-05, %v1435_v50  ;;  %v1598_v22 = vadd.f32 %v1561_v28, %v1526_v60  ;;  %v1599_v43 = vadd.f32 %v1561_v28, %v1527_v54  ;;  %v1600_v17 = vadd.f32 %v1561_v28, %v1528_v34  ;;  %v1636_v28 = vld [vmem:[%s3062_s4 + $0x10] sm:$0xff]  ;;  %v1639_v60 = vld [vmem:[%s3062_s4 + $0x28] sm:$0xff] }
 0x298   :  { %2125 = vrsqrt.f32 %v1442_v31  ;;  %v1529_v1 = vmul.f32 %v2883_v38, %v1457_v62  ;;  %v1530_v18 = vmul.f32 %v2883_v38, %v1458_v3  ;;  %v1531_v46 = vmul.f32 %v2883_v38, %v1459_v4 }
 0x299   :  { %2127 = vrsqrt.f32 %v1443_v27 }
 0x29a   :  { %v1602_v50 = vadd.f32 %v1566_v58, %v1530_v18  ;;  %v1603_v27 = vadd.f32 %v1566_v58, %v1531_v46 }
 0x2a2   :  { %v2126_v40 = vpop.eup %2125 }
 0x2a3   :  { %v2128_v6 = vpop.eup %2127  ;;  %v1466_v8 = vmul.f32 %v2126_v40, %v2832_v32  ;;  %v1467_v0 = vmul.f32 %v2126_v40, %v2835_v45  ;;  %v1468_v37 = vmul.f32 %v2126_v40, %v2838_v55  ;;  %v1601_v32 = vadd.f32 %v1566_v58, %v1529_v1 }
 0x2a4   :  { %v1469_v48 = vmul.f32 %v2128_v6, %v2842_v59  ;;  %v1470_v30 = vmul.f32 %v2128_v6, %v2845_v61  ;;  %v1471_v41 = vmul.f32 %v2128_v6, %v2848_v7  ;;  %v1634_v7 = vld [vmem:[%s3062_s4] sm:$0xff]  ;;  %v1432_v1 = vmul.f32 0.0034722222, %v2922_v20  ;;  %v1424_v6 = vpop.xlane.xlu0 %1423 }
 0x2a5   :  { %v1538_v9 = vmul.f32 %v2889_v14, %v1466_v8  ;;  %v1539_v11 = vmul.f32 %v2889_v14, %v1467_v0  ;;  %v1540_v25 = vmul.f32 %v2889_v14, %v1468_v37  ;;  %v1635_v14 = vld [vmem:[%s3062_s4 + $0x8] sm:$0xff]  ;;  %v1436_v18 = vmul.f32 0.0034722222, %v1424_v6 }
 0x2a6   :  { %v1541_v45 = vmul.f32 %v2891_v56, %v1469_v48  ;;  %v1542_v55 = vmul.f32 %v2891_v56, %v1470_v30  ;;  %v1543_v38 = vmul.f32 %v2891_v56, %v1471_v41  ;;  %v1440_v8 = vadd.f32 1e-05, %v1432_v1 }
 0x2a7   :  { %v1610_v59 = vadd.f32 %v1581_v19, %v1538_v9  ;;  %v1611_v31 = vadd.f32 %v1581_v19, %v1539_v11  ;;  %v1612_v61 = vadd.f32 %v1581_v19, %v1540_v25  ;;  %v1444_v0 = vadd.f32 1e-05, %v1436_v18 }
 0x2a8   :  { %v1613_v35 = vadd.f32 %v2920_v63, %v1541_v45  ;;  %v1614_v56 = vadd.f32 %v2920_v63, %v1542_v55  ;;  %v1615_v12 = vadd.f32 %v2920_v63, %v1543_v38  ;;  %2129 = vrsqrt.f32 %v1440_v8 }
 0x2a9   :  { %v1622_v19 = vadd.f32 %v1610_v59, %v1598_v22  ;;  %v1623_v58 = vadd.f32 %v1611_v31, %v1599_v43  ;;  %v1624_v36 = vadd.f32 %v1612_v61, %v1600_v17  ;;  %2131 = vrsqrt.f32 %v1444_v0 }
 0x2aa   :  { %v1625_v54 = vadd.f32 %v1613_v35, %v1601_v32  ;;  %v1626_v62 = vadd.f32 %v1614_v56, %v1602_v50  ;;  %v1627_v3 = vadd.f32 %v1615_v12, %v1603_v27  ;;  %v1433_v37 = vmul.f32 0.0034722222, %v2924_v21 }
 0x2ab   :  { %v1646_v4 = vadd.f32 %v1634_v7, %v1622_v19  ;;  %v1647_v63 = vadd.f32 %v1635_v14, %v1623_v58  ;;  %v1648_v34 = vadd.f32 %v1636_v28, %v1624_v36  ;;  %v1641_v7 = vld [vmem:[%s3062_s4 + $0x38] sm:$0xff] }
 0x2ac   :  { %v1649_v40 = vadd.f32 %v1637_v47, %v1625_v54  ;;  %v1650_v22 = vadd.f32 %v1638_v49, %v1626_v62  ;;  %v1651_v43 = vadd.f32 %v1639_v60, %v1627_v3  ;;  %v1441_v48 = vadd.f32 1e-05, %v1433_v37 }
 0x2ad   :  { %1658 = vst [vmem:[%s3063_s5] sm:$0xff] %v1646_v4  ;;  %1659 = vst [vmem:[%s3063_s5 + $0x8] sm:$0xff] %v1647_v63 }
 0x2ae   :  { %1660 = vst.msk [vmem:[%s3063_s5 + $0x10] sm:$0xff] %vm1293_vm1, %v1648_v34  ;;  %1661 = vst [vmem:[%s3063_s5 + $0x18] sm:$0xff] %v1649_v40  ;;  %2133 = vrsqrt.f32 %v1441_v48 }
 0x2af   :  { %1662 = vst [vmem:[%s3063_s5 + $0x20] sm:$0xff] %v1650_v22  ;;  %1663 = vst.msk [vmem:[%s3063_s5 + $0x28] sm:$0xff] %vm1293_vm1, %v1651_v43  ;;  %v1596_v22 = vpop.permute.xlu0 %1595 }
 0x2b2   :  { %v2130_v46 = vpop.eup %2129 }
 0x2b3   :  { %v2132_v30 = vpop.eup %2131  ;;  %v1460_v41 = vmul.f32 %v2130_v46, %v2800_v52  ;;  %v1461_v17 = vmul.f32 %v2130_v46, %v2803_v33  ;;  %v1462_v9 = vmul.f32 %v2130_v46, %v2806_v26 }
 0x2b4   :  { %v1472_v20 = vmul.f32 %v2132_v30, %v2865_v10  ;;  %v1473_v11 = vmul.f32 %v2132_v30, %v2868_v23  ;;  %v1474_v25 = vmul.f32 %v2132_v30, %v2871_v24 }
 0x2b5   :  { %v1532_v45 = vmul.f32 %v2885_v13, %v1460_v41  ;;  %v1533_v21 = vmul.f32 %v2885_v13, %v1461_v17  ;;  %v1534_v55 = vmul.f32 %v2885_v13, %v1462_v9  ;;  %v1640_v13 = vld [vmem:[%s3062_s4 + $0x30] sm:$0xff] }
 0x2b6   :  { %v1544_v33 = vmul.f32 %v2893_v57, %v1472_v20  ;;  %v1545_v26 = vmul.f32 %v2893_v57, %v1473_v11  ;;  %v1546_v50 = vmul.f32 %v2893_v57, %v1474_v25  ;;  %v1642_v57 = vld [vmem:[%s3062_s4 + $0x40] sm:$0xff] }
 0x2b7   :  { %v1604_v10 = vadd.f32 %v2918_v39, %v1532_v45  ;;  %v1605_v23 = vadd.f32 %v2918_v39, %v1533_v21  ;;  %v1606_v24 = vadd.f32 %v2918_v39, %v1534_v55 }
 0x2b8   :  { %v2134_v35 = vpop.eup %2133 }
 0x2b9   :  { %v1463_v58 = vmul.f32 %v2134_v35, %v2816_v15  ;;  %v1464_v36 = vmul.f32 %v2134_v35, %v2819_v29  ;;  %v1465_v47 = vmul.f32 %v2134_v35, %v2822_v16 }
 0x2bb   :  { %v1535_v15 = vmul.f32 %v2887_v42, %v1463_v58  ;;  %v1536_v29 = vmul.f32 %v2887_v42, %v1464_v36  ;;  %v1537_v60 = vmul.f32 %v2887_v42, %v1465_v47 }
 0x2bd   :  { %v1607_v16 = vadd.f32 %v2916_v5, %v1535_v15  ;;  %v1608_v40 = vadd.f32 %v2916_v5, %v1536_v29  ;;  %v1609_v43 = vadd.f32 %v2916_v5, %v1537_v60 }
 0x2e1   :  { %v1429_v32 = vpop.xlane.xlu1 %1428 }
 0x2e2   :  { %v1437_v38 = vmul.f32 0.0034722222, %v1429_v32 }
 0x2e4   :  { %v1445_v52 = vadd.f32 1e-05, %v1437_v38 }
 0x2e5   :  { %v1591_v59 = vpop.permute.xlu1 %1590 }
 0x2e6   :  { %2135 = vrsqrt.f32 %v1445_v52  ;;  %v1616_v31 = vadd.f32 %v1591_v59, %v1544_v33  ;;  %v1617_v61 = vadd.f32 %v1591_v59, %v1545_v26  ;;  %v1618_v27 = vadd.f32 %v1591_v59, %v1546_v50 }
 0x2e8   :  { %v1628_v14 = vadd.f32 %v1616_v31, %v1604_v10  ;;  %v1629_v28 = vadd.f32 %v1617_v61, %v1605_v23  ;;  %v1630_v39 = vadd.f32 %v1618_v27, %v1606_v24 }
 0x2ea   :  { %v1652_v56 = vadd.f32 %v1640_v13, %v1628_v14  ;;  %v1653_v12 = vadd.f32 %v1641_v7, %v1629_v28  ;;  %v1654_v19 = vadd.f32 %v1642_v57, %v1630_v39 }
 0x2ec   :  { %1664 = vst [vmem:[%s3063_s5 + $0x30] sm:$0xff] %v1652_v56  ;;  %1665 = vst [vmem:[%s3063_s5 + $0x38] sm:$0xff] %v1653_v12 }
 0x2ed   :  { %1666 = vst.msk [vmem:[%s3063_s5 + $0x40] sm:$0xff] %vm1293_vm1, %v1654_v19 }
 0x2f0   :  { %v2136_v49 = vpop.eup %2135 }
 0x2f1   :  { %v1475_v54 = vmul.f32 %v2136_v49, %v2898_v51  ;;  %v1476_v62 = vmul.f32 %v2136_v49, %v2901_v53  ;;  %v1477_v3 = vmul.f32 %v2136_v49, %v2904_v2  ;;  %v1643_v53 = vld [vmem:[%s3062_s4 + $0x48] sm:$0xff]  ;;  %v1644_v2 = vld [vmem:[%s3062_s4 + $0x50] sm:$0xff] }
 0x2f3   :  { %v1547_v4 = vmul.f32 %v2895_v44, %v1475_v54  ;;  %v1548_v63 = vmul.f32 %v2895_v44, %v1476_v62  ;;  %v1549_v34 = vmul.f32 %v2895_v44, %v1477_v3  ;;  %v1645_v44 = vld [vmem:[%s3062_s4 + $0x58] sm:$0xff] }
 0x2f5   :  { %v1619_v42 = vadd.f32 %v1596_v22, %v1547_v4  ;;  %v1620_v1 = vadd.f32 %v1596_v22, %v1548_v63  ;;  %v1621_v51 = vadd.f32 %v1596_v22, %v1549_v34 }
 0x2f7   :  { %v1631_v6 = vadd.f32 %v1619_v42, %v1607_v16  ;;  %v1632_v18 = vadd.f32 %v1620_v1, %v1608_v40  ;;  %v1633_v8 = vadd.f32 %v1621_v51, %v1609_v43 }
 0x2f9   :  { %v1655_v0 = vadd.f32 %v1643_v53, %v1631_v6  ;;  %v1656_v5 = vadd.f32 %v1644_v2, %v1632_v18  ;;  %v1657_v37 = vadd.f32 %v1645_v44, %v1633_v8 }
 0x2fb   :  { %1667 = vst [vmem:[%s3063_s5 + $0x48] sm:$0xff] %v1655_v0  ;;  %1668 = vst [vmem:[%s3063_s5 + $0x50] sm:$0xff] %v1656_v5 }
 0x2fc   :  { %1669 = vst.msk [vmem:[%s3063_s5 + $0x58] sm:$0xff] %vm1293_vm1, %v1657_v37 }

// kernel: _lambda_.17
= control target key start
LH: loop header
LB: loop body
LE: loop exit
PB: predicated region body
PF: predicated region fallthrough
CT: control target
= control target key end

     0   :  { %v1484_v1 = vmov 0   ;;  %vm454_vm0 = vcmask 261120   ;;  %vm1177_vm1 = vcmask 257024   ;;  %s2153_s1 = inlined_call_operand.vmem [shape: bf16[288,288], index: 1, kind: input, shape index: {}]   ;;  %s2154_s0 = inlined_call_operand.vmem [shape: bf16[64,288], index: 0, kind: input, shape index: {}]   ;;  %s2155_s2 = inlined_call_operand.vmem [shape: f32[64,1], index: 2, kind: input, shape index: {}]   ;;  %s2156_s3 = inlined_call_operand.vmem [shape: f32[64,1], index: 3, kind: input, shape index: {}]   ;;  %s2157_s4 = inlined_call_operand.vmem [shape: bf16[64,288], index: 4, kind: output, shape index: {}]  }
   0x1   :  { %v1380_v0 = vld [vmem:[%s2153_s1 + $0x4] ss:$12 sps:$4 sm:$0xff]   ;;  %572 = vmatprep.mubr.bf16.mxu1 %v1484_v1  ;;  %1379 = vset.pattern.permute.xlu1 %v1484_v1  ;;  %v1384_v3 = vld [vmem:[%s2153_s1] ss:$12 sps:$4 sm:$0xff]   ;;  %v1386_v5 = vld [vmem:[%s2153_s1 + $0x1c] ss:$12 sps:$4 sm:$0xff]  }
   0x2   :  { %v1382_v2 = vld [vmem:[%s2153_s1 + $0x184] ss:$12 sps:$4 sm:$0xff]   ;;  %1378 = vset.pattern.permute.xlu0 %v1484_v1  ;;  %467 = vmatprep.subr.bf16.mxu0 %v1380_v0  ;;  %v1385_v4 = vld [vmem:[%s2153_s1 + $0x180] ss:$12 sps:$4 sm:$0xff]   ;;  %v1388_v6 = vld [vmem:[%s2153_s1 + $0x19c] ss:$12 sps:$4 sm:$0xff]  }
   0x3   :  { %540 = vmatprep.subr.bf16.mxu1 %v1382_v2  ;;  %468 = vmatpush1.bf16.msra.mxu0 %v1384_v3  ;;  %v1390_v7 = vld [vmem:[%s2153_s1 + $0x18] ss:$12 sps:$4 sm:$0xff]   ;;  %v1392_v9 = vld [vmem:[%s2153_s1 + $0x34] ss:$12 sps:$4 sm:$0xff]   ;;  %v1396_v12 = vld [vmem:[%s2153_s1 + $0x30] ss:$12 sps:$4 sm:$0xff]  }
   0x4   :  { %541 = vmatpush1.bf16.msra.mxu1 %v1385_v4  ;;  %469 = vmatprep.subr.bf16.mxu0 %v1386_v5  ;;  %v1391_v8 = vld [vmem:[%s2153_s1 + $0x198] ss:$12 sps:$4 sm:$0xff]   ;;  %v1543_v10 = vld [vmem:[%s2154_s0 + $0x8] ss:$12 sps:$4 sm:$0xff]   ;;  %v1400_v15 = vld [vmem:[%s2153_s1 + $0xe0] ss:$12 sps:$4 sm:$0xff]  }
   0x5   :  { %542 = vmatprep.subr.bf16.mxu1 %v1388_v6  ;;  %v1395_v11 = vld [vmem:[%s2153_s1 + $0xc8] ss:$12 sps:$4 sm:$0xff]   ;;  %v1398_v14 = vld [vmem:[%s2153_s1 + $0x4c] ss:$12 sps:$4 sm:$0xff]   ;;  %v1403_v18 = vld [vmem:[%s2153_s1 + $0x64] ss:$12 sps:$4 sm:$0xff]  }
   0x6   :  { %v1397_v13 = vld [vmem:[%s2153_s1 + $0x8] ss:$12 sps:$4 sm:$0xff]   ;;  %v1402_v17 = vld [vmem:[%s2153_s1 + $0x20] ss:$12 sps:$4 sm:$0xff]   ;;  %v1406_v20 = vld [vmem:[%s2153_s1 + $0xf8] ss:$12 sps:$4 sm:$0xff]  }
   0x7   :  { %470 = vmatpush1.bf16.msra.mxu0 %v1390_v7  ;;  %v1401_v16 = vld [vmem:[%s2153_s1 + $0x48] ss:$12 sps:$4 sm:$0xff]   ;;  %v1575_v19 = vld [vmem:[%s2154_s0 + $0x20] ss:$12 sps:$4 sm:$0xff]   ;;  %v1408_v22 = vld [vmem:[%s2153_s1 + $0x38] ss:$12 sps:$4 sm:$0xff]  }
   0x8   :  { %543 = vmatpush1.bf16.msra.mxu1 %v1391_v8  ;;  %471 = vmatprep.subr.bf16.mxu0 %v1392_v9  ;;  %v1407_v21 = vld [vmem:[%s2153_s1 + $0x60] ss:$12 sps:$4 sm:$0xff]   ;;  %v1409_v23 = vld [vmem:[%s2153_s1 + $0x7c] ss:$12 sps:$4 sm:$0xff]   ;;  %v1412_v25 = vld [vmem:[%s2153_s1 + $0x78] ss:$12 sps:$4 sm:$0xff]  }
   0x9   :  { %1303 = vmatprep.subr.bf16.mxu1 %v1395_v11  ;;  %v1411_v24 = vld [vmem:[%s2153_s1 + $0x110] ss:$12 sps:$4 sm:$0xff]   ;;  %v1414_v27 = vld [vmem:[%s2153_s1 + $0x94] ss:$12 sps:$4 sm:$0xff]   ;;  %v1607_v28 = vld [vmem:[%s2154_s0 + $0x38] ss:$12 sps:$4 sm:$0xff]  }
   0xa   :  { %v1413_v26 = vld [vmem:[%s2153_s1 + $0x50] ss:$12 sps:$4 sm:$0xff]   ;;  %v1417_v29 = vld [vmem:[%s2153_s1 + $0x128] ss:$12 sps:$4 sm:$0xff]   ;;  %v1420_v32 = vld [vmem:[%s2153_s1 + $0xac] ss:$12 sps:$4 sm:$0xff]  }
   0xb   :  { %1263 = vmatmul.mubr.msk.bf16.vlgmr.msra.gmra.mrb[0].mxu1 %vm454_vm0, %v1543_v10  ;;  %472 = vmatpush1.bf16.msra.mxu0 %v1396_v12  ;;  %v1418_v30 = vld [vmem:[%s2153_s1 + $0x90] ss:$12 sps:$4 sm:$0xff]   ;;  %v1419_v31 = vld [vmem:[%s2153_s1 + $0x68] ss:$12 sps:$4 sm:$0xff]   ;;  %v1422_v33 = vld [vmem:[%s2153_s1 + $0x140] ss:$12 sps:$4 sm:$0xff]  }
   0xc   :  { %1304 = vmatpush3.bf16.msra.mxu1 %v1397_v13  ;;  %473 = vmatprep.subr.bf16.mxu0 %v1398_v14  ;;  %v1423_v34 = vld [vmem:[%s2153_s1 + $0xa8] ss:$12 sps:$4 sm:$0xff]   ;;  %v1424_v35 = vld [vmem:[%s2153_s1 + $0x80] ss:$12 sps:$4 sm:$0xff]   ;;  %v1425_v36 = vld [vmem:[%s2153_s1 + $0xc4] ss:$12 sps:$4 sm:$0xff]  }
   0xd   :  { %1305 = vmatprep.subr.bf16.mxu1 %v1400_v15  ;;  %582 = vmatprep.mubr.bf16.mxu1 %v1484_v1  ;;  %v1639_v37 = vld [vmem:[%s2154_s0 + $0x50] ss:$12 sps:$4 sm:$0xff]   ;;  %v1428_v38 = vld [vmem:[%s2153_s1 + $0x158] ss:$12 sps:$4 sm:$0xff]   ;;  %v1429_v39 = vld [vmem:[%s2153_s1 + $0xc0] ss:$12 sps:$4 sm:$0xff]  }
   0xe   :  { %v1430_v40 = vld [vmem:[%s2153_s1 + $0x98] ss:$12 sps:$4 sm:$0xff]   ;;  %v1431_v41 = vld [vmem:[%s2153_s1 + $0xdc] ss:$12 sps:$4 sm:$0xff]   ;;  %v1439_v46 = vld [vmem:[%s2153_s1 + $0xf4] ss:$12 sps:$4 sm:$0xff]  }
   0xf   :  { %474 = vmatpush1.bf16.msra.mxu0 %v1401_v16  ;;  %v1433_v42 = vld [vmem:[%s2153_s1 + $0x170] ss:$12 sps:$4 sm:$0xff]   ;;  %v1434_v43 = vld [vmem:[%s2153_s1 + $0xd8] ss:$12 sps:$4 sm:$0xff]   ;;  %v1436_v47 = vld [vmem:[%s2154_s0] ss:$12 sps:$4 sm:$0xff]  }
  0x10   :  { %1306 = vmatpush3.bf16.msra.mxu1 %v1402_v17  ;;  %475 = vmatprep.subr.bf16.mxu0 %v1403_v18  ;;  %v1435_v44 = vld [vmem:[%s2153_s1 + $0xb0] ss:$12 sps:$4 sm:$0xff]   ;;  %v1441_v48 = vld [vmem:[%s2153_s1 + $0x188] ss:$12 sps:$4 sm:$0xff]   ;;  %v1443_v50 = vld [vmem:[%s2153_s1 + $0x10c] ss:$12 sps:$4 sm:$0xff]  }
  0x11   :  { %1307 = vmatprep.subr.bf16.mxu1 %v1406_v20  ;;  %v1438_v45 = vld [vmem:[%s2154_s0 + $0x4] ss:$12 sps:$4 sm:$0xff]   ;;  %v1446_v51 = vld [vmem:[%s2154_s0 + $0x1c] ss:$12 sps:$4 sm:$0xff]   ;;  %v1451_v55 = vld [vmem:[%s2153_s1 + $0x120] ss:$12 sps:$4 sm:$0xff]  }
  0x12   :  { %499 = vmatprep.mubr.bf16.mxu0 %v1438_v45  ;;  %v1442_v49 = vld [vmem:[%s2153_s1 + $0xf0] ss:$12 sps:$4 sm:$0xff]   ;;  %v1445_v52 = vld [vmem:[%s2153_s1 + $0x108] ss:$12 sps:$4 sm:$0xff]   ;;  %v1450_v54 = vld [vmem:[%s2154_s0 + $0x18] ss:$12 sps:$4 sm:$0xff]  }
  0x13   :  { %1264 = vmatmul.mubr.msk.bf16.gmra.mrb[4].mxu1 %vm454_vm0, %v1575_v19  ;;  %476 = vmatpush1.bf16.msra.mxu0 %v1407_v21  ;;  %v1448_v53 = vld [vmem:[%s2153_s1 + $0x124] ss:$12 sps:$4 sm:$0xff]   ;;  %v1455_v56 = vld [vmem:[%s2154_s0 + $0x34] ss:$12 sps:$4 sm:$0xff]   ;;  %v1452_v58 = vld [vmem:[%s2153_s1 + $0x13c] ss:$12 sps:$4 sm:$0xff]  }
  0x14   :  { %1308 = vmatpush3.bf16.msra.mxu1 %v1408_v22  ;;  %477 = vmatprep.subr.bf16.mxu0 %v1409_v23  ;;  %v1460_v57 = vld [vmem:[%s2153_s1 + $0x1a0] ss:$12 sps:$4 sm:$0xff]   ;;  %v1454_v59 = vld [vmem:[%s2153_s1 + $0x138] ss:$12 sps:$4 sm:$0xff]   ;;  %v1459_v61 = vld [vmem:[%s2154_s0 + $0x30] ss:$12 sps:$4 sm:$0xff]  }
  0x15   :  { %1309 = vmatprep.subr.bf16.mxu1 %v1411_v24  ;;  %592 = vmatprep.mubr.bf16.mxu1 %v1484_v1  ;;  %v1457_v60 = vld [vmem:[%s2153_s1 + $0x154] ss:$12 sps:$4 sm:$0xff]   ;;  %v1461_v62 = vld [vmem:[%s2153_s1 + $0x150] ss:$12 sps:$4 sm:$0xff]   ;;  %v1465_v63 = vld [vmem:[%s2154_s0 + $0x4c] ss:$12 sps:$4 sm:$0xff]  }
  0x16   :  { %v1462_v0 = vld [vmem:[%s2153_s1 + $0x16c] ss:$12 sps:$4 sm:$0xff]   ;;  %v1467_v2 = vld [vmem:[%s2154_s0 + $0x48] ss:$12 sps:$4 sm:$0xff]  }
  0x17   :  { %478 = vmatpush1.bf16.msra.mxu0 %v1412_v25 }
  0x18   :  { %1310 = vmatpush3.bf16.msra.mxu1 %v1413_v26  ;;  %479 = vmatprep.subr.bf16.mxu0 %v1414_v27 }
  0x19   :  { %1311 = vmatprep.subr.bf16.mxu1 %v1417_v29 }
  0x1b   :  { %1265 = vmatmul.mubr.msk.bf16.gmra.mrb[8].mxu1 %vm454_vm0, %v1607_v28  ;;  %480 = vmatpush1.bf16.msra.mxu0 %v1418_v30 }
  0x1c   :  { %1312 = vmatpush3.bf16.msra.mxu1 %v1419_v31  ;;  %481 = vmatprep.subr.bf16.mxu0 %v1420_v32 }
  0x1d   :  { %1313 = vmatprep.subr.bf16.mxu1 %v1422_v33  ;;  %602 = vmatprep.mubr.bf16.mxu1 %v1484_v1  ;;  %v1464_v1 = vld [vmem:[%s2153_s1 + $0x168] ss:$12 sps:$4 sm:$0xff]  }
  0x1f   :  { %482 = vmatpush1.bf16.msra.mxu0 %v1423_v34 }
  0x20   :  { %1314 = vmatpush3.bf16.msra.mxu1 %v1424_v35  ;;  %483 = vmatprep.subr.bf16.mxu0 %v1425_v36 }
  0x21   :  { %1315 = vmatprep.subr.bf16.mxu1 %v1428_v38 }
  0x23   :  { %1266 = vmatmul.mubr.msk.bf16.gmra.mrb[12].mxu1 %vm454_vm0, %v1639_v37  ;;  %484 = vmatpush1.bf16.msra.mxu0 %v1429_v39 }
  0x24   :  { %1316 = vmatpush3.bf16.msra.mxu1 %v1430_v40  ;;  %485 = vmatprep.subr.bf16.mxu0 %v1431_v41 }
  0x25   :  { %1317 = vmatprep.subr.bf16.mxu1 %v1433_v42  ;;  %645 = vmatprep.mubr.bf16.mxu1 %v1438_v45 }
  0x27   :  { %486 = vmatpush1.bf16.msra.mxu0 %v1434_v43 }
  0x28   :  { %1318 = vmatpush3.bf16.msra.mxu1 %v1435_v44  ;;  %487 = vmatprep.subr.bf16.mxu0 %v1439_v46 }
  0x29   :  { %1349 = vmatprep.subr.bf16.mxu1 %v1441_v48 }
  0x2b   :  { %646 = vmatmul.mubr.bf16.vlgmr.msra.gmra.mrb[16].mxu1 %v1436_v47  ;;  %488 = vmatpush1.bf16.msra.mxu0 %v1442_v49 }
  0x2c   :  { %1350 = vmatpush3.bf16.msra.mxu1 %v1441_v48  ;;  %489 = vmatprep.subr.bf16.mxu0 %v1443_v50 }
  0x2d   :  { %653 = vmatprep.mubr.bf16.mxu1 %v1446_v51  ;;  %1351 = vmatprep.subr.bf16.mxu1 %v1460_v57 }
  0x2f   :  { %490 = vmatpush1.bf16.msra.mxu0 %v1445_v52 }
  0x30   :  { %491 = vmatprep.subr.bf16.mxu0 %v1448_v53  ;;  %1352 = vmatpush3.bf16.msra.mxu1 %v1460_v57 }
  0x33   :  { %654 = vmatmul.mubr.bf16.gmra.mrb[20].mxu1 %v1450_v54  ;;  %492 = vmatpush1.bf16.msra.mxu0 %v1451_v55 }
  0x34   :  { %661 = vmatprep.mubr.bf16.mxu1 %v1455_v56  ;;  %493 = vmatprep.subr.bf16.mxu0 %v1452_v58 }
  0x37   :  { %494 = vmatpush1.bf16.msra.mxu0 %v1454_v59 }
  0x38   :  { %495 = vmatprep.subr.bf16.mxu0 %v1457_v60 }
  0x3b   :  { %662 = vmatmul.mubr.bf16.gmra.mrb[24].mxu1 %v1459_v61  ;;  %496 = vmatpush1.bf16.msra.mxu0 %v1461_v62 }
  0x3c   :  { %669 = vmatprep.mubr.bf16.mxu1 %v1465_v63  ;;  %497 = vmatprep.subr.bf16.mxu0 %v1462_v0 }
  0x3f   :  { %498 = vmatpush1.bf16.msra.mxu0 %v1464_v1 }
  0x42   :  { %500 = vmatmul.mubr.bf16.vlgmr.msra.gmra.mrb[0].mxu0 %v1436_v47 }
  0x43   :  { %670 = vmatmul.mubr.bf16.gmra.mrb[28].mxu1 %v1467_v2  ;;  %509 = vmatprep.mubr.bf16.mxu0 %v1446_v51 }
  0x44   :  { %1353 = vmatprep.mubr.msk.bf16.mxu1 %vm454_vm0, %v1543_v10 }
  0x4a   :  { %510 = vmatmul.mubr.bf16.gmra.mrb[4].mxu0 %v1450_v54 }
  0x4b   :  { %1354 = vmatmul.mubr.msk.bf16.vlgmr.msra.gmra.mrb[32].mxu1 %vm454_vm0, %v1575_v19  ;;  %519 = vmatprep.mubr.bf16.mxu0 %v1455_v56 }
  0x4c   :  { %1357 = vmatprep.mubr.msk.bf16.mxu1 %vm454_vm0, %v1607_v28 }
  0x52   :  { %520 = vmatmul.mubr.bf16.gmra.mrb[8].mxu0 %v1459_v61 }
  0x53   :  { %1358 = vmatmul.mubr.msk.bf16.gmra.mrb[36].mxu1 %vm454_vm0, %v1639_v37  ;;  %529 = vmatprep.mubr.bf16.mxu0 %v1465_v63 }
  0x5a   :  { %530 = vmatmul.mubr.bf16.gmra.mrb[12].mxu0 %v1467_v2 }
  0xde   :  { %v574_v3 = vpop.f32.mrb[0].mxu1 }
  0xdf   :  { %v576_v4 = vpop.f32.mrb[1].mxu1 }
  0xe0   :  { %v578_v5 = vpop.f32.mrb[2].mxu1 }
  0xe1   :  { %v580_v6 = vpop.f32.mrb[3].mxu1 }
  0xe6   :  { %v584_v7 = vpop.f32.mrb[4].mxu1 }
  0xe7   :  { %v586_v8 = vpop.f32.mrb[5].mxu1 }
  0xe8   :  { %v588_v9 = vpop.f32.mrb[6].mxu1 }
  0xe9   :  { %v590_v10 = vpop.f32.mrb[7].mxu1 }
  0xee   :  { %v1738_v11 = vpop.f32.mrb[8].mxu1 }
  0xef   :  { %v1740_v12 = vpop.f32.mrb[9].mxu1 }
  0xf0   :  { %v1742_v13 = vpop.f32.mrb[10].mxu1 }
  0xf1   :  { %v1744_v14 = vpop.f32.mrb[11].mxu1 }
  0xf6   :  { %v1746_v15 = vpop.f32.mrb[12].mxu1 }
  0xf7   :  { %v1748_v16 = vpop.f32.mrb[13].mxu1 }
  0xf8   :  { %v1750_v17 = vpop.f32.mrb[14].mxu1 }
  0xf9   :  { %v1752_v18 = vpop.f32.mrb[15].mxu1 }
  0xfe   :  { %v1319_v19 = vpop.f32.mrb[16].mxu1 }
  0xff   :  { %v1320_v20 = vpop.f32.mrb[17].mxu1 }
 0x100   :  { %v1321_v21 = vadd.f32 %v1320_v20, %v1319_v19  ;;  %v1322_v22 = vpop.f32.mrb[18].mxu1 }
 0x101   :  { %v1323_v23 = vpop.f32.mrb[19].mxu1 }
 0x102   :  { %v1324_v24 = vadd.f32 %v1323_v23, %v1322_v22 }
 0x106   :  { %v1325_v25 = vpop.f32.mrb[20].mxu1 }
 0x107   :  { %v1326_v26 = vpop.f32.mrb[21].mxu1 }
 0x108   :  { %v1327_v27 = vadd.f32 %v1326_v26, %v1325_v25  ;;  %v1328_v28 = vpop.f32.mrb[22].mxu1 }
 0x109   :  { %v1329_v29 = vpop.f32.mrb[23].mxu1 }
 0x10a   :  { %v1330_v30 = vadd.f32 %v1329_v29, %v1328_v28 }
 0x10e   :  { %v1331_v31 = vpop.f32.mrb[24].mxu1 }
 0x10f   :  { %v1332_v32 = vpop.f32.mrb[25].mxu1 }
 0x110   :  { %v1333_v33 = vadd.f32 %v1332_v32, %v1331_v31  ;;  %v1334_v34 = vpop.f32.mrb[26].mxu1 }
 0x111   :  { %v1335_v35 = vpop.f32.mrb[27].mxu1 }
 0x112   :  { %v1336_v36 = vadd.f32 %v1335_v35, %v1334_v34 }
 0x115   :  { %v501_v37 = vpop.f32.mrb[0].mxu0 }
 0x116   :  { %v1337_v38 = vpop.f32.mrb[28].mxu1  ;;  %v1754_v39 = vadd.f32 %v574_v3, %v501_v37  ;;  %v503_v40 = vpop.f32.mrb[1].mxu0 }
 0x117   :  { %v1338_v41 = vpop.f32.mrb[29].mxu1  ;;  %v1756_v42 = vadd.f32 %v576_v4, %v503_v40  ;;  %v505_v44 = vpop.f32.mrb[2].mxu0 }
 0x118   :  { %v1339_v43 = vadd.f32 %v1338_v41, %v1337_v38  ;;  %v1340_v45 = vpop.f32.mrb[30].mxu1  ;;  %v1758_v46 = vadd.f32 %v578_v5, %v505_v44  ;;  %v507_v47 = vpop.f32.mrb[3].mxu0 }
 0x119   :  { %v1341_v48 = vpop.f32.mrb[31].mxu1  ;;  %v1760_v49 = vadd.f32 %v580_v6, %v507_v47  ;;  %v743_v1 = vadd.f32 %v1756_v42, %v1754_v39 }
 0x11a   :  { %v1342_v50 = vadd.f32 %v1341_v48, %v1340_v45 }
 0x11b   :  { %v748_v19 = vadd.f32 %v1760_v49, %v1758_v46 }
 0x11d   :  { %v511_v51 = vpop.f32.mrb[4].mxu0 }
 0x11e   :  { %v1355_v52 = vpop.f32.mrb[32].mxu1  ;;  %v1762_v53 = vadd.f32 %v584_v7, %v511_v51  ;;  %v513_v55 = vpop.f32.mrb[5].mxu0 }
 0x11f   :  { %v1764_v54 = vadd.f32 %v1355_v52, %v1327_v27  ;;  %v712_v56 = vpop.f32.mrb[33].mxu1  ;;  %v1766_v57 = vadd.f32 %v586_v8, %v513_v55  ;;  %v515_v59 = vpop.f32.mrb[6].mxu0 }
 0x120   :  { %v1768_v58 = vadd.f32 %v1321_v21, %v712_v56  ;;  %v1356_v60 = vpop.f32.mrb[34].mxu1  ;;  %v1770_v61 = vadd.f32 %v588_v9, %v515_v59  ;;  %v517_v63 = vpop.f32.mrb[7].mxu0  ;;  %v928_v59 = vld [vmem:[%s2155_s2] sm:$0xff] }
 0x121   :  { %v1772_v62 = vadd.f32 %v1356_v60, %v1330_v30  ;;  %v715_v0 = vpop.f32.mrb[35].mxu1  ;;  %v1776_v2 = vadd.f32 %v590_v10, %v517_v63  ;;  %v753_v5 = vadd.f32 %v1766_v57, %v1762_v53  ;;  %v754_v7 = vsel %vm454_vm0, %v1764_v54, 0.0  ;;  %v932_v60 = vld [vmem:[%s2155_s2 + $0x20] sm:$0xff]  ;;  %v1001_v63 = vld [vmem:[%s2156_s3 + $0x8] sm:$0xff] }
 0x122   :  { %v1778_v3 = vadd.f32 %v1324_v24, %v715_v0  ;;  %v744_v4 = vsel %vm454_vm0, %v1768_v58, 0.0  ;;  %v933_v0 = vld [vmem:[%s2155_s2 + $0x28] sm:$0xff] }
 0x123   :  { %v745_v6 = vadd.f32 %v744_v4, %v743_v1  ;;  %v758_v8 = vadd.f32 %v1776_v2, %v1770_v61  ;;  %v755_v9 = vadd.f32 %v754_v7, %v753_v5  ;;  %v759_v27 = vsel %vm454_vm0, %v1772_v62, 0.0  ;;  %v1003_v1 = vld [vmem:[%s2156_s3 + $0x18] sm:$0xff]  ;;  %v934_v4 = vld [vmem:[%s2155_s2 + $0x30] sm:$0xff]  ;;  %v1005_v5 = vld [vmem:[%s2156_s3 + $0x28] sm:$0xff] }
 0x124   :  { %v749_v10 = vsel %vm454_vm0, %v1778_v3, 0.0 }
 0x125   :  { %746 = vadd.xlane.f32.xlu0 %v745_v6  ;;  %756 = vadd.xlane.f32.xlu1 %v755_v9  ;;  %v521_v21 = vpop.f32.mrb[8].mxu0  ;;  %v750_v26 = vadd.f32 %v749_v10, %v748_v19  ;;  %v760_v32 = vadd.f32 %v759_v27, %v758_v8  ;;  %v935_v6 = vld [vmem:[%s2155_s2 + $0x38] sm:$0xff]  ;;  %v1000_v10 = vld [vmem:[%s2156_s3] sm:$0xff]  ;;  %v1002_v19 = vld [vmem:[%s2156_s3 + $0x10] sm:$0xff] }
 0x126   :  { %v1359_v20 = vpop.f32.mrb[36].mxu1  ;;  %v1795_v23 = vadd.f32 %v1738_v11, %v521_v21  ;;  %v523_v24 = vpop.f32.mrb[9].mxu0 }
 0x127   :  { %v1792_v22 = vadd.f32 %v1359_v20, %v1339_v43  ;;  %v728_v25 = vpop.f32.mrb[37].mxu1  ;;  %v1800_v28 = vadd.f32 %v1740_v12, %v523_v24  ;;  %v525_v30 = vpop.f32.mrb[10].mxu0  ;;  %v1004_v20 = vld [vmem:[%s2156_s3 + $0x20] sm:$0xff] }
 0x128   :  { %v1802_v29 = vadd.f32 %v1333_v33, %v728_v25  ;;  %v1360_v31 = vpop.f32.mrb[38].mxu1  ;;  %v1805_v34 = vadd.f32 %v1742_v13, %v525_v30  ;;  %v527_v37 = vpop.f32.mrb[11].mxu0 }
 0x129   :  { %v1807_v35 = vadd.f32 %v1360_v31, %v1342_v50  ;;  %v731_v11 = vpop.f32.mrb[39].mxu1  ;;  %751 = vadd.xlane.f32.xlu0 %v750_v26  ;;  %v763_v38 = vadd.f32 %v1800_v28, %v1795_v23  ;;  %v1814_v12 = vadd.f32 %v1744_v14, %v527_v37  ;;  %761 = vadd.xlane.f32.xlu1 %v760_v32 }
 0x12a   :  { %v1811_v40 = vadd.f32 %v1336_v36, %v731_v11  ;;  %v764_v33 = vsel %vm454_vm0, %v1802_v29, 0.0 }
 0x12b   :  { %v768_v13 = vadd.f32 %v1814_v12, %v1805_v34  ;;  %v765_v41 = vadd.f32 %v764_v33, %v763_v38  ;;  %v779_v8 = vsel %vm454_vm0, %v1807_v35, 0.0 }
 0x12c   :  { %v769_v43 = vsel %vm454_vm0, %v1811_v40, 0.0 }
 0x12d   :  { %766 = vadd.xlane.f32.xlu0 %v765_v41  ;;  %v531_v44 = vpop.f32.mrb[12].mxu0  ;;  %v770_v45 = vadd.f32 %v769_v43, %v768_v13 }
 0x12e   :  { %v1823_v36 = vadd.f32 %v1746_v15, %v531_v44  ;;  %v533_v47 = vpop.f32.mrb[13].mxu0  ;;  %v774_v15 = vsel %vm454_vm0, %v1792_v22, 0.0 }
 0x12f   :  { %v1826_v14 = vadd.f32 %v1748_v16, %v533_v47  ;;  %771 = vadd.xlane.f32.xlu1 %v770_v45  ;;  %v535_v48 = vpop.f32.mrb[14].mxu0  ;;  %v929_v16 = vld [vmem:[%s2155_s2 + $0x8] sm:$0xff] }
 0x130   :  { %v1829_v50 = vadd.f32 %v1750_v17, %v535_v48  ;;  %v537_v51 = vpop.f32.mrb[15].mxu0  ;;  %v930_v17 = vld [vmem:[%s2155_s2 + $0x10] sm:$0xff] }
 0x131   :  { %v773_v52 = vadd.f32 %v1826_v14, %v1823_v36  ;;  %v1834_v55 = vadd.f32 %v1752_v18, %v537_v51  ;;  %v931_v18 = vld [vmem:[%s2155_s2 + $0x18] sm:$0xff] }
 0x133   :  { %v775_v56 = vadd.f32 %v774_v15, %v773_v52  ;;  %v778_v7 = vadd.f32 %v1834_v55, %v1829_v50 }
 0x135   :  { %776 = vadd.xlane.f32.xlu0 %v775_v56  ;;  %v780_v9 = vadd.f32 %v779_v8, %v778_v7 }
 0x140   :  { %943 = vperm.xlu1 %1379, %v929_v16  }
 0x144   :  { %948 = vperm.xlu1 %1379, %v930_v17  }
 0x148   :  { %953 = vperm.xlu1 %1379, %v931_v18  }
 0x14b   :  { %938 = vperm.xlu0 %1378, %v928_v59  }
 0x14c   :  { %958 = vperm.xlu1 %1379, %v932_v60  }
 0x14f   :  { %1015 = vperm.xlu0 %1378, %v1001_v63  }
 0x150   :  { %963 = vperm.xlu1 %1379, %v933_v0  }
 0x153   :  { %1025 = vperm.xlu0 %1378, %v1003_v1  }
 0x154   :  { %968 = vperm.xlu1 %1379, %v934_v4  }
 0x157   :  { %1035 = vperm.xlu0 %1378, %v1005_v5  }
 0x158   :  { %973 = vperm.xlu1 %1379, %v935_v6  }
 0x17c   :  { %781 = vadd.xlane.f32.xlu1 %v780_v9 }
 0x18d   :  { %1010 = vperm.xlu1 %1379, %v1000_v10  }
 0x191   :  { %1020 = vperm.xlu1 %1379, %v1002_v19  }
 0x195   :  { %1030 = vperm.xlu1 %1379, %v1004_v20  }
 0x1b2   :  { %v747_v21 = vpop.xlane.xlu0 %746  ;;  %v757_v25 = vpop.xlane.xlu1 %756 }
 0x1b3   :  { %v784_v24 = vmul.f32 0.0034722222, %v747_v21  ;;  %v786_v26 = vmul.f32 0.0034722222, %v757_v25 }
 0x1b5   :  { %v1885_v27 = vsub.f32 %v1754_v39, %v784_v24  ;;  %v1888_v30 = vsub.f32 %v1756_v42, %v784_v24  ;;  %v1891_v31 = vsub.f32 %v1768_v58, %v784_v24  ;;  %v1894_v32 = vsub.f32 %v1762_v53, %v786_v26 }
 0x1b6   :  { %v1897_v11 = vsub.f32 %v1766_v57, %v786_v26  ;;  %v1900_v37 = vsub.f32 %v1764_v54, %v786_v26  ;;  %v752_v38 = vpop.xlane.xlu0 %751  ;;  %v762_v13 = vpop.xlane.xlu1 %761 }
 0x1b7   :  { %v785_v33 = vmul.f32 0.0034722222, %v752_v38  ;;  %v816_v39 = vmul.f32 %v1885_v27, %v1885_v27  ;;  %v817_v42 = vmul.f32 %v1888_v30, %v1888_v30  ;;  %v818_v58 = vmul.f32 %v1891_v31, %v1891_v31 }
 0x1b8   :  { %v787_v53 = vmul.f32 0.0034722222, %v762_v13  ;;  %v822_v57 = vmul.f32 %v1894_v32, %v1894_v32  ;;  %v823_v54 = vmul.f32 %v1897_v11, %v1897_v11  ;;  %v824_v41 = vmul.f32 %v1900_v37, %v1900_v37 }
 0x1b9   :  { %v1915_v43 = vsub.f32 %v1758_v46, %v785_v33  ;;  %v1918_v44 = vsub.f32 %v1760_v49, %v785_v33  ;;  %v1921_v45 = vsub.f32 %v1778_v3, %v785_v33  ;;  %v840_v47 = vadd.f32 %v817_v42, %v816_v39 }
 0x1ba   :  { %v1924_v48 = vsub.f32 %v1770_v61, %v787_v53  ;;  %v1927_v51 = vsub.f32 %v1776_v2, %v787_v53  ;;  %v1930_v52 = vsub.f32 %v1772_v62, %v787_v53  ;;  %v841_v15 = vsel %vm454_vm0, %v818_v58, 0.0  ;;  %v767_v46 = vpop.xlane.xlu0 %766 }
 0x1bb   :  { %v842_v56 = vadd.f32 %v841_v15, %v840_v47  ;;  %v850_v16 = vadd.f32 %v823_v54, %v822_v57  ;;  %v819_v49 = vmul.f32 %v1915_v43, %v1915_v43  ;;  %v788_v3 = vmul.f32 0.0034722222, %v767_v46 }
 0x1bc   :  { %v851_v17 = vsel %vm454_vm0, %v824_v41, 0.0  ;;  %v820_v61 = vmul.f32 %v1918_v44, %v1918_v44  ;;  %v821_v2 = vmul.f32 %v1921_v45, %v1921_v45  ;;  %v772_v18 = vpop.xlane.xlu1 %771  ;;  %v825_v62 = vmul.f32 %v1924_v48, %v1924_v48 }
 0x1bd   :  { %843 = vadd.xlane.f32.xlu0 %v842_v56  ;;  %v826_v59 = vmul.f32 %v1927_v51, %v1927_v51  ;;  %v827_v60 = vmul.f32 %v1930_v52, %v1930_v52  ;;  %v1947_v63 = vsub.f32 %v1795_v23, %v788_v3  ;;  %v1950_v0 = vsub.f32 %v1800_v28, %v788_v3 }
 0x1be   :  { %v1953_v1 = vsub.f32 %v1802_v29, %v788_v3  ;;  %v789_v4 = vmul.f32 0.0034722222, %v772_v18  ;;  %v852_v5 = vadd.f32 %v851_v17, %v850_v16  ;;  %v845_v6 = vadd.f32 %v820_v61, %v819_v49 }
 0x1bf   :  { %v846_v7 = vsel %vm454_vm0, %v821_v2, 0.0  ;;  %v828_v28 = vmul.f32 %v1947_v63, %v1947_v63  ;;  %v855_v10 = vadd.f32 %v826_v59, %v825_v62  ;;  %v829_v19 = vmul.f32 %v1950_v0, %v1950_v0 }
 0x1c0   :  { %v1957_v8 = vsub.f32 %v1805_v34, %v789_v4  ;;  %v1960_v9 = vsub.f32 %v1814_v12, %v789_v4  ;;  %v1963_v23 = vsub.f32 %v1811_v40, %v789_v4  ;;  %v847_v29 = vadd.f32 %v846_v7, %v845_v6  ;;  %v1999_v56 = vpop.permute.xlu1 %943 }
 0x1c1   :  { %853 = vadd.xlane.f32.xlu0 %v852_v5  ;;  %v830_v20 = vmul.f32 %v1953_v1, %v1953_v1  ;;  %v856_v34 = vsel %vm454_vm0, %v827_v60, 0.0  ;;  %v860_v25 = vadd.f32 %v829_v19, %v828_v28 }
 0x1c2   :  { %v831_v12 = vmul.f32 %v1957_v8, %v1957_v8  ;;  %v832_v40 = vmul.f32 %v1960_v9, %v1960_v9  ;;  %v833_v21 = vmul.f32 %v1963_v23, %v1963_v23  ;;  %848 = vadd.xlane.f32.xlu1 %v847_v29  ;;  %v777_v24 = vpop.xlane.xlu0 %776  ;;  %v857_v39 = vadd.f32 %v856_v34, %v855_v10 }
 0x1c3   :  { %v861_v26 = vsel %vm454_vm0, %v830_v20, 0.0  ;;  %v790_v38 = vmul.f32 0.0034722222, %v777_v24 }
 0x1c4   :  { %v865_v33 = vadd.f32 %v832_v40, %v831_v12  ;;  %v866_v13 = vsel %vm454_vm0, %v833_v21, 0.0  ;;  %v862_v42 = vadd.f32 %v861_v26, %v860_v25  ;;  %v2001_v16 = vpop.permute.xlu1 %948 }
 0x1c5   :  { %v1981_v58 = vsub.f32 %v1823_v36, %v790_v38  ;;  %v1984_v53 = vsub.f32 %v1826_v14, %v790_v38  ;;  %v1987_v57 = vsub.f32 %v1792_v22, %v790_v38  ;;  %v1007_v22 = vld [vmem:[%s2156_s3 + $0x38] sm:$0xff] }
 0x1c6   :  { %858 = vadd.xlane.f32.xlu1 %v857_v39  ;;  %863 = vadd.xlane.f32.xlu0 %v862_v42  ;;  %v867_v54 = vadd.f32 %v866_v13, %v865_v33 }
 0x1c7   :  { %v834_v41 = vmul.f32 %v1981_v58, %v1981_v58  ;;  %v835_v47 = vmul.f32 %v1984_v53, %v1984_v53  ;;  %v836_v15 = vmul.f32 %v1987_v57, %v1987_v57 }
 0x1c8   :  { %v2003_v49 = vpop.permute.xlu1 %953 }
 0x1c9   :  { %v870_v36 = vadd.f32 %v835_v47, %v834_v41  ;;  %v871_v46 = vsel %vm454_vm0, %v836_v15, 0.0 }
 0x1ca   :  { %868 = vadd.xlane.f32.xlu1 %v867_v54 }
 0x1cb   :  { %v872_v14 = vadd.f32 %v871_v46, %v870_v36 }
 0x1cc   :  { %v2005_v3 = vpop.permute.xlu1 %958 }
 0x1cd   :  { %873 = vadd.xlane.f32.xlu0 %v872_v14 }
 0x1d0   :  { %v2007_v17 = vpop.permute.xlu1 %963 }
 0x1d4   :  { %v2009_v61 = vpop.permute.xlu1 %968 }
 0x1d8   :  { %v2011_v2 = vpop.permute.xlu1 %973 }
 0x1e3   :  { %1045 = vperm.xlu0 %1378, %v1007_v22  }
 0x209   :  { %v782_v18 = vpop.xlane.xlu1 %781 }
 0x20a   :  { %v791_v62 = vmul.f32 0.0034722222, %v782_v18 }
 0x20c   :  { %v2014_v59 = vsub.f32 %v1829_v50, %v791_v62  ;;  %v2017_v60 = vsub.f32 %v1834_v55, %v791_v62  ;;  %v2020_v4 = vsub.f32 %v1807_v35, %v791_v62  ;;  %v1006_v55 = vld [vmem:[%s2156_s3 + $0x30] sm:$0xff]  ;;  %v939_v35 = vpop.permute.xlu0 %938 }
 0x20d   :  { %v1011_v20 = vpop.permute.xlu1 %1010 }
 0x20e   :  { %v837_v5 = vmul.f32 %v2014_v59, %v2014_v59  ;;  %v838_v6 = vmul.f32 %v2017_v60, %v2017_v60  ;;  %v839_v7 = vmul.f32 %v2020_v4, %v2020_v4 }
 0x210   :  { %v875_v28 = vadd.f32 %v838_v6, %v837_v5  ;;  %v876_v29 = vsel %vm454_vm0, %v839_v7, 0.0  ;;  %v2032_v10 = vpop.permute.xlu0 %1015 }
 0x211   :  { %v1021_v12 = vpop.permute.xlu1 %1020 }
 0x212   :  { %v877_v50 = vadd.f32 %v876_v29, %v875_v28 }
 0x214   :  { %878 = vadd.xlane.f32.xlu1 %v877_v50  ;;  %v2034_v19 = vpop.permute.xlu0 %1025 }
 0x215   :  { %v2038_v24 = vpop.permute.xlu1 %1030 }
 0x218   :  { %v2036_v34 = vpop.permute.xlu0 %1035 }
 0x225   :  { %1040 = vperm.xlu1 %1379, %v1006_v55  }
 0x24a   :  { %v844_v40 = vpop.xlane.xlu0 %843 }
 0x24b   :  { %v880_v21 = vmul.f32 0.0034722222, %v844_v40 }
 0x24d   :  { %v888_v25 = vadd.f32 1e-05, %v880_v21 }
 0x24e   :  { %v854_v26 = vpop.xlane.xlu0 %853 }
 0x24f   :  { %1468 = vrsqrt.f32 %v888_v25  ;;  %v882_v38 = vmul.f32 0.0034722222, %v854_v26  ;;  %v849_v33 = vpop.xlane.xlu1 %848 }
 0x250   :  { %v881_v39 = vmul.f32 0.0034722222, %v849_v33 }
 0x251   :  { %v890_v13 = vadd.f32 1e-05, %v882_v38 }
 0x252   :  { %v889_v42 = vadd.f32 1e-05, %v881_v39 }
 0x253   :  { %1470 = vrsqrt.f32 %v890_v13  ;;  %v859_v54 = vpop.xlane.xlu1 %858  ;;  %v864_v41 = vpop.xlane.xlu0 %863 }
 0x254   :  { %1472 = vrsqrt.f32 %v889_v42  ;;  %v883_v47 = vmul.f32 0.0034722222, %v859_v54  ;;  %v884_v15 = vmul.f32 0.0034722222, %v864_v41 }
 0x256   :  { %v891_v36 = vadd.f32 1e-05, %v883_v47  ;;  %v892_v46 = vadd.f32 1e-05, %v884_v15 }
 0x257   :  { %v869_v14 = vpop.xlane.xlu1 %868 }
 0x258   :  { %1474 = vrsqrt.f32 %v891_v36  ;;  %v885_v18 = vmul.f32 0.0034722222, %v869_v14 }
 0x259   :  { %v1469_v22 = vpop.eup %1468  ;;  %1476 = vrsqrt.f32 %v892_v46 }
 0x25a   :  { %v904_v62 = vmul.f32 %v1469_v22, %v1885_v27  ;;  %v905_v5 = vmul.f32 %v1469_v22, %v1888_v30  ;;  %v906_v6 = vmul.f32 %v1469_v22, %v1891_v31  ;;  %v893_v7 = vadd.f32 1e-05, %v885_v18 }
 0x25c   :  { %v976_v28 = vmul.f32 %v939_v35, %v904_v62  ;;  %v977_v29 = vmul.f32 %v939_v35, %v905_v5  ;;  %v978_v50 = vmul.f32 %v939_v35, %v906_v6  ;;  %1478 = vrsqrt.f32 %v893_v7 }
 0x25d   :  { %v1471_v55 = vpop.eup %1470 }
 0x25e   :  { %v1048_v40 = vadd.f32 %v1011_v20, %v976_v28  ;;  %v1049_v21 = vadd.f32 %v1011_v20, %v977_v29  ;;  %v1050_v25 = vadd.f32 %v1011_v20, %v978_v50  ;;  %v910_v26 = vmul.f32 %v1471_v55, %v1894_v32  ;;  %v1473_v38 = vpop.eup %1472 }
 0x25f   :  { %v911_v33 = vmul.f32 %v1471_v55, %v1897_v11  ;;  %v912_v27 = vmul.f32 %v1471_v55, %v1900_v37  ;;  %v907_v54 = vmul.f32 %v1473_v38, %v1915_v43  ;;  %v908_v20 = vmul.f32 %v1473_v38, %v1918_v44 }
 0x260   :  { %v1072_v30 = vmax.f32 %v1048_v40, 0.0  ;;  %v1073_v31 = vmax.f32 %v1049_v21, 0.0  ;;  %v1074_v13 = vmax.f32 %v1050_v25, 0.0  ;;  %v982_v39 = vmul.f32 %v2001_v16, %v910_v26 }
 0x261   :  { %v983_v35 = vmul.f32 %v2001_v16, %v911_v33  ;;  %v984_v42 = vmul.f32 %v2001_v16, %v912_v27  ;;  %v909_v11 = vmul.f32 %v1473_v38, %v1921_v45  ;;  %v979_v46 = vmul.f32 %v1999_v56, %v907_v54 }
 0x262   :  { %v1287_v32 = vpack.c.bf16 %v1073_v31, %v1072_v30  ;;  %v1288_v41 = vpack.c.bf16 %v1074_v13, %v1074_v13  ;;  %v1054_v47 = vadd.f32 %v1021_v12, %v982_v39  ;;  %v1475_v37 = vpop.eup %1474  ;;  %v980_v14 = vmul.f32 %v1999_v56, %v908_v20 }
 0x263   :  { %v1055_v15 = vadd.f32 %v1021_v12, %v983_v35  ;;  %v1056_v36 = vadd.f32 %v1021_v12, %v984_v42  ;;  %v981_v43 = vmul.f32 %v1999_v56, %v909_v11  ;;  %v913_v44 = vmul.f32 %v1475_v37, %v1924_v48  ;;  %v1477_v5 = vpop.eup %1476 }
 0x264   :  { %1176 = vst [vmem:[%s2157_s4] sm:$0xff] %v1287_v32  ;;  %v1078_v16 = vmax.f32 %v1054_v47, 0.0  ;;  %v914_v22 = vmul.f32 %v1475_v37, %v1927_v51  ;;  %1178 = vst.msk [vmem:[%s2157_s4 + $0x8] sm:$0xf] %vm1177_vm1, %v1288_v41  ;;  %v1051_v18 = vadd.f32 %v2032_v10, %v979_v46  ;;  %v1052_v62 = vadd.f32 %v2032_v10, %v980_v14 }
 0x265   :  { %v1079_v45 = vmax.f32 %v1055_v15, 0.0  ;;  %v1080_v12 = vmax.f32 %v1056_v36, 0.0  ;;  %v1053_v6 = vadd.f32 %v2032_v10, %v981_v43  ;;  %v915_v56 = vmul.f32 %v1475_v37, %v1930_v52 }
 0x266   :  { %v985_v48 = vmul.f32 %v2003_v49, %v913_v44  ;;  %v986_v51 = vmul.f32 %v2003_v49, %v914_v22  ;;  %v1479_v7 = vpop.eup %1478  ;;  %v1075_v50 = vmax.f32 %v1051_v18, 0.0  ;;  %v1076_v55 = vmax.f32 %v1052_v62, 0.0  ;;  %v874_v44 = vpop.xlane.xlu0 %873 }
 0x267   :  { %v1291_v28 = vpack.c.bf16 %v1079_v45, %v1078_v16  ;;  %v1292_v29 = vpack.c.bf16 %v1080_v12, %v1080_v12  ;;  %v1077_v40 = vmax.f32 %v1053_v6, 0.0  ;;  %v987_v21 = vmul.f32 %v2003_v49, %v915_v56 }
 0x268   :  { %v1057_v25 = vadd.f32 %v2034_v19, %v985_v48  ;;  %v1058_v26 = vadd.f32 %v2034_v19, %v986_v51  ;;  %v1289_v52 = vpack.c.bf16 %v1076_v55, %v1075_v50  ;;  %v916_v10 = vmul.f32 %v1477_v5, %v1947_v63 }
 0x269   :  { %1181 = vst [vmem:[%s2157_s4 + $0x18] sm:$0xff] %v1291_v28  ;;  %v917_v38 = vmul.f32 %v1477_v5, %v1950_v0  ;;  %v918_v33 = vmul.f32 %v1477_v5, %v1953_v1  ;;  %1182 = vst.msk [vmem:[%s2157_s4 + $0x20] sm:$0xf] %vm1177_vm1, %v1292_v29  ;;  %v1290_v49 = vpack.c.bf16 %v1077_v40, %v1077_v40  ;;  %v886_v22 = vmul.f32 0.0034722222, %v874_v44 }
 0x26a   :  { %v1059_v27 = vadd.f32 %v2034_v19, %v987_v21  ;;  %v1081_v30 = vmax.f32 %v1057_v25, 0.0  ;;  %v1082_v31 = vmax.f32 %v1058_v26, 0.0  ;;  %1179 = vst [vmem:[%s2157_s4 + $0xc] sm:$0xff] %v1289_v52  ;;  %v988_v63 = vmul.f32 %v2005_v3, %v916_v10 }
 0x26b   :  { %v989_v0 = vmul.f32 %v2005_v3, %v917_v38  ;;  %v990_v1 = vmul.f32 %v2005_v3, %v918_v33  ;;  %v919_v13 = vmul.f32 %v1479_v7, %v1957_v8  ;;  %v920_v42 = vmul.f32 %v1479_v7, %v1960_v9  ;;  %1180 = vst.msk [vmem:[%s2157_s4 + $0x14] sm:$0xf] %vm1177_vm1, %v1290_v49 }
 0x26c   :  { %v1083_v39 = vmax.f32 %v1059_v27, 0.0  ;;  %v1293_v35 = vpack.c.bf16 %v1082_v31, %v1081_v30  ;;  %v921_v19 = vmul.f32 %v1479_v7, %v1963_v23  ;;  %v1060_v54 = vadd.f32 %v2038_v24, %v988_v63  ;;  %v1046_v27 = vpop.permute.xlu0 %1045 }
 0x26d   :  { %v1061_v20 = vadd.f32 %v2038_v24, %v989_v0  ;;  %v1062_v32 = vadd.f32 %v2038_v24, %v990_v1  ;;  %v991_v3 = vmul.f32 %v2007_v17, %v919_v13  ;;  %v992_v9 = vmul.f32 %v2007_v17, %v920_v42 }
 0x26e   :  { %v1294_v8 = vpack.c.bf16 %v1083_v39, %v1083_v39  ;;  %1183 = vst [vmem:[%s2157_s4 + $0x24] sm:$0xff] %v1293_v35  ;;  %v993_v23 = vmul.f32 %v2007_v17, %v921_v19  ;;  %v1084_v41 = vmax.f32 %v1060_v54, 0.0  ;;  %v894_v45 = vadd.f32 1e-05, %v886_v22 }
 0x26f   :  { %v1085_v47 = vmax.f32 %v1061_v20, 0.0  ;;  %v1086_v11 = vmax.f32 %v1062_v32, 0.0  ;;  %v1063_v37 = vadd.f32 %v2036_v34, %v991_v3  ;;  %v1064_v15 = vadd.f32 %v2036_v34, %v992_v9 }
 0x270   :  { %v1065_v24 = vadd.f32 %v2036_v34, %v993_v23  ;;  %1184 = vst.msk [vmem:[%s2157_s4 + $0x2c] sm:$0xf] %vm1177_vm1, %v1294_v8  ;;  %1480 = vrsqrt.f32 %v894_v45 }
 0x271   :  { %v1295_v36 = vpack.c.bf16 %v1085_v47, %v1084_v41  ;;  %v1296_v46 = vpack.c.bf16 %v1086_v11, %v1086_v11  ;;  %v1087_v14 = vmax.f32 %v1063_v37, 0.0  ;;  %v1088_v16 = vmax.f32 %v1064_v15, 0.0 }
 0x272   :  { %v1089_v43 = vmax.f32 %v1065_v24, 0.0 }
 0x273   :  { %1185 = vst [vmem:[%s2157_s4 + $0x30] sm:$0xff] %v1295_v36  ;;  %1186 = vst.msk [vmem:[%s2157_s4 + $0x38] sm:$0xf] %vm1177_vm1, %v1296_v46  ;;  %v1297_v17 = vpack.c.bf16 %v1088_v16, %v1087_v14 }
 0x274   :  { %v1298_v34 = vpack.c.bf16 %v1089_v43, %v1089_v43 }
 0x275   :  { %1187 = vst [vmem:[%s2157_s4 + $0x3c] sm:$0xff] %v1297_v17 }
 0x276   :  { %1188 = vst.msk [vmem:[%s2157_s4 + $0x44] sm:$0xf] %vm1177_vm1, %v1298_v34 }
 0x27a   :  { %v1481_v12 = vpop.eup %1480 }
 0x27b   :  { %v922_v18 = vmul.f32 %v1481_v12, %v1981_v58  ;;  %v923_v62 = vmul.f32 %v1481_v12, %v1984_v53  ;;  %v924_v5 = vmul.f32 %v1481_v12, %v1987_v57 }
 0x27d   :  { %v994_v51 = vmul.f32 %v2009_v61, %v922_v18  ;;  %v995_v7 = vmul.f32 %v2009_v61, %v923_v62  ;;  %v996_v28 = vmul.f32 %v2009_v61, %v924_v5 }
 0x2a1   :  { %v879_v6 = vpop.xlane.xlu1 %878 }
 0x2a2   :  { %v887_v56 = vmul.f32 0.0034722222, %v879_v6 }
 0x2a4   :  { %v895_v48 = vadd.f32 1e-05, %v887_v56 }
 0x2a5   :  { %v1041_v29 = vpop.permute.xlu1 %1040 }
 0x2a6   :  { %1482 = vrsqrt.f32 %v895_v48  ;;  %v1066_v50 = vadd.f32 %v1041_v29, %v994_v51  ;;  %v1067_v55 = vadd.f32 %v1041_v29, %v995_v7  ;;  %v1068_v40 = vadd.f32 %v1041_v29, %v996_v28 }
 0x2a8   :  { %v1090_v21 = vmax.f32 %v1066_v50, 0.0  ;;  %v1091_v58 = vmax.f32 %v1067_v55, 0.0  ;;  %v1092_v25 = vmax.f32 %v1068_v40, 0.0 }
 0x2aa   :  { %v1299_v53 = vpack.c.bf16 %v1091_v58, %v1090_v21  ;;  %v1300_v26 = vpack.c.bf16 %v1092_v25, %v1092_v25 }
 0x2ac   :  { %1189 = vst [vmem:[%s2157_s4 + $0x48] sm:$0xff] %v1299_v53  ;;  %1190 = vst.msk [vmem:[%s2157_s4 + $0x50] sm:$0xf] %vm1177_vm1, %v1300_v26 }
 0x2b0   :  { %v1483_v57 = vpop.eup %1482 }
 0x2b1   :  { %v925_v61 = vmul.f32 %v1483_v57, %v2014_v59  ;;  %v926_v52 = vmul.f32 %v1483_v57, %v2017_v60  ;;  %v927_v10 = vmul.f32 %v1483_v57, %v2020_v4 }
 0x2b3   :  { %v997_v38 = vmul.f32 %v2011_v2, %v925_v61  ;;  %v998_v33 = vmul.f32 %v2011_v2, %v926_v52  ;;  %v999_v49 = vmul.f32 %v2011_v2, %v927_v10 }
 0x2b5   :  { %v1069_v30 = vadd.f32 %v1046_v27, %v997_v38  ;;  %v1070_v31 = vadd.f32 %v1046_v27, %v998_v33  ;;  %v1071_v63 = vadd.f32 %v1046_v27, %v999_v49 }
 0x2b7   :  { %v1093_v0 = vmax.f32 %v1069_v30, 0.0  ;;  %v1094_v1 = vmax.f32 %v1070_v31, 0.0  ;;  %v1095_v13 = vmax.f32 %v1071_v63, 0.0 }
 0x2b9   :  { %v1301_v39 = vpack.c.bf16 %v1094_v1, %v1093_v0  ;;  %v1302_v35 = vpack.c.bf16 %v1095_v13, %v1095_v13 }
 0x2bb   :  { %1191 = vst [vmem:[%s2157_s4 + $0x54] sm:$0xff] %v1301_v39  ;;  %1192 = vst.msk [vmem:[%s2157_s4 + $0x5c] sm:$0xf] %vm1177_vm1, %v1302_v35 }

// kernel: _lambda_.19
= control target key start
LH: loop header
LB: loop body
LE: loop exit
PB: predicated region body
PF: predicated region fallthrough
CT: control target
= control target key end

     0   :  { %v4645_v3 = vmov 0   ;;  %vm3861_vm0 = vcmask 15360   ;;  %vm3863_vm1 = vcmask 9216   ;;  %s7148_s1 = inlined_call_operand.vmem [shape: bf16[4608,2], index: 1, kind: input, shape index: {}]   ;;  %s7149_s0 = inlined_call_operand.vmem [shape: bf16[10,4608], index: 0, kind: input, shape index: {}]   ;;  %s7150_s2 = inlined_call_operand.vmem [shape: f32[10,1], index: 2, kind: input, shape index: {}]   ;;  %s7151_s3 = inlined_call_operand.vmem [shape: f32[10,2], index: 3, kind: output, shape index: {}]  }
   0x1   :  { %v31_v0 = vld [vmem:[%s7148_s1 + $0x40] sm:$0xf]  ;;  %v32_v1 = vld [vmem:[%s7148_s1 + $0x44] sm:$0xf]  ;;  %4590 = vset.pattern.permute.xlu0 %v4645_v3  ;;  %v33_v15 = vld [vmem:[%s7148_s1 + $0x48] sm:$0xf] }
   0x2   :  { %v63_v2 = vld [vmem:[%s7148_s1 + $0xc0] sm:$0xf]  ;;  %v607_v4 = vmax.bf16 %v4645_v3, %v31_v0  ;;  %v608_v5 = vmax.bf16 %v4645_v3, %v32_v1  ;;  %v64_v6 = vld [vmem:[%s7148_s1 + $0xc4] sm:$0xf]  ;;  %v34_v19 = vld [vmem:[%s7148_s1 + $0x4c] sm:$0xf]  ;;  %v609_v20 = vmax.bf16 %v4645_v3, %v33_v15 }
   0x3   :  { %v639_v7 = vmax.bf16 %v4645_v3, %v63_v2  ;;  %v15_v8 = vld [vmem:[%s7148_s1] sm:$0xf]  ;;  %v16_v9 = vld [vmem:[%s7148_s1 + $0x4] sm:$0xf]  ;;  %v640_v10 = vmax.bf16 %v4645_v3, %v64_v6  ;;  %v65_v21 = vld [vmem:[%s7148_s1 + $0xc8] sm:$0xf]  ;;  %v610_v25 = vmax.bf16 %v4645_v3, %v34_v19 }
   0x4   :  { %v591_v11 = vmax.bf16 %v4645_v3, %v15_v8  ;;  %v592_v12 = vmax.bf16 %v4645_v3, %v16_v9  ;;  %v47_v13 = vld [vmem:[%s7148_s1 + $0x80] sm:$0xf]  ;;  %v48_v14 = vld [vmem:[%s7148_s1 + $0x84] sm:$0xf]  ;;  %v3913_v16 = vcombine.low %v607_v4, %v608_v5  ;;  %v66_v22 = vld [vmem:[%s7148_s1 + $0xcc] sm:$0xf]  ;;  %v641_v26 = vmax.bf16 %v4645_v3, %v65_v21 }
   0x5   :  { %v623_v17 = vmax.bf16 %v4645_v3, %v47_v13  ;;  %v624_v18 = vmax.bf16 %v4645_v3, %v48_v14  ;;  %v3929_v23 = vcombine.low %v639_v7, %v640_v10  ;;  %v17_v27 = vld [vmem:[%s7148_s1 + $0x8] sm:$0xf]  ;;  %v18_v28 = vld [vmem:[%s7148_s1 + $0xc] sm:$0xf]  ;;  %v642_v31 = vmax.bf16 %v4645_v3, %v66_v22  ;;  %v35_v35 = vld [vmem:[%s7148_s1 + $0x50] sm:$0xf] }
   0x6   :  { %v3905_v24 = vcombine.low %v591_v11, %v592_v12  ;;  %v49_v29 = vld [vmem:[%s7148_s1 + $0x88] sm:$0xf]  ;;  %4193 = vmatprep.subr.bf16.mxu0 %v3913_v16  ;;  %v593_v32 = vmax.bf16 %v4645_v3, %v17_v27  ;;  %v594_v33 = vmax.bf16 %v4645_v3, %v18_v28  ;;  %v50_v34 = vld [vmem:[%s7148_s1 + $0x8c] sm:$0xf]  ;;  %v36_v36 = vld [vmem:[%s7148_s1 + $0x54] sm:$0xf]  ;;  %v3914_v37 = vcombine.low %v609_v20, %v610_v25 }
   0x7   :  { %v3921_v30 = vcombine.low %v623_v17, %v624_v18  ;;  %4215 = vmatprep.subr.bf16.mxu1 %v3929_v23  ;;  %v625_v38 = vmax.bf16 %v4645_v3, %v49_v29  ;;  %v626_v39 = vmax.bf16 %v4645_v3, %v50_v34  ;;  %v67_v40 = vld [vmem:[%s7148_s1 + $0xd0] sm:$0xf]  ;;  %v68_v41 = vld [vmem:[%s7148_s1 + $0xd4] sm:$0xf]  ;;  %v3930_v43 = vcombine.low %v641_v26, %v642_v31  ;;  %v37_v54 = vld [vmem:[%s7148_s1 + $0x58] sm:$0xf] }
   0x8   :  { %4194 = vmatpush3.bf16.msra.mxu0 %v3905_v24  ;;  %v19_v42 = vld [vmem:[%s7148_s1 + $0x10] sm:$0xf]  ;;  %v3906_v44 = vcombine.low %v593_v32, %v594_v33  ;;  %v611_v45 = vmax.bf16 %v4645_v3, %v35_v35  ;;  %v612_v46 = vmax.bf16 %v4645_v3, %v36_v36  ;;  %v20_v47 = vld [vmem:[%s7148_s1 + $0x14] sm:$0xf]  ;;  %v643_v51 = vmax.bf16 %v4645_v3, %v67_v40  ;;  %v38_v55 = vld [vmem:[%s7148_s1 + $0x5c] sm:$0xf] }
   0x9   :  { %4216 = vmatpush3.bf16.msra.mxu1 %v3921_v30  ;;  %v51_v48 = vld [vmem:[%s7148_s1 + $0x90] sm:$0xf]  ;;  %v52_v49 = vld [vmem:[%s7148_s1 + $0x94] sm:$0xf]  ;;  %4195 = vmatprep.subr.bf16.mxu0 %v3914_v37  ;;  %v3922_v50 = vcombine.low %v625_v38, %v626_v39  ;;  %v644_v52 = vmax.bf16 %v4645_v3, %v68_v41  ;;  %v595_v53 = vmax.bf16 %v4645_v3, %v19_v42  ;;  %v69_v56 = vld [vmem:[%s7148_s1 + $0xd8] sm:$0xf] }
   0xa   :  { %4217 = vmatprep.subr.bf16.mxu1 %v3930_v43  ;;  %v3915_v57 = vcombine.low %v611_v45, %v612_v46  ;;  %v596_v58 = vmax.bf16 %v4645_v3, %v20_v47  ;;  %v627_v59 = vmax.bf16 %v4645_v3, %v51_v48  ;;  %v628_v60 = vmax.bf16 %v4645_v3, %v52_v49  ;;  %v70_v61 = vld [vmem:[%s7148_s1 + $0xdc] sm:$0xf]  ;;  %v21_v62 = vld [vmem:[%s7148_s1 + $0x18] sm:$0xf]  ;;  %v39_v7 = vld [vmem:[%s7148_s1 + $0x60] sm:$0xf] }
   0xb   :  { %v22_v63 = vld [vmem:[%s7148_s1 + $0x1c] sm:$0xf]  ;;  %v3931_v0 = vcombine.low %v643_v51, %v644_v52  ;;  %v613_v1 = vmax.bf16 %v4645_v3, %v37_v54  ;;  %v614_v2 = vmax.bf16 %v4645_v3, %v38_v55  ;;  %v645_v4 = vmax.bf16 %v4645_v3, %v69_v56  ;;  %v53_v5 = vld [vmem:[%s7148_s1 + $0x98] sm:$0xf]  ;;  %v40_v11 = vld [vmem:[%s7148_s1 + $0x64] sm:$0xf] }
   0xc   :  { %4196 = vmatpush3.bf16.msra.mxu0 %v3906_v44  ;;  %v54_v6 = vld [vmem:[%s7148_s1 + $0x9c] sm:$0xf]  ;;  %v3907_v8 = vcombine.low %v595_v53, %v596_v58  ;;  %v3923_v9 = vcombine.low %v627_v59, %v628_v60  ;;  %v646_v10 = vmax.bf16 %v4645_v3, %v70_v61  ;;  %v71_v12 = vld [vmem:[%s7148_s1 + $0xe0] sm:$0xf]  ;;  %v72_v13 = vld [vmem:[%s7148_s1 + $0xe4] sm:$0xf]  ;;  %v597_v15 = vmax.bf16 %v4645_v3, %v21_v62 }
   0xd   :  { %4218 = vmatpush3.bf16.msra.mxu1 %v3922_v50  ;;  %4197 = vmatprep.subr.bf16.mxu0 %v3915_v57  ;;  %v3916_v14 = vcombine.low %v613_v1, %v614_v2  ;;  %v598_v16 = vmax.bf16 %v4645_v3, %v22_v63  ;;  %v629_v17 = vmax.bf16 %v4645_v3, %v53_v5  ;;  %v23_v18 = vld [vmem:[%s7148_s1 + $0x20] sm:$0xf]  ;;  %v24_v19 = vld [vmem:[%s7148_s1 + $0x24] sm:$0xf]  ;;  %v41_v26 = vld [vmem:[%s7148_s1 + $0x68] sm:$0xf] }
   0xe   :  { %4219 = vmatprep.subr.bf16.mxu1 %v3931_v0  ;;  %v3932_v20 = vcombine.low %v645_v4, %v646_v10  ;;  %v630_v21 = vmax.bf16 %v4645_v3, %v54_v6  ;;  %v615_v22 = vmax.bf16 %v4645_v3, %v39_v7  ;;  %v616_v23 = vmax.bf16 %v4645_v3, %v40_v11  ;;  %v55_v24 = vld [vmem:[%s7148_s1 + $0xa0] sm:$0xf]  ;;  %v56_v25 = vld [vmem:[%s7148_s1 + $0xa4] sm:$0xf]  ;;  %v42_v31 = vld [vmem:[%s7148_s1 + $0x6c] sm:$0xf] }
   0xf   :  { %v3908_v27 = vcombine.low %v597_v15, %v598_v16  ;;  %v647_v28 = vmax.bf16 %v4645_v3, %v71_v12  ;;  %v648_v29 = vmax.bf16 %v4645_v3, %v72_v13  ;;  %v599_v30 = vmax.bf16 %v4645_v3, %v23_v18  ;;  %v73_v32 = vld [vmem:[%s7148_s1 + $0xe8] sm:$0xf]  ;;  %v74_v33 = vld [vmem:[%s7148_s1 + $0xec] sm:$0xf]  ;;  %v43_v45 = vld [vmem:[%s7148_s1 + $0x70] sm:$0xf] }
  0x10   :  { %4198 = vmatpush3.bf16.msra.mxu0 %v3907_v8  ;;  %v3924_v34 = vcombine.low %v629_v17, %v630_v21  ;;  %v3917_v35 = vcombine.low %v615_v22, %v616_v23  ;;  %v600_v36 = vmax.bf16 %v4645_v3, %v24_v19  ;;  %v25_v37 = vld [vmem:[%s7148_s1 + $0x28] sm:$0xf]  ;;  %v26_v38 = vld [vmem:[%s7148_s1 + $0x2c] sm:$0xf]  ;;  %v631_v41 = vmax.bf16 %v4645_v3, %v55_v24  ;;  %v44_v46 = vld [vmem:[%s7148_s1 + $0x74] sm:$0xf] }
  0x11   :  { %4220 = vmatpush3.bf16.msra.mxu1 %v3923_v9  ;;  %4199 = vmatprep.subr.bf16.mxu0 %v3916_v14  ;;  %v57_v39 = vld [vmem:[%s7148_s1 + $0xa8] sm:$0xf]  ;;  %v3933_v40 = vcombine.low %v647_v28, %v648_v29  ;;  %v632_v42 = vmax.bf16 %v4645_v3, %v56_v25  ;;  %v617_v43 = vmax.bf16 %v4645_v3, %v41_v26  ;;  %v58_v44 = vld [vmem:[%s7148_s1 + $0xac] sm:$0xf]  ;;  %v75_v50 = vld [vmem:[%s7148_s1 + $0xf0] sm:$0xf] }
  0x12   :  { %4221 = vmatprep.subr.bf16.mxu1 %v3932_v20  ;;  %v618_v47 = vmax.bf16 %v4645_v3, %v42_v31  ;;  %v649_v48 = vmax.bf16 %v4645_v3, %v73_v32  ;;  %v650_v49 = vmax.bf16 %v4645_v3, %v74_v33  ;;  %v76_v51 = vld [vmem:[%s7148_s1 + $0xf4] sm:$0xf]  ;;  %v27_v52 = vld [vmem:[%s7148_s1 + $0x30] sm:$0xf]  ;;  %v3909_v53 = vcombine.low %v599_v30, %v600_v36  ;;  %v45_v63 = vld [vmem:[%s7148_s1 + $0x78] sm:$0xf] }
  0x13   :  { %v601_v54 = vmax.bf16 %v4645_v3, %v25_v37  ;;  %v602_v55 = vmax.bf16 %v4645_v3, %v26_v38  ;;  %v633_v56 = vmax.bf16 %v4645_v3, %v57_v39  ;;  %v28_v57 = vld [vmem:[%s7148_s1 + $0x34] sm:$0xf]  ;;  %v59_v58 = vld [vmem:[%s7148_s1 + $0xb0] sm:$0xf]  ;;  %v3925_v60 = vcombine.low %v631_v41, %v632_v42  ;;  %v46_v0 = vld [vmem:[%s7148_s1 + $0x7c] sm:$0xf] }
  0x14   :  { %4200 = vmatpush3.bf16.msra.mxu0 %v3908_v27  ;;  %v60_v59 = vld [vmem:[%s7148_s1 + $0xb4] sm:$0xf]  ;;  %v3918_v61 = vcombine.low %v617_v43, %v618_v47  ;;  %v634_v62 = vmax.bf16 %v4645_v3, %v58_v44  ;;  %v77_v1 = vld [vmem:[%s7148_s1 + $0xf8] sm:$0xf]  ;;  %v3934_v2 = vcombine.low %v649_v48, %v650_v49  ;;  %v619_v4 = vmax.bf16 %v4645_v3, %v43_v45  ;;  %v78_v7 = vld [vmem:[%s7148_s1 + $0xfc] sm:$0xf] }
  0x15   :  { %4222 = vmatpush3.bf16.msra.mxu1 %v3924_v34  ;;  %4201 = vmatprep.subr.bf16.mxu0 %v3917_v35  ;;  %v620_v5 = vmax.bf16 %v4645_v3, %v44_v46  ;;  %v651_v6 = vmax.bf16 %v4645_v3, %v75_v50  ;;  %v29_v8 = vld [vmem:[%s7148_s1 + $0x38] sm:$0xf]  ;;  %v30_v9 = vld [vmem:[%s7148_s1 + $0x3c] sm:$0xf]  ;;  %v3910_v10 = vcombine.low %v601_v54, %v602_v55  ;;  %v95_v27 = vld [vmem:[%s7148_s1 + $0x140] sm:$0xf] }
  0x16   :  { %4223 = vmatprep.subr.bf16.mxu1 %v3933_v40  ;;  %v3926_v11 = vcombine.low %v633_v56, %v634_v62  ;;  %v652_v12 = vmax.bf16 %v4645_v3, %v76_v51  ;;  %v61_v13 = vld [vmem:[%s7148_s1 + $0xb8] sm:$0xf]  ;;  %v603_v14 = vmax.bf16 %v4645_v3, %v27_v52  ;;  %v604_v15 = vmax.bf16 %v4645_v3, %v28_v57  ;;  %v62_v18 = vld [vmem:[%s7148_s1 + $0xbc] sm:$0xf]  ;;  %v96_v32 = vld [vmem:[%s7148_s1 + $0x144] sm:$0xf] }
  0x17   :  { %v635_v16 = vmax.bf16 %v4645_v3, %v59_v58  ;;  %v636_v17 = vmax.bf16 %v4645_v3, %v60_v59  ;;  %v4593_v19 = vld [vmem:[%s7149_s0 + $0x4] ss:$144 sps:$4 sm:$0x1f]   ;;  %v3919_v20 = vcombine.low %v619_v4, %v620_v5  ;;  %v621_v21 = vmax.bf16 %v4645_v3, %v45_v63  ;;  %v4596_v26 = vld [vmem:[%s7149_s0 + $0xc] ss:$144 sps:$4 sm:$0x1f]  }
  0x18   :  { %4202 = vmatpush3.bf16.msra.mxu0 %v3909_v53  ;;  %v622_v22 = vmax.bf16 %v4645_v3, %v46_v0  ;;  %v3935_v23 = vcombine.low %v651_v6, %v652_v12  ;;  %v653_v24 = vmax.bf16 %v4645_v3, %v77_v1  ;;  %v654_v25 = vmax.bf16 %v4645_v3, %v78_v7  ;;  %v127_v33 = vld [vmem:[%s7148_s1 + $0x1c0] sm:$0xf]  ;;  %v128_v34 = vld [vmem:[%s7148_s1 + $0x1c4] sm:$0xf]  ;;  %v97_v47 = vld [vmem:[%s7148_s1 + $0x148] sm:$0xf] }
  0x19   :  { %4224 = vmatpush3.bf16.msra.mxu1 %v3925_v60  ;;  %4203 = vmatprep.subr.bf16.mxu0 %v3918_v61  ;;  %v605_v28 = vmax.bf16 %v4645_v3, %v29_v8  ;;  %v606_v29 = vmax.bf16 %v4645_v3, %v30_v9  ;;  %v637_v30 = vmax.bf16 %v4645_v3, %v61_v13  ;;  %v79_v37 = vld [vmem:[%s7148_s1 + $0x100] sm:$0xf]  ;;  %v80_v41 = vld [vmem:[%s7148_s1 + $0x104] sm:$0xf]  ;;  %v98_v48 = vld [vmem:[%s7148_s1 + $0x14c] sm:$0xf] }
  0x1a   :  { %4225 = vmatprep.subr.bf16.mxu1 %v3934_v2  ;;  %v638_v31 = vmax.bf16 %v4645_v3, %v62_v18  ;;  %3155 = vmatprep.mubr.bf16.mxu0 %v4593_v19  ;;  %v3911_v35 = vcombine.low %v603_v14, %v604_v15  ;;  %v3927_v36 = vcombine.low %v635_v16, %v636_v17  ;;  %v111_v42 = vld [vmem:[%s7148_s1 + $0x180] sm:$0xf]  ;;  %v112_v43 = vld [vmem:[%s7148_s1 + $0x184] sm:$0xf]  ;;  %v129_v51 = vld [vmem:[%s7148_s1 + $0x1c8] sm:$0xf] }
  0x1b   :  { %3196 = vmatprep.mubr.bf16.mxu1 %v4596_v26  ;;  %v3920_v38 = vcombine.low %v621_v21, %v622_v22  ;;  %v671_v39 = vmax.bf16 %v4645_v3, %v95_v27  ;;  %v672_v40 = vmax.bf16 %v4645_v3, %v96_v32  ;;  %v3936_v44 = vcombine.low %v653_v24, %v654_v25  ;;  %v130_v52 = vld [vmem:[%s7148_s1 + $0x1cc] sm:$0xf]  ;;  %v81_v53 = vld [vmem:[%s7148_s1 + $0x108] sm:$0xf]  ;;  %v99_v5 = vld [vmem:[%s7148_s1 + $0x150] sm:$0xf] }
  0x1c   :  { %4204 = vmatpush3.bf16.msra.mxu0 %v3910_v10  ;;  %v703_v45 = vmax.bf16 %v4645_v3, %v127_v33  ;;  %v704_v46 = vmax.bf16 %v4645_v3, %v128_v34  ;;  %v3912_v49 = vcombine.low %v605_v28, %v606_v29  ;;  %v3928_v50 = vcombine.low %v637_v30, %v638_v31  ;;  %v82_v58 = vld [vmem:[%s7148_s1 + $0x10c] sm:$0xf]  ;;  %v113_v59 = vld [vmem:[%s7148_s1 + $0x188] sm:$0xf]  ;;  %v100_v6 = vld [vmem:[%s7148_s1 + $0x154] sm:$0xf] }
  0x1d   :  { %4226 = vmatpush3.bf16.msra.mxu1 %v3926_v11  ;;  %4205 = vmatprep.subr.bf16.mxu0 %v3919_v20  ;;  %v655_v54 = vmax.bf16 %v4645_v3, %v79_v37  ;;  %v656_v55 = vmax.bf16 %v4645_v3, %v80_v41  ;;  %v687_v56 = vmax.bf16 %v4645_v3, %v111_v42  ;;  %v114_v60 = vld [vmem:[%s7148_s1 + $0x18c] sm:$0xf]  ;;  %v4591_v61 = vld [vmem:[%s7149_s0] ss:$144 sps:$4 sm:$0x1f]  }
  0x1e   :  { %4227 = vmatprep.subr.bf16.mxu1 %v3935_v23  ;;  %v688_v57 = vmax.bf16 %v4645_v3, %v112_v43  ;;  %v3945_v62 = vcombine.low %v671_v39, %v672_v40  ;;  %v673_v63 = vmax.bf16 %v4645_v3, %v97_v47  ;;  %v674_v0 = vmax.bf16 %v4645_v3, %v98_v48  ;;  %v131_v11 = vld [vmem:[%s7148_s1 + $0x1d0] sm:$0xf]  ;;  %v132_v12 = vld [vmem:[%s7148_s1 + $0x1d4] sm:$0xf]  ;;  %v101_v26 = vld [vmem:[%s7148_s1 + $0x158] sm:$0xf] }
  0x1f   :  { %v3961_v1 = vcombine.low %v703_v45, %v704_v46  ;;  %v705_v2 = vmax.bf16 %v4645_v3, %v129_v51  ;;  %v706_v4 = vmax.bf16 %v4645_v3, %v130_v52  ;;  %v657_v7 = vmax.bf16 %v4645_v3, %v81_v53  ;;  %v4594_v13 = vld [vmem:[%s7149_s0 + $0x8] ss:$144 sps:$4 sm:$0x1f]   ;;  %v83_v16 = vld [vmem:[%s7148_s1 + $0x110] sm:$0xf] }
  0x20   :  { %4206 = vmatpush3.bf16.msra.mxu0 %v3911_v35  ;;  %v658_v8 = vmax.bf16 %v4645_v3, %v82_v58  ;;  %v689_v9 = vmax.bf16 %v4645_v3, %v113_v59  ;;  %v690_v10 = vmax.bf16 %v4645_v3, %v114_v60  ;;  %v3937_v14 = vcombine.low %v655_v54, %v656_v55  ;;  %v84_v20 = vld [vmem:[%s7148_s1 + $0x114] sm:$0xf]  ;;  %v115_v21 = vld [vmem:[%s7148_s1 + $0x190] sm:$0xf]  ;;  %v102_v27 = vld [vmem:[%s7148_s1 + $0x15c] sm:$0xf] }
  0x21   :  { %4228 = vmatpush3.bf16.msra.mxu1 %v3927_v36  ;;  %4207 = vmatprep.subr.bf16.mxu0 %v3920_v38  ;;  %v3953_v15 = vcombine.low %v687_v56, %v688_v57  ;;  %v3946_v17 = vcombine.low %v673_v63, %v674_v0  ;;  %v675_v18 = vmax.bf16 %v4645_v3, %v99_v5  ;;  %v116_v22 = vld [vmem:[%s7148_s1 + $0x194] sm:$0xf]  ;;  %v133_v31 = vld [vmem:[%s7148_s1 + $0x1d8] sm:$0xf]  ;;  %v134_v32 = vld [vmem:[%s7148_s1 + $0x1dc] sm:$0xf] }
  0x22   :  { %4229 = vmatprep.subr.bf16.mxu1 %v3936_v44  ;;  %v676_v19 = vmax.bf16 %v4645_v3, %v100_v6  ;;  %v3962_v23 = vcombine.low %v705_v2, %v706_v4  ;;  %v707_v24 = vmax.bf16 %v4645_v3, %v131_v11  ;;  %v708_v25 = vmax.bf16 %v4645_v3, %v132_v12  ;;  %v85_v33 = vld [vmem:[%s7148_s1 + $0x118] sm:$0xf]  ;;  %v86_v37 = vld [vmem:[%s7148_s1 + $0x11c] sm:$0xf]  ;;  %v103_v46 = vld [vmem:[%s7148_s1 + $0x160] sm:$0xf] }
  0x23   :  { %v3938_v28 = vcombine.low %v657_v7, %v658_v8  ;;  %v3954_v29 = vcombine.low %v689_v9, %v690_v10  ;;  %v659_v30 = vmax.bf16 %v4645_v3, %v83_v16  ;;  %v660_v34 = vmax.bf16 %v4645_v3, %v84_v20  ;;  %v117_v38 = vld [vmem:[%s7148_s1 + $0x198] sm:$0xf]  ;;  %v118_v39 = vld [vmem:[%s7148_s1 + $0x19c] sm:$0xf]  ;;  %v104_v47 = vld [vmem:[%s7148_s1 + $0x164] sm:$0xf] }
  0x24   :  { %4208 = vmatpush3.bf16.msra.mxu0 %v3912_v49  ;;  %v691_v35 = vmax.bf16 %v4645_v3, %v115_v21  ;;  %v692_v36 = vmax.bf16 %v4645_v3, %v116_v22  ;;  %v3947_v40 = vcombine.low %v675_v18, %v676_v19  ;;  %v677_v41 = vmax.bf16 %v4645_v3, %v101_v26  ;;  %v135_v52 = vld [vmem:[%s7148_s1 + $0x1e0] sm:$0xf]  ;;  %v136_v53 = vld [vmem:[%s7148_s1 + $0x1e4] sm:$0xf]  ;;  %v105_v63 = vld [vmem:[%s7148_s1 + $0x168] sm:$0xf] }
  0x25   :  { %4230 = vmatpush3.bf16.msra.mxu1 %v3928_v50  ;;  %4237 = vmatprep.subr.bf16.mxu0 %v3945_v62  ;;  %v678_v42 = vmax.bf16 %v4645_v3, %v102_v27  ;;  %v3963_v43 = vcombine.low %v707_v24, %v708_v25  ;;  %v709_v44 = vmax.bf16 %v4645_v3, %v133_v31  ;;  %v87_v56 = vld [vmem:[%s7148_s1 + $0x120] sm:$0xf]  ;;  %v88_v57 = vld [vmem:[%s7148_s1 + $0x124] sm:$0xf]  ;;  %v106_v0 = vld [vmem:[%s7148_s1 + $0x16c] sm:$0xf] }
  0x26   :  { %4259 = vmatprep.subr.bf16.mxu1 %v3961_v1  ;;  %v710_v45 = vmax.bf16 %v4645_v3, %v134_v32  ;;  %v661_v48 = vmax.bf16 %v4645_v3, %v85_v33  ;;  %v662_v49 = vmax.bf16 %v4645_v3, %v86_v37  ;;  %v693_v50 = vmax.bf16 %v4645_v3, %v117_v38  ;;  %v119_v58 = vld [vmem:[%s7148_s1 + $0x1a0] sm:$0xf]  ;;  %v120_v62 = vld [vmem:[%s7148_s1 + $0x1a4] sm:$0xf]  ;;  %v137_v5 = vld [vmem:[%s7148_s1 + $0x1e8] sm:$0xf] }
  0x27   :  { %3156 = vmatmul.mubr.bf16.vlgmr.msra.gmra.mrb[0].mxu0 %v4591_v61  ;;  %v694_v51 = vmax.bf16 %v4645_v3, %v118_v39  ;;  %v3939_v54 = vcombine.low %v659_v30, %v660_v34  ;;  %v3955_v55 = vcombine.low %v691_v35, %v692_v36  ;;  %v3948_v59 = vcombine.low %v677_v41, %v678_v42  ;;  %v138_v6 = vld [vmem:[%s7148_s1 + $0x1ec] sm:$0xf]  ;;  %v89_v7 = vld [vmem:[%s7148_s1 + $0x128] sm:$0xf]  ;;  %v108_v25 = vld [vmem:[%s7148_s1 + $0x174] sm:$0xf] }
  0x28   :  { %3197 = vmatmul.mubr.bf16.vlgmr.msra.gmra.mrb[0].mxu1 %v4594_v13  ;;  %4238 = vmatpush3.bf16.msra.mxu0 %v3937_v14  ;;  %v679_v60 = vmax.bf16 %v4645_v3, %v103_v46  ;;  %v680_v61 = vmax.bf16 %v4645_v3, %v104_v47  ;;  %v3964_v1 = vcombine.low %v709_v44, %v710_v45  ;;  %v90_v10 = vld [vmem:[%s7148_s1 + $0x12c] sm:$0xf]  ;;  %v121_v11 = vld [vmem:[%s7148_s1 + $0x1a8] sm:$0xf]  ;;  %v139_v31 = vld [vmem:[%s7148_s1 + $0x1f0] sm:$0xf] }
  0x29   :  { %4260 = vmatpush3.bf16.msra.mxu1 %v3953_v15  ;;  %4239 = vmatprep.subr.bf16.mxu0 %v3946_v17  ;;  %v711_v2 = vmax.bf16 %v4645_v3, %v135_v52  ;;  %v712_v4 = vmax.bf16 %v4645_v3, %v136_v53  ;;  %v3940_v8 = vcombine.low %v661_v48, %v662_v49  ;;  %v122_v12 = vld [vmem:[%s7148_s1 + $0x1ac] sm:$0xf]  ;;  %v107_v17 = vld [vmem:[%s7148_s1 + $0x170] sm:$0xf]  ;;  %v140_v32 = vld [vmem:[%s7148_s1 + $0x1f4] sm:$0xf] }
  0x2a   :  { %4261 = vmatprep.subr.bf16.mxu1 %v3962_v23  ;;  %v3956_v9 = vcombine.low %v693_v50, %v694_v51  ;;  %v663_v13 = vmax.bf16 %v4645_v3, %v87_v56  ;;  %v664_v14 = vmax.bf16 %v4645_v3, %v88_v57  ;;  %v695_v15 = vmax.bf16 %v4645_v3, %v119_v58  ;;  %v4599_v21 = vld [vmem:[%s7149_s0 + $0x14] ss:$144 sps:$4 sm:$0x1f]   ;;  %v4602_v26 = vld [vmem:[%s7149_s0 + $0x1c] ss:$144 sps:$4 sm:$0x1f]  }
  0x2b   :  { %v696_v16 = vmax.bf16 %v4645_v3, %v120_v62  ;;  %v3949_v18 = vcombine.low %v679_v60, %v680_v61  ;;  %v681_v19 = vmax.bf16 %v4645_v3, %v105_v63  ;;  %v682_v20 = vmax.bf16 %v4645_v3, %v106_v0  ;;  %3237 = vmatprep.mubr.bf16.mxu0 %v4599_v21  ;;  %v91_v35 = vld [vmem:[%s7148_s1 + $0x130] sm:$0xf]  ;;  %v92_v39 = vld [vmem:[%s7148_s1 + $0x134] sm:$0xf]  ;;  %v109_v45 = vld [vmem:[%s7148_s1 + $0x178] sm:$0xf] }
  0x2c   :  { %4240 = vmatpush3.bf16.msra.mxu0 %v3938_v28  ;;  %v3965_v22 = vcombine.low %v711_v2, %v712_v4  ;;  %v713_v23 = vmax.bf16 %v4645_v3, %v137_v5  ;;  %v714_v24 = vmax.bf16 %v4645_v3, %v138_v6  ;;  %v665_v27 = vmax.bf16 %v4645_v3, %v89_v7  ;;  %v124_v41 = vld [vmem:[%s7148_s1 + $0x1b4] sm:$0xf]  ;;  %v110_v46 = vld [vmem:[%s7148_s1 + $0x17c] sm:$0xf]  ;;  %v141_v49 = vld [vmem:[%s7148_s1 + $0x1f8] sm:$0xf] }
  0x2d   :  { %4262 = vmatpush3.bf16.msra.mxu1 %v3954_v29  ;;  %4241 = vmatprep.subr.bf16.mxu0 %v3947_v40  ;;  %v666_v28 = vmax.bf16 %v4645_v3, %v90_v10  ;;  %v697_v29 = vmax.bf16 %v4645_v3, %v121_v11  ;;  %v698_v30 = vmax.bf16 %v4645_v3, %v122_v12  ;;  %v123_v40 = vld [vmem:[%s7148_s1 + $0x1b0] sm:$0xf]  ;;  %v142_v50 = vld [vmem:[%s7148_s1 + $0x1fc] sm:$0xf]  ;;  %v93_v51 = vld [vmem:[%s7148_s1 + $0x138] sm:$0xf] }
  0x2e   :  { %4263 = vmatprep.subr.bf16.mxu1 %v3963_v43  ;;  %v3941_v33 = vcombine.low %v663_v13, %v664_v14  ;;  %v3957_v34 = vcombine.low %v695_v15, %v696_v16  ;;  %v3950_v36 = vcombine.low %v681_v19, %v682_v20  ;;  %v683_v37 = vmax.bf16 %v4645_v3, %v107_v17  ;;  %v94_v56 = vld [vmem:[%s7148_s1 + $0x13c] sm:$0xf]  ;;  %v125_v57 = vld [vmem:[%s7148_s1 + $0x1b8] sm:$0xf]  ;;  %v160_v2 = vld [vmem:[%s7148_s1 + $0x244] sm:$0xf] }
  0x2f   :  { %v684_v38 = vmax.bf16 %v4645_v3, %v108_v25  ;;  %v3966_v42 = vcombine.low %v713_v23, %v714_v24  ;;  %v715_v43 = vmax.bf16 %v4645_v3, %v139_v31  ;;  %v716_v44 = vmax.bf16 %v4645_v3, %v140_v32  ;;  %3278 = vmatprep.mubr.bf16.mxu1 %v4602_v26  ;;  %v126_v58 = vld [vmem:[%s7148_s1 + $0x1bc] sm:$0xf]  ;;  %v143_v12 = vld [vmem:[%s7148_s1 + $0x200] sm:$0xf]  ;;  %v144_v16 = vld [vmem:[%s7148_s1 + $0x204] sm:$0xf] }
  0x30   :  { %4242 = vmatpush3.bf16.msra.mxu0 %v3939_v54  ;;  %v3942_v47 = vcombine.low %v665_v27, %v666_v28  ;;  %v3958_v48 = vcombine.low %v697_v29, %v698_v30  ;;  %v667_v52 = vmax.bf16 %v4645_v3, %v91_v35  ;;  %v668_v53 = vmax.bf16 %v4645_v3, %v92_v39  ;;  %v175_v17 = vld [vmem:[%s7148_s1 + $0x280] sm:$0xf]  ;;  %v162_v23 = vld [vmem:[%s7148_s1 + $0x24c] sm:$0xf]  ;;  %v193_v26 = vld [vmem:[%s7148_s1 + $0x2c8] sm:$0xf] }
  0x31   :  { %4264 = vmatpush3.bf16.msra.mxu1 %v3955_v55  ;;  %4243 = vmatprep.subr.bf16.mxu0 %v3948_v59  ;;  %v699_v54 = vmax.bf16 %v4645_v3, %v123_v40  ;;  %v700_v55 = vmax.bf16 %v4645_v3, %v124_v41  ;;  %v3951_v59 = vcombine.low %v683_v37, %v684_v38  ;;  %v194_v27 = vld [vmem:[%s7148_s1 + $0x2cc] sm:$0xf]  ;;  %v145_v28 = vld [vmem:[%s7148_s1 + $0x208] sm:$0xf] }
  0x32   :  { %4265 = vmatprep.subr.bf16.mxu1 %v3964_v1  ;;  %v685_v60 = vmax.bf16 %v4645_v3, %v109_v45  ;;  %v686_v61 = vmax.bf16 %v4645_v3, %v110_v46  ;;  %v3967_v62 = vcombine.low %v715_v43, %v716_v44  ;;  %v717_v63 = vmax.bf16 %v4645_v3, %v141_v49  ;;  %v159_v1 = vld [vmem:[%s7148_s1 + $0x240] sm:$0xf]  ;;  %v178_v35 = vld [vmem:[%s7148_s1 + $0x28c] sm:$0xf]  ;;  %v163_v44 = vld [vmem:[%s7148_s1 + $0x250] sm:$0xf] }
  0x33   :  { %v718_v0 = vmax.bf16 %v4645_v3, %v142_v50  ;;  %v669_v4 = vmax.bf16 %v4645_v3, %v93_v51  ;;  %v670_v5 = vmax.bf16 %v4645_v3, %v94_v56  ;;  %v701_v6 = vmax.bf16 %v4645_v3, %v125_v57  ;;  %v4600_v40 = vld [vmem:[%s7149_s0 + $0x18] ss:$144 sps:$4 sm:$0x1f]   ;;  %v164_v45 = vld [vmem:[%s7148_s1 + $0x254] sm:$0xf] }
  0x34   :  { %4244 = vmatpush3.bf16.msra.mxu0 %v3940_v8  ;;  %v702_v7 = vmax.bf16 %v4645_v3, %v126_v58  ;;  %v191_v8 = vld [vmem:[%s7148_s1 + $0x2c0] sm:$0xf]  ;;  %v3943_v10 = vcombine.low %v667_v52, %v668_v53  ;;  %v3959_v11 = vcombine.low %v699_v54, %v700_v55  ;;  %v3952_v13 = vcombine.low %v685_v60, %v686_v61  ;;  %v195_v50 = vld [vmem:[%s7148_s1 + $0x2d0] sm:$0xf]  ;;  %v196_v51 = vld [vmem:[%s7148_s1 + $0x2d4] sm:$0xf] }
  0x35   :  { %4266 = vmatpush3.bf16.msra.mxu1 %v3956_v9  ;;  %4245 = vmatprep.subr.bf16.mxu0 %v3949_v18  ;;  %v192_v9 = vld [vmem:[%s7148_s1 + $0x2c4] sm:$0xf]  ;;  %v735_v14 = vmax.bf16 %v4645_v3, %v159_v1  ;;  %v736_v15 = vmax.bf16 %v4645_v3, %v160_v2  ;;  %v3968_v19 = vcombine.low %v717_v63, %v718_v0  ;;  %v147_v54 = vld [vmem:[%s7148_s1 + $0x210] sm:$0xf]  ;;  %v148_v55 = vld [vmem:[%s7148_s1 + $0x214] sm:$0xf] }
  0x36   :  { %4267 = vmatprep.subr.bf16.mxu1 %v3965_v22  ;;  %v176_v18 = vld [vmem:[%s7148_s1 + $0x284] sm:$0xf]  ;;  %v767_v20 = vmax.bf16 %v4645_v3, %v191_v8  ;;  %v768_v21 = vmax.bf16 %v4645_v3, %v192_v9  ;;  %v161_v22 = vld [vmem:[%s7148_s1 + $0x248] sm:$0xf]  ;;  %v3944_v24 = vcombine.low %v669_v4, %v670_v5  ;;  %v3960_v25 = vcombine.low %v701_v6, %v702_v7  ;;  %v180_v60 = vld [vmem:[%s7148_s1 + $0x294] sm:$0xf] }
  0x37   :  { %v719_v29 = vmax.bf16 %v4645_v3, %v143_v12  ;;  %v720_v30 = vmax.bf16 %v4645_v3, %v144_v16  ;;  %v751_v31 = vmax.bf16 %v4645_v3, %v175_v17  ;;  %v752_v32 = vmax.bf16 %v4645_v3, %v176_v18  ;;  %v165_v61 = vld [vmem:[%s7148_s1 + $0x258] sm:$0xf]  ;;  %v166_v1 = vld [vmem:[%s7148_s1 + $0x25c] sm:$0xf]  ;;  %v167_v18 = vld [vmem:[%s7148_s1 + $0x260] sm:$0xf] }
  0x38   :  { %4246 = vmatpush3.bf16.msra.mxu0 %v3941_v33  ;;  %v146_v33 = vld [vmem:[%s7148_s1 + $0x20c] sm:$0xf]  ;;  %v3977_v37 = vcombine.low %v735_v14, %v736_v15  ;;  %v737_v38 = vmax.bf16 %v4645_v3, %v161_v22  ;;  %v738_v39 = vmax.bf16 %v4645_v3, %v162_v23  ;;  %v3993_v41 = vcombine.low %v767_v20, %v768_v21  ;;  %v197_v2 = vld [vmem:[%s7148_s1 + $0x2d8] sm:$0xf]  ;;  %v198_v4 = vld [vmem:[%s7148_s1 + $0x2dc] sm:$0xf] }
  0x39   :  { %4268 = vmatpush3.bf16.msra.mxu1 %v3957_v34  ;;  %4247 = vmatprep.subr.bf16.mxu0 %v3950_v36  ;;  %v177_v34 = vld [vmem:[%s7148_s1 + $0x288] sm:$0xf]  ;;  %v4597_v36 = vld [vmem:[%s7149_s0 + $0x10] ss:$144 sps:$4 sm:$0x1f]   ;;  %v770_v43 = vmax.bf16 %v4645_v3, %v194_v27  ;;  %v721_v46 = vmax.bf16 %v4645_v3, %v145_v28  ;;  %v754_v49 = vmax.bf16 %v4645_v3, %v178_v35 }
  0x3a   :  { %4269 = vmatprep.subr.bf16.mxu1 %v3966_v42  ;;  %v769_v42 = vmax.bf16 %v4645_v3, %v193_v26  ;;  %v3969_v52 = vcombine.low %v719_v29, %v720_v30  ;;  %v3985_v53 = vcombine.low %v751_v31, %v752_v32  ;;  %v3978_v56 = vcombine.low %v737_v38, %v738_v39  ;;  %v149_v8 = vld [vmem:[%s7148_s1 + $0x218] sm:$0xf]  ;;  %v150_v9 = vld [vmem:[%s7148_s1 + $0x21c] sm:$0xf]  ;;  %v168_v23 = vld [vmem:[%s7148_s1 + $0x264] sm:$0xf] }
  0x3b   :  { %v739_v57 = vmax.bf16 %v4645_v3, %v163_v44  ;;  %v740_v58 = vmax.bf16 %v4645_v3, %v164_v45  ;;  %v771_v63 = vmax.bf16 %v4645_v3, %v195_v50  ;;  %v772_v0 = vmax.bf16 %v4645_v3, %v196_v51  ;;  %v182_v14 = vld [vmem:[%s7148_s1 + $0x29c] sm:$0xf]  ;;  %v200_v27 = vld [vmem:[%s7148_s1 + $0x2e4] sm:$0xf]  ;;  %v183_v38 = vld [vmem:[%s7148_s1 + $0x2a0] sm:$0xf] }
  0x3c   :  { %4248 = vmatpush3.bf16.msra.mxu0 %v3942_v47  ;;  %v722_v47 = vmax.bf16 %v4645_v3, %v146_v33  ;;  %v723_v7 = vmax.bf16 %v4645_v3, %v147_v54  ;;  %v741_v16 = vmax.bf16 %v4645_v3, %v165_v61  ;;  %v742_v17 = vmax.bf16 %v4645_v3, %v166_v1  ;;  %v4608_v28 = vld [vmem:[%s7149_s0 + $0x2c] ss:$144 sps:$4 sm:$0x1f]   ;;  %v151_v33 = vld [vmem:[%s7148_s1 + $0x220] sm:$0xf] }
  0x3d   :  { %4270 = vmatpush3.bf16.msra.mxu1 %v3958_v48  ;;  %4249 = vmatprep.subr.bf16.mxu0 %v3951_v59  ;;  %v753_v48 = vmax.bf16 %v4645_v3, %v177_v34  ;;  %v179_v59 = vld [vmem:[%s7148_s1 + $0x290] sm:$0xf]  ;;  %v3979_v15 = vcombine.low %v739_v57, %v740_v58  ;;  %v3995_v20 = vcombine.low %v771_v63, %v772_v0  ;;  %v184_v39 = vld [vmem:[%s7148_s1 + $0x2a4] sm:$0xf]  ;;  %v170_v44 = vld [vmem:[%s7148_s1 + $0x26c] sm:$0xf] }
  0x3e   :  { %4271 = vmatprep.subr.bf16.mxu1 %v3967_v62  ;;  %v3994_v62 = vcombine.low %v769_v42, %v770_v43  ;;  %v3970_v5 = vcombine.low %v721_v46, %v722_v47  ;;  %v755_v12 = vmax.bf16 %v4645_v3, %v179_v59  ;;  %v773_v21 = vmax.bf16 %v4645_v3, %v197_v2  ;;  %v169_v43 = vld [vmem:[%s7148_s1 + $0x268] sm:$0xf]  ;;  %v154_v54 = vld [vmem:[%s7148_s1 + $0x22c] sm:$0xf]  ;;  %v171_v0 = vld [vmem:[%s7148_s1 + $0x270] sm:$0xf] }
  0x3f   :  { %v3986_v6 = vcombine.low %v753_v48, %v754_v49  ;;  %v774_v22 = vmax.bf16 %v4645_v3, %v198_v4  ;;  %v726_v26 = vmax.bf16 %v4645_v3, %v150_v9  ;;  %v758_v32 = vmax.bf16 %v4645_v3, %v182_v14  ;;  %v201_v47 = vld [vmem:[%s7148_s1 + $0x2e8] sm:$0xf]  ;;  %v202_v48 = vld [vmem:[%s7148_s1 + $0x2ec] sm:$0xf]  ;;  %v172_v1 = vld [vmem:[%s7148_s1 + $0x274] sm:$0xf] }
  0x40   :  { %4250 = vmatpush3.bf16.msra.mxu0 %v3943_v10  ;;  %v181_v10 = vld [vmem:[%s7148_s1 + $0x298] sm:$0xf]  ;;  %v3980_v34 = vcombine.low %v741_v16, %v742_v17  ;;  %v743_v35 = vmax.bf16 %v4645_v3, %v167_v18  ;;  %v776_v42 = vmax.bf16 %v4645_v3, %v200_v27  ;;  %v727_v46 = vmax.bf16 %v4645_v3, %v151_v33  ;;  %v185_v59 = vld [vmem:[%s7148_s1 + $0x2a8] sm:$0xf]  ;;  %v187_v16 = vld [vmem:[%s7148_s1 + $0x2b0] sm:$0xf] }
  0x41   :  { %4272 = vmatpush3.bf16.msra.mxu1 %v3959_v11  ;;  %4251 = vmatprep.subr.bf16.mxu0 %v3952_v13  ;;  %v724_v11 = vmax.bf16 %v4645_v3, %v148_v55  ;;  %v756_v13 = vmax.bf16 %v4645_v3, %v180_v60  ;;  %v757_v31 = vmax.bf16 %v4645_v3, %v181_v10  ;;  %v1203_v55 = vld [vmem:[%s7150_s2] sm:$0xff]  ;;  %v186_v60 = vld [vmem:[%s7148_s1 + $0x2ac] sm:$0xf]  ;;  %v188_v17 = vld [vmem:[%s7148_s1 + $0x2b4] sm:$0xf] }
  0x42   :  { %4273 = vmatprep.subr.bf16.mxu1 %v3968_v19  ;;  %v4605_v19 = vld [vmem:[%s7149_s0 + $0x24] ss:$144 sps:$4 sm:$0x1f]   ;;  %v759_v51 = vmax.bf16 %v4645_v3, %v183_v38  ;;  %v745_v57 = vmax.bf16 %v4645_v3, %v169_v43  ;;  %v746_v58 = vmax.bf16 %v4645_v3, %v170_v44  ;;  %v778_v63 = vmax.bf16 %v4645_v3, %v202_v48  ;;  %v157_v27 = vld [vmem:[%s7148_s1 + $0x238] sm:$0xf] }
  0x43   :  { %v3971_v29 = vcombine.low %v723_v7, %v724_v11  ;;  %v3987_v30 = vcombine.low %v755_v12, %v756_v13  ;;  %v3988_v49 = vcombine.low %v757_v31, %v758_v32  ;;  %v730_v4 = vmax.bf16 %v4645_v3, %v154_v54  ;;  %1207 = vperm.xlu0 %4590, %v1203_v55   ;;  %v155_v11 = vld [vmem:[%s7148_s1 + $0x230] sm:$0xf]  ;;  %v158_v32 = vld [vmem:[%s7148_s1 + $0x23c] sm:$0xf]  ;;  %v189_v33 = vld [vmem:[%s7148_s1 + $0x2b8] sm:$0xf] }
  0x44   :  { %4252 = vmatpush3.bf16.msra.mxu0 %v3944_v24  ;;  %v199_v24 = vld [vmem:[%s7148_s1 + $0x2e0] sm:$0xf]  ;;  %v761_v9 = vmax.bf16 %v4645_v3, %v185_v59  ;;  %v762_v10 = vmax.bf16 %v4645_v3, %v186_v60  ;;  %v3982_v12 = vcombine.low %v745_v57, %v746_v58  ;;  %v747_v13 = vmax.bf16 %v4645_v3, %v171_v0  ;;  %v256_v48 = vld [vmem:[%s7148_s1 + $0x3c4] sm:$0xf]  ;;  %v1204_v58 = vld [vmem:[%s7150_s2 + $0x8] sm:$0x3] }
  0x45   :  { %4274 = vmatpush3.bf16.msra.mxu1 %v3960_v25  ;;  %4281 = vmatprep.subr.bf16.mxu0 %v3977_v37  ;;  %v725_v25 = vmax.bf16 %v4645_v3, %v149_v8  ;;  %v152_v37 = vld [vmem:[%s7148_s1 + $0x224] sm:$0xf]  ;;  %v748_v14 = vmax.bf16 %v4645_v3, %v172_v1  ;;  %v764_v31 = vmax.bf16 %v4645_v3, %v188_v17  ;;  %v257_v0 = vld [vmem:[%s7148_s1 + $0x3c8] sm:$0xf] }
  0x46   :  { %4303 = vmatprep.subr.bf16.mxu1 %v3993_v41  ;;  %v775_v41 = vmax.bf16 %v4645_v3, %v199_v24  ;;  %v728_v50 = vmax.bf16 %v4645_v3, %v152_v37  ;;  %v731_v24 = vmax.bf16 %v4645_v3, %v155_v11  ;;  %v733_v43 = vmax.bf16 %v4645_v3, %v157_v27  ;;  %v240_v57 = vld [vmem:[%s7148_s1 + $0x384] sm:$0xf]  ;;  %v241_v11 = vld [vmem:[%s7148_s1 + $0x388] sm:$0xf] }
  0x47   :  { %3238 = vmatmul.mubr.bf16.vlgmr.msra.gmra.mrb[4].mxu0 %v4597_v36  ;;  %v744_v36 = vmax.bf16 %v4645_v3, %v168_v23  ;;  %v3972_v45 = vcombine.low %v725_v25, %v726_v26  ;;  %v205_v25 = vld [vmem:[%s7148_s1 + $0x2f8] sm:$0xf]  ;;  %v206_v26 = vld [vmem:[%s7148_s1 + $0x2fc] sm:$0xf]  ;;  %v734_v44 = vmax.bf16 %v4645_v3, %v158_v32  ;;  %1212 = vperm.xlu0 %4590, %v1204_v58  }
  0x48   :  { %3279 = vmatmul.mubr.bf16.vlgmr.msra.gmra.mrb[4].mxu1 %v4600_v40  ;;  %4282 = vmatpush3.bf16.msra.mxu0 %v3969_v52  ;;  %v3996_v40 = vcombine.low %v773_v21, %v774_v22  ;;  %v760_v52 = vmax.bf16 %v4645_v3, %v184_v39  ;;  %v3997_v61 = vcombine.low %v775_v41, %v776_v42  ;;  %v173_v21 = vld [vmem:[%s7148_s1 + $0x278] sm:$0xf]  ;;  %v174_v22 = vld [vmem:[%s7148_s1 + $0x27c] sm:$0xf]  ;;  %v223_v41 = vld [vmem:[%s7148_s1 + $0x340] sm:$0xf] }
  0x49   :  { %4304 = vmatpush3.bf16.msra.mxu1 %v3985_v53  ;;  %4283 = vmatprep.subr.bf16.mxu0 %v3978_v56  ;;  %v153_v53 = vld [vmem:[%s7148_s1 + $0x228] sm:$0xf]  ;;  %v3981_v56 = vcombine.low %v743_v35, %v744_v36  ;;  %v3973_v7 = vcombine.low %v727_v46, %v728_v50  ;;  %v3983_v35 = vcombine.low %v747_v13, %v748_v14  ;;  %v224_v42 = vld [vmem:[%s7148_s1 + $0x344] sm:$0xf]  ;;  %v227_v13 = vld [vmem:[%s7148_s1 + $0x350] sm:$0xf] }
  0x4a   :  { %4305 = vmatprep.subr.bf16.mxu1 %v3994_v62  ;;  %3319 = vmatprep.mubr.bf16.mxu0 %v4605_v19  ;;  %v777_v62 = vmax.bf16 %v4645_v3, %v201_v47  ;;  %v729_v2 = vmax.bf16 %v4645_v3, %v153_v53  ;;  %v3989_v8 = vcombine.low %v759_v51, %v760_v52  ;;  %v255_v47 = vld [vmem:[%s7148_s1 + $0x3c0] sm:$0xf]  ;;  %v208_v52 = vld [vmem:[%s7148_s1 + $0x304] sm:$0xf] }
  0x4b   :  { %3360 = vmatprep.mubr.bf16.mxu1 %v4608_v28  ;;  %v3990_v28 = vcombine.low %v761_v9, %v762_v10  ;;  %v749_v36 = vmax.bf16 %v4645_v3, %v173_v21  ;;  %v750_v37 = vmax.bf16 %v4645_v3, %v174_v22  ;;  %v781_v39 = vmax.bf16 %v4645_v3, %v205_v25  ;;  %v207_v51 = vld [vmem:[%s7148_s1 + $0x300] sm:$0xf]  ;;  %v211_v25 = vld [vmem:[%s7148_s1 + $0x310] sm:$0xf] }
  0x4c   :  { %4284 = vmatpush3.bf16.msra.mxu0 %v3970_v5  ;;  %v203_v5 = vld [vmem:[%s7148_s1 + $0x2f0] sm:$0xf]  ;;  %v3998_v18 = vcombine.low %v777_v62, %v778_v63  ;;  %v3974_v23 = vcombine.low %v729_v2, %v730_v4  ;;  %v799_v54 = vmax.bf16 %v4645_v3, %v223_v41  ;;  %v800_v55 = vmax.bf16 %v4645_v3, %v224_v42  ;;  %v225_v62 = vld [vmem:[%s7148_s1 + $0x348] sm:$0xf]  ;;  %v226_v63 = vld [vmem:[%s7148_s1 + $0x34c] sm:$0xf] }
  0x4d   :  { %4306 = vmatpush3.bf16.msra.mxu1 %v3986_v6  ;;  %4285 = vmatprep.subr.bf16.mxu0 %v3979_v15  ;;  %v204_v6 = vld [vmem:[%s7148_s1 + $0x2f4] sm:$0xf]  ;;  %v779_v19 = vmax.bf16 %v4645_v3, %v203_v5  ;;  %v3984_v53 = vcombine.low %v749_v36, %v750_v37  ;;  %v831_v60 = vmax.bf16 %v4645_v3, %v255_v47  ;;  %v258_v4 = vld [vmem:[%s7148_s1 + $0x3cc] sm:$0xf]  ;;  %v209_v5 = vld [vmem:[%s7148_s1 + $0x308] sm:$0xf] }
  0x4e   :  { %4307 = vmatprep.subr.bf16.mxu1 %v3995_v20  ;;  %v156_v15 = vld [vmem:[%s7148_s1 + $0x234] sm:$0xf]  ;;  %v780_v20 = vmax.bf16 %v4645_v3, %v204_v6  ;;  %v3976_v1 = vcombine.low %v733_v43, %v734_v44  ;;  %v210_v6 = vld [vmem:[%s7148_s1 + $0x30c] sm:$0xf]  ;;  %v816_v10 = vmax.bf16 %v4645_v3, %v240_v57  ;;  %v802_v17 = vmax.bf16 %v4645_v3, %v226_v63  ;;  %v262_v44 = vld [vmem:[%s7148_s1 + $0x3dc] sm:$0xf] }
  0x4f   :  { %v4603_v14 = vld [vmem:[%s7149_s0 + $0x20] ss:$144 sps:$4 sm:$0x1f]   ;;  %v833_v21 = vmax.bf16 %v4645_v3, %v257_v0  ;;  %v834_v22 = vmax.bf16 %v4645_v3, %v258_v4  ;;  %v786_v27 = vmax.bf16 %v4645_v3, %v210_v6  ;;  %v803_v36 = vmax.bf16 %v4645_v3, %v227_v13  ;;  %v232_v0 = vld [vmem:[%s7148_s1 + $0x364] sm:$0xf] }
  0x50   :  { %4286 = vmatpush3.bf16.msra.mxu0 %v3971_v29  ;;  %v732_v29 = vmax.bf16 %v4645_v3, %v156_v15  ;;  %v3999_v38 = vcombine.low %v779_v19, %v780_v20  ;;  %v4009_v15 = vcombine.low %v799_v54, %v800_v55  ;;  %v4606_v19 = vld [vmem:[%s7149_s0 + $0x28] ss:$144 sps:$4 sm:$0x1f]   ;;  %v214_v54 = vld [vmem:[%s7148_s1 + $0x31c] sm:$0xf]  ;;  %v808_v13 = vmax.bf16 %v4645_v3, %v232_v0 }
  0x51   :  { %4308 = vmatpush3.bf16.msra.mxu1 %v3987_v30  ;;  %4287 = vmatprep.subr.bf16.mxu0 %v3980_v34  ;;  %v763_v30 = vmax.bf16 %v4645_v3, %v187_v16  ;;  %v190_v34 = vld [vmem:[%s7148_s1 + $0x2bc] sm:$0xf]  ;;  %v801_v16 = vmax.bf16 %v4645_v3, %v225_v62  ;;  %v4026_v41 = vcombine.low %v833_v21, %v834_v22  ;;  %v245_v55 = vld [vmem:[%s7148_s1 + $0x398] sm:$0xf]  ;;  %v231_v63 = vld [vmem:[%s7148_s1 + $0x360] sm:$0xf] }
  0x52   :  { %4309 = vmatprep.subr.bf16.mxu1 %v3996_v40  ;;  %v782_v40 = vmax.bf16 %v4645_v3, %v206_v26  ;;  %v766_v46 = vmax.bf16 %v4645_v3, %v190_v34  ;;  %v785_v26 = vmax.bf16 %v4645_v3, %v209_v5  ;;  %v244_v34 = vld [vmem:[%s7148_s1 + $0x394] sm:$0xf]  ;;  %v838_v62 = vmax.bf16 %v4645_v3, %v262_v44  ;;  %v263_v6 = vld [vmem:[%s7148_s1 + $0x3e0] sm:$0xf]  ;;  %v234_v21 = vld [vmem:[%s7148_s1 + $0x36c] sm:$0xf] }
  0x53   :  { %v3991_v50 = vcombine.low %v763_v30, %v764_v31  ;;  %v212_v30 = vld [vmem:[%s7148_s1 + $0x314] sm:$0xf]  ;;  %v821_v4 = vmax.bf16 %v4645_v3, %v245_v55  ;;  %v251_v55 = vld [vmem:[%s7148_s1 + $0x3b0] sm:$0xf]  ;;  %v269_v0 = vld [vmem:[%s7148_s1 + $0x3f8] sm:$0xf] }
  0x54   :  { %4288 = vmatpush3.bf16.msra.mxu0 %v3972_v45  ;;  %v5473_v45 = vmax.bf16 %v4645_v3, %v189_v33  ;;  %v4000_v59 = vcombine.low %v781_v39, %v782_v40  ;;  %v243_v33 = vld [vmem:[%s7148_s1 + $0x390] sm:$0xf]  ;;  %v230_v39 = vld [vmem:[%s7148_s1 + $0x35c] sm:$0xf]  ;;  %v261_v40 = vld [vmem:[%s7148_s1 + $0x3d8] sm:$0xf] }
  0x55   :  { %4310 = vmatpush3.bf16.msra.mxu1 %v3988_v49  ;;  %4289 = vmatprep.subr.bf16.mxu0 %v3981_v56  ;;  %v3975_v49 = vcombine.low %v731_v24, %v732_v29  ;;  %v239_v56 = vld [vmem:[%s7148_s1 + $0x380] sm:$0xf]  ;;  %v260_v24 = vld [vmem:[%s7148_s1 + $0x3d4] sm:$0xf] }
  0x56   :  { %4311 = vmatprep.subr.bf16.mxu1 %v3997_v61  ;;  %v832_v61 = vmax.bf16 %v4645_v3, %v256_v48  ;;  %v3992_v2 = vcombine.low %v5473_v45, %v766_v46  ;;  %v815_v9 = vmax.bf16 %v4645_v3, %v239_v56  ;;  %v836_v43 = vmax.bf16 %v4645_v3, %v260_v24  ;;  %v4611_v45 = vld [vmem:[%s7149_s0 + $0x34] ss:$144 sps:$4 sm:$0x1f]   ;;  %v246_v56 = vld [vmem:[%s7148_s1 + $0x39c] sm:$0xf] }
  0x57   :  { %v4002_v46 = vcombine.low %v785_v26, %v786_v27  ;;  %v787_v48 = vmax.bf16 %v4645_v3, %v211_v25  ;;  %v822_v5 = vmax.bf16 %v4645_v3, %v246_v56  ;;  %v265_v24 = vld [vmem:[%s7148_s1 + $0x3e8] sm:$0xf]  ;;  %v266_v25 = vld [vmem:[%s7148_s1 + $0x3ec] sm:$0xf]  ;;  %v252_v56 = vld [vmem:[%s7148_s1 + $0x3b4] sm:$0xf] }
  0x58   :  { %4290 = vmatpush3.bf16.msra.mxu0 %v3973_v7  ;;  %v783_v7 = vmax.bf16 %v4645_v3, %v207_v51  ;;  %v4025_v20 = vcombine.low %v831_v60, %v832_v61  ;;  %v4017_v32 = vcombine.low %v815_v9, %v816_v10  ;;  %v788_v51 = vmax.bf16 %v4645_v3, %v212_v30  ;;  %v215_v10 = vld [vmem:[%s7148_s1 + $0x320] sm:$0xf]  ;;  %v217_v26 = vld [vmem:[%s7148_s1 + $0x328] sm:$0xf] }
  0x59   :  { %4312 = vmatpush3.bf16.msra.mxu1 %v3989_v8  ;;  %4291 = vmatprep.subr.bf16.mxu0 %v3982_v12  ;;  %v784_v8 = vmax.bf16 %v4645_v3, %v208_v52  ;;  %v242_v12 = vld [vmem:[%s7148_s1 + $0x38c] sm:$0xf]  ;;  %v819_v52 = vmax.bf16 %v4645_v3, %v243_v33  ;;  %v837_v61 = vmax.bf16 %v4645_v3, %v261_v40  ;;  %v235_v40 = vld [vmem:[%s7148_s1 + $0x370] sm:$0xf] }
  0x5a   :  { %4313 = vmatprep.subr.bf16.mxu1 %v3998_v18  ;;  %v228_v18 = vld [vmem:[%s7148_s1 + $0x354] sm:$0xf]  ;;  %v818_v29 = vmax.bf16 %v4645_v3, %v242_v12  ;;  %v807_v12 = vmax.bf16 %v4645_v3, %v231_v63  ;;  %v791_v27 = vmax.bf16 %v4645_v3, %v215_v10  ;;  %v250_v33 = vld [vmem:[%s7148_s1 + $0x3ac] sm:$0xf]  ;;  %v254_v10 = vld [vmem:[%s7148_s1 + $0x3bc] sm:$0xf] }
  0x5b   :  { %v4001_v31 = vcombine.low %v783_v7, %v784_v8  ;;  %v804_v37 = vmax.bf16 %v4645_v3, %v228_v18  ;;  %v264_v7 = vld [vmem:[%s7148_s1 + $0x3e4] sm:$0xf]  ;;  %v4003_v8 = vcombine.low %v787_v48, %v788_v51  ;;  %v839_v18 = vmax.bf16 %v4645_v3, %v263_v6 }
  0x5c   :  { %4292 = vmatpush3.bf16.msra.mxu0 %v3974_v23  ;;  %v259_v23 = vld [vmem:[%s7148_s1 + $0x3d0] sm:$0xf]  ;;  %v827_v6 = vmax.bf16 %v4645_v3, %v251_v55  ;;  %v4612_v55 = vld [vmem:[%s7149_s0 + $0x38] ss:$144 sps:$4 sm:$0x1f]  }
  0x5d   :  { %4314 = vmatpush3.bf16.msra.mxu1 %v3990_v28  ;;  %4293 = vmatprep.subr.bf16.mxu0 %v3983_v35  ;;  %v817_v28 = vmax.bf16 %v4645_v3, %v241_v11  ;;  %v4010_v35 = vcombine.low %v801_v16, %v802_v17  ;;  %v835_v42 = vmax.bf16 %v4645_v3, %v259_v23  ;;  %v248_v16 = vld [vmem:[%s7148_s1 + $0x3a4] sm:$0xf] }
  0x5e   :  { %4315 = vmatprep.subr.bf16.mxu1 %v3999_v38  ;;  %v229_v38 = vld [vmem:[%s7148_s1 + $0x358] sm:$0xf]  ;;  %v4011_v57 = vcombine.low %v803_v36, %v804_v37  ;;  %v4028_v17 = vcombine.low %v837_v61, %v838_v62  ;;  %v4020_v23 = vcombine.low %v821_v4, %v822_v5  ;;  %v824_v30 = vmax.bf16 %v4645_v3, %v248_v16  ;;  %v238_v61 = vld [vmem:[%s7148_s1 + $0x37c] sm:$0xf] }
  0x5f   :  { %v4018_v47 = vcombine.low %v817_v28, %v818_v29  ;;  %v805_v58 = vmax.bf16 %v4645_v3, %v229_v38  ;;  %v4027_v60 = vcombine.low %v835_v42, %v836_v43  ;;  %v810_v36 = vmax.bf16 %v4645_v3, %v234_v21 }
  0x60   :  { %4294 = vmatpush3.bf16.msra.mxu0 %v3975_v49  ;;  %v213_v49 = vld [vmem:[%s7148_s1 + $0x318] sm:$0xf]  ;;  %v841_v38 = vmax.bf16 %v4645_v3, %v265_v24  ;;  %v793_v42 = vmax.bf16 %v4645_v3, %v217_v26  ;;  %v320_v24 = vld [vmem:[%s7148_s1 + $0x4c4] sm:$0xf] }
  0x61   :  { %4316 = vmatpush3.bf16.msra.mxu1 %v3991_v50  ;;  %4295 = vmatprep.subr.bf16.mxu0 %v3984_v53  ;;  %v4614_v50 = vld [vmem:[%s7149_s0 + $0x3c] ss:$144 sps:$4 sm:$0x1f]   ;;  %v820_v53 = vmax.bf16 %v4645_v3, %v244_v34  ;;  %v4013_v34 = vcombine.low %v807_v12, %v808_v13  ;;  %v814_v13 = vmax.bf16 %v4645_v3, %v238_v61 }
  0x62   :  { %4317 = vmatprep.subr.bf16.mxu1 %v4000_v59  ;;  %v806_v59 = vmax.bf16 %v4645_v3, %v230_v39  ;;  %v842_v39 = vmax.bf16 %v4645_v3, %v266_v25 }
  0x63   :  { %v4019_v9 = vcombine.low %v819_v52, %v820_v53  ;;  %v811_v52 = vmax.bf16 %v4645_v3, %v235_v40 }
  0x64   :  { %4296 = vmatpush3.bf16.msra.mxu0 %v3976_v1  ;;  %v789_v1 = vmax.bf16 %v4645_v3, %v213_v49  ;;  %v4012_v11 = vcombine.low %v805_v58, %v806_v59 }
  0x65   :  { %4318 = vmatpush3.bf16.msra.mxu1 %v3992_v2  ;;  %4325 = vmatprep.subr.bf16.mxu0 %v4009_v15  ;;  %v790_v2 = vmax.bf16 %v4645_v3, %v214_v54  ;;  %v247_v15 = vld [vmem:[%s7148_s1 + $0x3a0] sm:$0xf]  ;;  %v220_v54 = vld [vmem:[%s7148_s1 + $0x334] sm:$0xf] }
  0x66   :  { %4347 = vmatprep.subr.bf16.mxu1 %v4025_v20  ;;  %v233_v20 = vld [vmem:[%s7148_s1 + $0x368] sm:$0xf]  ;;  %v823_v29 = vmax.bf16 %v4645_v3, %v247_v15  ;;  %v796_v5 = vmax.bf16 %v4645_v3, %v220_v54  ;;  %v288_v15 = vld [vmem:[%s7148_s1 + $0x444] sm:$0xf] }
  0x67   :  { %3320 = vmatmul.mubr.bf16.vlgmr.msra.gmra.mrb[8].mxu0 %v4603_v14  ;;  %v216_v14 = vld [vmem:[%s7148_s1 + $0x324] sm:$0xf]  ;;  %v4004_v22 = vcombine.low %v789_v1, %v790_v2  ;;  %v270_v1 = vld [vmem:[%s7148_s1 + $0x3fc] sm:$0xf]  ;;  %v221_v2 = vld [vmem:[%s7148_s1 + $0x338] sm:$0xf] }
  0x68   :  { %3361 = vmatmul.mubr.bf16.vlgmr.msra.gmra.mrb[8].mxu1 %v4606_v19  ;;  %4326 = vmatpush3.bf16.msra.mxu0 %v4001_v31  ;;  %v840_v19 = vmax.bf16 %v4645_v3, %v264_v7  ;;  %v792_v28 = vmax.bf16 %v4645_v3, %v216_v14  ;;  %v218_v31 = vld [vmem:[%s7148_s1 + $0x32c] sm:$0xf]  ;;  %v4021_v49 = vcombine.low %v823_v29, %v824_v30  ;;  %v287_v14 = vld [vmem:[%s7148_s1 + $0x440] sm:$0xf] }
  0x69   :  { %4348 = vmatpush3.bf16.msra.mxu1 %v4017_v32  ;;  %4327 = vmatprep.subr.bf16.mxu0 %v4010_v35  ;;  %v249_v32 = vld [vmem:[%s7148_s1 + $0x3a8] sm:$0xf]  ;;  %v809_v35 = vmax.bf16 %v4645_v3, %v233_v20  ;;  %v794_v43 = vmax.bf16 %v4645_v3, %v218_v31  ;;  %v828_v7 = vmax.bf16 %v4645_v3, %v252_v56  ;;  %v272_v31 = vld [vmem:[%s7148_s1 + $0x404] sm:$0xf] }
  0x6a   :  { %4349 = vmatprep.subr.bf16.mxu1 %v4026_v41  ;;  %3401 = vmatprep.mubr.bf16.mxu0 %v4611_v45  ;;  %v4029_v37 = vcombine.low %v839_v18, %v840_v19  ;;  %v236_v41 = vld [vmem:[%s7148_s1 + $0x374] sm:$0xf]  ;;  %v825_v44 = vmax.bf16 %v4645_v3, %v249_v32  ;;  %v826_v45 = vmax.bf16 %v4645_v3, %v250_v33  ;;  %v319_v19 = vld [vmem:[%s7148_s1 + $0x4c0] sm:$0xf]  ;;  %v304_v33 = vld [vmem:[%s7148_s1 + $0x484] sm:$0xf] }
  0x6b   :  { %3442 = vmatprep.mubr.bf16.mxu1 %v4614_v50  ;;  %v4005_v48 = vcombine.low %v791_v27, %v792_v28  ;;  %v219_v50 = vld [vmem:[%s7148_s1 + $0x330] sm:$0xf]  ;;  %v4014_v51 = vcombine.low %v809_v35, %v810_v36  ;;  %v812_v53 = vmax.bf16 %v4645_v3, %v236_v41  ;;  %v4006_v62 = vcombine.low %v793_v42, %v794_v43  ;;  %v271_v27 = vld [vmem:[%s7148_s1 + $0x400] sm:$0xf]  ;;  %v321_v41 = vld [vmem:[%s7148_s1 + $0x4c8] sm:$0xf] }
  0x6c   :  { %4328 = vmatpush3.bf16.msra.mxu0 %v4002_v46  ;;  %v267_v46 = vld [vmem:[%s7148_s1 + $0x3f0] sm:$0xf]  ;;  %v4022_v63 = vcombine.low %v825_v44, %v826_v45  ;;  %v795_v4 = vmax.bf16 %v4645_v3, %v219_v50  ;;  %v846_v18 = vmax.bf16 %v4645_v3, %v270_v1  ;;  %v797_v20 = vmax.bf16 %v4645_v3, %v221_v2  ;;  %v303_v32 = vld [vmem:[%s7148_s1 + $0x480] sm:$0xf]  ;;  %v322_v42 = vld [vmem:[%s7148_s1 + $0x4cc] sm:$0xf] }
  0x6d   :  { %4350 = vmatpush3.bf16.msra.mxu1 %v4018_v47  ;;  %4329 = vmatprep.subr.bf16.mxu0 %v4011_v57  ;;  %v268_v47 = vld [vmem:[%s7148_s1 + $0x3f4] sm:$0xf]  ;;  %v4030_v57 = vcombine.low %v841_v38, %v842_v39  ;;  %v843_v58 = vmax.bf16 %v4645_v3, %v267_v46  ;;  %v4023_v26 = vcombine.low %v827_v6, %v828_v7  ;;  %v290_v38 = vld [vmem:[%s7148_s1 + $0x44c] sm:$0xf]  ;;  %v273_v43 = vld [vmem:[%s7148_s1 + $0x408] sm:$0xf] }
  0x6e   :  { %4351 = vmatprep.subr.bf16.mxu1 %v4027_v60  ;;  %v844_v59 = vmax.bf16 %v4645_v3, %v268_v47  ;;  %v237_v60 = vld [vmem:[%s7148_s1 + $0x378] sm:$0xf]  ;;  %v4007_v25 = vcombine.low %v795_v4, %v796_v5  ;;  %v863_v29 = vmax.bf16 %v4645_v3, %v287_v14  ;;  %v864_v30 = vmax.bf16 %v4645_v3, %v288_v15  ;;  %v306_v50 = vld [vmem:[%s7148_s1 + $0x48c] sm:$0xf]  ;;  %v323_v1 = vld [vmem:[%s7148_s1 + $0x4d0] sm:$0xf] }
  0x6f   :  { %v813_v12 = vmax.bf16 %v4645_v3, %v237_v60  ;;  %v895_v35 = vmax.bf16 %v4645_v3, %v319_v19  ;;  %v896_v36 = vmax.bf16 %v4645_v3, %v320_v24  ;;  %v847_v44 = vmax.bf16 %v4645_v3, %v271_v27  ;;  %v292_v60 = vld [vmem:[%s7148_s1 + $0x454] sm:$0xf]  ;;  %v275_v6 = vld [vmem:[%s7148_s1 + $0x410] sm:$0xf]  ;;  %v294_v14 = vld [vmem:[%s7148_s1 + $0x45c] sm:$0xf] }
  0x70   :  { %4330 = vmatpush3.bf16.msra.mxu0 %v4003_v8  ;;  %v222_v8 = vld [vmem:[%s7148_s1 + $0x33c] sm:$0xf]  ;;  %v4031_v16 = vcombine.low %v843_v58, %v844_v59  ;;  %v848_v45 = vmax.bf16 %v4645_v3, %v272_v31  ;;  %v879_v46 = vmax.bf16 %v4645_v3, %v303_v32  ;;  %v880_v47 = vmax.bf16 %v4645_v3, %v304_v33  ;;  %v291_v59 = vld [vmem:[%s7148_s1 + $0x450] sm:$0xf]  ;;  %v324_v2 = vld [vmem:[%s7148_s1 + $0x4d4] sm:$0xf] }
  0x71   :  { %4352 = vmatpush3.bf16.msra.mxu1 %v4019_v9  ;;  %4331 = vmatprep.subr.bf16.mxu0 %v4012_v11  ;;  %v253_v9 = vld [vmem:[%s7148_s1 + $0x3b8] sm:$0xf]  ;;  %v4015_v11 = vcombine.low %v811_v52, %v812_v53  ;;  %v798_v21 = vmax.bf16 %v4645_v3, %v222_v8  ;;  %v4016_v28 = vcombine.low %v813_v12, %v814_v13  ;;  %v276_v7 = vld [vmem:[%s7148_s1 + $0x414] sm:$0xf]  ;;  %v307_v8 = vld [vmem:[%s7148_s1 + $0x490] sm:$0xf] }
  0x72   :  { %4353 = vmatprep.subr.bf16.mxu1 %v4028_v17  ;;  %v845_v17 = vmax.bf16 %v4645_v3, %v269_v0  ;;  %v4041_v52 = vcombine.low %v863_v29, %v864_v30  ;;  %v866_v54 = vmax.bf16 %v4645_v3, %v290_v38  ;;  %v4057_v56 = vcombine.low %v895_v35, %v896_v36  ;;  %v308_v12 = vld [vmem:[%s7148_s1 + $0x494] sm:$0xf]  ;;  %v293_v13 = vld [vmem:[%s7148_s1 + $0x458] sm:$0xf]  ;;  %v278_v29 = vld [vmem:[%s7148_s1 + $0x41c] sm:$0xf] }
  0x73   :  { %v4008_v39 = vcombine.low %v797_v20, %v798_v21  ;;  %v898_v58 = vmax.bf16 %v4645_v3, %v322_v42  ;;  %v849_v61 = vmax.bf16 %v4645_v3, %v273_v43  ;;  %v882_v0 = vmax.bf16 %v4645_v3, %v306_v50  ;;  %v4617_v19 = vld [vmem:[%s7149_s0 + $0x44] ss:$144 sps:$4 sm:$0x1f]   ;;  %v4620_v24 = vld [vmem:[%s7149_s0 + $0x4c] ss:$144 sps:$4 sm:$0x1f]  }
  0x74   :  { %4332 = vmatpush3.bf16.msra.mxu0 %v4004_v22  ;;  %v829_v22 = vmax.bf16 %v4645_v3, %v253_v9  ;;  %v4033_v4 = vcombine.low %v847_v44, %v848_v45  ;;  %v4049_v5 = vcombine.low %v879_v46, %v880_v47  ;;  %v884_v27 = vmax.bf16 %v4645_v3, %v308_v12  ;;  %v309_v33 = vld [vmem:[%s7148_s1 + $0x498] sm:$0xf]  ;;  %v295_v38 = vld [vmem:[%s7148_s1 + $0x460] sm:$0xf]  ;;  %v328_v43 = vld [vmem:[%s7148_s1 + $0x4e4] sm:$0xf] }
  0x75   :  { %4354 = vmatpush3.bf16.msra.mxu1 %v4020_v23  ;;  %4333 = vmatprep.subr.bf16.mxu0 %v4013_v34  ;;  %v830_v23 = vmax.bf16 %v4645_v3, %v254_v10  ;;  %v4032_v34 = vcombine.low %v845_v17, %v846_v18  ;;  %v867_v10 = vmax.bf16 %v4645_v3, %v291_v59  ;;  %v325_v18 = vld [vmem:[%s7148_s1 + $0x4d8] sm:$0xf]  ;;  %v327_v42 = vld [vmem:[%s7148_s1 + $0x4e0] sm:$0xf]  ;;  %v298_v59 = vld [vmem:[%s7148_s1 + $0x46c] sm:$0xf] }
  0x76   :  { %4355 = vmatprep.subr.bf16.mxu1 %v4029_v37  ;;  %v289_v37 = vld [vmem:[%s7148_s1 + $0x448] sm:$0xf]  ;;  %v900_v17 = vmax.bf16 %v4645_v3, %v324_v2  ;;  %v869_v31 = vmax.bf16 %v4645_v3, %v293_v13  ;;  %v870_v32 = vmax.bf16 %v4645_v3, %v294_v14  ;;  %v901_v36 = vmax.bf16 %v4645_v3, %v325_v18  ;;  %v299_v12 = vld [vmem:[%s7148_s1 + $0x470] sm:$0xf] }
  0x77   :  { %v4024_v40 = vcombine.low %v829_v22, %v830_v23  ;;  %v865_v53 = vmax.bf16 %v4645_v3, %v289_v37  ;;  %v851_v22 = vmax.bf16 %v4645_v3, %v275_v6  ;;  %v326_v23 = vld [vmem:[%s7148_s1 + $0x4dc] sm:$0xf]  ;;  %v885_v46 = vmax.bf16 %v4645_v3, %v309_v33  ;;  %v282_v6 = vld [vmem:[%s7148_s1 + $0x42c] sm:$0xf] }
  0x78   :  { %4334 = vmatpush3.bf16.msra.mxu0 %v4005_v48  ;;  %v274_v48 = vld [vmem:[%s7148_s1 + $0x40c] sm:$0xf]  ;;  %v902_v37 = vmax.bf16 %v4645_v3, %v326_v23  ;;  %v871_v50 = vmax.bf16 %v4645_v3, %v295_v38  ;;  %v858_v18 = vmax.bf16 %v4645_v3, %v282_v6  ;;  %v336_v6 = vld [vmem:[%s7148_s1 + $0x504] sm:$0xf] }
  0x79   :  { %4356 = vmatpush3.bf16.msra.mxu1 %v4021_v49  ;;  %4335 = vmatprep.subr.bf16.mxu0 %v4014_v51  ;;  %v305_v49 = vld [vmem:[%s7148_s1 + $0x488] sm:$0xf]  ;;  %v4609_v51 = vld [vmem:[%s7149_s0 + $0x30] ss:$144 sps:$4 sm:$0x1f]   ;;  %v4042_v9 = vcombine.low %v865_v53, %v866_v54 }
  0x7a   :  { %4357 = vmatprep.subr.bf16.mxu1 %v4030_v57  ;;  %v897_v57 = vmax.bf16 %v4645_v3, %v321_v41  ;;  %v854_v41 = vmax.bf16 %v4645_v3, %v278_v29  ;;  %v311_v53 = vld [vmem:[%s7148_s1 + $0x4a0] sm:$0xf]  ;;  %v312_v54 = vld [vmem:[%s7148_s1 + $0x4a4] sm:$0xf]  ;;  %v284_v29 = vld [vmem:[%s7148_s1 + $0x434] sm:$0xf] }
  0x7c   :  { %4336 = vmatpush3.bf16.msra.mxu0 %v4006_v62  ;;  %v850_v62 = vmax.bf16 %v4645_v3, %v274_v48  ;;  %v4058_v15 = vcombine.low %v897_v57, %v898_v58  ;;  %v279_v48 = vld [vmem:[%s7148_s1 + $0x420] sm:$0xf]  ;;  %v904_v57 = vmax.bf16 %v4645_v3, %v328_v43  ;;  %v297_v58 = vld [vmem:[%s7148_s1 + $0x468] sm:$0xf]  ;;  %v860_v43 = vmax.bf16 %v4645_v3, %v284_v29  ;;  %v370_v29 = vld [vmem:[%s7148_s1 + $0x58c] sm:$0xf] }
  0x7d   :  { %4358 = vmatpush3.bf16.msra.mxu1 %v4022_v63  ;;  %4337 = vmatprep.subr.bf16.mxu0 %v4015_v11  ;;  %v881_v63 = vmax.bf16 %v4645_v3, %v305_v49  ;;  %v868_v11 = vmax.bf16 %v4645_v3, %v292_v60  ;;  %v4044_v49 = vcombine.low %v869_v31, %v870_v32  ;;  %v316_v31 = vld [vmem:[%s7148_s1 + $0x4b4] sm:$0xf] }
  0x7e   :  { %4359 = vmatprep.subr.bf16.mxu1 %v4031_v16  ;;  %v899_v16 = vmax.bf16 %v4645_v3, %v323_v1  ;;  %v4034_v20 = vcombine.low %v849_v61, %v850_v62  ;;  %v855_v61 = vmax.bf16 %v4645_v3, %v279_v48  ;;  %v329_v62 = vld [vmem:[%s7148_s1 + $0x4e8] sm:$0xf]  ;;  %v318_v48 = vld [vmem:[%s7148_s1 + $0x4bc] sm:$0xf] }
  0x7f   :  { %v4050_v21 = vcombine.low %v881_v63, %v882_v0  ;;  %v4043_v30 = vcombine.low %v867_v10, %v868_v11  ;;  %v330_v63 = vld [vmem:[%s7148_s1 + $0x4ec] sm:$0xf]  ;;  %v281_v0 = vld [vmem:[%s7148_s1 + $0x428] sm:$0xf]  ;;  %v873_v10 = vmax.bf16 %v4645_v3, %v297_v58  ;;  %v874_v11 = vmax.bf16 %v4645_v3, %v298_v59 }
  0x80   :  { %4338 = vmatpush3.bf16.msra.mxu0 %v4007_v25  ;;  %v852_v25 = vmax.bf16 %v4645_v3, %v276_v7  ;;  %v4059_v35 = vcombine.low %v899_v16, %v900_v17  ;;  %v313_v7 = vld [vmem:[%s7148_s1 + $0x4a8] sm:$0xf]  ;;  %v905_v14 = vmax.bf16 %v4645_v3, %v329_v62  ;;  %v300_v16 = vld [vmem:[%s7148_s1 + $0x474] sm:$0xf]  ;;  %v857_v17 = vmax.bf16 %v4645_v3, %v281_v0  ;;  %v384_v62 = vld [vmem:[%s7148_s1 + $0x5c4] sm:$0xf] }
  0x81   :  { %4360 = vmatpush3.bf16.msra.mxu1 %v4023_v26  ;;  %4339 = vmatprep.subr.bf16.mxu0 %v4016_v28  ;;  %v883_v26 = vmax.bf16 %v4645_v3, %v307_v8  ;;  %v277_v28 = vld [vmem:[%s7148_s1 + $0x418] sm:$0xf]  ;;  %v314_v8 = vld [vmem:[%s7148_s1 + $0x4ac] sm:$0xf] }
  0x82   :  { %4361 = vmatprep.subr.bf16.mxu1 %v4032_v34  ;;  %v310_v34 = vld [vmem:[%s7148_s1 + $0x49c] sm:$0xf]  ;;  %v4035_v44 = vcombine.low %v851_v22, %v852_v25  ;;  %v332_v22 = vld [vmem:[%s7148_s1 + $0x4f4] sm:$0xf]  ;;  %v283_v25 = vld [vmem:[%s7148_s1 + $0x430] sm:$0xf] }
  0x83   :  { %v4051_v45 = vcombine.low %v883_v26, %v884_v27  ;;  %v886_v47 = vmax.bf16 %v4645_v3, %v310_v34  ;;  %v4046_v26 = vcombine.low %v873_v10, %v874_v11  ;;  %v875_v27 = vmax.bf16 %v4645_v3, %v299_v12  ;;  %v353_v12 = vld [vmem:[%s7148_s1 + $0x548] sm:$0xf] }
  0x84   :  { %4340 = vmatpush3.bf16.msra.mxu0 %v4008_v39  ;;  %v296_v39 = vld [vmem:[%s7148_s1 + $0x464] sm:$0xf]  ;;  %v908_v34 = vmax.bf16 %v4645_v3, %v332_v22  ;;  %v960_v11 = vmax.bf16 %v4645_v3, %v384_v62  ;;  %v337_v22 = vld [vmem:[%s7148_s1 + $0x508] sm:$0xf]  ;;  %v341_v62 = vld [vmem:[%s7148_s1 + $0x518] sm:$0xf] }
  0x85   :  { %4362 = vmatpush3.bf16.msra.mxu1 %v4024_v40  ;;  %4369 = vmatprep.subr.bf16.mxu0 %v4041_v52  ;;  %v853_v40 = vmax.bf16 %v4645_v3, %v277_v28  ;;  %v280_v52 = vld [vmem:[%s7148_s1 + $0x424] sm:$0xf]  ;;  %v4052_v1 = vcombine.low %v885_v46, %v886_v47  ;;  %v876_v28 = vmax.bf16 %v4645_v3, %v300_v16  ;;  %v286_v46 = vld [vmem:[%s7148_s1 + $0x43c] sm:$0xf]  ;;  %v317_v47 = vld [vmem:[%s7148_s1 + $0x4b8] sm:$0xf] }
  0x86   :  { %4391 = vmatprep.subr.bf16.mxu1 %v4057_v56  ;;  %v903_v56 = vmax.bf16 %v4645_v3, %v327_v42  ;;  %v856_v2 = vmax.bf16 %v4645_v3, %v280_v52  ;;  %v859_v42 = vmax.bf16 %v4645_v3, %v283_v25  ;;  %v862_v58 = vmax.bf16 %v4645_v3, %v286_v46  ;;  %v385_v16 = vld [vmem:[%s7148_s1 + $0x5c8] sm:$0xf]  ;;  %v371_v46 = vld [vmem:[%s7148_s1 + $0x590] sm:$0xf] }
  0x87   :  { %3402 = vmatmul.mubr.bf16.vlgmr.msra.gmra.mrb[12].mxu0 %v4609_v51  ;;  %v872_v51 = vmax.bf16 %v4645_v3, %v296_v39  ;;  %v4036_v60 = vcombine.low %v853_v40, %v854_v41  ;;  %v333_v39 = vld [vmem:[%s7148_s1 + $0x4f8] sm:$0xf]  ;;  %v334_v40 = vld [vmem:[%s7148_s1 + $0x4fc] sm:$0xf]  ;;  %v893_v59 = vmax.bf16 %v4645_v3, %v317_v47  ;;  %v372_v47 = vld [vmem:[%s7148_s1 + $0x594] sm:$0xf] }
  0x88   :  { %3443 = vmatmul.mubr.bf16.vlgmr.msra.gmra.mrb[12].mxu1 %v4612_v55  ;;  %4370 = vmatpush3.bf16.msra.mxu0 %v4033_v4  ;;  %v4060_v55 = vcombine.low %v901_v36, %v902_v37  ;;  %v887_v4 = vmax.bf16 %v4645_v3, %v311_v53  ;;  %v4061_v13 = vcombine.low %v903_v56, %v904_v57  ;;  %v302_v36 = vld [vmem:[%s7148_s1 + $0x47c] sm:$0xf]  ;;  %v285_v41 = vld [vmem:[%s7148_s1 + $0x438] sm:$0xf]  ;;  %v352_v56 = vld [vmem:[%s7148_s1 + $0x544] sm:$0xf] }
  0x89   :  { %4392 = vmatpush3.bf16.msra.mxu1 %v4049_v5  ;;  %4371 = vmatprep.subr.bf16.mxu0 %v4042_v9  ;;  %v888_v5 = vmax.bf16 %v4645_v3, %v312_v54  ;;  %v4045_v9 = vcombine.low %v871_v50, %v872_v51  ;;  %v4037_v23 = vcombine.low %v855_v61, %v856_v2  ;;  %v383_v61 = vld [vmem:[%s7148_s1 + $0x5c0] sm:$0xf] }
  0x8a   :  { %4393 = vmatprep.subr.bf16.mxu1 %v4058_v15  ;;  %3483 = vmatprep.mubr.bf16.mxu0 %v4617_v19  ;;  %v906_v15 = vmax.bf16 %v4645_v3, %v330_v63  ;;  %v889_v19 = vmax.bf16 %v4645_v3, %v313_v7  ;;  %v4038_v37 = vcombine.low %v857_v17, %v858_v18  ;;  %v367_v7 = vld [vmem:[%s7148_s1 + $0x580] sm:$0xf]  ;;  %v386_v17 = vld [vmem:[%s7148_s1 + $0x5cc] sm:$0xf] }
  0x8b   :  { %3524 = vmatprep.mubr.bf16.mxu1 %v4620_v24  ;;  %v4053_v24 = vcombine.low %v887_v4, %v888_v5  ;;  %v878_v51 = vmax.bf16 %v4645_v3, %v302_v36  ;;  %v909_v53 = vmax.bf16 %v4645_v3, %v333_v39  ;;  %v910_v54 = vmax.bf16 %v4645_v3, %v334_v40  ;;  %v388_v39 = vld [vmem:[%s7148_s1 + $0x5d4] sm:$0xf]  ;;  %v339_v40 = vld [vmem:[%s7148_s1 + $0x510] sm:$0xf] }
  0x8c   :  { %4372 = vmatpush3.bf16.msra.mxu0 %v4034_v20  ;;  %v890_v20 = vmax.bf16 %v4645_v3, %v314_v8  ;;  %v4062_v32 = vcombine.low %v905_v14, %v906_v15  ;;  %v861_v57 = vmax.bf16 %v4645_v3, %v285_v41  ;;  %v4039_v63 = vcombine.low %v859_v42, %v860_v43  ;;  %v368_v8 = vld [vmem:[%s7148_s1 + $0x584] sm:$0xf] }
  0x8d   :  { %4394 = vmatpush3.bf16.msra.mxu1 %v4050_v21  ;;  %4373 = vmatprep.subr.bf16.mxu0 %v4043_v30  ;;  %v331_v21 = vld [vmem:[%s7148_s1 + $0x4f0] sm:$0xf]  ;;  %v928_v5 = vmax.bf16 %v4645_v3, %v352_v56  ;;  %v959_v10 = vmax.bf16 %v4645_v3, %v383_v61  ;;  %v913_v36 = vmax.bf16 %v4645_v3, %v337_v22 }
  0x8e   :  { %4395 = vmatprep.subr.bf16.mxu1 %v4059_v35  ;;  %v315_v30 = vld [vmem:[%s7148_s1 + $0x4b0] sm:$0xf]  ;;  %v907_v33 = vmax.bf16 %v4645_v3, %v331_v21  ;;  %v301_v35 = vld [vmem:[%s7148_s1 + $0x478] sm:$0xf]  ;;  %v4054_v38 = vcombine.low %v889_v19, %v890_v20  ;;  %v4040_v14 = vcombine.low %v861_v57, %v862_v58  ;;  %v912_v19 = vmax.bf16 %v4645_v3, %v336_v6  ;;  %v390_v57 = vld [vmem:[%s7148_s1 + $0x5dc] sm:$0xf] }
  0x8f   :  { %v877_v50 = vmax.bf16 %v4645_v3, %v301_v35  ;;  %v943_v20 = vmax.bf16 %v4645_v3, %v367_v7  ;;  %v944_v21 = vmax.bf16 %v4645_v3, %v368_v8  ;;  %v356_v35 = vld [vmem:[%s7148_s1 + $0x554] sm:$0xf]  ;;  %v964_v56 = vmax.bf16 %v4645_v3, %v388_v39  ;;  %v374_v6 = vld [vmem:[%s7148_s1 + $0x59c] sm:$0xf]  ;;  %v345_v39 = vld [vmem:[%s7148_s1 + $0x528] sm:$0xf] }
  0x90   :  { %4374 = vmatpush3.bf16.msra.mxu0 %v4035_v44  ;;  %v891_v44 = vmax.bf16 %v4645_v3, %v315_v30  ;;  %v4063_v52 = vcombine.low %v907_v33, %v908_v34  ;;  %v4618_v30 = vld [vmem:[%s7149_s0 + $0x48] ss:$144 sps:$4 sm:$0x1f]   ;;  %v962_v33 = vmax.bf16 %v4645_v3, %v386_v17  ;;  %v355_v34 = vld [vmem:[%s7148_s1 + $0x550] sm:$0xf] }
  0x91   :  { %4396 = vmatpush3.bf16.msra.mxu1 %v4051_v45  ;;  %4375 = vmatprep.subr.bf16.mxu0 %v4044_v49  ;;  %v892_v45 = vmax.bf16 %v4645_v3, %v316_v31  ;;  %v4047_v49 = vcombine.low %v875_v27, %v876_v28  ;;  %v4048_v2 = vcombine.low %v877_v50, %v878_v51  ;;  %v369_v28 = vld [vmem:[%s7148_s1 + $0x588] sm:$0xf]  ;;  %v357_v51 = vld [vmem:[%s7148_s1 + $0x558] sm:$0xf] }
  0x92   :  { %4397 = vmatprep.subr.bf16.mxu1 %v4060_v55  ;;  %v351_v55 = vld [vmem:[%s7148_s1 + $0x540] sm:$0xf]  ;;  %v4089_v31 = vcombine.low %v959_v10, %v960_v11  ;;  %v4081_v42 = vcombine.low %v943_v20, %v944_v21  ;;  %v945_v43 = vmax.bf16 %v4645_v3, %v369_v28  ;;  %v932_v50 = vmax.bf16 %v4645_v3, %v356_v35  ;;  %v4623_v58 = vld [vmem:[%s7149_s0 + $0x54] ss:$144 sps:$4 sm:$0x1f]  }
  0x93   :  { %v4055_v0 = vcombine.low %v891_v44, %v892_v45  ;;  %v927_v4 = vmax.bf16 %v4645_v3, %v351_v55  ;;  %v946_v44 = vmax.bf16 %v4645_v3, %v370_v29  ;;  %v340_v45 = vld [vmem:[%s7148_s1 + $0x514] sm:$0xf]  ;;  %v933_v8 = vmax.bf16 %v4645_v3, %v357_v51  ;;  %v359_v10 = vld [vmem:[%s7148_s1 + $0x560] sm:$0xf]  ;;  %v392_v20 = vld [vmem:[%s7148_s1 + $0x5e4] sm:$0xf] }
  0x94   :  { %4376 = vmatpush3.bf16.msra.mxu0 %v4036_v60  ;;  %v894_v60 = vmax.bf16 %v4645_v3, %v318_v48  ;;  %v916_v61 = vmax.bf16 %v4645_v3, %v340_v45  ;;  %v343_v21 = vld [vmem:[%s7148_s1 + $0x520] sm:$0xf]  ;;  %v376_v29 = vld [vmem:[%s7148_s1 + $0x5a4] sm:$0xf]  ;;  %v377_v45 = vld [vmem:[%s7148_s1 + $0x5a8] sm:$0xf] }
  0x95   :  { %4398 = vmatpush3.bf16.msra.mxu1 %v4052_v1  ;;  %4377 = vmatprep.subr.bf16.mxu0 %v4045_v9  ;;  %v335_v1 = vld [vmem:[%s7148_s1 + $0x500] sm:$0xf]  ;;  %v4064_v9 = vcombine.low %v909_v53, %v910_v54  ;;  %v4073_v25 = vcombine.low %v927_v4, %v928_v5  ;;  %v389_v53 = vld [vmem:[%s7148_s1 + $0x5d8] sm:$0xf]  ;;  %v342_v4 = vld [vmem:[%s7148_s1 + $0x51c] sm:$0xf] }
  0x96   :  { %4399 = vmatprep.subr.bf16.mxu1 %v4061_v13  ;;  %v354_v13 = vld [vmem:[%s7148_s1 + $0x54c] sm:$0xf]  ;;  %v4056_v15 = vcombine.low %v893_v59, %v894_v60  ;;  %v911_v18 = vmax.bf16 %v4645_v3, %v335_v1  ;;  %v915_v60 = vmax.bf16 %v4645_v3, %v339_v40  ;;  %v947_v1 = vmax.bf16 %v4645_v3, %v371_v46  ;;  %v373_v5 = vld [vmem:[%s7148_s1 + $0x598] sm:$0xf]  ;;  %v375_v28 = vld [vmem:[%s7148_s1 + $0x5a0] sm:$0xf] }
  0x97   :  { %v930_v27 = vmax.bf16 %v4645_v3, %v354_v13  ;;  %v966_v13 = vmax.bf16 %v4645_v3, %v390_v57  ;;  %v949_v17 = vmax.bf16 %v4645_v3, %v373_v5  ;;  %v919_v40 = vmax.bf16 %v4645_v3, %v343_v21  ;;  %v378_v46 = vld [vmem:[%s7148_s1 + $0x5ac] sm:$0xf]  ;;  %v379_v5 = vld [vmem:[%s7148_s1 + $0x5b0] sm:$0xf]  ;;  %v350_v21 = vld [vmem:[%s7148_s1 + $0x53c] sm:$0xf] }
  0x98   :  { %4378 = vmatpush3.bf16.msra.mxu0 %v4037_v23  ;;  %v338_v23 = vld [vmem:[%s7148_s1 + $0x50c] sm:$0xf]  ;;  %v4065_v41 = vcombine.low %v911_v18, %v912_v19  ;;  %v950_v18 = vmax.bf16 %v4645_v3, %v374_v6  ;;  %v391_v19 = vld [vmem:[%s7148_s1 + $0x5e0] sm:$0xf]  ;;  %v4067_v22 = vcombine.low %v915_v60, %v916_v61  ;;  %v953_v57 = vmax.bf16 %v4645_v3, %v377_v45  ;;  %v396_v60 = vld [vmem:[%s7148_s1 + $0x5f4] sm:$0xf] }
  0x99   :  { %4400 = vmatpush3.bf16.msra.mxu1 %v4053_v24  ;;  %4379 = vmatprep.subr.bf16.mxu0 %v4046_v26  ;;  %v4615_v24 = vld [vmem:[%s7149_s0 + $0x40] ss:$144 sps:$4 sm:$0x1f]   ;;  %v929_v26 = vmax.bf16 %v4645_v3, %v353_v12  ;;  %v965_v12 = vmax.bf16 %v4645_v3, %v389_v53  ;;  %v380_v6 = vld [vmem:[%s7148_s1 + $0x5b4] sm:$0xf] }
  0x9a   :  { %4401 = vmatprep.subr.bf16.mxu1 %v4062_v32  ;;  %v961_v32 = vmax.bf16 %v4645_v3, %v385_v16  ;;  %v918_v16 = vmax.bf16 %v4645_v3, %v342_v4  ;;  %v363_v53 = vld [vmem:[%s7148_s1 + $0x570] sm:$0xf]  ;;  %v348_v4 = vld [vmem:[%s7148_s1 + $0x534] sm:$0xf]  ;;  %v431_v45 = vld [vmem:[%s7148_s1 + $0x680] sm:$0xf] }
  0x9b   :  { %v4074_v48 = vcombine.low %v929_v26, %v930_v27  ;;  %v935_v26 = vmax.bf16 %v4645_v3, %v359_v10  ;;  %v365_v10 = vld [vmem:[%s7148_s1 + $0x578] sm:$0xf] }
  0x9c   :  { %4380 = vmatpush3.bf16.msra.mxu0 %v4038_v37  ;;  %v914_v37 = vmax.bf16 %v4645_v3, %v338_v23  ;;  %v4090_v54 = vcombine.low %v961_v32, %v962_v33  ;;  %v968_v32 = vmax.bf16 %v4645_v3, %v392_v20  ;;  %v361_v33 = vld [vmem:[%s7148_s1 + $0x568] sm:$0xf]  ;;  %v349_v20 = vld [vmem:[%s7148_s1 + $0x538] sm:$0xf] }
  0x9d   :  { %4402 = vmatpush3.bf16.msra.mxu1 %v4054_v38  ;;  %4381 = vmatprep.subr.bf16.mxu0 %v4047_v49  ;;  %v387_v38 = vld [vmem:[%s7148_s1 + $0x5d0] sm:$0xf]  ;;  %v931_v49 = vmax.bf16 %v4645_v3, %v355_v34  ;;  %v362_v34 = vld [vmem:[%s7148_s1 + $0x56c] sm:$0xf] }
  0x9e   :  { %4403 = vmatprep.subr.bf16.mxu1 %v4063_v52  ;;  %v358_v52 = vld [vmem:[%s7148_s1 + $0x55c] sm:$0xf]  ;;  %v963_v55 = vmax.bf16 %v4645_v3, %v387_v38  ;;  %v4066_v59 = vcombine.low %v913_v36, %v914_v37  ;;  %v4084_v36 = vcombine.low %v949_v17, %v950_v18  ;;  %v393_v37 = vld [vmem:[%s7148_s1 + $0x5e8] sm:$0xf]  ;;  %v394_v38 = vld [vmem:[%s7148_s1 + $0x5ec] sm:$0xf]  ;;  %v924_v17 = vmax.bf16 %v4645_v3, %v348_v4 }
  0x9f   :  { %v4075_v7 = vcombine.low %v931_v49, %v932_v50  ;;  %v938_v49 = vmax.bf16 %v4645_v3, %v362_v34  ;;  %v969_v51 = vmax.bf16 %v4645_v3, %v393_v37  ;;  %v955_v18 = vmax.bf16 %v4645_v3, %v379_v5  ;;  %v447_v34 = vld [vmem:[%s7148_s1 + $0x6c0] sm:$0xf]  ;;  %v419_v5 = vld [vmem:[%s7148_s1 + $0x650] sm:$0xf] }
  0xa0   :  { %4382 = vmatpush3.bf16.msra.mxu0 %v4039_v63  ;;  %v4626_v63 = vld [vmem:[%s7149_s0 + $0x5c] ss:$144 sps:$4 sm:$0x1f]   ;;  %v4091_v11 = vcombine.low %v963_v55, %v964_v56  ;;  %v921_v55 = vmax.bf16 %v4645_v3, %v345_v39 }
  0xa1   :  { %4404 = vmatpush3.bf16.msra.mxu1 %v4055_v0  ;;  %4383 = vmatprep.subr.bf16.mxu0 %v4048_v2  ;;  %v4082_v0 = vcombine.low %v945_v43, %v946_v44  ;;  %v948_v2 = vmax.bf16 %v4645_v3, %v372_v47  ;;  %v952_v43 = vmax.bf16 %v4645_v3, %v376_v29  ;;  %v346_v44 = vld [vmem:[%s7148_s1 + $0x52c] sm:$0xf] }
  0xa2   :  { %4405 = vmatprep.subr.bf16.mxu1 %v4064_v9  ;;  %v934_v9 = vmax.bf16 %v4645_v3, %v358_v52  ;;  %v970_v52 = vmax.bf16 %v4645_v3, %v394_v38  ;;  %v922_v56 = vmax.bf16 %v4645_v3, %v346_v44  ;;  %v400_v44 = vld [vmem:[%s7148_s1 + $0x604] sm:$0xf] }
  0xa3   :  { %v4083_v23 = vcombine.low %v947_v1, %v948_v2  ;;  %v939_v1 = vmax.bf16 %v4645_v3, %v363_v53 }
  0xa4   :  { %4384 = vmatpush3.bf16.msra.mxu0 %v4040_v14  ;;  %v360_v14 = vld [vmem:[%s7148_s1 + $0x564] sm:$0xf] }
  0xa5   :  { %4406 = vmatpush3.bf16.msra.mxu1 %v4056_v15  ;;  %4413 = vmatprep.subr.bf16.mxu0 %v4073_v25  ;;  %v917_v15 = vmax.bf16 %v4645_v3, %v341_v62  ;;  %v4076_v25 = vcombine.low %v933_v8, %v934_v9  ;;  %v936_v27 = vmax.bf16 %v4645_v3, %v360_v14  ;;  %v397_v14 = vld [vmem:[%s7148_s1 + $0x5f8] sm:$0xf] }
  0xa6   :  { %4435 = vmatprep.subr.bf16.mxu1 %v4089_v31  ;;  %v967_v31 = vmax.bf16 %v4645_v3, %v391_v19  ;;  %v972_v9 = vmax.bf16 %v4645_v3, %v396_v60  ;;  %v956_v19 = vmax.bf16 %v4645_v3, %v380_v6  ;;  %v420_v6 = vld [vmem:[%s7148_s1 + $0x654] sm:$0xf] }
  0xa7   :  { %3484 = vmatmul.mubr.bf16.vlgmr.msra.gmra.mrb[16].mxu0 %v4615_v24  ;;  %v344_v24 = vld [vmem:[%s7148_s1 + $0x524] sm:$0xf]  ;;  %v4068_v35 = vcombine.low %v917_v15, %v918_v16  ;;  %v4077_v47 = vcombine.low %v935_v26, %v936_v27  ;;  %v398_v15 = vld [vmem:[%s7148_s1 + $0x5fc] sm:$0xf] }
  0xa8   :  { %3525 = vmatmul.mubr.bf16.vlgmr.msra.gmra.mrb[16].mxu1 %v4618_v30  ;;  %4414 = vmatpush3.bf16.msra.mxu0 %v4065_v41  ;;  %v4092_v30 = vcombine.low %v965_v12, %v966_v13  ;;  %v920_v41 = vmax.bf16 %v4645_v3, %v344_v24  ;;  %v4093_v50 = vcombine.low %v967_v31, %v968_v32  ;;  %v382_v26 = vld [vmem:[%s7148_s1 + $0x5bc] sm:$0xf]  ;;  %v416_v31 = vld [vmem:[%s7148_s1 + $0x644] sm:$0xf] }
  0xa9   :  { %4436 = vmatpush3.bf16.msra.mxu1 %v4081_v42  ;;  %4415 = vmatprep.subr.bf16.mxu0 %v4074_v48  ;;  %v951_v42 = vmax.bf16 %v4645_v3, %v375_v28  ;;  %v937_v48 = vmax.bf16 %v4645_v3, %v361_v33  ;;  %v4070_v12 = vcombine.low %v921_v55, %v922_v56  ;;  %v450_v55 = vld [vmem:[%s7148_s1 + $0x6cc] sm:$0xf]  ;;  %v401_v56 = vld [vmem:[%s7148_s1 + $0x608] sm:$0xf] }
  0xaa   :  { %4437 = vmatprep.subr.bf16.mxu1 %v4090_v54  ;;  %3565 = vmatprep.mubr.bf16.mxu0 %v4623_v58  ;;  %v364_v54 = vld [vmem:[%s7148_s1 + $0x574] sm:$0xf]  ;;  %v954_v58 = vmax.bf16 %v4645_v3, %v378_v46  ;;  %v4069_v61 = vcombine.low %v919_v40, %v920_v41  ;;  %v973_v28 = vmax.bf16 %v4645_v3, %v397_v14  ;;  %v399_v40 = vld [vmem:[%s7148_s1 + $0x600] sm:$0xf]  ;;  %v432_v46 = vld [vmem:[%s7148_s1 + $0x684] sm:$0xf] }
  0xab   :  { %3606 = vmatprep.mubr.bf16.mxu1 %v4626_v63  ;;  %v4085_v62 = vcombine.low %v951_v42, %v952_v43  ;;  %v347_v63 = vld [vmem:[%s7148_s1 + $0x530] sm:$0xf]  ;;  %v940_v2 = vmax.bf16 %v4645_v3, %v364_v54  ;;  %v974_v29 = vmax.bf16 %v4645_v3, %v398_v15  ;;  %v925_v32 = vmax.bf16 %v4645_v3, %v349_v20  ;;  %v449_v54 = vld [vmem:[%s7148_s1 + $0x6c8] sm:$0xf] }
  0xac   :  { %4416 = vmatpush3.bf16.msra.mxu0 %v4066_v59  ;;  %v395_v59 = vld [vmem:[%s7148_s1 + $0x5f0] sm:$0xf]  ;;  %v4086_v13 = vcombine.low %v953_v57, %v954_v58  ;;  %v923_v16 = vmax.bf16 %v4645_v3, %v347_v63  ;;  %v926_v33 = vmax.bf16 %v4645_v3, %v350_v21  ;;  %v4087_v37 = vcombine.low %v955_v18, %v956_v19  ;;  %v434_v63 = vld [vmem:[%s7148_s1 + $0x68c] sm:$0xf]  ;;  %v404_v18 = vld [vmem:[%s7148_s1 + $0x614] sm:$0xf] }
  0xad   :  { %4438 = vmatpush3.bf16.msra.mxu1 %v4082_v0  ;;  %4417 = vmatprep.subr.bf16.mxu0 %v4075_v7  ;;  %v4078_v0 = vcombine.low %v937_v48, %v938_v49  ;;  %v4094_v7 = vcombine.low %v969_v51, %v970_v52  ;;  %v971_v8 = vmax.bf16 %v4645_v3, %v395_v59  ;;  %v418_v51 = vld [vmem:[%s7148_s1 + $0x64c] sm:$0xf]  ;;  %v435_v19 = vld [vmem:[%s7148_s1 + $0x690] sm:$0xf] }
  0xae   :  { %4439 = vmatprep.subr.bf16.mxu1 %v4091_v11  ;;  %v366_v11 = vld [vmem:[%s7148_s1 + $0x57c] sm:$0xf]  ;;  %v958_v39 = vmax.bf16 %v4645_v3, %v382_v26  ;;  %v992_v43 = vmax.bf16 %v4645_v3, %v416_v31  ;;  %v1023_v48 = vmax.bf16 %v4645_v3, %v447_v34  ;;  %v4072_v52 = vcombine.low %v925_v32, %v926_v33  ;;  %v421_v26 = vld [vmem:[%s7148_s1 + $0x658] sm:$0xf] }
  0xaf   :  { %v942_v24 = vmax.bf16 %v4645_v3, %v366_v11  ;;  %v4095_v27 = vcombine.low %v971_v8, %v972_v9  ;;  %v975_v53 = vmax.bf16 %v4645_v3, %v399_v40  ;;  %v976_v58 = vmax.bf16 %v4645_v3, %v400_v44  ;;  %v451_v11 = vld [vmem:[%s7148_s1 + $0x6d0] sm:$0xf]  ;;  %v454_v32 = vld [vmem:[%s7148_s1 + $0x6dc] sm:$0xf] }
  0xb0   :  { %4418 = vmatpush3.bf16.msra.mxu0 %v4067_v22  ;;  %v4079_v22 = vcombine.low %v939_v1, %v940_v2  ;;  %v1007_v59 = vmax.bf16 %v4645_v3, %v431_v45  ;;  %v1008_v60 = vmax.bf16 %v4645_v3, %v432_v46  ;;  %v994_v4 = vmax.bf16 %v4645_v3, %v418_v51  ;;  %v4629_v33 = vld [vmem:[%s7149_s0 + $0x64] ss:$144 sps:$4 sm:$0x1f]   ;;  %v438_v44 = vld [vmem:[%s7148_s1 + $0x69c] sm:$0xf] }
  0xb1   :  { %4440 = vmatpush3.bf16.msra.mxu1 %v4083_v23  ;;  %4419 = vmatprep.subr.bf16.mxu0 %v4076_v25  ;;  %v941_v23 = vmax.bf16 %v4645_v3, %v365_v10  ;;  %v381_v25 = vld [vmem:[%s7148_s1 + $0x5b8] sm:$0xf]  ;;  %v1025_v9 = vmax.bf16 %v4645_v3, %v449_v54  ;;  %v1026_v10 = vmax.bf16 %v4645_v3, %v450_v55  ;;  %v423_v51 = vld [vmem:[%s7148_s1 + $0x660] sm:$0xf] }
  0xb2   :  { %4441 = vmatprep.subr.bf16.mxu1 %v4092_v30  ;;  %v415_v30 = vld [vmem:[%s7148_s1 + $0x640] sm:$0xf]  ;;  %v957_v38 = vmax.bf16 %v4645_v3, %v381_v25  ;;  %v977_v14 = vmax.bf16 %v4645_v3, %v401_v56  ;;  %v4097_v20 = vcombine.low %v975_v53, %v976_v58  ;;  %v4113_v21 = vcombine.low %v1007_v59, %v1008_v60  ;;  %v456_v58 = vld [vmem:[%s7148_s1 + $0x6e4] sm:$0xf] }
  0xb3   :  { %v4080_v41 = vcombine.low %v941_v23, %v942_v24  ;;  %v991_v42 = vmax.bf16 %v4645_v3, %v415_v30  ;;  %v995_v24 = vmax.bf16 %v4645_v3, %v419_v5  ;;  %v996_v25 = vmax.bf16 %v4645_v3, %v420_v6 }
  0xb4   :  { %4420 = vmatpush3.bf16.msra.mxu0 %v4068_v35  ;;  %v448_v35 = vld [vmem:[%s7148_s1 + $0x6c4] sm:$0xf]  ;;  %v4088_v57 = vcombine.low %v957_v38, %v958_v39  ;;  %v1027_v30 = vmax.bf16 %v4645_v3, %v451_v11  ;;  %v4632_v38 = vld [vmem:[%s7149_s0 + $0x6c] ss:$144 sps:$4 sm:$0x1f]   ;;  %v980_v39 = vmax.bf16 %v4645_v3, %v404_v18  ;;  %v1011_v40 = vmax.bf16 %v4645_v3, %v435_v19 }
  0xb5   :  { %4442 = vmatpush3.bf16.msra.mxu1 %v4084_v36  ;;  %4421 = vmatprep.subr.bf16.mxu0 %v4077_v47  ;;  %v4071_v36 = vcombine.low %v923_v16, %v924_v17  ;;  %v4096_v47 = vcombine.low %v973_v28, %v974_v29  ;;  %v1024_v49 = vmax.bf16 %v4645_v3, %v448_v35  ;;  %v453_v28 = vld [vmem:[%s7148_s1 + $0x6d8] sm:$0xf]  ;;  %v410_v19 = vld [vmem:[%s7148_s1 + $0x62c] sm:$0xf] }
  0xb6   :  { %4443 = vmatprep.subr.bf16.mxu1 %v4093_v50  ;;  %v417_v50 = vld [vmem:[%s7148_s1 + $0x648] sm:$0xf]  ;;  %v4105_v1 = vcombine.low %v991_v42, %v992_v43  ;;  %v1010_v17 = vmax.bf16 %v4645_v3, %v434_v63  ;;  %v4122_v29 = vcombine.low %v1025_v9, %v1026_v10  ;;  %v406_v42 = vld [vmem:[%s7148_s1 + $0x61c] sm:$0xf]  ;;  %v437_v43 = vld [vmem:[%s7148_s1 + $0x698] sm:$0xf]  ;;  %v4107_v45 = vcombine.low %v995_v24, %v996_v25 }
  0xb7   :  { %v993_v2 = vmax.bf16 %v4645_v3, %v417_v50  ;;  %v4121_v8 = vcombine.low %v1023_v48, %v1024_v49  ;;  %v997_v46 = vmax.bf16 %v4645_v3, %v421_v26  ;;  %v1029_v49 = vmax.bf16 %v4645_v3, %v453_v28  ;;  %v426_v9 = vld [vmem:[%s7148_s1 + $0x66c] sm:$0xf]  ;;  %v427_v25 = vld [vmem:[%s7148_s1 + $0x670] sm:$0xf]  ;;  %v428_v26 = vld [vmem:[%s7148_s1 + $0x674] sm:$0xf] }
  0xb8   :  { %4422 = vmatpush3.bf16.msra.mxu0 %v4069_v61  ;;  %v402_v61 = vld [vmem:[%s7148_s1 + $0x60c] sm:$0xf]  ;;  %v1030_v50 = vmax.bf16 %v4645_v3, %v454_v32  ;;  %v982_v54 = vmax.bf16 %v4645_v3, %v406_v42  ;;  %v1013_v55 = vmax.bf16 %v4645_v3, %v437_v43  ;;  %v1014_v56 = vmax.bf16 %v4645_v3, %v438_v44 }
  0xb9   :  { %4444 = vmatpush3.bf16.msra.mxu1 %v4085_v62  ;;  %4423 = vmatprep.subr.bf16.mxu0 %v4078_v0  ;;  %v433_v62 = vld [vmem:[%s7148_s1 + $0x688] sm:$0xf]  ;;  %v4621_v0 = vld [vmem:[%s7149_s0 + $0x50] ss:$144 sps:$4 sm:$0x1f]   ;;  %v978_v15 = vmax.bf16 %v4645_v3, %v402_v61  ;;  %v4106_v23 = vcombine.low %v993_v2, %v994_v4  ;;  %v999_v63 = vmax.bf16 %v4645_v3, %v423_v51 }
  0xba   :  { %4445 = vmatprep.subr.bf16.mxu1 %v4094_v7  ;;  %v4624_v7 = vld [vmem:[%s7149_s0 + $0x58] ss:$144 sps:$4 sm:$0x1f]   ;;  %v1009_v16 = vmax.bf16 %v4645_v3, %v433_v62  ;;  %v407_v61 = vld [vmem:[%s7148_s1 + $0x620] sm:$0xf]  ;;  %v4124_v5 = vcombine.low %v1029_v49, %v1030_v50  ;;  %v4116_v11 = vcombine.low %v1013_v55, %v1014_v56  ;;  %v1002_v24 = vmax.bf16 %v4645_v3, %v426_v9 }
  0xbb   :  { %v4098_v34 = vcombine.low %v977_v14, %v978_v15  ;;  %v439_v2 = vld [vmem:[%s7148_s1 + $0x6a0] sm:$0xf]  ;;  %v440_v4 = vld [vmem:[%s7148_s1 + $0x6a4] sm:$0xf]  ;;  %v409_v14 = vld [vmem:[%s7148_s1 + $0x628] sm:$0xf]  ;;  %v983_v15 = vmax.bf16 %v4645_v3, %v407_v61 }
  0xbc   :  { %4424 = vmatpush3.bf16.msra.mxu0 %v4070_v12  ;;  %v452_v12 = vld [vmem:[%s7148_s1 + $0x6d4] sm:$0xf]  ;;  %v4114_v35 = vcombine.low %v1009_v16, %v1010_v17  ;;  %v1015_v17 = vmax.bf16 %v4645_v3, %v439_v2  ;;  %v1016_v18 = vmax.bf16 %v4645_v3, %v440_v4  ;;  %v985_v32 = vmax.bf16 %v4645_v3, %v409_v14  ;;  %v430_v49 = vld [vmem:[%s7148_s1 + $0x67c] sm:$0xf]  ;;  %v461_v50 = vld [vmem:[%s7148_s1 + $0x6f8] sm:$0xf] }
  0xbd   :  { %4446 = vmatpush3.bf16.msra.mxu1 %v4086_v13  ;;  %4425 = vmatprep.subr.bf16.mxu0 %v4079_v22  ;;  %v403_v13 = vld [vmem:[%s7148_s1 + $0x610] sm:$0xf]  ;;  %v436_v22 = vld [vmem:[%s7148_s1 + $0x694] sm:$0xf]  ;;  %v1028_v31 = vmax.bf16 %v4645_v3, %v452_v12  ;;  %v457_v12 = vld [vmem:[%s7148_s1 + $0x6e8] sm:$0xf]  ;;  %v1006_v4 = vmax.bf16 %v4645_v3, %v430_v49 }
  0xbe   :  { %4447 = vmatprep.subr.bf16.mxu1 %v4095_v27  ;;  %v422_v27 = vld [vmem:[%s7148_s1 + $0x65c] sm:$0xf]  ;;  %v1033_v28 = vmax.bf16 %v4645_v3, %v457_v12  ;;  %v413_v55 = vld [vmem:[%s7148_s1 + $0x638] sm:$0xf]  ;;  %v511_v9 = vld [vmem:[%s7148_s1 + $0x7c0] sm:$0xf] }
  0xbf   :  { %v4123_v48 = vcombine.low %v1027_v30, %v1028_v31  ;;  %v459_v30 = vld [vmem:[%s7148_s1 + $0x6f0] sm:$0xf]  ;;  %v460_v31 = vld [vmem:[%s7148_s1 + $0x6f4] sm:$0xf]  ;;  %v462_v51 = vld [vmem:[%s7148_s1 + $0x6fc] sm:$0xf] }
  0xc0   :  { %4426 = vmatpush3.bf16.msra.mxu0 %v4071_v36  ;;  %v979_v36 = vmax.bf16 %v4645_v3, %v403_v13  ;;  %v458_v13 = vld [vmem:[%s7148_s1 + $0x6ec] sm:$0xf]  ;;  %v1035_v43 = vmax.bf16 %v4645_v3, %v459_v30  ;;  %v1036_v44 = vmax.bf16 %v4645_v3, %v460_v31  ;;  %v414_v56 = vld [vmem:[%s7148_s1 + $0x63c] sm:$0xf]  ;;  %v483_v49 = vld [vmem:[%s7148_s1 + $0x750] sm:$0xf] }
  0xc1   :  { %4448 = vmatpush3.bf16.msra.mxu1 %v4087_v37  ;;  %4427 = vmatprep.subr.bf16.mxu0 %v4080_v41  ;;  %v405_v37 = vld [vmem:[%s7148_s1 + $0x618] sm:$0xf]  ;;  %v1012_v41 = vmax.bf16 %v4645_v3, %v436_v22  ;;  %v514_v31 = vld [vmem:[%s7148_s1 + $0x7cc] sm:$0xf] }
  0xc2   :  { %4449 = vmatprep.subr.bf16.mxu1 %v4096_v47  ;;  %v998_v47 = vmax.bf16 %v4645_v3, %v422_v27  ;;  %v981_v53 = vmax.bf16 %v4645_v3, %v405_v37  ;;  %v4099_v59 = vcombine.low %v979_v36, %v980_v39  ;;  %v4117_v37 = vcombine.low %v1015_v17, %v1016_v18  ;;  %v463_v17 = vld [vmem:[%s7148_s1 + $0x700] sm:$0xf]  ;;  %v464_v18 = vld [vmem:[%s7148_s1 + $0x704] sm:$0xf] }
  0xc3   :  { %v4115_v60 = vcombine.low %v1011_v40, %v1012_v41  ;;  %v1004_v39 = vmax.bf16 %v4645_v3, %v428_v26  ;;  %v411_v40 = vld [vmem:[%s7148_s1 + $0x630] sm:$0xf]  ;;  %v412_v41 = vld [vmem:[%s7148_s1 + $0x634] sm:$0xf]  ;;  %v482_v26 = vld [vmem:[%s7148_s1 + $0x74c] sm:$0xf] }
  0xc4   :  { %4428 = vmatpush3.bf16.msra.mxu0 %v4072_v52  ;;  %v424_v52 = vld [vmem:[%s7148_s1 + $0x664] sm:$0xf]  ;;  %v4108_v62 = vcombine.low %v997_v46, %v998_v47  ;;  %v4100_v10 = vcombine.low %v981_v53, %v982_v54  ;;  %v444_v46 = vld [vmem:[%s7148_s1 + $0x6b4] sm:$0xf]  ;;  %v429_v47 = vld [vmem:[%s7148_s1 + $0x678] sm:$0xf]  ;;  %v987_v54 = vmax.bf16 %v4645_v3, %v411_v40 }
  0xc5   :  { %4450 = vmatpush3.bf16.msra.mxu1 %v4088_v57  ;;  %4457 = vmatprep.subr.bf16.mxu0 %v4105_v1  ;;  %v455_v57 = vld [vmem:[%s7148_s1 + $0x6e0] sm:$0xf]  ;;  %v408_v1 = vld [vmem:[%s7148_s1 + $0x624] sm:$0xf]  ;;  %v1020_v61 = vmax.bf16 %v4645_v3, %v444_v46  ;;  %v1005_v2 = vmax.bf16 %v4645_v3, %v429_v47  ;;  %v1090_v46 = vmax.bf16 %v4645_v3, %v514_v31 }
  0xc6   :  { %4479 = vmatprep.subr.bf16.mxu1 %v4121_v8  ;;  %v1031_v6 = vmax.bf16 %v4645_v3, %v455_v57  ;;  %v425_v8 = vld [vmem:[%s7148_s1 + $0x668] sm:$0xf]  ;;  %v984_v16 = vmax.bf16 %v4645_v3, %v408_v1  ;;  %v445_v57 = vld [vmem:[%s7148_s1 + $0x6b8] sm:$0xf]  ;;  %v4127_v1 = vcombine.low %v1035_v43, %v1036_v44  ;;  %v498_v43 = vld [vmem:[%s7148_s1 + $0x78c] sm:$0xf] }
  0xc7   :  { %3566 = vmatmul.mubr.bf16.vlgmr.msra.gmra.mrb[20].mxu0 %v4621_v0  ;;  %v1000_v0 = vmax.bf16 %v4645_v3, %v424_v52  ;;  %v4630_v44 = vld [vmem:[%s7149_s0 + $0x68] ss:$144 sps:$4 sm:$0x1f]  }
  0xc8   :  { %3607 = vmatmul.mubr.bf16.vlgmr.msra.gmra.mrb[20].mxu1 %v4624_v7  ;;  %4458 = vmatpush3.bf16.msra.mxu0 %v4097_v20  ;;  %v1032_v7 = vmax.bf16 %v4645_v3, %v456_v58  ;;  %v441_v20 = vld [vmem:[%s7148_s1 + $0x6a8] sm:$0xf]  ;;  %v4101_v36 = vcombine.low %v983_v15, %v984_v16 }
  0xc9   :  { %4480 = vmatpush3.bf16.msra.mxu1 %v4113_v21  ;;  %4459 = vmatprep.subr.bf16.mxu0 %v4106_v23  ;;  %v442_v21 = vld [vmem:[%s7148_s1 + $0x6ac] sm:$0xf]  ;;  %v4109_v22 = vcombine.low %v999_v63, %v1000_v0  ;;  %v1001_v23 = vmax.bf16 %v4645_v3, %v425_v8  ;;  %v479_v63 = vld [vmem:[%s7148_s1 + $0x740] sm:$0xf]  ;;  %v480_v0 = vld [vmem:[%s7148_s1 + $0x744] sm:$0xf]  ;;  %v990_v8 = vmax.bf16 %v4645_v3, %v414_v56 }
  0xca   :  { %4481 = vmatprep.subr.bf16.mxu1 %v4122_v29  ;;  %3647 = vmatprep.mubr.bf16.mxu0 %v4629_v33  ;;  %v4125_v27 = vcombine.low %v1031_v6, %v1032_v7  ;;  %v1034_v29 = vmax.bf16 %v4645_v3, %v458_v13  ;;  %v986_v33 = vmax.bf16 %v4645_v3, %v410_v19 }
  0xcb   :  { %3688 = vmatprep.mubr.bf16.mxu1 %v4632_v38  ;;  %v1003_v38 = vmax.bf16 %v4645_v3, %v427_v25  ;;  %v4110_v42 = vcombine.low %v1001_v23, %v1002_v24  ;;  %v1038_v6 = vmax.bf16 %v4645_v3, %v462_v51  ;;  %v989_v7 = vmax.bf16 %v4645_v3, %v413_v55  ;;  %v496_v23 = vld [vmem:[%s7148_s1 + $0x784] sm:$0xf]  ;;  %v481_v25 = vld [vmem:[%s7148_s1 + $0x748] sm:$0xf]  ;;  %v515_v51 = vld [vmem:[%s7148_s1 + $0x7d0] sm:$0xf] }
  0xcc   :  { %4460 = vmatpush3.bf16.msra.mxu0 %v4098_v34  ;;  %v1017_v34 = vmax.bf16 %v4645_v3, %v441_v20  ;;  %v4102_v52 = vcombine.low %v985_v32, %v986_v33  ;;  %v1055_v13 = vmax.bf16 %v4645_v3, %v479_v63  ;;  %v1056_v14 = vmax.bf16 %v4645_v3, %v480_v0  ;;  %v465_v32 = vld [vmem:[%s7148_s1 + $0x708] sm:$0xf]  ;;  %v466_v33 = vld [vmem:[%s7148_s1 + $0x70c] sm:$0xf]  ;;  %v485_v0 = vld [vmem:[%s7148_s1 + $0x758] sm:$0xf] }
  0xcd   :  { %4482 = vmatpush3.bf16.msra.mxu1 %v4114_v35  ;;  %4461 = vmatprep.subr.bf16.mxu0 %v4107_v45  ;;  %v1018_v35 = vmax.bf16 %v4645_v3, %v442_v21  ;;  %v443_v45 = vld [vmem:[%s7148_s1 + $0x6b0] sm:$0xf]  ;;  %v4111_v58 = vcombine.low %v1003_v38, %v1004_v39  ;;  %v4112_v19 = vcombine.low %v1005_v2, %v1006_v4  ;;  %v517_v2 = vld [vmem:[%s7148_s1 + $0x7d8] sm:$0xf] }
  0xce   :  { %4483 = vmatprep.subr.bf16.mxu1 %v4123_v48  ;;  %v4126_v48 = vcombine.low %v1033_v28, %v1034_v29  ;;  %v1087_v20 = vmax.bf16 %v4645_v3, %v511_v9  ;;  %v4104_v28 = vcombine.low %v989_v7, %v990_v8  ;;  %v4137_v30 = vcombine.low %v1055_v13, %v1056_v14  ;;  %v4627_v38 = vld [vmem:[%s7149_s0 + $0x60] ss:$144 sps:$4 sm:$0x1f]   ;;  %v518_v8 = vld [vmem:[%s7148_s1 + $0x7dc] sm:$0xf] }
  0xcf   :  { %v4118_v53 = vcombine.low %v1017_v34, %v1018_v35  ;;  %v1039_v34 = vmax.bf16 %v4645_v3, %v463_v17  ;;  %v1040_v35 = vmax.bf16 %v4645_v3, %v464_v18  ;;  %v1057_v40 = vmax.bf16 %v4645_v3, %v481_v25  ;;  %v4635_v9 = vld [vmem:[%s7149_s0 + $0x74] ss:$144 sps:$4 sm:$0x1f]   ;;  %v4638_v14 = vld [vmem:[%s7149_s0 + $0x7c] ss:$144 sps:$4 sm:$0x1f]  }
  0xd0   :  { %4462 = vmatpush3.bf16.msra.mxu0 %v4099_v59  ;;  %v988_v59 = vmax.bf16 %v4645_v3, %v412_v41  ;;  %v1058_v41 = vmax.bf16 %v4645_v3, %v482_v26  ;;  %v6613_v47 = vmax.bf16 %v4645_v3, %v465_v32  ;;  %v469_v18 = vld [vmem:[%s7148_s1 + $0x718] sm:$0xf]  ;;  %v487_v25 = vld [vmem:[%s7148_s1 + $0x760] sm:$0xf] }
  0xd1   :  { %4484 = vmatpush3.bf16.msra.mxu1 %v4115_v60  ;;  %4463 = vmatprep.subr.bf16.mxu0 %v4108_v62  ;;  %v1019_v60 = vmax.bf16 %v4645_v3, %v443_v45  ;;  %v446_v62 = vld [vmem:[%s7148_s1 + $0x6bc] sm:$0xf]  ;;  %v1045_v32 = vmax.bf16 %v4645_v3, %v469_v18 }
  0xd2   :  { %4485 = vmatprep.subr.bf16.mxu1 %v4124_v5  ;;  %v1037_v5 = vmax.bf16 %v4645_v3, %v461_v50  ;;  %v1022_v12 = vmax.bf16 %v4645_v3, %v446_v62  ;;  %v4103_v15 = vcombine.low %v987_v54, %v988_v59  ;;  %v484_v50 = vld [vmem:[%s7148_s1 + $0x754] sm:$0xf]  ;;  %v4129_v54 = vcombine.low %v1039_v34, %v1040_v35  ;;  %v499_v59 = vld [vmem:[%s7148_s1 + $0x790] sm:$0xf]  ;;  %v472_v34 = vld [vmem:[%s7148_s1 + $0x724] sm:$0xf] }
  0xd3   :  { %v4119_v16 = vcombine.low %v1019_v60, %v1020_v61  ;;  %v500_v60 = vld [vmem:[%s7148_s1 + $0x794] sm:$0xf]  ;;  %v4138_v61 = vcombine.low %v1057_v40, %v1058_v41  ;;  %v1059_v62 = vmax.bf16 %v4645_v3, %v483_v49  ;;  %v1060_v63 = vmax.bf16 %v4645_v3, %v484_v50  ;;  %v503_v35 = vld [vmem:[%s7148_s1 + $0x7a0] sm:$0xf]  ;;  %v504_v40 = vld [vmem:[%s7148_s1 + $0x7a4] sm:$0xf] }
  0xd4   :  { %4464 = vmatpush3.bf16.msra.mxu0 %v4100_v10  ;;  %v512_v10 = vld [vmem:[%s7148_s1 + $0x7c4] sm:$0xf]  ;;  %v4128_v24 = vcombine.low %v1037_v5, %v1038_v6  ;;  %v1091_v6 = vmax.bf16 %v4645_v3, %v515_v51  ;;  %v1076_v13 = vmax.bf16 %v4645_v3, %v500_v60  ;;  %v489_v41 = vld [vmem:[%s7148_s1 + $0x768] sm:$0xf]  ;;  %v1048_v51 = vmax.bf16 %v4645_v3, %v472_v34  ;;  %v474_v60 = vld [vmem:[%s7148_s1 + $0x72c] sm:$0xf] }
  0xd5   :  { %4486 = vmatpush3.bf16.msra.mxu1 %v4116_v11  ;;  %4465 = vmatprep.subr.bf16.mxu0 %v4109_v22  ;;  %v1021_v11 = vmax.bf16 %v4645_v3, %v445_v57  ;;  %v1088_v21 = vmax.bf16 %v4645_v3, %v512_v10  ;;  %v495_v22 = vld [vmem:[%s7148_s1 + $0x780] sm:$0xf]  ;;  %v1074_v57 = vmax.bf16 %v4645_v3, %v498_v43 }
  0xd6   :  { %4487 = vmatprep.subr.bf16.mxu1 %v4125_v27  ;;  %v513_v27 = vld [vmem:[%s7148_s1 + $0x7c8] sm:$0xf] }
  0xd7   :  { %v4120_v29 = vcombine.low %v1021_v11, %v1022_v12  ;;  %v4153_v39 = vcombine.low %v1087_v20, %v1088_v21  ;;  %v1089_v45 = vmax.bf16 %v4645_v3, %v513_v27  ;;  %v6668_v12 = vmax.bf16 %v4645_v3, %v499_v59  ;;  %v488_v27 = vld [vmem:[%s7148_s1 + $0x764] sm:$0xf] }
  0xd8   :  { %4466 = vmatpush3.bf16.msra.mxu0 %v4101_v36  ;;  %v1071_v36 = vmax.bf16 %v4645_v3, %v495_v22  ;;  %v4139_v20 = vcombine.low %v1059_v62, %v1060_v63  ;;  %v1093_v21 = vmax.bf16 %v4645_v3, %v517_v2  ;;  %v1094_v22 = vmax.bf16 %v4645_v3, %v518_v8  ;;  %v506_v62 = vld [vmem:[%s7148_s1 + $0x7ac] sm:$0xf]  ;;  %v492_v2 = vld [vmem:[%s7148_s1 + $0x774] sm:$0xf]  ;;  %v475_v8 = vld [vmem:[%s7148_s1 + $0x730] sm:$0xf] }
  0xd9   :  { %4488 = vmatpush3.bf16.msra.mxu1 %v4117_v37  ;;  %4467 = vmatprep.subr.bf16.mxu0 %v4110_v42  ;;  %v1072_v37 = vmax.bf16 %v4645_v3, %v496_v23  ;;  %v497_v42 = vld [vmem:[%s7148_s1 + $0x788] sm:$0xf]  ;;  %v4154_v4 = vcombine.low %v1089_v45, %v1090_v46  ;;  %v501_v23 = vld [vmem:[%s7148_s1 + $0x798] sm:$0xf]  ;;  %v4147_v31 = vcombine.low %v6668_v12, %v1076_v13 }
  0xda   :  { %4489 = vmatprep.subr.bf16.mxu1 %v4126_v48  ;;  %v6616_v48 = vmax.bf16 %v4645_v3, %v466_v33  ;;  %v1073_v56 = vmax.bf16 %v4645_v3, %v497_v42  ;;  %v471_v33 = vld [vmem:[%s7148_s1 + $0x720] sm:$0xf]  ;;  %v490_v42 = vld [vmem:[%s7148_s1 + $0x76c] sm:$0xf]  ;;  %v4156_v43 = vcombine.low %v1093_v21, %v1094_v22  ;;  %v1064_v45 = vmax.bf16 %v4645_v3, %v488_v27  ;;  %v521_v46 = vld [vmem:[%s7148_s1 + $0x7e8] sm:$0xf] }
  0xdb   :  { %v4145_v55 = vcombine.low %v1071_v36, %v1072_v37  ;;  %v1047_v50 = vmax.bf16 %v4645_v3, %v471_v33  ;;  %v1050_v13 = vmax.bf16 %v4645_v3, %v474_v60  ;;  %v494_v22 = vld [vmem:[%s7148_s1 + $0x77c] sm:$0xf] }
  0xdc   :  { %4468 = vmatpush3.bf16.msra.mxu0 %v4102_v52  ;;  %v516_v52 = vld [vmem:[%s7148_s1 + $0x7d4] sm:$0xf]  ;;  %v4130_v5 = vcombine.low %v6613_v47, %v6616_v48  ;;  %v522_v47 = vld [vmem:[%s7148_s1 + $0x7ec] sm:$0xf]  ;;  %v6817_v33 = vmax.bf16 %v4645_v3, %v494_v22 }
  0xdd   :  { %4490 = vmatpush3.bf16.msra.mxu1 %v4118_v53  ;;  %4469 = vmatprep.subr.bf16.mxu0 %v4111_v58  ;;  %v467_v53 = vld [vmem:[%s7148_s1 + $0x710] sm:$0xf]  ;;  %v468_v58 = vld [vmem:[%s7148_s1 + $0x714] sm:$0xf]  ;;  %v1092_v7 = vmax.bf16 %v4645_v3, %v516_v52  ;;  %v1079_v52 = vmax.bf16 %v4645_v3, %v503_v35  ;;  %v1098_v59 = vmax.bf16 %v4645_v3, %v522_v47  ;;  %v578_v22 = vld [vmem:[%s7148_s1 + $0x8cc] sm:$0xf] }
  0xde   :  { %4491 = vmatprep.subr.bf16.mxu1 %v4127_v1  ;;  %v486_v1 = vld [vmem:[%s7148_s1 + $0x75c] sm:$0xf]  ;;  %v1043_v10 = vmax.bf16 %v4645_v3, %v467_v53  ;;  %v1044_v11 = vmax.bf16 %v4645_v3, %v468_v58  ;;  %v1080_v53 = vmax.bf16 %v4645_v3, %v504_v40  ;;  %v1097_v58 = vmax.bf16 %v4645_v3, %v521_v46 }
  0xdf   :  { %v1062_v17 = vmax.bf16 %v4645_v3, %v486_v1  ;;  %v4155_v26 = vcombine.low %v1091_v6, %v1092_v7  ;;  %v491_v1 = vld [vmem:[%s7148_s1 + $0x770] sm:$0xf]  ;;  %v4133_v6 = vcombine.low %v1047_v50, %v1048_v51  ;;  %v524_v7 = vld [vmem:[%s7148_s1 + $0x7f4] sm:$0xf]  ;;  %v575_v50 = vld [vmem:[%s7148_s1 + $0x8c0] sm:$0xf] }
  0xe0   :  { %4470 = vmatpush3.bf16.msra.mxu0 %v4103_v15  ;;  %v4146_v15 = vcombine.low %v1073_v56, %v1074_v57  ;;  %v473_v56 = vld [vmem:[%s7148_s1 + $0x728] sm:$0xf]  ;;  %v4158_v18 = vcombine.low %v1097_v58, %v1098_v59  ;;  %v1067_v21 = vmax.bf16 %v4645_v3, %v491_v1  ;;  %v1100_v27 = vmax.bf16 %v4645_v3, %v524_v7  ;;  %v576_v51 = vld [vmem:[%s7148_s1 + $0x8c4] sm:$0xf]  ;;  %v527_v58 = vld [vmem:[%s7148_s1 + $0x800] sm:$0xf] }
  0xe1   :  { %4492 = vmatpush3.bf16.msra.mxu1 %v4119_v16  ;;  %4471 = vmatprep.subr.bf16.mxu0 %v4112_v19  ;;  %v1061_v16 = vmax.bf16 %v4645_v3, %v485_v0  ;;  %v470_v19 = vld [vmem:[%s7148_s1 + $0x71c] sm:$0xf]  ;;  %v1049_v12 = vmax.bf16 %v4645_v3, %v473_v56  ;;  %v528_v59 = vld [vmem:[%s7148_s1 + $0x804] sm:$0xf] }
  0xe2   :  { %4493 = vmatprep.subr.bf16.mxu1 %v4128_v24  ;;  %v502_v24 = vld [vmem:[%s7148_s1 + $0x79c] sm:$0xf]  ;;  %v1046_v37 = vmax.bf16 %v4645_v3, %v470_v19 }
  0xe3   :  { %v4140_v36 = vcombine.low %v1061_v16, %v1062_v17  ;;  %v493_v16 = vld [vmem:[%s7148_s1 + $0x778] sm:$0xf]  ;;  %v6784_v17 = vpop.permute.xlu0 %1207 }
  0xe4   :  { %4472 = vmatpush3.bf16.msra.mxu0 %v4104_v28  ;;  %v519_v28 = vld [vmem:[%s7148_s1 + $0x7e0] sm:$0xf]  ;;  %v4132_v57 = vcombine.low %v1045_v32, %v1046_v37  ;;  %v6814_v32 = vmax.bf16 %v4645_v3, %v493_v16  ;;  %v4134_v37 = vcombine.low %v1049_v12, %v1050_v13  ;;  %v1152_v13 = vmax.bf16 %v4645_v3, %v576_v51  ;;  %v546_v16 = vld [vmem:[%s7148_s1 + $0x84c] sm:$0xf]  ;;  %v532_v51 = vld [vmem:[%s7148_s1 + $0x814] sm:$0xf] }
  0xe5   :  { %4494 = vmatpush3.bf16.msra.mxu1 %v4120_v29  ;;  %4501 = vmatprep.subr.bf16.mxu0 %v4137_v30  ;;  %v520_v29 = vld [vmem:[%s7148_s1 + $0x7e4] sm:$0xf]  ;;  %v4131_v30 = vcombine.low %v1043_v10, %v1044_v11  ;;  %v1095_v48 = vmax.bf16 %v4645_v3, %v519_v28  ;;  %v4149_v10 = vcombine.low %v1079_v52, %v1080_v53 }
  0xe6   :  { %4523 = vmatprep.subr.bf16.mxu1 %v4153_v39  ;;  %v1078_v39 = vmax.bf16 %v4645_v3, %v502_v24  ;;  %v1096_v49 = vmax.bf16 %v4645_v3, %v520_v29  ;;  %v526_v24 = vld [vmem:[%s7148_s1 + $0x7fc] sm:$0xf]  ;;  %v6802_v28 = vmax.bf16 %v4645_v3, %v475_v8 }
  0xe7   :  { %3648 = vmatmul.mubr.bf16.vlgmr.msra.gmra.mrb[24].mxu0 %v4627_v38  ;;  %v1077_v38 = vmax.bf16 %v4645_v3, %v501_v23  ;;  %v525_v23 = vld [vmem:[%s7148_s1 + $0x7f8] sm:$0xf]  ;;  %v6823_v35 = vmax.bf16 %v4645_v3, %v526_v24  ;;  %v1213_v46 = vpop.permute.xlu0 %1212 }
  0xe8   :  { %3689 = vmatmul.mubr.bf16.vlgmr.msra.gmra.mrb[24].mxu1 %v4630_v44  ;;  %4502 = vmatpush3.bf16.msra.mxu0 %v4129_v54  ;;  %v1063_v44 = vmax.bf16 %v4645_v3, %v487_v25  ;;  %v1065_v54 = vmax.bf16 %v4645_v3, %v489_v41  ;;  %v1068_v25 = vmax.bf16 %v4645_v3, %v492_v2  ;;  %v559_v2 = vld [vmem:[%s7148_s1 + $0x880] sm:$0xf] }
  0xe9   :  { %4524 = vmatpush3.bf16.msra.mxu1 %v4145_v55  ;;  %4503 = vmatprep.subr.bf16.mxu0 %v4138_v61  ;;  %v1066_v55 = vmax.bf16 %v4645_v3, %v490_v42  ;;  %v505_v61 = vld [vmem:[%s7148_s1 + $0x7a8] sm:$0xf]  ;;  %v4148_v63 = vcombine.low %v1077_v38, %v1078_v39  ;;  %v6820_v34 = vmax.bf16 %v4645_v3, %v525_v23  ;;  %v478_v38 = vld [vmem:[%s7148_s1 + $0x73c] sm:$0xf]  ;;  %v509_v39 = vld [vmem:[%s7148_s1 + $0x7b8] sm:$0xf] }
  0xea   :  { %4525 = vmatprep.subr.bf16.mxu1 %v4154_v4  ;;  %3729 = vmatprep.mubr.bf16.mxu0 %v4635_v9  ;;  %v4141_v0 = vcombine.low %v1063_v44, %v1064_v45  ;;  %v523_v4 = vld [vmem:[%s7148_s1 + $0x7f0] sm:$0xf]  ;;  %v476_v9 = vld [vmem:[%s7148_s1 + $0x734] sm:$0xf]  ;;  %v1081_v19 = vmax.bf16 %v4645_v3, %v505_v61  ;;  %v4143_v41 = vcombine.low %v1067_v21, %v1068_v25  ;;  %v510_v42 = vld [vmem:[%s7148_s1 + $0x7bc] sm:$0xf] }
  0xeb   :  { %3770 = vmatprep.mubr.bf16.mxu1 %v4638_v14  ;;  %v4142_v11 = vcombine.low %v1065_v54, %v1066_v55  ;;  %v507_v14 = vld [vmem:[%s7148_s1 + $0x7b0] sm:$0xf]  ;;  %v6805_v29 = vmax.bf16 %v4645_v3, %v476_v9  ;;  %v544_v44 = vld [vmem:[%s7148_s1 + $0x844] sm:$0xf]  ;;  %v4144_v55 = vcombine.low %v6814_v32, %v6817_v33  ;;  %v4160_v56 = vcombine.low %v6820_v34, %v6823_v35  ;;  %v577_v21 = vld [vmem:[%s7148_s1 + $0x8c8] sm:$0xf] }
  0xec   :  { %4504 = vmatpush3.bf16.msra.mxu0 %v4130_v5  ;;  %v4157_v5 = vcombine.low %v1095_v48, %v1096_v49  ;;  %v1120_v8 = vmax.bf16 %v4645_v3, %v544_v44  ;;  %v1151_v9 = vmax.bf16 %v4645_v3, %v575_v50  ;;  %v530_v32 = vld [vmem:[%s7148_s1 + $0x80c] sm:$0xf]  ;;  %v561_v33 = vld [vmem:[%s7148_s1 + $0x888] sm:$0xf]  ;;  %v579_v44 = vld [vmem:[%s7148_s1 + $0x8d0] sm:$0xf] }
  0xed   :  { %4526 = vmatpush3.bf16.msra.mxu1 %v4146_v15  ;;  %4505 = vmatprep.subr.bf16.mxu0 %v4139_v20  ;;  %v508_v15 = vld [vmem:[%s7148_s1 + $0x7b4] sm:$0xf]  ;;  %v1082_v20 = vmax.bf16 %v4645_v3, %v506_v62  ;;  %v4135_v48 = vcombine.low %v6802_v28, %v6805_v29  ;;  %v4633_v28 = vld [vmem:[%s7149_s0 + $0x70] ss:$144 sps:$4 sm:$0x1f]  }
  0xee   :  { %4527 = vmatprep.subr.bf16.mxu1 %v4155_v26  ;;  %v1099_v26 = vmax.bf16 %v4645_v3, %v523_v4  ;;  %v560_v4 = vld [vmem:[%s7148_s1 + $0x884] sm:$0xf]  ;;  %v562_v34 = vld [vmem:[%s7148_s1 + $0x88c] sm:$0xf] }
  0xef   :  { %v4150_v40 = vcombine.low %v1081_v19, %v1082_v20  ;;  %v1104_v19 = vmax.bf16 %v4645_v3, %v528_v59  ;;  %v6894_v20 = vmax.bf16 %v4645_v3, %v560_v4  ;;  %v1138_v50 = vmax.bf16 %v4645_v3, %v562_v34 }
  0xf0   :  { %4506 = vmatpush3.bf16.msra.mxu0 %v4131_v30  ;;  %v6808_v30 = vmax.bf16 %v4645_v3, %v507_v14  ;;  %v4159_v47 = vcombine.low %v1099_v26, %v1100_v27  ;;  %v6881_v14 = vmax.bf16 %v4645_v3, %v527_v58  ;;  %v529_v27 = vld [vmem:[%s7148_s1 + $0x808] sm:$0xf]  ;;  %v550_v58 = vld [vmem:[%s7148_s1 + $0x85c] sm:$0xf] }
  0xf1   :  { %4528 = vmatpush3.bf16.msra.mxu1 %v4147_v31  ;;  %4507 = vmatprep.subr.bf16.mxu0 %v4140_v36  ;;  %v6811_v31 = vmax.bf16 %v4645_v3, %v508_v15  ;;  %v477_v36 = vld [vmem:[%s7148_s1 + $0x738] sm:$0xf]  ;;  %v545_v15 = vld [vmem:[%s7148_s1 + $0x848] sm:$0xf] }
  0xf2   :  { %4529 = vmatprep.subr.bf16.mxu1 %v4156_v43  ;;  %v543_v43 = vld [vmem:[%s7148_s1 + $0x840] sm:$0xf]  ;;  %v6846_v49 = vmax.bf16 %v4645_v3, %v477_v36  ;;  %v4636_v36 = vld [vmem:[%s7149_s0 + $0x78] ss:$144 sps:$4 sm:$0x1f]  }
  0xf3   :  { %v4151_v54 = vcombine.low %v6808_v30, %v6811_v31  ;;  %v1119_v1 = vmax.bf16 %v4645_v3, %v543_v43  ;;  %v1121_v30 = vmax.bf16 %v4645_v3, %v545_v15  ;;  %v1122_v31 = vmax.bf16 %v4645_v3, %v546_v16  ;;  %v566_v15 = vld [vmem:[%s7148_s1 + $0x89c] sm:$0xf] }
  0xf4   :  { %4508 = vmatpush3.bf16.msra.mxu0 %v4132_v57  ;;  %v1054_v57 = vmax.bf16 %v4645_v3, %v478_v38  ;;  %v1153_v38 = vmax.bf16 %v4645_v3, %v577_v21 }
  0xf5   :  { %4530 = vmatpush3.bf16.msra.mxu1 %v4148_v63  ;;  %4509 = vmatprep.subr.bf16.mxu0 %v4141_v0  ;;  %v1085_v63 = vmax.bf16 %v4645_v3, %v509_v39  ;;  %v1086_v0 = vmax.bf16 %v4645_v3, %v510_v42  ;;  %v4169_v29 = vcombine.low %v1119_v1, %v1120_v8 }
  0xf6   :  { %4531 = vmatprep.subr.bf16.mxu1 %v4157_v5  ;;  %v4136_v25 = vcombine.low %v6846_v49, %v1054_v57  ;;  %v1154_v39 = vmax.bf16 %v4645_v3, %v578_v22  ;;  %v4161_v42 = vcombine.low %v6881_v14, %v1104_v19  ;;  %v1137_v49 = vmax.bf16 %v4645_v3, %v561_v33  ;;  %v549_v57 = vld [vmem:[%s7148_s1 + $0x858] sm:$0xf]  ;;  %v568_v33 = vld [vmem:[%s7148_s1 + $0x8a4] sm:$0xf] }
  0xf7   :  { %v4152_v26 = vcombine.low %v1085_v63, %v1086_v0  ;;  %v4641_v63 = vld [vmem:[%s7149_s0 + $0x84] ss:$144 sps:$4 sm:$0x1f]   ;;  %v1108_v1 = vmax.bf16 %v4645_v3, %v532_v51  ;;  %v565_v14 = vld [vmem:[%s7148_s1 + $0x898] sm:$0xf] }
  0xf8   :  { %4510 = vmatpush3.bf16.msra.mxu0 %v4133_v6  ;;  %v4186_v59 = vcombine.low %v1153_v38, %v1154_v39  ;;  %v4178_v8 = vcombine.low %v1137_v49, %v1138_v50  ;;  %v537_v51 = vld [vmem:[%s7148_s1 + $0x828] sm:$0xf] }
  0xf9   :  { %4532 = vmatpush3.bf16.msra.mxu1 %v4149_v10  ;;  %4511 = vmatprep.subr.bf16.mxu0 %v4142_v11 }
  0xfa   :  { %v4209_v45 = vpop.f32.mrb[0].mxu0  ;;  %4533 = vmatprep.subr.bf16.mxu1 %v4158_v18 }
  0xfb   :  { %v4231_v52 = vpop.f32.mrb[0].mxu1  ;;  %v4210_v53 = vpop.f32.mrb[1].mxu0 }
  0xfc   :  { %v4211_v60 = vadd.f32 %v4210_v53, %v4209_v45  ;;  %v4232_v61 = vpop.f32.mrb[1].mxu1  ;;  %v4212_v62 = vpop.f32.mrb[2].mxu0  ;;  %4512 = vmatpush3.bf16.msra.mxu0 %v4134_v37  ;;  %v4185_v37 = vcombine.low %v1151_v9, %v1152_v13  ;;  %v580_v45 = vld [vmem:[%s7148_s1 + $0x8d4] sm:$0xf]  ;;  %v533_v9 = vld [vmem:[%s7148_s1 + $0x818] sm:$0xf] }
  0xfd   :  { %v4233_v5 = vadd.f32 %v4232_v61, %v4231_v52  ;;  %v4234_v6 = vpop.f32.mrb[2].mxu1  ;;  %4534 = vmatpush3.bf16.msra.mxu1 %v4150_v40  ;;  %v4213_v7 = vpop.f32.mrb[3].mxu0  ;;  %4513 = vmatprep.subr.bf16.mxu0 %v4143_v41  ;;  %v547_v40 = vld [vmem:[%s7148_s1 + $0x850] sm:$0xf]  ;;  %v548_v41 = vld [vmem:[%s7148_s1 + $0x854] sm:$0xf]  ;;  %v1156_v61 = vmax.bf16 %v4645_v3, %v580_v45 }
  0xfe   :  { %v3158_v10 = vadd.f32 %v4211_v60, %v6784_v17  ;;  %v4214_v11 = vadd.f32 %v4213_v7, %v4212_v62  ;;  %v4235_v12 = vpop.f32.mrb[3].mxu1  ;;  %4535 = vmatprep.subr.bf16.mxu1 %v4159_v47  ;;  %v6891_v17 = vmax.bf16 %v4645_v3, %v559_v2  ;;  %v1105_v47 = vmax.bf16 %v4645_v3, %v529_v27  ;;  %v563_v52 = vld [vmem:[%s7148_s1 + $0x890] sm:$0xf]  ;;  %v564_v53 = vld [vmem:[%s7148_s1 + $0x894] sm:$0xf] }
  0xff   :  { %v4236_v18 = vadd.f32 %v4235_v12, %v4234_v6  ;;  %v1155_v60 = vmax.bf16 %v4645_v3, %v579_v44  ;;  %v581_v62 = vld [vmem:[%s7148_s1 + $0x8d8] sm:$0xf]  ;;  %v1139_v2 = vmax.bf16 %v4645_v3, %v563_v52  ;;  %v1140_v4 = vmax.bf16 %v4645_v3, %v564_v53  ;;  %v4644_v6 = vld [vmem:[%s7149_s0 + $0x8c] ss:$144 sps:$4 sm:$0x1f]  }
 0x100   :  { %v6902_v23 = vadd.f32 %v4233_v5, %v3158_v10  ;;  %v3161_v24 = vadd.f32 %v4214_v11, %v1213_v46  ;;  %4514 = vmatpush3.bf16.msra.mxu0 %v4135_v48  ;;  %v4177_v43 = vcombine.low %v6891_v17, %v6894_v20  ;;  %v531_v46 = vld [vmem:[%s7148_s1 + $0x810] sm:$0xf]  ;;  %v1106_v48 = vmax.bf16 %v4645_v3, %v530_v32  ;;  %v582_v5 = vld [vmem:[%s7148_s1 + $0x8dc] sm:$0xf]  ;;  %v551_v17 = vld [vmem:[%s7148_s1 + $0x860] sm:$0xf] }
 0x101   :  { %4536 = vmatpush3.bf16.msra.mxu1 %v4151_v54  ;;  %4515 = vmatprep.subr.bf16.mxu0 %v4144_v55  ;;  %v4170_v54 = vcombine.low %v1121_v30, %v1122_v31  ;;  %v1123_v55 = vmax.bf16 %v4645_v3, %v547_v40  ;;  %v1107_v0 = vmax.bf16 %v4645_v3, %v531_v46  ;;  %v534_v13 = vld [vmem:[%s7148_s1 + $0x81c] sm:$0xf]  ;;  %v552_v20 = vld [vmem:[%s7148_s1 + $0x864] sm:$0xf]  ;;  %v567_v32 = vld [vmem:[%s7148_s1 + $0x8a0] sm:$0xf] }
 0x102   :  { %v6922_v35 = vadd.f32 %v4236_v18, %v3161_v24  ;;  %4537 = vmatprep.subr.bf16.mxu1 %v4160_v56  ;;  %v1124_v56 = vmax.bf16 %v4645_v3, %v548_v41  ;;  %v4162_v7 = vcombine.low %v1105_v47, %v1106_v48  ;;  %v1125_v11 = vmax.bf16 %v4645_v3, %v549_v57  ;;  %v583_v24 = vld [vmem:[%s7148_s1 + $0x8e0] sm:$0xf]  ;;  %v536_v31 = vld [vmem:[%s7148_s1 + $0x824] sm:$0xf]  ;;  %v553_v41 = vld [vmem:[%s7148_s1 + $0x868] sm:$0xf] }
 0x103   :  { %v1126_v12 = vmax.bf16 %v4645_v3, %v550_v58  ;;  %v4187_v16 = vcombine.low %v1155_v60, %v1156_v61  ;;  %v1157_v18 = vmax.bf16 %v4645_v3, %v581_v62  ;;  %v1158_v19 = vmax.bf16 %v4645_v3, %v582_v5  ;;  %v585_v47 = vld [vmem:[%s7148_s1 + $0x8e8] sm:$0xf]  ;;  %v586_v48 = vld [vmem:[%s7148_s1 + $0x8ec] sm:$0xf]  ;;  %v555_v61 = vld [vmem:[%s7148_s1 + $0x870] sm:$0xf] }
 0x104   :  { %4516 = vmatpush3.bf16.msra.mxu0 %v4136_v25  ;;  %v4171_v10 = vcombine.low %v1123_v55, %v1124_v56  ;;  %v4163_v21 = vcombine.low %v1107_v0, %v1108_v1  ;;  %v4179_v22 = vcombine.low %v1139_v2, %v1140_v4  ;;  %v584_v25 = vld [vmem:[%s7148_s1 + $0x8e4] sm:$0xf]  ;;  %v1109_v27 = vmax.bf16 %v4645_v3, %v533_v9  ;;  %v538_v55 = vld [vmem:[%s7148_s1 + $0x82c] sm:$0xf]  ;;  %v569_v56 = vld [vmem:[%s7148_s1 + $0x8a8] sm:$0xf] }
 0x105   :  { %4538 = vmatpush3.bf16.msra.mxu1 %v4152_v26  ;;  %4545 = vmatprep.subr.bf16.mxu0 %v4169_v29  ;;  %v535_v26 = vld [vmem:[%s7148_s1 + $0x820] sm:$0xf]  ;;  %v1141_v29 = vmax.bf16 %v4645_v3, %v565_v14  ;;  %v1142_v30 = vmax.bf16 %v4645_v3, %v566_v15  ;;  %v4172_v34 = vcombine.low %v1125_v11, %v1126_v12  ;;  %v570_v57 = vld [vmem:[%s7148_s1 + $0x8ac] sm:$0xf]  ;;  %v556_v62 = vld [vmem:[%s7148_s1 + $0x874] sm:$0xf] }
 0x106   :  { %4567 = vmatprep.subr.bf16.mxu1 %v4185_v37  ;;  %v1128_v37 = vmax.bf16 %v4645_v3, %v552_v20  ;;  %v4188_v38 = vcombine.low %v1157_v18, %v1158_v19  ;;  %v1159_v39 = vmax.bf16 %v4645_v3, %v583_v24  ;;  %v1160_v40 = vmax.bf16 %v4645_v3, %v584_v25  ;;  %v587_v1 = vld [vmem:[%s7148_s1 + $0x8f0] sm:$0xf]  ;;  %v588_v2 = vld [vmem:[%s7148_s1 + $0x8f4] sm:$0xf]  ;;  %v557_v19 = vld [vmem:[%s7148_s1 + $0x878] sm:$0xf] }
 0x107   :  { %3730 = vmatmul.mubr.bf16.vlgmr.msra.gmra.mrb[28].mxu0 %v4633_v28  ;;  %v1110_v28 = vmax.bf16 %v4645_v3, %v534_v13  ;;  %v1112_v44 = vmax.bf16 %v4645_v3, %v536_v31  ;;  %v1143_v45 = vmax.bf16 %v4645_v3, %v567_v32  ;;  %v1144_v46 = vmax.bf16 %v4645_v3, %v568_v33  ;;  %v539_v4 = vld [vmem:[%s7148_s1 + $0x830] sm:$0xf]  ;;  %v540_v9 = vld [vmem:[%s7148_s1 + $0x834] sm:$0xf]  ;;  %v589_v25 = vld [vmem:[%s7148_s1 + $0x8f8] sm:$0xf] }
 0x108   :  { %3771 = vmatmul.mubr.bf16.vlgmr.msra.gmra.mrb[28].mxu1 %v4636_v36  ;;  %4546 = vmatpush3.bf16.msra.mxu0 %v4161_v42  ;;  %v1127_v36 = vmax.bf16 %v4645_v3, %v551_v17  ;;  %v554_v42 = vld [vmem:[%s7148_s1 + $0x86c] sm:$0xf]  ;;  %v4180_v50 = vcombine.low %v1141_v29, %v1142_v30  ;;  %v1129_v53 = vmax.bf16 %v4645_v3, %v553_v41  ;;  %v572_v11 = vld [vmem:[%s7148_s1 + $0x8b4] sm:$0xf]  ;;  %v558_v17 = vld [vmem:[%s7148_s1 + $0x87c] sm:$0xf] }
 0x109   :  { %4568 = vmatpush3.bf16.msra.mxu1 %v4177_v43  ;;  %4547 = vmatprep.subr.bf16.mxu0 %v4170_v54  ;;  %v1111_v43 = vmax.bf16 %v4645_v3, %v535_v26  ;;  %v4164_v49 = vcombine.low %v1109_v27, %v1110_v28  ;;  %v1130_v54 = vmax.bf16 %v4645_v3, %v554_v42  ;;  %v590_v26 = vld [vmem:[%s7148_s1 + $0x8fc] sm:$0xf]  ;;  %v541_v32 = vld [vmem:[%s7148_s1 + $0x838] sm:$0xf] }
 0x10a   :  { %4569 = vmatprep.subr.bf16.mxu1 %v4186_v59  ;;  %3811 = vmatprep.mubr.bf16.mxu0 %v4641_v63  ;;  %v4173_v52 = vcombine.low %v1127_v36, %v1128_v37  ;;  %v4189_v58 = vcombine.low %v1159_v39, %v1160_v40  ;;  %v1161_v59 = vmax.bf16 %v4645_v3, %v585_v47  ;;  %v542_v33 = vld [vmem:[%s7148_s1 + $0x83c] sm:$0xf] }
 0x10b   :  { %3852 = vmatprep.mubr.bf16.mxu1 %v4644_v6  ;;  %v1162_v60 = vmax.bf16 %v4645_v3, %v586_v48  ;;  %v4165_v63 = vcombine.low %v1111_v43, %v1112_v44  ;;  %v4181_v0 = vcombine.low %v1143_v45, %v1144_v46  ;;  %v1113_v5 = vmax.bf16 %v4645_v3, %v537_v51  ;;  %v574_v40 = vld [vmem:[%s7148_s1 + $0x8bc] sm:$0xf] }
 0x10c   :  { %4548 = vmatpush3.bf16.msra.mxu0 %v4162_v7  ;;  %v1114_v6 = vmax.bf16 %v4645_v3, %v538_v55  ;;  %v1145_v7 = vmax.bf16 %v4645_v3, %v569_v56  ;;  %v4174_v12 = vcombine.low %v1129_v53, %v1130_v54  ;;  %v1131_v13 = vmax.bf16 %v4645_v3, %v555_v61 }
 0x10d   :  { %4570 = vmatpush3.bf16.msra.mxu1 %v4178_v8  ;;  %4549 = vmatprep.subr.bf16.mxu0 %v4171_v10  ;;  %v1146_v8 = vmax.bf16 %v4645_v3, %v570_v57  ;;  %v571_v10 = vld [vmem:[%s7148_s1 + $0x8b0] sm:$0xf]  ;;  %v1132_v14 = vmax.bf16 %v4645_v3, %v556_v62  ;;  %v4190_v15 = vcombine.low %v1161_v59, %v1162_v60 }
 0x10e   :  { %4571 = vmatprep.subr.bf16.mxu1 %v4187_v16  ;;  %v1163_v16 = vmax.bf16 %v4645_v3, %v587_v1  ;;  %v1164_v18 = vmax.bf16 %v4645_v3, %v588_v2  ;;  %v1115_v20 = vmax.bf16 %v4645_v3, %v539_v4  ;;  %v1148_v24 = vmax.bf16 %v4645_v3, %v572_v11 }
 0x10f   :  { %v4166_v27 = vcombine.low %v1113_v5, %v1114_v6  ;;  %v4182_v28 = vcombine.low %v1145_v7, %v1146_v8  ;;  %v4175_v29 = vcombine.low %v1131_v13, %v1132_v14  ;;  %v1133_v30 = vmax.bf16 %v4645_v3, %v557_v19 }
 0x110   :  { %4550 = vmatpush3.bf16.msra.mxu0 %v4163_v21  ;;  %v1116_v21 = vmax.bf16 %v4645_v3, %v540_v9  ;;  %v1134_v31 = vmax.bf16 %v4645_v3, %v558_v17  ;;  %v4191_v37 = vcombine.low %v1163_v16, %v1164_v18  ;;  %v1166_v39 = vmax.bf16 %v4645_v3, %v590_v26 }
 0x111   :  { %4572 = vmatpush3.bf16.msra.mxu1 %v4179_v22  ;;  %4551 = vmatprep.subr.bf16.mxu0 %v4172_v34  ;;  %v1147_v22 = vmax.bf16 %v4645_v3, %v571_v10  ;;  %v573_v34 = vld [vmem:[%s7148_s1 + $0x8b8] sm:$0xf]  ;;  %v1117_v48 = vmax.bf16 %v4645_v3, %v541_v32  ;;  %v1150_v55 = vmax.bf16 %v4645_v3, %v574_v40 }
 0x112   :  { %4573 = vmatprep.subr.bf16.mxu1 %v4188_v38  ;;  %v1165_v38 = vmax.bf16 %v4645_v3, %v589_v25  ;;  %v4167_v43 = vcombine.low %v1115_v20, %v1116_v21  ;;  %v4176_v54 = vcombine.low %v1133_v30, %v1134_v31 }
 0x113   :  { %v4183_v44 = vcombine.low %v1147_v22, %v1148_v24 }
 0x114   :  { %4552 = vmatpush3.bf16.msra.mxu0 %v4164_v49  ;;  %v1118_v49 = vmax.bf16 %v4645_v3, %v542_v33  ;;  %v4192_v59 = vcombine.low %v1165_v38, %v1166_v39 }
 0x115   :  { %4574 = vmatpush3.bf16.msra.mxu1 %v4180_v50  ;;  %4553 = vmatprep.subr.bf16.mxu0 %v4173_v52  ;;  %v1149_v50 = vmax.bf16 %v4645_v3, %v573_v34  ;;  %v4639_v3 = vld [vmem:[%s7149_s0 + $0x80] ss:$144 sps:$4 sm:$0x1f]  }
 0x116   :  { %4575 = vmatprep.subr.bf16.mxu1 %v4189_v58 }
 0x118   :  { %4554 = vmatpush3.bf16.msra.mxu0 %v4165_v63  ;;  %v4168_v63 = vcombine.low %v1117_v48, %v1118_v49 }
 0x119   :  { %4576 = vmatpush3.bf16.msra.mxu1 %v4181_v0  ;;  %4555 = vmatprep.subr.bf16.mxu0 %v4174_v12  ;;  %v4184_v0 = vcombine.low %v1149_v50, %v1150_v55 }
 0x11a   :  { %v4253_v36 = vpop.f32.mrb[4].mxu0  ;;  %4577 = vmatprep.subr.bf16.mxu1 %v4190_v15 }
 0x11b   :  { %v4275_v41 = vpop.f32.mrb[4].mxu1  ;;  %v4254_v42 = vpop.f32.mrb[5].mxu0 }
 0x11c   :  { %v4255_v45 = vadd.f32 %v4254_v42, %v4253_v36  ;;  %v4276_v46 = vpop.f32.mrb[5].mxu1  ;;  %v4256_v47 = vpop.f32.mrb[6].mxu0  ;;  %4556 = vmatpush3.bf16.msra.mxu0 %v4166_v27 }
 0x11d   :  { %v4277_v51 = vadd.f32 %v4276_v46, %v4275_v41  ;;  %v4278_v52 = vpop.f32.mrb[6].mxu1  ;;  %4578 = vmatpush3.bf16.msra.mxu1 %v4182_v28  ;;  %v4257_v53 = vpop.f32.mrb[7].mxu0  ;;  %4557 = vmatprep.subr.bf16.mxu0 %v4175_v29 }
 0x11e   :  { %v3240_v56 = vadd.f32 %v4255_v45, %v6902_v23  ;;  %v4258_v57 = vadd.f32 %v4257_v53, %v4256_v47  ;;  %v4279_v58 = vpop.f32.mrb[7].mxu1  ;;  %4579 = vmatprep.subr.bf16.mxu1 %v4191_v37  ;;  %v4642_v23 = vld [vmem:[%s7149_s0 + $0x88] ss:$144 sps:$4 sm:$0x1f]  }
 0x11f   :  { %v4280_v60 = vadd.f32 %v4279_v58, %v4278_v52 }
 0x120   :  { %v3281_v61 = vadd.f32 %v4277_v51, %v3240_v56  ;;  %v3243_v62 = vadd.f32 %v4258_v57, %v6922_v35  ;;  %4558 = vmatpush3.bf16.msra.mxu0 %v4167_v43 }
 0x121   :  { %4580 = vmatpush3.bf16.msra.mxu1 %v4183_v44  ;;  %4559 = vmatprep.subr.bf16.mxu0 %v4176_v54 }
 0x122   :  { %v3284_v1 = vadd.f32 %v4280_v60, %v3243_v62  ;;  %4581 = vmatprep.subr.bf16.mxu1 %v4192_v59 }
 0x124   :  { %4560 = vmatpush3.bf16.msra.mxu0 %v4168_v63 }
 0x125   :  { %4582 = vmatpush3.bf16.msra.mxu1 %v4184_v0 }
 0x127   :  { %3812 = vmatmul.mubr.bf16.vlgmr.msra.gmra.mrb[32].mxu0 %v4639_v3 }
 0x128   :  { %3853 = vmatmul.mubr.bf16.vlgmr.msra.gmra.mrb[32].mxu1 %v4642_v23 }
 0x13a   :  { %v4297_v35 = vpop.f32.mrb[8].mxu0 }
 0x13b   :  { %v4319_v2 = vpop.f32.mrb[8].mxu1  ;;  %v4298_v4 = vpop.f32.mrb[9].mxu0 }
 0x13c   :  { %v4299_v5 = vadd.f32 %v4298_v4, %v4297_v35  ;;  %v4320_v6 = vpop.f32.mrb[9].mxu1  ;;  %v4300_v7 = vpop.f32.mrb[10].mxu0 }
 0x13d   :  { %v4321_v8 = vadd.f32 %v4320_v6, %v4319_v2  ;;  %v4322_v9 = vpop.f32.mrb[10].mxu1  ;;  %v4301_v10 = vpop.f32.mrb[11].mxu0 }
 0x13e   :  { %v3322_v11 = vadd.f32 %v4299_v5, %v3281_v61  ;;  %v4302_v12 = vadd.f32 %v4301_v10, %v4300_v7  ;;  %v4323_v13 = vpop.f32.mrb[11].mxu1 }
 0x13f   :  { %v4324_v14 = vadd.f32 %v4323_v13, %v4322_v9 }
 0x140   :  { %v3363_v15 = vadd.f32 %v4321_v8, %v3322_v11  ;;  %v3325_v16 = vadd.f32 %v4302_v12, %v3284_v1 }
 0x142   :  { %v3366_v18 = vadd.f32 %v4324_v14, %v3325_v16 }
 0x15a   :  { %v4341_v19 = vpop.f32.mrb[12].mxu0 }
 0x15b   :  { %v4363_v17 = vpop.f32.mrb[12].mxu1  ;;  %v4342_v20 = vpop.f32.mrb[13].mxu0 }
 0x15c   :  { %v4343_v21 = vadd.f32 %v4342_v20, %v4341_v19  ;;  %v4364_v22 = vpop.f32.mrb[13].mxu1  ;;  %v4344_v24 = vpop.f32.mrb[14].mxu0 }
 0x15d   :  { %v4365_v25 = vadd.f32 %v4364_v22, %v4363_v17  ;;  %v4366_v26 = vpop.f32.mrb[14].mxu1  ;;  %v4345_v27 = vpop.f32.mrb[15].mxu0 }
 0x15e   :  { %v3404_v28 = vadd.f32 %v4343_v21, %v3363_v15  ;;  %v4346_v29 = vadd.f32 %v4345_v27, %v4344_v24  ;;  %v4367_v30 = vpop.f32.mrb[15].mxu1 }
 0x15f   :  { %v4368_v31 = vadd.f32 %v4367_v30, %v4366_v26 }
 0x160   :  { %v3445_v32 = vadd.f32 %v4365_v25, %v3404_v28  ;;  %v3407_v33 = vadd.f32 %v4346_v29, %v3366_v18 }
 0x162   :  { %v3448_v34 = vadd.f32 %v4368_v31, %v3407_v33 }
 0x17a   :  { %v4385_v36 = vpop.f32.mrb[16].mxu0 }
 0x17b   :  { %v4407_v37 = vpop.f32.mrb[16].mxu1  ;;  %v4386_v38 = vpop.f32.mrb[17].mxu0 }
 0x17c   :  { %v4387_v39 = vadd.f32 %v4386_v38, %v4385_v36  ;;  %v4408_v40 = vpop.f32.mrb[17].mxu1  ;;  %v4388_v41 = vpop.f32.mrb[18].mxu0 }
 0x17d   :  { %v4409_v42 = vadd.f32 %v4408_v40, %v4407_v37  ;;  %v4410_v43 = vpop.f32.mrb[18].mxu1  ;;  %v4389_v44 = vpop.f32.mrb[19].mxu0 }
 0x17e   :  { %v3486_v45 = vadd.f32 %v4387_v39, %v3445_v32  ;;  %v4390_v46 = vadd.f32 %v4389_v44, %v4388_v41  ;;  %v4411_v47 = vpop.f32.mrb[19].mxu1 }
 0x17f   :  { %v4412_v48 = vadd.f32 %v4411_v47, %v4410_v43 }
 0x180   :  { %v3527_v49 = vadd.f32 %v4409_v42, %v3486_v45  ;;  %v3489_v50 = vadd.f32 %v4390_v46, %v3448_v34 }
 0x182   :  { %v3530_v51 = vadd.f32 %v4412_v48, %v3489_v50 }
 0x19a   :  { %v4429_v52 = vpop.f32.mrb[20].mxu0 }
 0x19b   :  { %v4451_v53 = vpop.f32.mrb[20].mxu1  ;;  %v4430_v54 = vpop.f32.mrb[21].mxu0 }
 0x19c   :  { %v4431_v55 = vadd.f32 %v4430_v54, %v4429_v52  ;;  %v4452_v56 = vpop.f32.mrb[21].mxu1  ;;  %v4432_v57 = vpop.f32.mrb[22].mxu0 }
 0x19d   :  { %v4453_v58 = vadd.f32 %v4452_v56, %v4451_v53  ;;  %v4454_v59 = vpop.f32.mrb[22].mxu1  ;;  %v4433_v60 = vpop.f32.mrb[23].mxu0 }
 0x19e   :  { %v3568_v61 = vadd.f32 %v4431_v55, %v3527_v49  ;;  %v4434_v62 = vadd.f32 %v4433_v60, %v4432_v57  ;;  %v4455_v63 = vpop.f32.mrb[23].mxu1 }
 0x19f   :  { %v4456_v0 = vadd.f32 %v4455_v63, %v4454_v59 }
 0x1a0   :  { %v3609_v1 = vadd.f32 %v4453_v58, %v3568_v61  ;;  %v3571_v3 = vadd.f32 %v4434_v62, %v3530_v51 }
 0x1a2   :  { %v3612_v23 = vadd.f32 %v4456_v0, %v3571_v3 }
 0x1ba   :  { %v4473_v35 = vpop.f32.mrb[24].mxu0 }
 0x1bb   :  { %v4495_v2 = vpop.f32.mrb[24].mxu1  ;;  %v4474_v4 = vpop.f32.mrb[25].mxu0 }
 0x1bc   :  { %v4475_v5 = vadd.f32 %v4474_v4, %v4473_v35  ;;  %v4496_v6 = vpop.f32.mrb[25].mxu1  ;;  %v4476_v7 = vpop.f32.mrb[26].mxu0 }
 0x1bd   :  { %v4497_v8 = vadd.f32 %v4496_v6, %v4495_v2  ;;  %v4498_v9 = vpop.f32.mrb[26].mxu1  ;;  %v4477_v10 = vpop.f32.mrb[27].mxu0 }
 0x1be   :  { %v3650_v11 = vadd.f32 %v4475_v5, %v3609_v1  ;;  %v4478_v12 = vadd.f32 %v4477_v10, %v4476_v7  ;;  %v4499_v13 = vpop.f32.mrb[27].mxu1 }
 0x1bf   :  { %v4500_v14 = vadd.f32 %v4499_v13, %v4498_v9 }
 0x1c0   :  { %v3691_v15 = vadd.f32 %v4497_v8, %v3650_v11  ;;  %v3653_v16 = vadd.f32 %v4478_v12, %v3612_v23 }
 0x1c2   :  { %v3694_v18 = vadd.f32 %v4500_v14, %v3653_v16 }
 0x1da   :  { %v4517_v19 = vpop.f32.mrb[28].mxu0 }
 0x1db   :  { %v4539_v17 = vpop.f32.mrb[28].mxu1  ;;  %v4518_v20 = vpop.f32.mrb[29].mxu0 }
 0x1dc   :  { %v4519_v21 = vadd.f32 %v4518_v20, %v4517_v19  ;;  %v4540_v22 = vpop.f32.mrb[29].mxu1  ;;  %v4520_v24 = vpop.f32.mrb[30].mxu0 }
 0x1dd   :  { %v4541_v25 = vadd.f32 %v4540_v22, %v4539_v17  ;;  %v4542_v26 = vpop.f32.mrb[30].mxu1  ;;  %v4521_v27 = vpop.f32.mrb[31].mxu0 }
 0x1de   :  { %v3732_v28 = vadd.f32 %v4519_v21, %v3691_v15  ;;  %v4522_v29 = vadd.f32 %v4521_v27, %v4520_v24  ;;  %v4543_v30 = vpop.f32.mrb[31].mxu1 }
 0x1df   :  { %v4544_v31 = vadd.f32 %v4543_v30, %v4542_v26 }
 0x1e0   :  { %v3773_v32 = vadd.f32 %v4541_v25, %v3732_v28  ;;  %v3735_v33 = vadd.f32 %v4522_v29, %v3694_v18 }
 0x1e2   :  { %v3776_v34 = vadd.f32 %v4544_v31, %v3735_v33 }
 0x1fa   :  { %v4561_v36 = vpop.f32.mrb[32].mxu0 }
 0x1fb   :  { %v4583_v37 = vpop.f32.mrb[32].mxu1  ;;  %v4562_v38 = vpop.f32.mrb[33].mxu0 }
 0x1fc   :  { %v4563_v39 = vadd.f32 %v4562_v38, %v4561_v36  ;;  %v4584_v40 = vpop.f32.mrb[33].mxu1  ;;  %v4564_v41 = vpop.f32.mrb[34].mxu0 }
 0x1fd   :  { %v4585_v42 = vadd.f32 %v4584_v40, %v4583_v37  ;;  %v4586_v43 = vpop.f32.mrb[34].mxu1  ;;  %v4565_v44 = vpop.f32.mrb[35].mxu0 }
 0x1fe   :  { %v3814_v45 = vadd.f32 %v4563_v39, %v3773_v32  ;;  %v4566_v46 = vadd.f32 %v4565_v44, %v4564_v41  ;;  %v4587_v47 = vpop.f32.mrb[35].mxu1 }
 0x1ff   :  { %v4588_v48 = vadd.f32 %v4587_v47, %v4586_v43 }
 0x200   :  { %v3855_v49 = vadd.f32 %v4585_v42, %v3814_v45  ;;  %v3817_v50 = vadd.f32 %v4566_v46, %v3776_v34 }
 0x202   :  { %3862 = vst.msk [vmem:[%s7151_s3] sm:$0xff] %vm3861_vm0, %v3855_v49  ;;  %v3858_v51 = vadd.f32 %v4588_v48, %v3817_v50 }
 0x204   :  { %3864 = vst.msk [vmem:[%s7151_s3 + $0x8] sm:$0x3] %vm3863_vm1, %v3858_v51 }

</bundles_post_ra>
